<compile_context>
chip_gen: v5e
topology: v5e:2x2
jax: 0.10.0
libtpu: 0.0.40
codegen_flags: <defaults>
</compile_context>

<pallas_src>
import functools

import jax
import jax.numpy as jnp
from jax.experimental import pallas as pl
from jax.experimental.pallas import tpu as pltpu

EPS = 1e-5
NEG_BIG = -1e30  # pad-lane logit bias (exp -> 0); avoids -inf NaN risk


def _vmem_spec():
    return pl.BlockSpec(memory_space=pltpu.MemorySpace.VMEM)


def _bias_relu_bn(y, bias, gamma, beta, out_dtype):
    """bias-add + ReLU + training-mode BatchNorm with one-pass statistics.

    y: (N, C) float32 (MXU accumulator); bias/gamma/beta: (1, C) float32.
    Returns (N, C) in out_dtype.
    """
    y = jnp.maximum(y + bias, 0.0)                                   # f32 pass
    mean = jnp.mean(y, axis=0, keepdims=True)
    mean_sq = jnp.mean(y * y, axis=0, keepdims=True)
    var = jnp.maximum(mean_sq - mean * mean, 0.0)                    # E[x^2]-E[x]^2
    scale = gamma * jax.lax.rsqrt(var + EPS)
    shift = beta - mean * scale
    return (y * scale + shift).astype(out_dtype)                     # apply + cast


# ---------------------------------------------------------------------------
# Single fused kernel.
# ---------------------------------------------------------------------------
def _convnet_kernel(p1_ref, w1_ref, w2_ref, wf1_ref, wf2_ref, vec_ref, out_ref,
                    *, batch, act_dtype):
    f32 = jnp.float32
    bf16 = jnp.bfloat16
    B = batch

    # Packed (1, C) parameter vectors: rows of the f32 slab.
    b1, g1, be1 = vec_ref[0:1, :64], vec_ref[1:2, :64], vec_ref[2:3, :64]
    b2, g2, be2 = vec_ref[3:4, :128], vec_ref[4:5, :128], vec_ref[5:6, :128]
    bf1, g3, be3 = vec_ref[6:7, :256], vec_ref[7:8, :256], vec_ref[8:9, :256]
    bf2 = vec_ref[9:10, :128]

    # ---- conv1 as im2col GEMM (bf16 x bf16 -> f32) + bias + ReLU + BN1 -----
    y1 = jnp.dot(p1_ref[...], w1_ref[...], preferred_element_type=f32)   # (B*256, 64)
    y1 = _bias_relu_bn(y1, b1, g1, be1, act_dtype)

    # ---- pool1: 2x2 stride-2 max (16x16 -> 8x8) ----------------------------
    yw = y1.reshape(B * 16 * 8, 2, 64)
    yw = jnp.maximum(yw[:, 0, :], yw[:, 1, :])                           # (B*128, 64)
    yh = yw.reshape(B, 8, 2, 8, 64)
    x1 = jnp.maximum(yh[:, :, 0, :, :], yh[:, :, 1, :, :])               # (B, 8, 8, 64)

    # ---- conv2 (k=2, s=2, 64->128): ONE K=256 GEMM -------------------------
    # Lane-concatenate the four (kh, kw) taps into a (B*16, 256) patch matrix
    # (cols ordered (kh, kw, cin) to match the stacked weight).
    v = x1.reshape(B, 4, 2, 4, 2, 64)                 # (b, oh, kh, ow, kw, c)
    p2 = jnp.concatenate(
        [v[:, :, 0, :, 0, :].reshape(B * 16, 64),
         v[:, :, 0, :, 1, :].reshape(B * 16, 64),
         v[:, :, 1, :, 0, :].reshape(B * 16, 64),
         v[:, :, 1, :, 1, :].reshape(B * 16, 64)], axis=-1).astype(bf16)  # (B*16, 256)
    y2 = jnp.dot(p2, w2_ref[...], preferred_element_type=f32)            # (B*16, 128)
    y2 = _bias_relu_bn(y2, b2, g2, be2, act_dtype)

    # ---- pool2: 2x2 stride-2 max (4x4 -> 2x2) ------------------------------
    yw = y2.reshape(B * 4 * 2, 2, 128)
    yw = jnp.maximum(yw[:, 0, :], yw[:, 1, :])                           # (B*8, 128)
    yh = yw.reshape(B, 2, 2, 2, 128)
    x2 = jnp.maximum(yh[:, :, 0, :, :], yh[:, :, 1, :, :])               # (B, 2, 2, 128)

    # ---- fc1: ONE (B,512)x(512,256) GEMM + bias + ReLU + BN3 ---------------
    # Lane-concat in (h, w, c) order; wf1 was pre-permuted from torch's
    # (c, h, w) flatten order to match.
    p3 = jnp.concatenate(
        [x2[:, 0, 0, :], x2[:, 0, 1, :], x2[:, 1, 0, :], x2[:, 1, 1, :]],
        axis=-1).astype(bf16)                                             # (B, 512)
    h1 = jnp.dot(p3, wf1_ref[...], preferred_element_type=f32)            # (B, 256)
    h1 = _bias_relu_bn(h1, bf1, g3, be3, f32)

    # ---- fc2 + softmax(dim=1), lane-dense 128-wide logits ------------------
    logits = jnp.dot(h1.astype(bf16), wf2_ref[...],
                     preferred_element_type=f32) + bf2                    # (B, 128)
    m = jnp.max(logits, axis=1, keepdims=True)
    e = jnp.exp(logits - m)
    out_ref[...] = e / jnp.sum(e, axis=1, keepdims=True)


# ---------------------------------------------------------------------------
# Wrapper: cheap weight packing / conv1 im2col + one pallas_call.
# ---------------------------------------------------------------------------
def convnet_forward(x, p):
    """x: (B, 1, 48, 48) float32 NCHW (as in PyTorch)."""
    B = x.shape[0]
    f32, bf16 = jnp.float32, jnp.bfloat16

    # bf16 elementwise only where the VPU supports it (v6e / v7x); f32 on v5e.
    kind = jax.devices()[0].device_kind.lower()
    act_dtype = bf16 if any(t in kind for t in ("v6", "v7", "7x")) else f32

    # conv1 im2col (stride == kernel == 3 -> pure regroup); K padded 9 -> 16.
    patches1 = (x.reshape(B, 16, 3, 16, 3)
                .transpose(0, 1, 3, 2, 4)
                .reshape(B * 256, 9))
    patches1 = jnp.pad(patches1, ((0, 0), (0, 7))).astype(bf16)           # (B*256, 16)

    # conv1 weight: (64,1,3,3) -> (9,64), K padded to 16.
    w1 = jnp.pad(p["conv1_w"].reshape(64, 9).T, ((0, 7), (0, 0))).astype(bf16)   # (16, 64)
    # conv2 weight stacked along K in (kh, kw, cin) order.
    w2 = p["conv2_w"].transpose(2, 3, 1, 0).reshape(256, 128).astype(bf16)        # (256, 128)
    # fc1 weight permuted to (h, w, cin) flatten order (torch view is (c,h,w)).
    wf1 = (p["fc1_w"].reshape(256, 128, 2, 2)
           .transpose(2, 3, 1, 0)
           .reshape(512, 256)
           .astype(bf16))                                                          # (512, 256)
    # fc2 weight, N padded 7 -> 128 with zeros (bias pad lanes carry -1e30).
    wf2 = jnp.pad(p["fc2_w"].T, ((0, 0), (0, 121))).astype(bf16)                   # (256, 128)

    # Pack all (1, C) vectors into a single (16, 256) f32 slab.
    def row(v, fill=0.0):
        v = v.reshape(-1).astype(f32)
        return jnp.pad(v, (0, 256 - v.shape[0]), constant_values=fill)

    vec = jnp.stack(
        [row(p["conv1_b"]), row(p["bn1_g"]), row(p["bn1_b"]),
         row(p["conv2_b"]), row(p["bn2_g"]), row(p["bn2_b"]),
         row(p["fc1_b"]), row(p["bn3_g"]), row(p["bn3_b"]),
         row(p["fc2_b"], fill=NEG_BIG)]
        + [jnp.zeros((256,), f32)] * 6)                                            # (16, 256)

    kernel = functools.partial(_convnet_kernel, batch=B, act_dtype=act_dtype)
    out = pl.pallas_call(
        kernel,
        out_shape=jax.ShapeDtypeStruct((B, 128), jnp.float32),
        in_specs=[_vmem_spec()] * 6,
        out_specs=_vmem_spec(),
        compiler_params=pltpu.CompilerParams(vmem_limit_bytes=32 * 1024 * 1024),
    )(patches1, w1, w2, wf1, wf2, vec)
    return out[:, :7]


def init_params(key):
    ks = jax.random.split(key, 8)
    f32 = jnp.float32
    return {
        # PyTorch parameter shapes, deterministic synthetic values.
        "conv1_w": 0.1 * jax.random.normal(ks[0], (64, 1, 3, 3), f32),
        "conv1_b": 0.1 * jax.random.normal(ks[1], (1, 64), f32),
        "conv2_w": 0.05 * jax.random.normal(ks[2], (128, 64, 2, 2), f32),
        "conv2_b": 0.05 * jax.random.normal(ks[3], (1, 128), f32),
        "fc1_w": 0.05 * jax.random.normal(ks[4], (256, 512), f32),
        "fc1_b": 0.05 * jax.random.normal(ks[5], (1, 256), f32),
        "fc2_w": 0.05 * jax.random.normal(ks[6], (7, 256), f32),
        "fc2_b": 0.05 * jax.random.normal(ks[7], (1, 7), f32),
        # BatchNorm affine params at their nn.BatchNorm* defaults.
        "bn1_g": jnp.ones((1, 64), f32), "bn1_b": jnp.zeros((1, 64), f32),
        "bn2_g": jnp.ones((1, 128), f32), "bn2_b": jnp.zeros((1, 128), f32),
        "bn3_g": jnp.ones((1, 256), f32), "bn3_b": jnp.zeros((1, 256), f32),
    }


if __name__ == "__main__":
    key = jax.random.PRNGKey(0)
    k_x, k_p = jax.random.split(key)
    params = init_params(k_p)

    # Architecture forces 48x48 spatial input (view(-1, 512) after conv/pools).
    x = jax.random.normal(k_x, (4, 1, 48, 48), jnp.float32)   # NCHW, like PyTorch

    out = jax.jit(convnet_forward)(x, params)
    out = jax.block_until_ready(out)

    assert out.shape == (4, 7)
    assert bool(jnp.all(jnp.isfinite(out)))
    assert bool(jnp.all(jnp.abs(jnp.sum(out, axis=1) - 1.0) < 1e-2))  # softmax rows ~ 1
    print("KERNEL_OK")
</pallas_src>

<mosaic_0001>
module attributes {stable_mosaic.version = 11 : i64} {
  func.func @_convnet_kernel(%arg0: memref<1024x16xbf16, #tpu.memory_space<vmem>>, %arg1: memref<16x64xbf16, #tpu.memory_space<vmem>>, %arg2: memref<256x128xbf16, #tpu.memory_space<vmem>>, %arg3: memref<512x256xbf16, #tpu.memory_space<vmem>>, %arg4: memref<256x128xbf16, #tpu.memory_space<vmem>>, %arg5: memref<16x256xf32, #tpu.memory_space<vmem>>, %arg6: memref<4x128xf32, #tpu.memory_space<vmem>>) attributes {dimension_semantics = [], scalar_prefetch = 0 : i64, scratch_operands = 0 : i64, tpu.core_type = #tpu.core_type<tc>} {
    %c0 = arith.constant 0 : index
    %c0_0 = arith.constant 0 : index
    %0 = vector.load %arg5[%c0, %c0_0] : memref<16x256xf32, #tpu.memory_space<vmem>>, vector<1x64xf32>
    %c1 = arith.constant 1 : index
    %c0_1 = arith.constant 0 : index
    %1 = vector.load %arg5[%c1, %c0_1] : memref<16x256xf32, #tpu.memory_space<vmem>>, vector<1x64xf32>
    %c2 = arith.constant 2 : index
    %c0_2 = arith.constant 0 : index
    %2 = vector.load %arg5[%c2, %c0_2] : memref<16x256xf32, #tpu.memory_space<vmem>>, vector<1x64xf32>
    %c3 = arith.constant 3 : index
    %c0_3 = arith.constant 0 : index
    %3 = vector.load %arg5[%c3, %c0_3] : memref<16x256xf32, #tpu.memory_space<vmem>>, vector<1x128xf32>
    %c4 = arith.constant 4 : index
    %c0_4 = arith.constant 0 : index
    %4 = vector.load %arg5[%c4, %c0_4] : memref<16x256xf32, #tpu.memory_space<vmem>>, vector<1x128xf32>
    %c5 = arith.constant 5 : index
    %c0_5 = arith.constant 0 : index
    %5 = vector.load %arg5[%c5, %c0_5] : memref<16x256xf32, #tpu.memory_space<vmem>>, vector<1x128xf32>
    %c6 = arith.constant 6 : index
    %c0_6 = arith.constant 0 : index
    %6 = vector.load %arg5[%c6, %c0_6] : memref<16x256xf32, #tpu.memory_space<vmem>>, vector<1x256xf32>
    %c7 = arith.constant 7 : index
    %c0_7 = arith.constant 0 : index
    %7 = vector.load %arg5[%c7, %c0_7] : memref<16x256xf32, #tpu.memory_space<vmem>>, vector<1x256xf32>
    %c8 = arith.constant 8 : index
    %c0_8 = arith.constant 0 : index
    %8 = vector.load %arg5[%c8, %c0_8] : memref<16x256xf32, #tpu.memory_space<vmem>>, vector<1x256xf32>
    %c9 = arith.constant 9 : index
    %c0_9 = arith.constant 0 : index
    %9 = vector.load %arg5[%c9, %c0_9] : memref<16x256xf32, #tpu.memory_space<vmem>>, vector<1x128xf32>
    %c0_10 = arith.constant 0 : index
    %c0_11 = arith.constant 0 : index
    %10 = vector.load %arg0[%c0_10, %c0_11] : memref<1024x16xbf16, #tpu.memory_space<vmem>>, vector<1024x16xbf16>
    %c0_12 = arith.constant 0 : index
    %c0_13 = arith.constant 0 : index
    %11 = vector.load %arg1[%c0_12, %c0_13] : memref<16x64xbf16, #tpu.memory_space<vmem>>, vector<16x64xbf16>
    %cst = arith.constant dense<0.000000e+00> : vector<1024x64xf32>
    %12 = tpu.matmul %10, %11, %cst {dimension_numbers = #tpu.dot_dimension_numbers<[1], [0], [0], [1], [0, 0, 1, 1], [], []>} : vector<1024x16xbf16>, vector<16x64xbf16>, vector<1024x64xf32> -> vector<1024x64xf32>
    %13 = vector.broadcast %0 : vector<1x64xf32> to vector<1024x64xf32>
    %14 = arith.addf %12, %13 : vector<1024x64xf32>
    %cst_14 = arith.constant 0.000000e+00 : f32
    %15 = vector.broadcast %cst_14 : f32 to vector<1024x64xf32>
    %16 = arith.maximumf %14, %15 : vector<1024x64xf32>
    %cst_15 = arith.constant dense<0.000000e+00> : vector<64xf32>
    %17 = vector.multi_reduction <add>, %16, %cst_15 [0] : vector<1024x64xf32> to vector<64xf32>
    %18 = vector.shape_cast %17 : vector<64xf32> to vector<1x64xf32>
    %cst_16 = arith.constant 1.024000e+03 : f32
    %19 = vector.broadcast %cst_16 : f32 to vector<1x64xf32>
    %20 = arith.divf %18, %19 : vector<1x64xf32>
    %21 = arith.mulf %16, %16 : vector<1024x64xf32>
    %cst_17 = arith.constant dense<0.000000e+00> : vector<64xf32>
    %22 = vector.multi_reduction <add>, %21, %cst_17 [0] : vector<1024x64xf32> to vector<64xf32>
    %23 = vector.shape_cast %22 : vector<64xf32> to vector<1x64xf32>
    %cst_18 = arith.constant 1.024000e+03 : f32
    %24 = vector.broadcast %cst_18 : f32 to vector<1x64xf32>
    %25 = arith.divf %23, %24 : vector<1x64xf32>
    %26 = arith.mulf %20, %20 : vector<1x64xf32>
    %27 = arith.subf %25, %26 : vector<1x64xf32>
    %cst_19 = arith.constant 0.000000e+00 : f32
    %28 = vector.broadcast %cst_19 : f32 to vector<1x64xf32>
    %29 = arith.maximumf %27, %28 : vector<1x64xf32>
    %cst_20 = arith.constant 9.99999974E-6 : f32
    %30 = vector.broadcast %cst_20 : f32 to vector<1x64xf32>
    %31 = arith.addf %29, %30 : vector<1x64xf32>
    %32 = math.rsqrt %31 : vector<1x64xf32>
    %33 = arith.mulf %1, %32 : vector<1x64xf32>
    %34 = arith.mulf %20, %33 : vector<1x64xf32>
    %35 = arith.subf %2, %34 : vector<1x64xf32>
    %36 = vector.broadcast %33 : vector<1x64xf32> to vector<1024x64xf32>
    %37 = arith.mulf %16, %36 : vector<1024x64xf32>
    %38 = vector.broadcast %35 : vector<1x64xf32> to vector<1024x64xf32>
    %39 = arith.addf %37, %38 : vector<1024x64xf32>
    %40 = vector.shape_cast %39 : vector<1024x64xf32> to vector<512x2x64xf32>
    %41 = vector.extract_strided_slice %40 {offsets = [0, 0, 0], sizes = [512, 1, 64], strides = [1, 1, 1]} : vector<512x2x64xf32> to vector<512x1x64xf32>
    %42 = vector.shape_cast %41 : vector<512x1x64xf32> to vector<512x64xf32>
    %43 = vector.extract_strided_slice %40 {offsets = [0, 1, 0], sizes = [512, 1, 64], strides = [1, 1, 1]} : vector<512x2x64xf32> to vector<512x1x64xf32>
    %44 = vector.shape_cast %43 : vector<512x1x64xf32> to vector<512x64xf32>
    %45 = arith.maximumf %42, %44 : vector<512x64xf32>
    %46 = vector.shape_cast %45 : vector<512x64xf32> to vector<4x8x2x8x64xf32>
    %47 = vector.extract_strided_slice %46 {offsets = [0, 0, 0, 0, 0], sizes = [4, 8, 1, 8, 64], strides = [1, 1, 1, 1, 1]} : vector<4x8x2x8x64xf32> to vector<4x8x1x8x64xf32>
    %48 = vector.shape_cast %47 : vector<4x8x1x8x64xf32> to vector<4x8x8x64xf32>
    %49 = vector.extract_strided_slice %46 {offsets = [0, 0, 1, 0, 0], sizes = [4, 8, 1, 8, 64], strides = [1, 1, 1, 1, 1]} : vector<4x8x2x8x64xf32> to vector<4x8x1x8x64xf32>
    %50 = vector.shape_cast %49 : vector<4x8x1x8x64xf32> to vector<4x8x8x64xf32>
    %51 = arith.maximumf %48, %50 : vector<4x8x8x64xf32>
    %52 = vector.shape_cast %51 : vector<4x8x8x64xf32> to vector<4x4x2x4x2x64xf32>
    %53 = vector.extract_strided_slice %52 {offsets = [0, 0, 0, 0, 0, 0], sizes = [4, 4, 1, 4, 1, 64], strides = [1, 1, 1, 1, 1, 1]} : vector<4x4x2x4x2x64xf32> to vector<4x4x1x4x1x64xf32>
    %54 = vector.shape_cast %53 : vector<4x4x1x4x1x64xf32> to vector<4x4x4x64xf32>
    %55 = vector.shape_cast %54 : vector<4x4x4x64xf32> to vector<64x64xf32>
    %56 = vector.extract_strided_slice %52 {offsets = [0, 0, 0, 0, 1, 0], sizes = [4, 4, 1, 4, 1, 64], strides = [1, 1, 1, 1, 1, 1]} : vector<4x4x2x4x2x64xf32> to vector<4x4x1x4x1x64xf32>
    %57 = vector.shape_cast %56 : vector<4x4x1x4x1x64xf32> to vector<4x4x4x64xf32>
    %58 = vector.shape_cast %57 : vector<4x4x4x64xf32> to vector<64x64xf32>
    %59 = vector.extract_strided_slice %52 {offsets = [0, 0, 1, 0, 0, 0], sizes = [4, 4, 1, 4, 1, 64], strides = [1, 1, 1, 1, 1, 1]} : vector<4x4x2x4x2x64xf32> to vector<4x4x1x4x1x64xf32>
    %60 = vector.shape_cast %59 : vector<4x4x1x4x1x64xf32> to vector<4x4x4x64xf32>
    %61 = vector.shape_cast %60 : vector<4x4x4x64xf32> to vector<64x64xf32>
    %62 = vector.extract_strided_slice %52 {offsets = [0, 0, 1, 0, 1, 0], sizes = [4, 4, 1, 4, 1, 64], strides = [1, 1, 1, 1, 1, 1]} : vector<4x4x2x4x2x64xf32> to vector<4x4x1x4x1x64xf32>
    %63 = vector.shape_cast %62 : vector<4x4x1x4x1x64xf32> to vector<4x4x4x64xf32>
    %64 = vector.shape_cast %63 : vector<4x4x4x64xf32> to vector<64x64xf32>
    %65 = tpu.concatenate %55, %58, %61, %64 in 1 : vector<64x64xf32>, vector<64x64xf32>, vector<64x64xf32>, vector<64x64xf32> -> vector<64x256xf32>
    %66 = arith.truncf %65 : vector<64x256xf32> to vector<64x256xbf16>
    %c0_21 = arith.constant 0 : index
    %c0_22 = arith.constant 0 : index
    %67 = vector.load %arg2[%c0_21, %c0_22] : memref<256x128xbf16, #tpu.memory_space<vmem>>, vector<256x128xbf16>
    %cst_23 = arith.constant dense<0.000000e+00> : vector<64x128xf32>
    %68 = tpu.matmul %66, %67, %cst_23 {dimension_numbers = #tpu.dot_dimension_numbers<[1], [0], [0], [1], [0, 0, 1, 1], [], []>} : vector<64x256xbf16>, vector<256x128xbf16>, vector<64x128xf32> -> vector<64x128xf32>
    %69 = vector.broadcast %3 : vector<1x128xf32> to vector<64x128xf32>
    %70 = arith.addf %68, %69 : vector<64x128xf32>
    %cst_24 = arith.constant 0.000000e+00 : f32
    %71 = vector.broadcast %cst_24 : f32 to vector<64x128xf32>
    %72 = arith.maximumf %70, %71 : vector<64x128xf32>
    %cst_25 = arith.constant dense<0.000000e+00> : vector<128xf32>
    %73 = vector.multi_reduction <add>, %72, %cst_25 [0] : vector<64x128xf32> to vector<128xf32>
    %74 = vector.shape_cast %73 : vector<128xf32> to vector<1x128xf32>
    %cst_26 = arith.constant 6.400000e+01 : f32
    %75 = vector.broadcast %cst_26 : f32 to vector<1x128xf32>
    %76 = arith.divf %74, %75 : vector<1x128xf32>
    %77 = arith.mulf %72, %72 : vector<64x128xf32>
    %cst_27 = arith.constant dense<0.000000e+00> : vector<128xf32>
    %78 = vector.multi_reduction <add>, %77, %cst_27 [0] : vector<64x128xf32> to vector<128xf32>
    %79 = vector.shape_cast %78 : vector<128xf32> to vector<1x128xf32>
    %cst_28 = arith.constant 6.400000e+01 : f32
    %80 = vector.broadcast %cst_28 : f32 to vector<1x128xf32>
    %81 = arith.divf %79, %80 : vector<1x128xf32>
    %82 = arith.mulf %76, %76 : vector<1x128xf32>
    %83 = arith.subf %81, %82 : vector<1x128xf32>
    %cst_29 = arith.constant 0.000000e+00 : f32
    %84 = vector.broadcast %cst_29 : f32 to vector<1x128xf32>
    %85 = arith.maximumf %83, %84 : vector<1x128xf32>
    %cst_30 = arith.constant 9.99999974E-6 : f32
    %86 = vector.broadcast %cst_30 : f32 to vector<1x128xf32>
    %87 = arith.addf %85, %86 : vector<1x128xf32>
    %88 = math.rsqrt %87 : vector<1x128xf32>
    %89 = arith.mulf %4, %88 : vector<1x128xf32>
    %90 = arith.mulf %76, %89 : vector<1x128xf32>
    %91 = arith.subf %5, %90 : vector<1x128xf32>
    %92 = vector.broadcast %89 : vector<1x128xf32> to vector<64x128xf32>
    %93 = arith.mulf %72, %92 : vector<64x128xf32>
    %94 = vector.broadcast %91 : vector<1x128xf32> to vector<64x128xf32>
    %95 = arith.addf %93, %94 : vector<64x128xf32>
    %96 = vector.shape_cast %95 : vector<64x128xf32> to vector<32x2x128xf32>
    %97 = vector.extract_strided_slice %96 {offsets = [0, 0, 0], sizes = [32, 1, 128], strides = [1, 1, 1]} : vector<32x2x128xf32> to vector<32x1x128xf32>
    %98 = vector.shape_cast %97 : vector<32x1x128xf32> to vector<32x128xf32>
    %99 = vector.extract_strided_slice %96 {offsets = [0, 1, 0], sizes = [32, 1, 128], strides = [1, 1, 1]} : vector<32x2x128xf32> to vector<32x1x128xf32>
    %100 = vector.shape_cast %99 : vector<32x1x128xf32> to vector<32x128xf32>
    %101 = arith.maximumf %98, %100 : vector<32x128xf32>
    %102 = vector.shape_cast %101 : vector<32x128xf32> to vector<4x2x2x2x128xf32>
    %103 = vector.extract_strided_slice %102 {offsets = [0, 0, 0, 0, 0], sizes = [4, 2, 1, 2, 128], strides = [1, 1, 1, 1, 1]} : vector<4x2x2x2x128xf32> to vector<4x2x1x2x128xf32>
    %104 = vector.shape_cast %103 : vector<4x2x1x2x128xf32> to vector<4x2x2x128xf32>
    %105 = vector.extract_strided_slice %102 {offsets = [0, 0, 1, 0, 0], sizes = [4, 2, 1, 2, 128], strides = [1, 1, 1, 1, 1]} : vector<4x2x2x2x128xf32> to vector<4x2x1x2x128xf32>
    %106 = vector.shape_cast %105 : vector<4x2x1x2x128xf32> to vector<4x2x2x128xf32>
    %107 = arith.maximumf %104, %106 : vector<4x2x2x128xf32>
    %108 = vector.extract_strided_slice %107 {offsets = [0, 0, 0, 0], sizes = [4, 1, 1, 128], strides = [1, 1, 1, 1]} : vector<4x2x2x128xf32> to vector<4x1x1x128xf32>
    %109 = vector.shape_cast %108 : vector<4x1x1x128xf32> to vector<4x128xf32>
    %110 = vector.extract_strided_slice %107 {offsets = [0, 0, 1, 0], sizes = [4, 1, 1, 128], strides = [1, 1, 1, 1]} : vector<4x2x2x128xf32> to vector<4x1x1x128xf32>
    %111 = vector.shape_cast %110 : vector<4x1x1x128xf32> to vector<4x128xf32>
    %112 = vector.extract_strided_slice %107 {offsets = [0, 1, 0, 0], sizes = [4, 1, 1, 128], strides = [1, 1, 1, 1]} : vector<4x2x2x128xf32> to vector<4x1x1x128xf32>
    %113 = vector.shape_cast %112 : vector<4x1x1x128xf32> to vector<4x128xf32>
    %114 = vector.extract_strided_slice %107 {offsets = [0, 1, 1, 0], sizes = [4, 1, 1, 128], strides = [1, 1, 1, 1]} : vector<4x2x2x128xf32> to vector<4x1x1x128xf32>
    %115 = vector.shape_cast %114 : vector<4x1x1x128xf32> to vector<4x128xf32>
    %116 = tpu.concatenate %109, %111, %113, %115 in 1 : vector<4x128xf32>, vector<4x128xf32>, vector<4x128xf32>, vector<4x128xf32> -> vector<4x512xf32>
    %117 = arith.truncf %116 : vector<4x512xf32> to vector<4x512xbf16>
    %c0_31 = arith.constant 0 : index
    %c0_32 = arith.constant 0 : index
    %118 = vector.load %arg3[%c0_31, %c0_32] : memref<512x256xbf16, #tpu.memory_space<vmem>>, vector<512x256xbf16>
    %cst_33 = arith.constant dense<0.000000e+00> : vector<4x256xf32>
    %119 = tpu.matmul %117, %118, %cst_33 {dimension_numbers = #tpu.dot_dimension_numbers<[1], [0], [0], [1], [0, 0, 1, 1], [], []>} : vector<4x512xbf16>, vector<512x256xbf16>, vector<4x256xf32> -> vector<4x256xf32>
    %120 = vector.broadcast %6 : vector<1x256xf32> to vector<4x256xf32>
    %121 = arith.addf %119, %120 : vector<4x256xf32>
    %cst_34 = arith.constant 0.000000e+00 : f32
    %122 = vector.broadcast %cst_34 : f32 to vector<4x256xf32>
    %123 = arith.maximumf %121, %122 : vector<4x256xf32>
    %cst_35 = arith.constant dense<0.000000e+00> : vector<256xf32>
    %124 = vector.multi_reduction <add>, %123, %cst_35 [0] : vector<4x256xf32> to vector<256xf32>
    %125 = vector.shape_cast %124 : vector<256xf32> to vector<1x256xf32>
    %cst_36 = arith.constant 4.000000e+00 : f32
    %126 = vector.broadcast %cst_36 : f32 to vector<1x256xf32>
    %127 = arith.divf %125, %126 : vector<1x256xf32>
    %128 = arith.mulf %123, %123 : vector<4x256xf32>
    %cst_37 = arith.constant dense<0.000000e+00> : vector<256xf32>
    %129 = vector.multi_reduction <add>, %128, %cst_37 [0] : vector<4x256xf32> to vector<256xf32>
    %130 = vector.shape_cast %129 : vector<256xf32> to vector<1x256xf32>
    %cst_38 = arith.constant 4.000000e+00 : f32
    %131 = vector.broadcast %cst_38 : f32 to vector<1x256xf32>
    %132 = arith.divf %130, %131 : vector<1x256xf32>
    %133 = arith.mulf %127, %127 : vector<1x256xf32>
    %134 = arith.subf %132, %133 : vector<1x256xf32>
    %cst_39 = arith.constant 0.000000e+00 : f32
    %135 = vector.broadcast %cst_39 : f32 to vector<1x256xf32>
    %136 = arith.maximumf %134, %135 : vector<1x256xf32>
    %cst_40 = arith.constant 9.99999974E-6 : f32
    %137 = vector.broadcast %cst_40 : f32 to vector<1x256xf32>
    %138 = arith.addf %136, %137 : vector<1x256xf32>
    %139 = math.rsqrt %138 : vector<1x256xf32>
    %140 = arith.mulf %7, %139 : vector<1x256xf32>
    %141 = arith.mulf %127, %140 : vector<1x256xf32>
    %142 = arith.subf %8, %141 : vector<1x256xf32>
    %143 = vector.broadcast %140 : vector<1x256xf32> to vector<4x256xf32>
    %144 = arith.mulf %123, %143 : vector<4x256xf32>
    %145 = vector.broadcast %142 : vector<1x256xf32> to vector<4x256xf32>
    %146 = arith.addf %144, %145 : vector<4x256xf32>
    %147 = arith.truncf %146 : vector<4x256xf32> to vector<4x256xbf16>
    %c0_41 = arith.constant 0 : index
    %c0_42 = arith.constant 0 : index
    %148 = vector.load %arg4[%c0_41, %c0_42] : memref<256x128xbf16, #tpu.memory_space<vmem>>, vector<256x128xbf16>
    %cst_43 = arith.constant dense<0.000000e+00> : vector<4x128xf32>
    %149 = tpu.matmul %147, %148, %cst_43 {dimension_numbers = #tpu.dot_dimension_numbers<[1], [0], [0], [1], [0, 0, 1, 1], [], []>} : vector<4x256xbf16>, vector<256x128xbf16>, vector<4x128xf32> -> vector<4x128xf32>
    %150 = vector.broadcast %9 : vector<1x128xf32> to vector<4x128xf32>
    %151 = arith.addf %149, %150 : vector<4x128xf32>
    %cst_44 = arith.constant dense<0xFF800000> : vector<4xf32>
    %152 = vector.multi_reduction <maximumf>, %151, %cst_44 [1] : vector<4x128xf32> to vector<4xf32>
    %153 = vector.shape_cast %152 : vector<4xf32> to vector<4x1xf32>
    %154 = vector.broadcast %153 : vector<4x1xf32> to vector<4x128xf32>
    %155 = arith.subf %151, %154 : vector<4x128xf32>
    %156 = math.exp %155 : vector<4x128xf32>
    %cst_45 = arith.constant dense<0.000000e+00> : vector<4xf32>
    %157 = vector.multi_reduction <add>, %156, %cst_45 [1] : vector<4x128xf32> to vector<4xf32>
    %158 = vector.shape_cast %157 : vector<4xf32> to vector<4x1xf32>
    %159 = vector.broadcast %158 : vector<4x1xf32> to vector<4x128xf32>
    %160 = arith.divf %156, %159 : vector<4x128xf32>
    %c0_46 = arith.constant 0 : index
    %c0_47 = arith.constant 0 : index
    %161 = vector.load %arg6[%c0_46, %c0_47] : memref<4x128xf32, #tpu.memory_space<vmem>>, vector<4x128xf32>
    tpu.vector_store %arg6[%c0_46, %c0_47], %160 {strides = array<i32>} : memref<4x128xf32, #tpu.memory_space<vmem>>, vector<4x128xf32>,
    return
  }
}

</mosaic_0001>

<bundles_post_ra>
// kernel: convnet_forward.1
= control target key start
LH: loop header
LB: loop body
LE: loop exit
PB: predicated region body
PF: predicated region fallthrough
CT: control target
= control target key end

     0   :  { %s15700_s0 = inlined_call_operand.vmem [shape: bf16[1024,16], index: 0, kind: input, shape index: {}]   ;;  %s15701_s1 = inlined_call_operand.vmem [shape: bf16[16,64], index: 1, kind: input, shape index: {}]   ;;  %s15702_s2 = inlined_call_operand.vmem [shape: bf16[256,128], index: 2, kind: input, shape index: {}]   ;;  %s15703_s3 = inlined_call_operand.vmem [shape: bf16[512,256], index: 3, kind: input, shape index: {}]   ;;  %s15704_s4 = inlined_call_operand.vmem [shape: bf16[256,128], index: 4, kind: input, shape index: {}]   ;;  %s15705_s5 = inlined_call_operand.vmem [shape: f32[16,256], index: 5, kind: input, shape index: {}]   ;;  %s15706_s6 = inlined_call_operand.hbm [shape: f32[4,128], index: 6, kind: output, shape index: {}]  }
   0x1   :  { %v8740_v0 = vld [vmem:[%s15701_s1] sm:$0xff] }
   0x2   :  { %v8676_v1 = vld [vmem:[%s15700_s0] sm:$0xff] }
   0x3   :  { %11 = vsyncpa [#allocation3], 0  ;;  %694 = vmatpush.bf16.msra.mxu0 %v8740_v0  ;;  %vm494_vm0 = vcmask 130048   ;;  %8837 = vmatpush.bf16.msra.mxu1 %v8740_v0  ;;  %v8677_v2 = vld [vmem:[%s15700_s0 + $0x8] sm:$0xff]  ;;  %v8678_v3 = vld [vmem:[%s15700_s0 + $0x10] sm:$0xff]  ;;  %vm1144_vm1 = vcmask 523264  }
   0x4   :  { %8839 = vmatpush.bf16.msra.mxu3 %v8740_v0  ;;  %8838 = vmatpush.bf16.msra.mxu2 %v8740_v0  ;;  %v8679_v4 = vld [vmem:[%s15700_s0 + $0x18] sm:$0xff]  ;;  %v8680_v5 = vld [vmem:[%s15700_s0 + $0x20] sm:$0xff]  ;;  %v8681_v6 = vld [vmem:[%s15700_s0 + $0x28] sm:$0xff]  ;;  %vm5405_vm6 = vcmask 1041409   ;;  %vm5407_vm7 = vcmask 1042434   ;;  %vm5409_vm8 = vcmask 1043459  }
   0x5   :  { %v8682_v7 = vld [vmem:[%s15700_s0 + $0x30] sm:$0xff]  ;;  %v8683_v8 = vld [vmem:[%s15700_s0 + $0x38] sm:$0xff]  ;;  %v8684_v9 = vld [vmem:[%s15700_s0 + $0x40] sm:$0xff]  ;;  %vm5411_vm9 = vcmask 1044484   ;;  %vm5413_vm10 = vcmask 1045509   ;;  %vm5415_vm11 = vcmask 1046534  }
   0x6   :  { %7684 = vmatmul.msk.bf16.vlgmr.msra.gmra.mxu0 %vm494_vm0, %v8676_v1  ;;  %v8685_v12 = vld [vmem:[%s15700_s0 + $0x48] sm:$0xff]  ;;  %v8686_v15 = vld [vmem:[%s15700_s0 + $0x50] sm:$0xff]  ;;  %v8687_v18 = vld [vmem:[%s15700_s0 + $0x58] sm:$0xff]  ;;  %vm5417_vm12 = vcmask 1047559   ;;  %s8931_s20 = smov 64   ;;  %s7412_s19 = sshll.u32 %s15706_s6, 4  ;;  %s7413_s19 = int_to_ptr.hbm [resolvable:$true] %s7412_s19 }
   0x7   :  { %v8700_v20 = vld [vmem:[%s15700_s0 + $0xc0] sm:$0xff]  ;;  %v8701_v24 = vld [vmem:[%s15700_s0 + $0xc8] sm:$0xff]  ;;  %v8702_v28 = vld [vmem:[%s15700_s0 + $0xd0] sm:$0xff] }
   0x8   :  { %7708 = vmatmul.msk.bf16.vlgmr.msra.gmra.mxu1 %vm494_vm0, %v8700_v20  ;;  %v8688_v22 = vld [vmem:[%s15700_s0 + $0x60] sm:$0xff]  ;;  %v8689_v26 = vld [vmem:[%s15700_s0 + $0x68] sm:$0xff]  ;;  %v8690_v30 = vld [vmem:[%s15700_s0 + $0x70] sm:$0xff] }
   0x9   :  { %v8703_v32 = vld [vmem:[%s15700_s0 + $0xd8] sm:$0xff]  ;;  %v8704_v36 = vld [vmem:[%s15700_s0 + $0xe0] sm:$0xff]  ;;  %v8705_v41 = vld [vmem:[%s15700_s0 + $0xe8] sm:$0xff] }
   0xa   :  { %v8691_v34 = vld [vmem:[%s15700_s0 + $0x78] sm:$0xff]  ;;  %v8724_v37 = vld [vmem:[%s15700_s0 + $0x180] sm:$0xff]  ;;  %v8725_v42 = vld [vmem:[%s15700_s0 + $0x188] sm:$0xff] }
   0xb   :  { %7732 = vmatmul.msk.bf16.vlgmr.msra.gmra.mxu3 %vm494_vm0, %v8724_v37  ;;  %v8692_v39 = vld [vmem:[%s15700_s0 + $0x80] sm:$0xff]  ;;  %v8693_v44 = vld [vmem:[%s15700_s0 + $0x88] sm:$0xff]  ;;  %v8706_v46 = vld [vmem:[%s15700_s0 + $0xf0] sm:$0xff] }
   0xc   :  { %v8714_v47 = vld [vmem:[%s15700_s0 + $0x130] sm:$0xff]  ;;  %v8707_v52 = vld [vmem:[%s15700_s0 + $0xf8] sm:$0xff]  ;;  %v8708_v59 = vld [vmem:[%s15700_s0 + $0x100] sm:$0xff] }
   0xd   :  { %v8726_v48 = vld [vmem:[%s15700_s0 + $0x190] sm:$0xff]  ;;  %7722 = vmatmul.msk.bf16.vlgmr.msra.gmra.mxu2 %vm494_vm0, %v8714_v47  ;;  %v8715_v53 = vld [vmem:[%s15700_s0 + $0x138] sm:$0xff]  ;;  %v8716_v60 = vld [vmem:[%s15700_s0 + $0x140] sm:$0xff] }
   0xe   :  { %v8694_v50 = vld [vmem:[%s15700_s0 + $0x90] sm:$0xff]  ;;  %v8727_v54 = vld [vmem:[%s15700_s0 + $0x198] sm:$0xff]  ;;  %v8728_v61 = vld [vmem:[%s15700_s0 + $0x1a0] sm:$0xff] }
   0xf   :  { %v8695_v56 = vld [vmem:[%s15700_s0 + $0x98] sm:$0xff]  ;;  %v8696_v0 = vld [vmem:[%s15700_s0 + $0xa0] sm:$0xff]  ;;  %v8730_v20 = vld [vmem:[%s15700_s0 + $0x1b0] sm:$0xff] }
  0x10   :  { %v8720_v47 = vld [vmem:[%s15700_s0 + $0x160] sm:$0xff] }
  0x16   :  { %7685 = vmatmul.msk.bf16.gmra.mxu0 %vm494_vm0, %v8677_v2 }
  0x18   :  { %7709 = vmatmul.msk.bf16.gmra.mxu1 %vm494_vm0, %v8701_v24 }
  0x1b   :  { %7733 = vmatmul.msk.bf16.gmra.mxu3 %vm494_vm0, %v8725_v42 }
  0x1d   :  { %7723 = vmatmul.msk.bf16.gmra.mxu2 %vm494_vm0, %v8715_v53 }
  0x26   :  { %7686 = vmatmul.msk.bf16.gmra.mxu0 %vm494_vm0, %v8678_v3  ;;  %v8709_v3 = vld [vmem:[%s15700_s0 + $0x108] sm:$0xff] }
  0x28   :  { %7710 = vmatmul.msk.bf16.gmra.mxu1 %vm494_vm0, %v8702_v28 }
  0x2b   :  { %7734 = vmatmul.msk.bf16.gmra.mxu3 %vm494_vm0, %v8726_v48  ;;  %v8732_v48 = vld [vmem:[%s15700_s0 + $0x1c0] sm:$0xff] }
  0x2d   :  { %7724 = vmatmul.msk.bf16.gmra.mxu2 %vm494_vm0, %v8716_v60  ;;  %v8713_v60 = vld [vmem:[%s15700_s0 + $0x128] sm:$0xff] }
  0x36   :  { %7687 = vmatmul.msk.bf16.gmra.mxu0 %vm494_vm0, %v8679_v4  ;;  %v8717_v4 = vld [vmem:[%s15700_s0 + $0x148] sm:$0xff] }
  0x38   :  { %7711 = vmatmul.msk.bf16.gmra.mxu1 %vm494_vm0, %v8703_v32  ;;  %v8711_v32 = vld [vmem:[%s15700_s0 + $0x118] sm:$0xff] }
  0x3b   :  { %7735 = vmatmul.msk.bf16.gmra.mxu3 %vm494_vm0, %v8727_v54 }
  0x3d   :  { %7725 = vmatmul.msk.bf16.gmra.mxu2 %vm494_vm0, %v8717_v4 }
  0x46   :  { %7688 = vmatmul.msk.bf16.gmra.mxu0 %vm494_vm0, %v8680_v5  ;;  %v8729_v5 = vld [vmem:[%s15700_s0 + $0x1a8] sm:$0xff] }
  0x48   :  { %7712 = vmatmul.msk.bf16.gmra.mxu1 %vm494_vm0, %v8704_v36  ;;  %v8731_v36 = vld [vmem:[%s15700_s0 + $0x1b8] sm:$0xff] }
  0x4b   :  { %7736 = vmatmul.msk.bf16.gmra.mxu3 %vm494_vm0, %v8728_v61  ;;  %v8721_v61 = vld [vmem:[%s15700_s0 + $0x168] sm:$0xff] }
  0x56   :  { %7689 = vmatmul.msk.bf16.gmra.mxu0 %vm494_vm0, %v8681_v6 }
  0x58   :  { %7713 = vmatmul.msk.bf16.gmra.mxu1 %vm494_vm0, %v8705_v41  ;;  %v8699_v41 = vld [vmem:[%s15700_s0 + $0xb8] sm:$0xff] }
  0x5b   :  { %7737 = vmatmul.msk.bf16.gmra.mxu3 %vm494_vm0, %v8729_v5 }
  0x66   :  { %7690 = vmatmul.msk.bf16.gmra.mxu0 %vm494_vm0, %v8682_v7 }
  0x68   :  { %7714 = vmatmul.msk.bf16.gmra.mxu1 %vm494_vm0, %v8706_v46  ;;  %v8712_v46 = vld [vmem:[%s15700_s0 + $0x120] sm:$0xff] }
  0x6b   :  { %7738 = vmatmul.msk.bf16.gmra.mxu3 %vm494_vm0, %v8730_v20  ;;  %v9304_v20 = vld [vmem:[%s15705_s5] ss:$0 sm:$0xff] }
  0x76   :  { %7691 = vmatmul.msk.bf16.gmra.mxu0 %vm494_vm0, %v8683_v8  ;;  %v8697_v8 = vld [vmem:[%s15700_s0 + $0xa8] sm:$0xff] }
  0x78   :  { %7715 = vmatmul.msk.bf16.gmra.mxu1 %vm494_vm0, %v8707_v52 }
  0x7b   :  { %7739 = vmatmul.msk.bf16.gmra.mxu3 %vm494_vm0, %v8731_v36 }
  0x83   :  { %v9008_v10 = vpop.f32.mrf.mxu0 }
  0x84   :  { %v697_v36 = vadd.f32 %v9008_v10, %v9304_v20 }
  0x85   :  { %v9154_v58 = vpop.f32.mrf.mxu1 }
  0x86   :  { %7692 = vmatmul.msk.bf16.gmra.mxu0 %vm494_vm0, %v8684_v9 }
  0x88   :  { %7716 = vmatmul.msk.bf16.gmra.mxu1 %vm494_vm0, %v8708_v59 }
  0x8b   :  { %v9011_v11 = vpop.f32.mrf.mxu0  ;;  %7740 = vmatmul.msk.bf16.gmra.mxu3 %vm494_vm0, %v8732_v48 }
  0x8d   :  { %v9171_v63 = vpop.f32.mrf.mxu1 }
  0x8e   :  { %v9269_v53 = vpop.f32.mrf.mxu3 }
  0x8f   :  { %16146 = vst [vmem:[#allocation5_spill] sm:$0xff] %v9269_v53 }
  0x93   :  { %v9016_v13 = vpop.f32.mrf.mxu0 }
  0x95   :  { %v9178_v2 = vpop.f32.mrf.mxu1 }
  0x96   :  { %7693 = vmatmul.msk.bf16.gmra.mxu0 %vm494_vm0, %v8685_v12  ;;  %v9275_v59 = vpop.f32.mrf.mxu3 }
  0x97   :  { %16147 = vst [vmem:[#allocation6_spill] sm:$0xff] %v9275_v59 }
  0x98   :  { %7717 = vmatmul.msk.bf16.gmra.mxu1 %vm494_vm0, %v8709_v3 }
  0x9b   :  { %v9019_v14 = vpop.f32.mrf.mxu0 }
  0x9c   :  { %v704_v48 = vadd.f32 %v9019_v14, %v9304_v20 }
  0x9d   :  { %v9195_v7 = vpop.f32.mrf.mxu1 }
  0x9e   :  { %v9293_v5 = vpop.f32.mrf.mxu3 }
  0x9f   :  { %16148 = vst [vmem:[#allocation7_spill] sm:$0xff] %v9293_v5 }
  0xa3   :  { %v9024_v16 = vpop.f32.mrf.mxu0 }
  0xa4   :  { %v707_v10 = vadd.f32 %v9024_v16, %v9304_v20 }
  0xa5   :  { %v9202_v12 = vpop.f32.mrf.mxu1 }
  0xa6   :  { %7694 = vmatmul.msk.bf16.gmra.mxu0 %vm494_vm0, %v8686_v15  ;;  %v8710_v15 = vld [vmem:[%s15700_s0 + $0x110] sm:$0xff] }
  0xa8   :  { %7718 = vmatmul.msk.bf16.gmra.mxu1 %vm494_vm0, %v8710_v15 }
  0xab   :  { %v9027_v17 = vpop.f32.mrf.mxu0 }
  0xac   :  { %v709_v14 = vadd.f32 %v9027_v17, %v9304_v20 }
  0xad   :  { %v9219_v24 = vpop.f32.mrf.mxu1 }
  0xae   :  { %v9363_v59 = vmax.f32 %v709_v14, 0.0 }
  0xb0   :  { %16159 = vst [vmem:[#allocation18_spill] sm:$0xff] %v9363_v59 }
  0xb3   :  { %v9032_v19 = vpop.f32.mrf.mxu0 }
  0xb6   :  { %7695 = vmatmul.msk.bf16.gmra.mxu0 %vm494_vm0, %v8687_v18  ;;  %v8718_v18 = vld [vmem:[%s15700_s0 + $0x150] sm:$0xff] }
  0xb7   :  { %7726 = vmatmul.msk.bf16.gmra.mxu2 %vm494_vm0, %v8718_v18  ;;  %v9299_v18 = vpop.f32.mrf.mxu3 }
  0xb8   :  { %7719 = vmatmul.msk.bf16.gmra.mxu1 %vm494_vm0, %v8711_v32  ;;  %16150 = vst [vmem:[#allocation9_spill] sm:$0xff] %v9299_v18  ;;  %v8734_v32 = vld [vmem:[%s15700_s0 + $0x1d0] sm:$0xff] }
  0xbb   :  { %v9039_v21 = vpop.f32.mrf.mxu0 }
  0xc3   :  { %v9044_v23 = vpop.f32.mrf.mxu0 }
  0xc6   :  { %7696 = vmatmul.msk.bf16.gmra.mxu0 %vm494_vm0, %v8688_v22 }
  0xc8   :  { %7720 = vmatmul.msk.bf16.gmra.mxu1 %vm494_vm0, %v8712_v46 }
  0xcb   :  { %v9051_v25 = vpop.f32.mrf.mxu0 }
  0xd3   :  { %v9056_v27 = vpop.f32.mrf.mxu0 }
  0xd6   :  { %7697 = vmatmul.msk.bf16.gmra.mxu0 %vm494_vm0, %v8689_v26  ;;  %v8698_v26 = vld [vmem:[%s15700_s0 + $0xb0] sm:$0xff] }
  0xd8   :  { %7721 = vmatmul.msk.bf16.gmra.mxu1 %vm494_vm0, %v8713_v60  ;;  %v9326_v60 = vpop.f32.mrf.mxu2 }
  0xd9   :  { %16152 = vst [vmem:[#allocation11_spill] sm:$0xff] %v9326_v60 }
  0xdb   :  { %v9063_v29 = vpop.f32.mrf.mxu0 }
  0xe3   :  { %v9068_v31 = vpop.f32.mrf.mxu0 }
  0xe6   :  { %7698 = vmatmul.msk.bf16.gmra.mxu0 %vm494_vm0, %v8690_v30  ;;  %v9226_v30 = vpop.f32.mrf.mxu1 }
  0xeb   :  { %v9075_v33 = vpop.f32.mrf.mxu0 }
  0xf3   :  { %v9080_v35 = vpop.f32.mrf.mxu0 }
  0xf6   :  { %7699 = vmatmul.msk.bf16.gmra.mxu0 %vm494_vm0, %v8691_v34  ;;  %v8719_v34 = vld [vmem:[%s15700_s0 + $0x158] sm:$0xff] }
  0xf7   :  { %7727 = vmatmul.msk.bf16.gmra.mxu2 %vm494_vm0, %v8719_v34  ;;  %v699_v34 = vadd.f32 %v9011_v11, %v9304_v20  ;;  %v9328_v11 = vpop.f32.mrf.mxu3 }
  0xf8   :  { %16153 = vst [vmem:[#allocation12_spill] sm:$0xff] %v9328_v11  ;;  %v9352_v11 = vmax.f32 %v707_v10, 0.0  ;;  %v9367_v10 = vpop.f32.mrf.mxu2 }
  0xf9   :  { %v9320_v46 = vmax.f32 %v699_v34, 0.0  ;;  %16160 = vst [vmem:[#allocation19_spill] sm:$0xff] %v9367_v10 }
  0xfa   :  { %16158 = vst [vmem:[#allocation17_spill] sm:$0xff] %v9352_v11  ;;  %v1418_v14 = vmul.f32 %v9352_v11, %v9352_v11 }
  0xfb   :  { %v9091_v38 = vpop.f32.mrf.mxu0  ;;  %16151 = vst [vmem:[#allocation10_spill] sm:$0xff] %v9320_v46  ;;  %v1146_v16 = vsel %vm1144_vm1, %v9320_v46, 0.0 }
  0xff   :  { %v9369_v53 = vpop.f32.mrf.mxu3 }
 0x100   :  { %16161 = vst [vmem:[#allocation20_spill] sm:$0xff] %v9369_v53  ;;  %v8723_v53 = vld [vmem:[%s15700_s0 + $0x178] sm:$0xff] }
 0x103   :  { %v9096_v40 = vpop.f32.mrf.mxu0 }
 0x106   :  { %7700 = vmatmul.msk.bf16.gmra.mxu0 %vm494_vm0, %v8692_v39  ;;  %v9243_v39 = vpop.f32.mrf.mxu1 }
 0x107   :  { %7728 = vmatmul.msk.bf16.gmra.mxu2 %vm494_vm0, %v8720_v47 }
 0x10b   :  { %v9107_v43 = vpop.f32.mrf.mxu0 }
 0x113   :  { %v9112_v45 = vpop.f32.mrf.mxu0 }
 0x116   :  { %7701 = vmatmul.msk.bf16.gmra.mxu0 %vm494_vm0, %v8693_v44  ;;  %v9250_v44 = vpop.f32.mrf.mxu1 }
 0x117   :  { %7729 = vmatmul.msk.bf16.gmra.mxu2 %vm494_vm0, %v8721_v61  ;;  %v9330_v61 = vmax.f32 %v697_v36, 0.0  ;;  %v712_v36 = vadd.f32 %v9032_v19, %v9304_v20 }
 0x119   :  { %16154 = vst [vmem:[#allocation13_spill] sm:$0xff] %v9330_v61  ;;  %v1414_v34 = vmul.f32 %v9330_v61, %v9330_v61  ;;  %v9372_v60 = vmax.f32 %v712_v36, 0.0 }
 0x11b   :  { %v9127_v49 = vpop.f32.mrf.mxu0  ;;  %16162 = vst [vmem:[#allocation21_spill] sm:$0xff] %v9372_v60 }
 0x11e   :  { %v9267_v52 = vpop.f32.mrf.mxu1 }
 0x123   :  { %v9132_v51 = vpop.f32.mrf.mxu0 }
 0x126   :  { %7702 = vmatmul.msk.bf16.gmra.mxu0 %vm494_vm0, %v8694_v50 }
 0x12b   :  { %v9147_v55 = vpop.f32.mrf.mxu0 }
 0x133   :  { %v9152_v57 = vpop.f32.mrf.mxu0 }
 0x136   :  { %7703 = vmatmul.msk.bf16.gmra.mxu0 %vm494_vm0, %v8695_v56  ;;  %v9273_v56 = vpop.f32.mrf.mxu1 }
 0x13b   :  { %v9169_v62 = vpop.f32.mrf.mxu0 }
 0x13e   :  { %v9291_v4 = vpop.f32.mrf.mxu1 }
 0x143   :  { %v9176_v1 = vpop.f32.mrf.mxu0 }
 0x146   :  { %7704 = vmatmul.msk.bf16.gmra.mxu0 %vm494_vm0, %v8696_v0  ;;  %v8733_v0 = vld [vmem:[%s15700_s0 + $0x1c8] sm:$0xff]  ;;  %v9297_v15 = vpop.f32.mrf.mxu1 }
 0x147   :  { %7741 = vmatmul.msk.bf16.gmra.mxu3 %vm494_vm0, %v8733_v0  ;;  %16149 = vst [vmem:[#allocation8_spill] sm:$0xff] %v9297_v15 }
 0x14b   :  { %v9193_v6 = vpop.f32.mrf.mxu0 }
 0x153   :  { %v9200_v9 = vpop.f32.mrf.mxu0 }
 0x156   :  { %7705 = vmatmul.msk.bf16.gmra.mxu0 %vm494_vm0, %v8697_v8 }
 0x157   :  { %7742 = vmatmul.msk.bf16.gmra.mxu3 %vm494_vm0, %v8734_v32  ;;  %v9340_v32 = vmax.f32 %v704_v48, 0.0  ;;  %v1145_v48 = vsel %vm1144_vm1, %v9330_v61, 0.0  ;;  %v1542_v61 = vsel %vm1144_vm1, %v1414_v34, 0.0  ;;  %v8735_v34 = vld [vmem:[%s15700_s0 + $0x1d8] sm:$0xff] }
 0x159   :  { %16157 = vst [vmem:[#allocation16_spill] sm:$0xff] %v9340_v32  ;;  %v1417_v19 = vmul.f32 %v9340_v32, %v9340_v32 }
 0x15b   :  { %v9217_v22 = vpop.f32.mrf.mxu0 }
 0x163   :  { %v9224_v28 = vpop.f32.mrf.mxu0 }
 0x166   :  { %7706 = vmatmul.msk.bf16.gmra.mxu0 %vm494_vm0, %v8698_v26  ;;  %v8722_v26 = vld [vmem:[%s15700_s0 + $0x170] sm:$0xff] }
 0x167   :  { %7730 = vmatmul.msk.bf16.gmra.mxu2 %vm494_vm0, %v8722_v26  ;;  %v9336_v26 = vpop.f32.mrf.mxu1  ;;  %7743 = vmatmul.msk.bf16.gmra.mxu3 %vm494_vm0, %v8735_v34 }
 0x168   :  { %16156 = vst [vmem:[#allocation15_spill] sm:$0xff] %v9336_v26 }
 0x16b   :  { %v9241_v37 = vpop.f32.mrf.mxu0 }
 0x16f   :  { %v9396_v15 = vpop.f32.mrf.mxu1 }
 0x170   :  { %16163 = vst [vmem:[#allocation22_spill] sm:$0xff] %v9396_v15 }
 0x173   :  { %v9248_v42 = vpop.f32.mrf.mxu0 }
 0x176   :  { %7707 = vmatmul.msk.bf16.gmra.mxu0 %vm494_vm0, %v8699_v41  ;;  %v702_v41 = vadd.f32 %v9016_v13, %v9304_v20  ;;  %v1415_v13 = vmul.f32 %v9320_v46, %v9320_v46  ;;  %v714_v46 = vadd.f32 %v9039_v21, %v9304_v20  ;;  %v717_v21 = vadd.f32 %v9044_v23, %v9304_v20 }
 0x177   :  { %v1419_v23 = vmul.f32 %v9363_v59, %v9363_v59  ;;  %7731 = vmatmul.msk.bf16.gmra.mxu2 %vm494_vm0, %v8723_v53 }
 0x178   :  { %v9332_v0 = vmax.f32 %v702_v41, 0.0  ;;  %v1543_v18 = vsel %vm1144_vm1, %v1415_v13, 0.0  ;;  %v1147_v13 = vadd.f32 %v1146_v16, %v1145_v48  ;;  %v1547_v48 = vsel %vm1144_vm1, %v1417_v19, 0.0 }
 0x179   :  { %v1544_v36 = vadd.f32 %v1543_v18, %v1542_v61  ;;  %v9394_v10 = vmax.f32 %v714_v46, 0.0  ;;  %v1549_v61 = vsel %vm1144_vm1, %v1418_v14, 0.0  ;;  %v1154_v19 = vsel %vm1144_vm1, %v9363_v59, 0.0 }
 0x17a   :  { %16155 = vst [vmem:[#allocation14_spill] sm:$0xff] %v9332_v0  ;;  %v1416_v41 = vmul.f32 %v9332_v0, %v9332_v0  ;;  %v1148_v5 = vsel %vm1144_vm1, %v9332_v0, 0.0  ;;  %v1150_v0 = vsel %vm1144_vm1, %v9340_v32, 0.0  ;;  %v1152_v32 = vsel %vm1144_vm1, %v9352_v11, 0.0 }
 0x17b   :  { %v9265_v50 = vpop.f32.mrf.mxu0  ;;  %v1149_v16 = vadd.f32 %v1148_v5, %v1147_v13  ;;  %v9405_v13 = vmax.f32 %v717_v21, 0.0  ;;  %v722_v46 = vadd.f32 %v9056_v27, %v9304_v20  ;;  %v1421_v14 = vmul.f32 %v9394_v10, %v9394_v10  ;;  %v9422_v27 = vpop.f32.mrf.mxu3 }
 0x17c   :  { %v1545_v26 = vsel %vm1144_vm1, %v1416_v41, 0.0  ;;  %v719_v41 = vadd.f32 %v9051_v25, %v9304_v20  ;;  %v1420_v25 = vmul.f32 %v9372_v60, %v9372_v60  ;;  %v724_v21 = vadd.f32 %v9063_v29, %v9304_v20 }
 0x17d   :  { %v1546_v5 = vadd.f32 %v1545_v26, %v1544_v36  ;;  %v1151_v18 = vadd.f32 %v1150_v0, %v1149_v16  ;;  %16164 = vst [vmem:[#allocation23_spill] sm:$0xff] %v9405_v13  ;;  %v1551_v0 = vsel %vm1144_vm1, %v1419_v23, 0.0  ;;  %v1156_v26 = vsel %vm1144_vm1, %v9372_v60, 0.0  ;;  %v9420_v36 = vpop.f32.mrf.mxu2 }
 0x17e   :  { %v9409_v53 = vmax.f32 %v719_v41, 0.0  ;;  %v1553_v41 = vsel %vm1144_vm1, %v1420_v25, 0.0  ;;  %v1422_v23 = vmul.f32 %v9405_v13, %v9405_v13  ;;  %v9438_v25 = vmax.f32 %v724_v21, 0.0  ;;  %v9451_v21 = vpop.f32.mrf.mxu1 }
 0x17f   :  { %v1548_v11 = vadd.f32 %v1547_v48, %v1546_v5  ;;  %v1153_v15 = vadd.f32 %v1152_v32, %v1151_v18  ;;  %v1158_v48 = vsel %vm1144_vm1, %v9394_v10, 0.0  ;;  %v9429_v5 = vmax.f32 %v722_v46, 0.0 }
 0x180   :  { %16165 = vst [vmem:[#allocation24_spill] sm:$0xff] %v9409_v53  ;;  %v727_v18 = vadd.f32 %v9068_v31, %v9304_v20  ;;  %v1423_v59 = vmul.f32 %v9409_v53, %v9409_v53  ;;  %v732_v31 = vadd.f32 %v9080_v35, %v9304_v20 }
 0x181   :  { %v1550_v32 = vadd.f32 %v1549_v61, %v1548_v11  ;;  %v1155_v16 = vadd.f32 %v1154_v19, %v1153_v15  ;;  %16166 = vst [vmem:[#allocation25_spill] sm:$0xff] %v9429_v5  ;;  %v1555_v15 = vsel %vm1144_vm1, %v1421_v14, 0.0  ;;  %v1160_v11 = vsel %vm1144_vm1, %v9405_v13, 0.0 }
 0x182   :  { %16167 = vst [vmem:[#allocation26_spill] sm:$0xff] %v9438_v25  ;;  %v729_v61 = vadd.f32 %v9075_v33, %v9304_v20  ;;  %v1424_v14 = vmul.f32 %v9429_v5, %v9429_v5  ;;  %v1559_v33 = vsel %vm1144_vm1, %v1423_v59, 0.0  ;;  %v1164_v35 = vsel %vm1144_vm1, %v9429_v5, 0.0 }
 0x183   :  { %v9271_v54 = vpop.f32.mrf.mxu0  ;;  %v1552_v29 = vadd.f32 %v1551_v0, %v1550_v32  ;;  %v1157_v60 = vadd.f32 %v1156_v26, %v1155_v16  ;;  %v1557_v0 = vsel %vm1144_vm1, %v1422_v23, 0.0  ;;  %v1162_v26 = vsel %vm1144_vm1, %v9409_v53, 0.0 }
 0x184   :  { %v9449_v32 = vmax.f32 %v727_v18, 0.0  ;;  %v734_v23 = vadd.f32 %v9091_v38, %v9304_v20  ;;  %v9468_v59 = vmax.f32 %v732_v31, 0.0  ;;  %v737_v5 = vadd.f32 %v9096_v40, %v9304_v20  ;;  %v8736_v38 = vld [vmem:[%s15700_s0 + $0x1e0] sm:$0xff] }
 0x185   :  { %v1554_v19 = vadd.f32 %v1553_v41, %v1552_v29  ;;  %v1159_v46 = vadd.f32 %v1158_v48, %v1157_v60  ;;  %v1425_v41 = vmul.f32 %v9438_v25, %v9438_v25  ;;  %v9460_v48 = vmax.f32 %v729_v61, 0.0  ;;  %v9464_v18 = vpop.f32.mrf.mxu2  ;;  %v9466_v29 = vpop.f32.mrf.mxu3  ;;  %7744 = vmatmul.msk.bf16.gmra.mxu3 %vm494_vm0, %v8736_v38 }
 0x186   :  { %16168 = vst [vmem:[#allocation27_spill] sm:$0xff] %v9449_v32  ;;  %v1426_v61 = vmul.f32 %v9449_v32, %v9449_v32 }
 0x187   :  { %v1556_v16 = vadd.f32 %v1555_v15, %v1554_v19  ;;  %v1161_v13 = vadd.f32 %v1160_v11, %v1159_v46  ;;  %16169 = vst [vmem:[#allocation28_spill] sm:$0xff] %v9460_v48  ;;  %v1561_v19 = vsel %vm1144_vm1, %v1424_v14, 0.0  ;;  %v1166_v46 = vsel %vm1144_vm1, %v9438_v25, 0.0 }
 0x188   :  { %16170 = vst [vmem:[#allocation29_spill] sm:$0xff] %v9468_v59  ;;  %v1563_v31 = vsel %vm1144_vm1, %v1425_v41, 0.0  ;;  %v1427_v14 = vmul.f32 %v9460_v48, %v9460_v48  ;;  %v9495_v41 = vmax.f32 %v737_v5, 0.0  ;;  %v744_v5 = vadd.f32 %v9127_v49, %v9304_v20 }
 0x189   :  { %v1558_v15 = vadd.f32 %v1557_v0, %v1556_v16  ;;  %v1163_v11 = vadd.f32 %v1162_v26, %v1161_v13  ;;  %v739_v13 = vadd.f32 %v9107_v43, %v9304_v20  ;;  %v1168_v26 = vsel %vm1144_vm1, %v9449_v32, 0.0 }
 0x18a   :  { %v9487_v16 = vmax.f32 %v734_v23, 0.0  ;;  %v1170_v43 = vsel %vm1144_vm1, %v9460_v48, 0.0  ;;  %16172 = vst [vmem:[#allocation31_spill] sm:$0xff] %v9495_v41  ;;  %v747_v49 = vadd.f32 %v9132_v51, %v9304_v20  ;;  %v752_v51 = vadd.f32 %v9152_v57, %v9304_v20 }
 0x18b   :  { %v9289_v3 = vpop.f32.mrf.mxu0  ;;  %v1560_v53 = vadd.f32 %v1559_v33, %v1558_v15  ;;  %v1165_v0 = vadd.f32 %v1164_v35, %v1163_v11  ;;  %v1428_v33 = vmul.f32 %v9468_v59, %v9468_v59  ;;  %v1565_v35 = vsel %vm1144_vm1, %v1426_v61, 0.0  ;;  %v9510_v61 = vpop.f32.mrf.mxu1 }
 0x18c   :  { %16171 = vst [vmem:[#allocation30_spill] sm:$0xff] %v9487_v16  ;;  %v742_v15 = vadd.f32 %v9112_v45, %v9304_v20  ;;  %v9499_v32 = vmax.f32 %v739_v13, 0.0 }
 0x18d   :  { %v1562_v40 = vadd.f32 %v1561_v19, %v1560_v53  ;;  %v1167_v25 = vadd.f32 %v1166_v46, %v1165_v0  ;;  %v1567_v53 = vsel %vm1144_vm1, %v1427_v14, 0.0  ;;  %v1172_v19 = vsel %vm1144_vm1, %v9468_v59, 0.0  ;;  %v9512_v45 = vpop.f32.mrf.mxu3 }
 0x18e   :  { %16173 = vst [vmem:[#allocation32_spill] sm:$0xff] %v9499_v32  ;;  %v1429_v46 = vmul.f32 %v9487_v16, %v9487_v16  ;;  %v1569_v13 = vsel %vm1144_vm1, %v1428_v33, 0.0  ;;  %v1430_v14 = vmul.f32 %v9495_v41, %v9495_v41 }
 0x18f   :  { %v1564_v11 = vadd.f32 %v1563_v31, %v1562_v40  ;;  %v1169_v23 = vadd.f32 %v1168_v26, %v1167_v25  ;;  %v9515_v31 = vpop.f32.mrf.mxu2  ;;  %v1174_v26 = vsel %vm1144_vm1, %v9487_v16, 0.0  ;;  %v9521_v40 = vmax.f32 %v742_v15, 0.0 }
 0x190   :  { %v1571_v33 = vsel %vm1144_vm1, %v1429_v46, 0.0 }
 0x191   :  { %v1566_v25 = vadd.f32 %v1565_v35, %v1564_v11  ;;  %v1171_v0 = vadd.f32 %v1170_v43, %v1169_v23  ;;  %16174 = vst [vmem:[#allocation33_spill] sm:$0xff] %v9521_v40  ;;  %v1431_v35 = vmul.f32 %v9499_v32, %v9499_v32  ;;  %v1176_v43 = vsel %vm1144_vm1, %v9495_v41, 0.0 }
 0x192   :  { %v9530_v11 = vmax.f32 %v744_v5, 0.0  ;;  %v749_v23 = vadd.f32 %v9147_v55, %v9304_v20  ;;  %v1432_v46 = vmul.f32 %v9521_v40, %v9521_v40 }
 0x193   :  { %v9295_v8 = vpop.f32.mrf.mxu0  ;;  %v1568_v59 = vadd.f32 %v1567_v53, %v1566_v25  ;;  %v1173_v48 = vadd.f32 %v1172_v19, %v1171_v0  ;;  %v1573_v53 = vsel %vm1144_vm1, %v1430_v14, 0.0  ;;  %v1178_v19 = vsel %vm1144_vm1, %v9499_v32, 0.0 }
 0x194   :  { %16175 = vst [vmem:[#allocation34_spill] sm:$0xff] %v9530_v11  ;;  %v9541_v25 = vmax.f32 %v747_v49, 0.0  ;;  %v1575_v41 = vsel %vm1144_vm1, %v1431_v35, 0.0  ;;  %v1433_v57 = vmul.f32 %v9530_v11, %v9530_v11  ;;  %v1577_v35 = vsel %vm1144_vm1, %v1432_v46, 0.0 }
 0x195   :  { %v1570_v15 = vadd.f32 %v1569_v13, %v1568_v59  ;;  %v1175_v16 = vadd.f32 %v1174_v26, %v1173_v48  ;;  %v1180_v48 = vsel %vm1144_vm1, %v9521_v40, 0.0  ;;  %v9550_v59 = vmax.f32 %v749_v23, 0.0  ;;  %v9554_v26 = vpop.f32.mrf.mxu3 }
 0x196   :  { %16176 = vst [vmem:[#allocation35_spill] sm:$0xff] %v9541_v25  ;;  %v754_v13 = vadd.f32 %v9169_v62, %v9304_v20  ;;  %v757_v23 = vadd.f32 %v9176_v1, %v9304_v20  ;;  %v8737_v62 = vld [vmem:[%s15700_s0 + $0x1e8] sm:$0xff] }
 0x197   :  { %v1572_v5 = vadd.f32 %v1571_v33, %v1570_v15  ;;  %v1177_v0 = vadd.f32 %v1176_v43, %v1175_v16  ;;  %v9556_v16 = vmax.f32 %v752_v51, 0.0  ;;  %v1182_v33 = vsel %vm1144_vm1, %v9530_v11, 0.0  ;;  %v9565_v15 = vpop.f32.mrf.mxu1  ;;  %v9572_v46 = vpop.f32.mrf.mxu2  ;;  %7745 = vmatmul.msk.bf16.gmra.mxu3 %vm494_vm0, %v8737_v62 }
 0x198   :  { %v1434_v43 = vmul.f32 %v9541_v25, %v9541_v25  ;;  %v1435_v1 = vmul.f32 %v9550_v59, %v9550_v59  ;;  %v9579_v11 = vmax.f32 %v754_v13, 0.0 }
 0x199   :  { %v1574_v14 = vadd.f32 %v1573_v53, %v1572_v5  ;;  %v1179_v49 = vadd.f32 %v1178_v19, %v1177_v0  ;;  %16177 = vst [vmem:[#allocation36_spill] sm:$0xff] %v9556_v16  ;;  %v759_v19 = vadd.f32 %v9193_v6, %v9304_v20  ;;  %v1579_v5 = vsel %vm1144_vm1, %v1433_v57, 0.0 }
 0x19a   :  { %v1184_v0 = vsel %vm1144_vm1, %v9541_v25, 0.0  ;;  %16178 = vst [vmem:[#allocation37_spill] sm:$0xff] %v9579_v11  ;;  %v1581_v6 = vsel %vm1144_vm1, %v1434_v43, 0.0  ;;  %v1186_v57 = vsel %vm1144_vm1, %v9550_v59, 0.0  ;;  %v1437_v43 = vmul.f32 %v9579_v11, %v9579_v11 }
 0x19b   :  { %v9322_v47 = vpop.f32.mrf.mxu0  ;;  %v1576_v53 = vadd.f32 %v1575_v41, %v1574_v14  ;;  %v1181_v51 = vadd.f32 %v1180_v48, %v1179_v49  ;;  %v1436_v48 = vmul.f32 %v9556_v16, %v9556_v16  ;;  %v9587_v14 = vmax.f32 %v757_v23, 0.0 }
 0x19c   :  { %v762_v49 = vadd.f32 %v9200_v9, %v9304_v20  ;;  %v9591_v32 = vmax.f32 %v759_v19, 0.0  ;;  %v764_v23 = vadd.f32 %v9217_v22, %v9304_v20  ;;  %v1190_v19 = vsel %vm1144_vm1, %v9579_v11, 0.0 }
 0x19d   :  { %v1578_v40 = vadd.f32 %v1577_v35, %v1576_v53  ;;  %v1183_v41 = vadd.f32 %v1182_v33, %v1181_v51  ;;  %16179 = vst [vmem:[#allocation38_spill] sm:$0xff] %v9587_v14  ;;  %v1583_v35 = vsel %vm1144_vm1, %v1435_v1, 0.0  ;;  %v1188_v33 = vsel %vm1144_vm1, %v9556_v16, 0.0  ;;  %v9602_v53 = vpop.f32.mrf.mxu3 }
 0x19e   :  { %16180 = vst [vmem:[#allocation39_spill] sm:$0xff] %v9591_v32  ;;  %v1585_v51 = vsel %vm1144_vm1, %v1436_v48, 0.0  ;;  %v767_v1 = vadd.f32 %v9224_v28, %v9304_v20  ;;  %v1439_v22 = vmul.f32 %v9591_v32, %v9591_v32  ;;  %v1192_v48 = vsel %vm1144_vm1, %v9587_v14, 0.0 }
 0x19f   :  { %v1580_v25 = vadd.f32 %v1579_v5, %v1578_v40  ;;  %v1185_v13 = vadd.f32 %v1184_v0, %v1183_v41  ;;  %v1438_v5 = vmul.f32 %v9587_v14, %v9587_v14  ;;  %v9609_v0 = vmax.f32 %v762_v49, 0.0  ;;  %v9622_v49 = vpop.f32.mrf.mxu1 }
 0x1a0   :  { %v772_v28 = vadd.f32 %v9248_v42, %v9304_v20 }
 0x1a1   :  { %v1582_v9 = vadd.f32 %v1581_v6, %v1580_v25  ;;  %v1187_v40 = vadd.f32 %v1186_v57, %v1185_v13  ;;  %16181 = vst [vmem:[#allocation40_spill] sm:$0xff] %v9609_v0  ;;  %v1587_v25 = vsel %vm1144_vm1, %v1437_v43, 0.0  ;;  %v9618_v6 = vmax.f32 %v764_v23, 0.0 }
 0x1a2   :  { %v769_v57 = vadd.f32 %v9241_v37, %v9304_v20  ;;  %v1194_v43 = vsel %vm1144_vm1, %v9591_v32, 0.0  ;;  %v1440_v23 = vmul.f32 %v9609_v0, %v9609_v0  ;;  %v1196_v42 = vsel %vm1144_vm1, %v9609_v0, 0.0 }
 0x1a3   :  { %v9357_v17 = vpop.f32.mrf.mxu0  ;;  %v1584_v41 = vadd.f32 %v1583_v35, %v1582_v9  ;;  %v1189_v16 = vadd.f32 %v1188_v33, %v1187_v40  ;;  %16182 = vst [vmem:[#allocation41_spill] sm:$0xff] %v9618_v6  ;;  %v9626_v35 = vpop.f32.mrf.mxu2  ;;  %v1589_v33 = vsel %vm1144_vm1, %v1438_v5, 0.0  ;;  %v9633_v9 = vmax.f32 %v767_v1, 0.0 }
 0x1a4   :  { %v9642_v5 = vmax.f32 %v769_v57, 0.0  ;;  %v777_v57 = vadd.f32 %v9271_v54, %v9304_v20 }
 0x1a5   :  { %v1586_v13 = vadd.f32 %v1585_v51, %v1584_v41  ;;  %v1191_v11 = vadd.f32 %v1190_v19, %v1189_v16  ;;  %16183 = vst [vmem:[#allocation42_spill] sm:$0xff] %v9633_v9  ;;  %v1591_v51 = vsel %vm1144_vm1, %v1439_v22, 0.0  ;;  %v1441_v19 = vmul.f32 %v9618_v6, %v9618_v6  ;;  %v9646_v32 = vpop.f32.mrf.mxu3 }
 0x1a6   :  { %16184 = vst [vmem:[#allocation43_spill] sm:$0xff] %v9642_v5  ;;  %v774_v41 = vadd.f32 %v9265_v50, %v9304_v20  ;;  %v1593_v22 = vsel %vm1144_vm1, %v1440_v23, 0.0  ;;  %v8738_v50 = vld [vmem:[%s15700_s0 + $0x1f0] sm:$0xff]  ;;  %v1200_v23 = vsel %vm1144_vm1, %v9633_v9, 0.0 }
 0x1a7   :  { %v1588_v37 = vadd.f32 %v1587_v25, %v1586_v13  ;;  %v1193_v40 = vadd.f32 %v1192_v48, %v1191_v11  ;;  %v9648_v11 = vmax.f32 %v772_v28, 0.0  ;;  %v1198_v48 = vsel %vm1144_vm1, %v9618_v6, 0.0  ;;  %7746 = vmatmul.msk.bf16.gmra.mxu3 %vm494_vm0, %v8738_v50 }
 0x1a8   :  { %v1442_v13 = vmul.f32 %v9633_v9, %v9633_v9  ;;  %v779_v28 = vadd.f32 %v9289_v3, %v9304_v20  ;;  %v1202_v3 = vsel %vm1144_vm1, %v9642_v5, 0.0 }
 0x1a9   :  { %v1590_v1 = vadd.f32 %v1589_v33, %v1588_v37  ;;  %v1195_v25 = vadd.f32 %v1194_v43, %v1193_v40  ;;  %16185 = vst [vmem:[#allocation44_spill] sm:$0xff] %v9648_v11  ;;  %v1595_v43 = vsel %vm1144_vm1, %v1441_v19, 0.0  ;;  %v1443_v37 = vmul.f32 %v9642_v5, %v9642_v5 }
 0x1aa   :  { %v9667_v40 = vmax.f32 %v774_v41, 0.0  ;;  %v9675_v19 = vmax.f32 %v777_v57, 0.0  ;;  %v9681_v50 = vmax.f32 %v779_v28, 0.0 }
 0x1ab   :  { %v9411_v34 = vpop.f32.mrf.mxu0  ;;  %v1592_v0 = vadd.f32 %v1591_v51, %v1590_v1  ;;  %v1197_v33 = vadd.f32 %v1196_v42, %v1195_v25  ;;  %v1444_v51 = vmul.f32 %v9648_v11, %v9648_v11  ;;  %v1597_v42 = vsel %vm1144_vm1, %v1442_v13, 0.0  ;;  %v9679_v25 = vpop.f32.mrf.mxu1 }
 0x1ac   :  { %16186 = vst [vmem:[#allocation45_spill] sm:$0xff] %v9675_v19  ;;  %v782_v1 = vadd.f32 %v9295_v8, %v9304_v20  ;;  %v1204_v13 = vsel %vm1144_vm1, %v9648_v11, 0.0  ;;  %v1445_v57 = vmul.f32 %v9667_v40, %v9667_v40  ;;  %v784_v8 = vadd.f32 %v9322_v47, %v9304_v20 }
 0x1ad   :  { %v1594_v54 = vadd.f32 %v1593_v22, %v1592_v0  ;;  %v1199_v6 = vadd.f32 %v1198_v48, %v1197_v33  ;;  %16187 = vst [vmem:[#allocation46_spill] sm:$0xff] %v9681_v50  ;;  %v9685_v22 = vpop.f32.mrf.mxu2  ;;  %v1599_v48 = vsel %vm1144_vm1, %v1443_v37, 0.0  ;;  %v9694_v33 = vpop.f32.mrf.mxu3  ;;  %v1446_v37 = vmul.f32 %v9675_v19, %v9675_v19 }
 0x1ae   :  { %v787_v11 = vadd.f32 %v9357_v17, %v9304_v20  ;;  %v1447_v47 = vmul.f32 %v9681_v50, %v9681_v50 }
 0x1af   :  { %v1596_v41 = vadd.f32 %v1595_v43, %v1594_v54  ;;  %v1201_v9 = vadd.f32 %v1200_v23, %v1199_v6  ;;  %v1601_v43 = vsel %vm1144_vm1, %v1444_v51, 0.0  ;;  %v1206_v23 = vsel %vm1144_vm1, %v9667_v40, 0.0 }
 0x1b0   :  { %v9701_v54 = vmax.f32 %v782_v1, 0.0  ;;  %v1208_v51 = vsel %vm1144_vm1, %v9675_v19, 0.0  ;;  %v1607_v19 = vsel %vm1144_vm1, %v1447_v47, 0.0 }
 0x1b1   :  { %v1598_v6 = vadd.f32 %v1597_v42, %v1596_v41  ;;  %v1203_v28 = vadd.f32 %v1202_v3, %v1201_v9  ;;  %v1603_v9 = vsel %vm1144_vm1, %v1445_v57, 0.0  ;;  %v9710_v42 = vmax.f32 %v784_v8, 0.0 }
 0x1b2   :  { %16188 = vst [vmem:[#allocation47_spill] sm:$0xff] %v9701_v54  ;;  %v789_v3 = vadd.f32 %v9411_v34, %v9304_v20  ;;  %v1448_v57 = vmul.f32 %v9701_v54, %v9701_v54 }
 0x1b3   :  { %v9454_v60 = vpop.f32.mrf.mxu0  ;;  %v1600_v5 = vadd.f32 %v1599_v48, %v1598_v6  ;;  %v1205_v14 = vadd.f32 %v1204_v13, %v1203_v28  ;;  %16189 = vst [vmem:[#allocation48_spill] sm:$0xff] %v9710_v42  ;;  %v1605_v48 = vsel %vm1144_vm1, %v1446_v37, 0.0  ;;  %v1210_v13 = vsel %vm1144_vm1, %v9681_v50, 0.0 }
 0x1b4   :  { %v792_v17 = vadd.f32 %v9454_v60, %v9304_v20  ;;  %v9721_v6 = vmax.f32 %v787_v11, 0.0  ;;  %v1449_v60 = vmul.f32 %v9710_v42, %v9710_v42 }
 0x1b5   :  { %v1602_v1 = vadd.f32 %v1601_v43, %v1600_v5  ;;  %v1207_v41 = vadd.f32 %v1206_v23, %v1205_v14  ;;  %v1212_v14 = vsel %vm1144_vm1, %v9701_v54, 0.0  ;;  %v9728_v5 = vmax.f32 %v789_v3, 0.0  ;;  %v9732_v23 = vpop.f32.mrf.mxu3  ;;  %v9738_v47 = vpop.f32.mrf.mxu2 }
 0x1b6   :  { %16190 = vst [vmem:[#allocation49_spill] sm:$0xff] %v9721_v6  ;;  %v1450_v3 = vmul.f32 %v9721_v6, %v9721_v6 }
 0x1b7   :  { %v1604_v8 = vadd.f32 %v1603_v9, %v1602_v1  ;;  %v1209_v28 = vadd.f32 %v1208_v51, %v1207_v41  ;;  %16191 = vst [vmem:[#allocation50_spill] sm:$0xff] %v9728_v5  ;;  %v9734_v9 = vmax.f32 %v792_v17, 0.0  ;;  %v9736_v51 = vpop.f32.mrf.mxu1  ;;  %v1609_v1 = vsel %vm1144_vm1, %v1448_v57, 0.0  ;;  %v8739_v17 = vld [vmem:[%s15700_s0 + $0x1f8] sm:$0xff] }
 0x1b8   :  { %v1214_v41 = vsel %vm1144_vm1, %v9710_v42, 0.0  ;;  %v1611_v57 = vsel %vm1144_vm1, %v1449_v60, 0.0  ;;  %v1451_v42 = vmul.f32 %v9728_v5, %v9728_v5  ;;  %7747 = vmatmul.msk.bf16.gmra.mxu3 %vm494_vm0, %v8739_v17 }
 0x1b9   :  { %v1606_v11 = vadd.f32 %v1605_v48, %v1604_v8  ;;  %v1211_v37 = vadd.f32 %v1210_v13, %v1209_v28  ;;  %16192 = vst [vmem:[#allocation51_spill] sm:$0xff] %v9734_v9  ;;  %v1216_v28 = vsel %vm1144_vm1, %v9721_v6, 0.0 }
 0x1bb   :  { %v9501_v38 = vpop.f32.mrf.mxu0  ;;  %v1608_v48 = vadd.f32 %v1607_v19, %v1606_v11  ;;  %v1213_v13 = vadd.f32 %v1212_v14, %v1211_v37  ;;  %v1452_v19 = vmul.f32 %v9734_v9, %v9734_v9  ;;  %v1613_v14 = vsel %vm1144_vm1, %v1450_v3, 0.0 }
 0x1bc   :  { %v794_v43 = vadd.f32 %v9501_v38, %v9304_v20 }
 0x1bd   :  { %v1215_v50 = vadd.f32 %v1214_v41, %v1213_v13  ;;  %v1220_v41 = vsel %vm1144_vm1, %v9734_v9, 0.0 }
 0x1be   :  { %v9757_v54 = vmax.f32 %v794_v43, 0.0 }
 0x1bf   :  { %v1217_v43 = vadd.f32 %v1216_v28, %v1215_v50  ;;  %v1617_v50 = vsel %vm1144_vm1, %v1452_v19, 0.0 }
 0x1c0   :  { %16193 = vst [vmem:[#allocation52_spill] sm:$0xff] %v9757_v54  ;;  %v1453_v3 = vmul.f32 %v9757_v54, %v9757_v54 }
 0x1c2   :  { %v1619_v19 = vsel %vm1144_vm1, %v1453_v3, 0.0 }
 0x1c3   :  { %v9544_v55 = vpop.f32.mrf.mxu0 }
 0x1c4   :  { %v797_v38 = vadd.f32 %v9544_v55, %v9304_v20  ;;  %v1610_v55 = vadd.f32 %v1609_v1, %v1608_v48  ;;  %v1615_v1 = vsel %vm1144_vm1, %v1451_v42, 0.0  ;;  %v9778_v48 = vpop.f32.mrf.mxu3 }
 0x1c6   :  { %v9765_v60 = vmax.f32 %v797_v38, 0.0  ;;  %v1612_v37 = vadd.f32 %v1611_v57, %v1610_v55 }
 0x1c8   :  { %16194 = vst [vmem:[#allocation53_spill] sm:$0xff] %v9765_v60  ;;  %v1614_v13 = vadd.f32 %v1613_v14, %v1612_v37  ;;  %v1454_v42 = vmul.f32 %v9765_v60, %v9765_v60  ;;  %v9792_v14 = vpop.f32.mrf.mxu2 }
 0x1ca   :  { %v1616_v55 = vadd.f32 %v1615_v1, %v1614_v13  ;;  %v1621_v1 = vsel %vm1144_vm1, %v1454_v42, 0.0 }
 0x1cb   :  { %v9593_v62 = vpop.f32.mrf.mxu0 }
 0x1cc   :  { %v799_v8 = vadd.f32 %v9593_v62, %v9304_v20  ;;  %v1218_v62 = vsel %vm1144_vm1, %v9728_v5, 0.0  ;;  %v9790_v5 = vpop.f32.mrf.mxu1  ;;  %v9815_v42 = vpop.f32.mrf.mxu3 }
 0x1ce   :  { %v9769_v6 = vmax.f32 %v799_v8, 0.0  ;;  %v1222_v8 = vsel %vm1144_vm1, %v9757_v54, 0.0 }
 0x1d0   :  { %16195 = vst [vmem:[#allocation54_spill] sm:$0xff] %v9769_v6 }
 0x1d3   :  { %v9636_v16 = vpop.f32.mrf.mxu0 }
 0x1d4   :  { %v802_v11 = vadd.f32 %v9636_v16, %v9304_v20  ;;  %v1219_v16 = vadd.f32 %v1218_v62, %v1217_v43  ;;  %v1224_v62 = vsel %vm1144_vm1, %v9765_v60, 0.0  ;;  %v1618_v43 = vadd.f32 %v1617_v50, %v1616_v55 }
 0x1d6   :  { %v9785_v57 = vmax.f32 %v802_v11, 0.0  ;;  %v1221_v9 = vadd.f32 %v1220_v41, %v1219_v16  ;;  %v1226_v41 = vsel %vm1144_vm1, %v9769_v6, 0.0  ;;  %v1620_v3 = vadd.f32 %v1619_v19, %v1618_v43 }
 0x1d8   :  { %16196 = vst [vmem:[#allocation55_spill] sm:$0xff] %v9785_v57  ;;  %v1456_v13 = vmul.f32 %v9785_v57, %v9785_v57  ;;  %v1622_v55 = vadd.f32 %v1621_v1, %v1620_v3  ;;  %v9831_v3 = vpop.f32.mrf.mxu1 }
 0x1da   :  { %v1625_v19 = vsel %vm1144_vm1, %v1456_v13, 0.0 }
 0x1db   :  { %v9683_v0 = vpop.f32.mrf.mxu0 }
 0x1dc   :  { %v804_v38 = vadd.f32 %v9683_v0, %v9304_v20  ;;  %v1455_v0 = vmul.f32 %v9769_v6, %v9769_v6 }
 0x1de   :  { %v9797_v37 = vmax.f32 %v804_v38, 0.0  ;;  %v1623_v60 = vsel %vm1144_vm1, %v1455_v0, 0.0 }
 0x1e0   :  { %16197 = vst [vmem:[#allocation56_spill] sm:$0xff] %v9797_v37  ;;  %v1230_v0 = vsel %vm1144_vm1, %v9797_v37, 0.0 }
 0x1e3   :  { %v806_v34 = vpop.f32.mrf.mxu0 }
 0x1e4   :  { %v807_v28 = vadd.f32 %v806_v34, %v9304_v20  ;;  %v1223_v34 = vadd.f32 %v1222_v8, %v1221_v9  ;;  %v1457_v9 = vmul.f32 %v9797_v37, %v9797_v37  ;;  %v9833_v37 = vpop.f32.mrf.mxu2 }
 0x1e6   :  { %v9805_v16 = vmax.f32 %v807_v28, 0.0  ;;  %v1225_v54 = vadd.f32 %v1224_v62, %v1223_v34  ;;  %v1624_v34 = vadd.f32 %v1623_v60, %v1622_v55 }
 0x1e8   :  { %16198 = vst [vmem:[#allocation57_spill] sm:$0xff] %v9805_v16  ;;  %v1227_v28 = vadd.f32 %v1226_v41, %v1225_v54  ;;  %v1458_v62 = vmul.f32 %v9805_v16, %v9805_v16  ;;  %v1232_v54 = vsel %vm1144_vm1, %v9805_v16, 0.0  ;;  %v1626_v41 = vadd.f32 %v1625_v19, %v1624_v34  ;;  %v9850_v16 = vpop.f32.mrf.mxu3 }
 0x1e9   :  { %v822_v19 = vadd.f32 %v9178_v2, %v9304_v20 }
 0x1eb   :  { %v808_v17 = vpop.f32.mrf.mxu0 }
 0x1ec   :  { %v809_v11 = vadd.f32 %v808_v17, %v9304_v20  ;;  %v1228_v17 = vsel %vm1144_vm1, %v9785_v57, 0.0 }
 0x1ed   :  { %v1229_v57 = vadd.f32 %v1228_v17, %v1227_v28 }
 0x1ee   :  { %v9812_v50 = vmax.f32 %v809_v11, 0.0  ;;  %v817_v11 = vadd.f32 %v9154_v58, %v9304_v20  ;;  %v1629_v58 = vsel %vm1144_vm1, %v1458_v62, 0.0 }
 0x1ef   :  { %v1231_v13 = vadd.f32 %v1230_v0, %v1229_v57 }
 0x1f0   :  { %16199 = vst [vmem:[#allocation58_spill] sm:$0xff] %v9812_v50  ;;  %v1459_v1 = vmul.f32 %v9812_v50, %v9812_v50  ;;  %v1234_v60 = vsel %vm1144_vm1, %v9812_v50, 0.0 }
 0x1f1   :  { %v1233_v28 = vadd.f32 %v1232_v54, %v1231_v13  ;;  %v9861_v13 = vmax.f32 %v822_v19, 0.0 }
 0x1f2   :  { %v1631_v0 = vsel %vm1144_vm1, %v1459_v1, 0.0 }
 0x1f3   :  { %v811_v38 = vpop.f32.mrf.mxu0  ;;  %v1235_v50 = vadd.f32 %v1234_v60, %v1233_v28  ;;  %16201 = vst [vmem:[#allocation60_spill] sm:$0xff] %v9861_v13  ;;  %v829_v60 = vadd.f32 %v9219_v24, %v9304_v20  ;;  %v9882_v24 = vpop.f32.mrf.mxu2 }
 0x1f4   :  { %v812_v8 = vadd.f32 %v811_v38, %v9304_v20  ;;  %v1627_v38 = vsel %vm1144_vm1, %v1457_v9, 0.0  ;;  %v9842_v9 = vmax.f32 %v817_v11, 0.0  ;;  %v824_v11 = vadd.f32 %v9195_v7, %v9304_v20 }
 0x1f5   :  { %v1628_v55 = vadd.f32 %v1627_v38, %v1626_v41 }
 0x1f6   :  { %v9822_v43 = vmax.f32 %v812_v8, 0.0  ;;  %v819_v8 = vadd.f32 %v9171_v63, %v9304_v20  ;;  %v1462_v2 = vmul.f32 %v9842_v9, %v9842_v9  ;;  %v1240_v28 = vsel %vm1144_vm1, %v9842_v9, 0.0 }
 0x1f7   :  { %v1630_v34 = vadd.f32 %v1629_v58, %v1628_v55  ;;  %v827_v58 = vadd.f32 %v9202_v12, %v9304_v20 }
 0x1f8   :  { %v1460_v17 = vmul.f32 %v9822_v43, %v9822_v43  ;;  %v1236_v63 = vsel %vm1144_vm1, %v9822_v43, 0.0  ;;  %v9852_v6 = vmax.f32 %v819_v8, 0.0 }
 0x1f9   :  { %v1632_v1 = vadd.f32 %v1631_v0, %v1630_v34  ;;  %v1237_v41 = vadd.f32 %v1236_v63, %v1235_v50  ;;  %v1637_v34 = vsel %vm1144_vm1, %v1462_v2, 0.0 }
 0x1fa   :  { %16200 = vst [vmem:[#allocation59_spill] sm:$0xff] %v9852_v6  ;;  %v1633_v38 = vsel %vm1144_vm1, %v1460_v17, 0.0  ;;  %v1463_v50 = vmul.f32 %v9852_v6, %v9852_v6  ;;  %v1242_v19 = vsel %vm1144_vm1, %v9852_v6, 0.0 }
 0x1fb   :  { %v813_v57 = vpop.f32.mrf.mxu0  ;;  %v1634_v17 = vadd.f32 %v1633_v38, %v1632_v1  ;;  %v1464_v38 = vmul.f32 %v9861_v13, %v9861_v13  ;;  %v9887_v1 = vmax.f32 %v827_v58, 0.0 }
 0x1fc   :  { %v814_v62 = vadd.f32 %v813_v57, %v9304_v20  ;;  %v9875_v57 = vmax.f32 %v824_v11, 0.0  ;;  %v832_v11 = vadd.f32 %v9226_v30, %v9304_v20 }
 0x1fd   :  { %16203 = vst [vmem:[#allocation62_spill] sm:$0xff] %v9887_v1 }
 0x1fe   :  { %v9857_v54 = vmax.f32 %v814_v62, 0.0  ;;  %16202 = vst [vmem:[#allocation61_spill] sm:$0xff] %v9875_v57  ;;  %v9880_v62 = vpop.f32.mrf.mxu1  ;;  %v1465_v2 = vmul.f32 %v9875_v57, %v9875_v57  ;;  %v1246_v58 = vsel %vm1144_vm1, %v9875_v57, 0.0 }
 0x200   :  { %v1238_v8 = vsel %vm1144_vm1, %v9857_v54, 0.0  ;;  %v1461_v7 = vmul.f32 %v9857_v54, %v9857_v54 }
 0x201   :  { %v1239_v55 = vadd.f32 %v1238_v8, %v1237_v41  ;;  %v9891_v41 = vmax.f32 %v829_v60, 0.0  ;;  %v9902_v60 = vpop.f32.mrf.mxu3 }
 0x202   :  { %v1635_v12 = vsel %vm1144_vm1, %v1461_v7, 0.0 }
 0x203   :  { %v1241_v0 = vadd.f32 %v1240_v28, %v1239_v55  ;;  %v1636_v63 = vadd.f32 %v1635_v12, %v1634_v17  ;;  %16204 = vst [vmem:[#allocation63_spill] sm:$0xff] %v9891_v41  ;;  %v1639_v17 = vsel %vm1144_vm1, %v1463_v50, 0.0  ;;  %v1244_v55 = vsel %vm1144_vm1, %v9861_v13, 0.0 }
 0x204   :  { %v834_v28 = vadd.f32 %v9243_v39, %v9304_v20  ;;  %v1466_v50 = vmul.f32 %v9887_v1, %v9887_v1  ;;  %v1467_v39 = vmul.f32 %v9891_v41, %v9891_v41 }
 0x205   :  { %v1243_v8 = vadd.f32 %v1242_v19, %v1241_v0  ;;  %v1638_v7 = vadd.f32 %v1637_v34, %v1636_v63  ;;  %v1641_v19 = vsel %vm1144_vm1, %v1464_v38, 0.0  ;;  %v9907_v0 = vmax.f32 %v832_v11, 0.0 }
 0x206   :  { %v837_v63 = vadd.f32 %v9250_v44, %v9304_v20  ;;  %v839_v38 = vadd.f32 %v9267_v52, %v9304_v20  ;;  %v1250_v11 = vsel %vm1144_vm1, %v9891_v41, 0.0  ;;  %v1645_v57 = vsel %vm1144_vm1, %v1466_v50, 0.0  ;;  %v9930_v52 = vpop.f32.mrf.mxu1 }
 0x207   :  { %v1245_v12 = vadd.f32 %v1244_v55, %v1243_v8  ;;  %v1640_v30 = vadd.f32 %v1639_v17, %v1638_v7  ;;  %16205 = vst [vmem:[#allocation64_spill] sm:$0xff] %v9907_v0  ;;  %v1643_v8 = vsel %vm1144_vm1, %v1465_v2, 0.0  ;;  %v1248_v7 = vsel %vm1144_vm1, %v9887_v1, 0.0  ;;  %v9932_v1 = vpop.f32.mrf.mxu2 }
 0x208   :  { %v9916_v17 = vmax.f32 %v834_v28, 0.0  ;;  %v842_v2 = vadd.f32 %v9273_v56, %v9304_v20  ;;  %v1647_v28 = vsel %vm1144_vm1, %v1467_v39, 0.0 }
 0x209   :  { %v1247_v34 = vadd.f32 %v1246_v58, %v1245_v12  ;;  %v1642_v13 = vadd.f32 %v1641_v19, %v1640_v30  ;;  %v1468_v58 = vmul.f32 %v9907_v0, %v9907_v0  ;;  %v9925_v12 = vmax.f32 %v837_v63, 0.0  ;;  %v9953_v6 = vpop.f32.mrf.mxu3 }
 0x20a   :  { %16206 = vst [vmem:[#allocation65_spill] sm:$0xff] %v9916_v17  ;;  %v1469_v50 = vmul.f32 %v9916_v17, %v9916_v17  ;;  %v844_v63 = vadd.f32 %v9291_v4, %v9304_v20  ;;  %v1254_v56 = vsel %vm1144_vm1, %v9916_v17, 0.0 }
 0x20b   :  { %v1249_v55 = vadd.f32 %v1248_v7, %v1247_v34  ;;  %v1644_v44 = vadd.f32 %v1643_v8, %v1642_v13  ;;  %16207 = vst [vmem:[#allocation66_spill] sm:$0xff] %v9925_v12  ;;  %v1252_v13 = vsel %vm1144_vm1, %v9907_v0, 0.0  ;;  %v9938_v34 = vmax.f32 %v839_v38, 0.0  ;;  %v16210_v38 = vld [vmem:[#allocation15_spill] sm:$0xff] }
 0x20c   :  { %v1649_v8 = vsel %vm1144_vm1, %v1468_v58, 0.0  ;;  %v1470_v7 = vmul.f32 %v9925_v12, %v9925_v12  ;;  %v849_v0 = vadd.f32 %v16210_v38, %v9304_v20  ;;  %v1256_v58 = vsel %vm1144_vm1, %v9925_v12, 0.0 }
 0x20d   :  { %v1251_v30 = vadd.f32 %v1250_v11, %v1249_v55  ;;  %v1646_v19 = vadd.f32 %v1645_v57, %v1644_v44  ;;  %v9947_v11 = vmax.f32 %v842_v2, 0.0  ;;  %v16209_v55 = vld [vmem:[#allocation8_spill] sm:$0xff]  ;;  %v9960_v2 = vmax.f32 %v844_v63, 0.0 }
 0x20e   :  { %v847_v44 = vadd.f32 %v16209_v55, %v9304_v20  ;;  %v9971_v38 = vmax.f32 %v849_v0, 0.0  ;;  %v9982_v0 = vpop.f32.mrf.mxu1 }
 0x20f   :  { %v1253_v39 = vadd.f32 %v1252_v13, %v1251_v30  ;;  %v1648_v57 = vadd.f32 %v1647_v28, %v1646_v19  ;;  %16208 = vst [vmem:[#allocation67_spill] sm:$0xff] %v9947_v11  ;;  %v1651_v30 = vsel %vm1144_vm1, %v1469_v50, 0.0  ;;  %v1471_v28 = vmul.f32 %v9938_v34, %v9938_v34  ;;  %v16212_v50 = vld [vmem:[#allocation22_spill] sm:$0xff] }
 0x210   :  { %16211 = vst [vmem:[#allocation8_spill] sm:$0xff] %v9960_v2  ;;  %v1258_v19 = vsel %vm1144_vm1, %v9938_v34, 0.0 }
 0x211   :  { %v1255_v41 = vadd.f32 %v1254_v56, %v1253_v39  ;;  %v1650_v4 = vadd.f32 %v1649_v8, %v1648_v57  ;;  %v1653_v56 = vsel %vm1144_vm1, %v1470_v7, 0.0  ;;  %v1472_v39 = vmul.f32 %v9947_v11, %v9947_v11  ;;  %16213 = vst [vmem:[#allocation15_spill] sm:$0xff] %v9971_v38 }
 0x212   :  { %v9967_v57 = vmax.f32 %v847_v44, 0.0  ;;  %v852_v8 = vadd.f32 %v16212_v50, %v9304_v20  ;;  %v1655_v17 = vsel %vm1144_vm1, %v1471_v28, 0.0  ;;  %v1473_v7 = vmul.f32 %v9960_v2, %v9960_v2 }
 0x213   :  { %v1257_v13 = vadd.f32 %v1256_v58, %v1255_v41  ;;  %v1652_v55 = vadd.f32 %v1651_v30, %v1650_v4  ;;  %v1260_v41 = vsel %vm1144_vm1, %v9947_v11, 0.0  ;;  %v854_v4 = vadd.f32 %v9451_v21, %v9304_v20  ;;  %v10004_v11 = vpop.f32.mrf.mxu3 }
 0x214   :  { %v1262_v44 = vsel %vm1144_vm1, %v9960_v2, 0.0  ;;  %v1657_v28 = vsel %vm1144_vm1, %v1472_v39, 0.0  ;;  %v1475_v21 = vmul.f32 %v9971_v38, %v9971_v38  ;;  %v859_v39 = vadd.f32 %v9565_v15, %v9304_v20 }
 0x215   :  { %v1259_v12 = vadd.f32 %v1258_v19, %v1257_v13  ;;  %v1654_v63 = vadd.f32 %v1653_v56, %v1652_v55  ;;  %v9984_v19 = vpop.f32.mrf.mxu2  ;;  %v1474_v13 = vmul.f32 %v9967_v57, %v9967_v57  ;;  %v9989_v55 = vmax.f32 %v852_v8, 0.0 }
 0x216   :  { %v857_v56 = vadd.f32 %v9510_v61, %v9304_v20  ;;  %v1266_v8 = vsel %vm1144_vm1, %v9971_v38, 0.0 }
 0x217   :  { %v1656_v30 = vadd.f32 %v1655_v17, %v1654_v63  ;;  %v1261_v58 = vadd.f32 %v1260_v41, %v1259_v12  ;;  %16214 = vst [vmem:[#allocation22_spill] sm:$0xff] %v9989_v55  ;;  %v1659_v12 = vsel %vm1144_vm1, %v1473_v7, 0.0  ;;  %v1264_v63 = vsel %vm1144_vm1, %v9967_v57, 0.0 }
 0x218   :  { %v9998_v41 = vmax.f32 %v854_v4, 0.0  ;;  %v1476_v7 = vmul.f32 %v9989_v55, %v9989_v55  ;;  %v862_v4 = vadd.f32 %v9622_v49, %v9304_v20 }
 0x219   :  { %v1263_v50 = vadd.f32 %v1262_v44, %v1261_v58  ;;  %v1658_v17 = vadd.f32 %v1657_v28, %v1656_v30  ;;  %v1661_v44 = vsel %vm1144_vm1, %v1474_v13, 0.0  ;;  %v10009_v30 = vmax.f32 %v857_v56, 0.0  ;;  %v10023_v13 = vld [vmem:[%s15705_s5] ss:$0 sm:$0xff] }
 0x21a   :  { %v1663_v58 = vsel %vm1144_vm1, %v1475_v21, 0.0  ;;  %v864_v20 = vadd.f32 %v10023_v13, %v9679_v25  ;;  %v1270_v49 = vsel %vm1144_vm1, %v9998_v41, 0.0  ;;  %v1665_v21 = vsel %vm1144_vm1, %v1476_v7, 0.0 }
 0x21b   :  { %v1265_v2 = vadd.f32 %v1264_v63, %v1263_v50  ;;  %v1660_v61 = vadd.f32 %v1659_v12, %v1658_v17  ;;  %16215 = vst [vmem:[#allocation68_spill] sm:$0xff] %v10009_v30  ;;  %v1268_v50 = vsel %vm1144_vm1, %v9989_v55, 0.0  ;;  %v1477_v17 = vmul.f32 %v9998_v41, %v9998_v41  ;;  %v881_v55 = vpop.f32.mrf.mxu1 }
 0x21c   :  { %v10018_v12 = vmax.f32 %v859_v39, 0.0  ;;  %v1478_v63 = vmul.f32 %v10009_v30, %v10009_v30  ;;  %v10032_v39 = vmax.f32 %v862_v4, 0.0  ;;  %v1272_v7 = vsel %vm1144_vm1, %v10009_v30, 0.0  ;;  %v10058_v30 = vpop.f32.mrf.mxu3 }
 0x21d   :  { %v1267_v15 = vadd.f32 %v1266_v8, %v1265_v2  ;;  %v1662_v28 = vadd.f32 %v1661_v44, %v1660_v61  ;;  %v867_v8 = vadd.f32 %v10023_v13, %v9736_v51  ;;  %v869_v61 = vadd.f32 %v10023_v13, %v9790_v5  ;;  %v10038_v38 = vpop.f32.mrf.mxu2 }
 0x21e   :  { %16216 = vst [vmem:[#allocation69_spill] sm:$0xff] %v10018_v12  ;;  %v1479_v4 = vmul.f32 %v10018_v12, %v10018_v12  ;;  %v1274_v51 = vsel %vm1144_vm1, %v10018_v12, 0.0 }
 0x21f   :  { %v1269_v2 = vadd.f32 %v1268_v50, %v1267_v15  ;;  %v1664_v56 = vadd.f32 %v1663_v58, %v1662_v28  ;;  %v1667_v58 = vsel %vm1144_vm1, %v1477_v17, 0.0  ;;  %v10045_v15 = vmax.f32 %v864_v20, 0.0 }
 0x220   :  { %v1669_v50 = vsel %vm1144_vm1, %v1478_v63, 0.0  ;;  %v872_v17 = vadd.f32 %v10023_v13, %v9831_v3  ;;  %v1671_v12 = vsel %vm1144_vm1, %v1479_v4, 0.0 }
 0x221   :  { %v1271_v44 = vadd.f32 %v1270_v49, %v1269_v2  ;;  %v1666_v25 = vadd.f32 %v1665_v21, %v1664_v56  ;;  %16217 = vst [vmem:[#allocation70_spill] sm:$0xff] %v10045_v15  ;;  %v1480_v49 = vmul.f32 %v10032_v39, %v10032_v39  ;;  %v10052_v2 = vmax.f32 %v867_v8, 0.0 }
 0x222   :  { %v10056_v56 = vmax.f32 %v869_v61, 0.0  ;;  %v1481_v63 = vmul.f32 %v10045_v15, %v10045_v15  ;;  %v874_v8 = vadd.f32 %v10023_v13, %v9880_v62  ;;  %v1278_v3 = vsel %vm1144_vm1, %v10045_v15, 0.0 }
 0x223   :  { %v1273_v28 = vadd.f32 %v1272_v7, %v1271_v44  ;;  %v1668_v5 = vadd.f32 %v1667_v58, %v1666_v25  ;;  %16218 = vst [vmem:[#allocation71_spill] sm:$0xff] %v10052_v2  ;;  %v1276_v44 = vsel %vm1144_vm1, %v10032_v39, 0.0  ;;  %v1673_v58 = vsel %vm1144_vm1, %v1480_v49, 0.0 }
 0x224   :  { %16219 = vst [vmem:[#allocation72_spill] sm:$0xff] %v10056_v56  ;;  %v1482_v7 = vmul.f32 %v10052_v2, %v10052_v2  ;;  %v10072_v4 = vmax.f32 %v872_v17, 0.0  ;;  %v879_v49 = vadd.f32 %v10023_v13, %v9982_v0 }
 0x225   :  { %v1275_v21 = vadd.f32 %v1274_v51, %v1273_v28  ;;  %v1670_v20 = vadd.f32 %v1669_v50, %v1668_v5  ;;  %v877_v51 = vadd.f32 %v10023_v13, %v9930_v52  ;;  %v1483_v5 = vmul.f32 %v10056_v56, %v10056_v56 }
 0x226   :  { %16220 = vst [vmem:[#allocation73_spill] sm:$0xff] %v10072_v4  ;;  %v1675_v50 = vsel %vm1144_vm1, %v1481_v63, 0.0  ;;  %v1484_v63 = vmul.f32 %v10072_v4, %v10072_v4 }
 0x227   :  { %v1277_v61 = vadd.f32 %v1276_v44, %v1275_v21  ;;  %v1672_v25 = vadd.f32 %v1671_v12, %v1670_v20  ;;  %v1280_v12 = vsel %vm1144_vm1, %v10052_v2, 0.0  ;;  %v10081_v21 = vmax.f32 %v874_v8, 0.0  ;;  %v883_v44 = vpop.f32.mrf.mxu1 }
 0x228   :  { %v1282_v20 = vsel %vm1144_vm1, %v10056_v56, 0.0  ;;  %v882_v8 = vadd.f32 %v10023_v13, %v881_v55  ;;  %v1679_v0 = vsel %vm1144_vm1, %v1483_v5, 0.0  ;;  %v10105_v55 = vpop.f32.mrf.mxu3 }
 0x229   :  { %v1279_v28 = vadd.f32 %v1278_v3, %v1277_v61  ;;  %v1674_v62 = vadd.f32 %v1673_v58, %v1672_v25  ;;  %16221 = vst [vmem:[#allocation74_spill] sm:$0xff] %v10081_v21  ;;  %v10087_v3 = vpop.f32.mrf.mxu2  ;;  %v1677_v61 = vsel %vm1144_vm1, %v1482_v7, 0.0  ;;  %v10092_v25 = vmax.f32 %v877_v51, 0.0 }
 0x22a   :  { %v884_v7 = vadd.f32 %v10023_v13, %v883_v44  ;;  %v1286_v5 = vsel %vm1144_vm1, %v10081_v21, 0.0 }
 0x22b   :  { %v1281_v17 = vadd.f32 %v1280_v12, %v1279_v28  ;;  %v1676_v52 = vadd.f32 %v1675_v50, %v1674_v62  ;;  %v1284_v28 = vsel %vm1144_vm1, %v10072_v4, 0.0  ;;  %v1485_v62 = vmul.f32 %v10081_v21, %v10081_v21  ;;  %v16222_v12 = vld [vmem:[#allocation11_spill] sm:$0xff] }
 0x22c   :  { %v10100_v50 = vmax.f32 %v879_v49, 0.0  ;;  %v887_v51 = vadd.f32 %v10023_v13, %v16222_v12  ;;  %v16224_v49 = vld [vmem:[#allocation19_spill] sm:$0xff]  ;;  %v892_v21 = vadd.f32 %v10023_v13, %v9420_v36 }
 0x22d   :  { %v1283_v58 = vadd.f32 %v1282_v20, %v1281_v17  ;;  %v1678_v2 = vadd.f32 %v1677_v61, %v1676_v52  ;;  %v1681_v17 = vsel %vm1144_vm1, %v1484_v63, 0.0  ;;  %v1486_v20 = vmul.f32 %v10092_v25, %v10092_v25 }
 0x22e   :  { %v10112_v52 = vmax.f32 %v882_v8, 0.0  ;;  %v889_v44 = vadd.f32 %v10023_v13, %v16224_v49  ;;  %v1487_v63 = vmul.f32 %v10100_v50, %v10100_v50 }
 0x22f   :  { %v1680_v56 = vadd.f32 %v1679_v0, %v1678_v2  ;;  %v1285_v15 = vadd.f32 %v1284_v28, %v1283_v58  ;;  %v1683_v2 = vsel %vm1144_vm1, %v1485_v62, 0.0  ;;  %v1288_v58 = vsel %vm1144_vm1, %v10092_v25, 0.0 }
 0x230   :  { %16223 = vst [vmem:[#allocation11_spill] sm:$0xff] %v10112_v52  ;;  %v10121_v0 = vmax.f32 %v884_v7, 0.0  ;;  %v10123_v28 = vmax.f32 %v887_v51, 0.0  ;;  %v1488_v62 = vmul.f32 %v10112_v52, %v10112_v52  ;;  %v1687_v51 = vsel %vm1144_vm1, %v1487_v63, 0.0 }
 0x231   :  { %v1682_v61 = vadd.f32 %v1681_v17, %v1680_v56  ;;  %v1287_v4 = vadd.f32 %v1286_v5, %v1285_v15  ;;  %v1685_v56 = vsel %vm1144_vm1, %v1486_v20, 0.0  ;;  %v1290_v15 = vsel %vm1144_vm1, %v10100_v50, 0.0  ;;  %v10134_v49 = vpop.f32.mrf.mxu2 }
 0x232   :  { %16225 = vst [vmem:[#allocation19_spill] sm:$0xff] %v10123_v28  ;;  %v10132_v17 = vmax.f32 %v889_v44, 0.0  ;;  %v1292_v36 = vsel %vm1144_vm1, %v10112_v52, 0.0  ;;  %v1489_v20 = vmul.f32 %v10121_v0, %v10121_v0  ;;  %v1294_v63 = vsel %vm1144_vm1, %v10121_v0, 0.0  ;;  %v10154_v52 = vpop.f32.mrf.mxu3 }
 0x233   :  { %v1684_v12 = vadd.f32 %v1683_v2, %v1682_v61  ;;  %v1289_v8 = vadd.f32 %v1288_v58, %v1287_v4  ;;  %v894_v4 = vadd.f32 %v10023_v13, %v9464_v18  ;;  %v1490_v61 = vmul.f32 %v10123_v28, %v10123_v28 }
 0x234   :  { %v10145_v58 = vmax.f32 %v892_v21, 0.0  ;;  %v1689_v18 = vsel %vm1144_vm1, %v1488_v62, 0.0  ;;  %v1491_v21 = vmul.f32 %v10132_v17, %v10132_v17  ;;  %v902_v62 = vadd.f32 %v10023_v13, %v9626_v35 }
 0x235   :  { %v1686_v5 = vadd.f32 %v1685_v56, %v1684_v12  ;;  %v1291_v7 = vadd.f32 %v1290_v15, %v1289_v8  ;;  %v897_v12 = vadd.f32 %v10023_v13, %v9515_v31  ;;  %v899_v8 = vadd.f32 %v10023_v13, %v9572_v46 }
 0x236   :  { %v1691_v31 = vsel %vm1144_vm1, %v1489_v20, 0.0  ;;  %v1693_v46 = vsel %vm1144_vm1, %v1490_v61, 0.0  ;;  %v1695_v20 = vsel %vm1144_vm1, %v1491_v21, 0.0  ;;  %v1300_v35 = vsel %vm1144_vm1, %v10145_v58, 0.0 }
 0x237   :  { %v1688_v44 = vadd.f32 %v1687_v51, %v1686_v5  ;;  %v1293_v2 = vadd.f32 %v1292_v36, %v1291_v7  ;;  %v1296_v5 = vsel %vm1144_vm1, %v10123_v28, 0.0  ;;  %v10160_v7 = vmax.f32 %v894_v4, 0.0 }
 0x239   :  { %v1690_v56 = vadd.f32 %v1689_v18, %v1688_v44  ;;  %v1295_v15 = vadd.f32 %v1294_v63, %v1293_v2  ;;  %16226 = vst [vmem:[#allocation75_spill] sm:$0xff] %v10160_v7  ;;  %v1298_v44 = vsel %vm1144_vm1, %v10132_v17, 0.0  ;;  %v1492_v2 = vmul.f32 %v10145_v58, %v10145_v58 }
 0x23a   :  { %v10170_v18 = vmax.f32 %v897_v12, 0.0  ;;  %v10172_v63 = vmax.f32 %v899_v8, 0.0  ;;  %v1493_v61 = vmul.f32 %v10160_v7, %v10160_v7  ;;  %v1302_v21 = vsel %vm1144_vm1, %v10160_v7, 0.0  ;;  %v10203_v7 = vpop.f32.mrf.mxu3 }
 0x23b   :  { %v1297_v51 = vadd.f32 %v1296_v5, %v1295_v15  ;;  %v1692_v36 = vadd.f32 %v1691_v31, %v1690_v56  ;;  %v904_v56 = vadd.f32 %v10023_v13, %v9685_v22  ;;  %v10181_v15 = vmax.f32 %v902_v62, 0.0  ;;  %v10183_v31 = vpop.f32.mrf.mxu2 }
 0x23c   :  { %16227 = vst [vmem:[#allocation76_spill] sm:$0xff] %v10172_v63  ;;  %v1697_v8 = vsel %vm1144_vm1, %v1492_v2, 0.0  ;;  %v1495_v22 = vmul.f32 %v10172_v63, %v10172_v63 }
 0x23d   :  { %v1299_v4 = vadd.f32 %v1298_v44, %v1297_v51  ;;  %v1694_v28 = vadd.f32 %v1693_v46, %v1692_v36  ;;  %v1494_v51 = vmul.f32 %v10170_v18, %v10170_v18  ;;  %v907_v36 = vadd.f32 %v10023_v13, %v9738_v47 }
 0x23e   :  { %v1304_v44 = vsel %vm1144_vm1, %v10170_v18, 0.0  ;;  %v10197_v2 = vmax.f32 %v904_v56, 0.0  ;;  %v912_v56 = vadd.f32 %v10023_v13, %v9833_v37 }
 0x23f   :  { %v1301_v5 = vadd.f32 %v1300_v35, %v1299_v4  ;;  %v1696_v12 = vadd.f32 %v1695_v20, %v1694_v28  ;;  %v1699_v28 = vsel %vm1144_vm1, %v1493_v61, 0.0  ;;  %v909_v4 = vadd.f32 %v10023_v13, %v9792_v14 }
 0x240   :  { %v1496_v20 = vmul.f32 %v10181_v15, %v10181_v15  ;;  %v1306_v61 = vsel %vm1144_vm1, %v10172_v63, 0.0  ;;  %v1310_v37 = vsel %vm1144_vm1, %v10197_v2, 0.0 }
 0x241   :  { %v1303_v62 = vadd.f32 %v1302_v21, %v1301_v5  ;;  %v1698_v46 = vadd.f32 %v1697_v8, %v1696_v12  ;;  %v1701_v5 = vsel %vm1144_vm1, %v1494_v51, 0.0  ;;  %v10208_v12 = vmax.f32 %v907_v36, 0.0 }
 0x242   :  { %v1703_v8 = vsel %vm1144_vm1, %v1495_v22, 0.0  ;;  %v914_v51 = vadd.f32 %v10023_v13, %v9882_v24  ;;  %v1705_v36 = vsel %vm1144_vm1, %v1496_v20, 0.0 }
 0x243   :  { %v1305_v35 = vadd.f32 %v1304_v44, %v1303_v62  ;;  %v1700_v47 = vadd.f32 %v1699_v28, %v1698_v46  ;;  %16228 = vst [vmem:[#allocation77_spill] sm:$0xff] %v10208_v12  ;;  %v1308_v62 = vsel %vm1144_vm1, %v10181_v15, 0.0  ;;  %v1497_v46 = vmul.f32 %v10197_v2, %v10197_v2 }
 0x244   :  { %v10217_v28 = vmax.f32 %v909_v4, 0.0  ;;  %v1498_v22 = vmul.f32 %v10208_v12, %v10208_v12  ;;  %v919_v4 = vadd.f32 %v10023_v13, %v9984_v19 }
 0x245   :  { %v1307_v14 = vadd.f32 %v1306_v61, %v1305_v35  ;;  %v1702_v21 = vadd.f32 %v1701_v5, %v1700_v47  ;;  %v10226_v35 = vmax.f32 %v912_v56, 0.0  ;;  %v917_v47 = vadd.f32 %v10023_v13, %v9932_v1  ;;  %v931_v61 = vpop.f32.mrf.mxu2 }
 0x246   :  { %16229 = vst [vmem:[#allocation78_spill] sm:$0xff] %v10217_v28  ;;  %v1707_v20 = vsel %vm1144_vm1, %v1497_v46, 0.0  ;;  %v1314_v56 = vsel %vm1144_vm1, %v10217_v28, 0.0  ;;  %v1709_v19 = vsel %vm1144_vm1, %v1498_v22, 0.0  ;;  %v922_v46 = vadd.f32 %v10023_v13, %v10038_v38 }
 0x247   :  { %v1309_v44 = vadd.f32 %v1308_v62, %v1307_v14  ;;  %v1704_v63 = vadd.f32 %v1703_v8, %v1702_v21  ;;  %v1312_v8 = vsel %vm1144_vm1, %v10208_v12, 0.0  ;;  %v1499_v14 = vmul.f32 %v10217_v28, %v10217_v28  ;;  %v10250_v12 = vpop.f32.mrf.mxu3 }
 0x248   :  { %v10237_v21 = vmax.f32 %v914_v51, 0.0 }
 0x249   :  { %v1706_v5 = vadd.f32 %v1705_v36, %v1704_v63  ;;  %v1311_v24 = vadd.f32 %v1310_v37, %v1309_v44  ;;  %v1500_v63 = vmul.f32 %v10226_v35, %v10226_v35  ;;  %v10244_v36 = vmax.f32 %v917_v47, 0.0 }
 0x24a   :  { %16230 = vst [vmem:[#allocation79_spill] sm:$0xff] %v10237_v21  ;;  %v10248_v44 = vmax.f32 %v919_v4, 0.0  ;;  %v1711_v28 = vsel %vm1144_vm1, %v1499_v14, 0.0  ;;  %v1501_v22 = vmul.f32 %v10237_v21, %v10237_v21  ;;  %v924_v47 = vadd.f32 %v10023_v13, %v10087_v3 }
 0x24b   :  { %v1313_v1 = vadd.f32 %v1312_v8, %v1311_v24  ;;  %v1708_v62 = vadd.f32 %v1707_v20, %v1706_v5  ;;  %16231 = vst [vmem:[#allocation80_spill] sm:$0xff] %v10244_v36  ;;  %v1316_v5 = vsel %vm1144_vm1, %v10226_v35, 0.0  ;;  %v1318_v38 = vsel %vm1144_vm1, %v10237_v21, 0.0 }
 0x24c   :  { %16232 = vst [vmem:[#allocation81_spill] sm:$0xff] %v10248_v44  ;;  %v1713_v20 = vsel %vm1144_vm1, %v1500_v63, 0.0  ;;  %v1502_v8 = vmul.f32 %v10244_v36, %v10244_v36  ;;  %v10264_v14 = vmax.f32 %v922_v46, 0.0  ;;  %v929_v63 = vadd.f32 %v10023_v13, %v10183_v31 }
 0x24d   :  { %v1315_v37 = vadd.f32 %v1314_v56, %v1313_v1  ;;  %v1710_v51 = vadd.f32 %v1709_v19, %v1708_v62  ;;  %v927_v56 = vadd.f32 %v10023_v13, %v10134_v49  ;;  %v1503_v1 = vmul.f32 %v10248_v44, %v10248_v44 }
 0x24e   :  { %16233 = vst [vmem:[#allocation82_spill] sm:$0xff] %v10264_v14  ;;  %v1715_v19 = vsel %vm1144_vm1, %v1501_v22, 0.0  ;;  %v1322_v46 = vsel %vm1144_vm1, %v10248_v44, 0.0  ;;  %v1717_v21 = vsel %vm1144_vm1, %v1502_v8, 0.0  ;;  %v1324_v31 = vsel %vm1144_vm1, %v10264_v14, 0.0 }
 0x24f   :  { %v1317_v4 = vadd.f32 %v1316_v5, %v1315_v37  ;;  %v1712_v24 = vadd.f32 %v1711_v28, %v1710_v51  ;;  %v1320_v28 = vsel %vm1144_vm1, %v10244_v36, 0.0  ;;  %v10273_v37 = vmax.f32 %v924_v47, 0.0  ;;  %v933_v5 = vpop.f32.mrf.mxu2 }
 0x250   :  { %v10282_v22 = vmax.f32 %v927_v56, 0.0  ;;  %v1719_v47 = vsel %vm1144_vm1, %v1503_v1, 0.0  ;;  %v934_v8 = vadd.f32 %v10023_v13, %v933_v5 }
 0x251   :  { %v1319_v62 = vadd.f32 %v1318_v38, %v1317_v4  ;;  %v1714_v3 = vadd.f32 %v1713_v20, %v1712_v24  ;;  %16234 = vst [vmem:[#allocation83_spill] sm:$0xff] %v10273_v37  ;;  %v1504_v38 = vmul.f32 %v10264_v14, %v10264_v14  ;;  %v932_v4 = vadd.f32 %v10023_v13, %v931_v61  ;;  %v10295_v61 = vpop.f32.mrf.mxu3 }
 0x252   :  { %16235 = vst [vmem:[#allocation84_spill] sm:$0xff] %v10282_v22 }
 0x253   :  { %v1321_v51 = vadd.f32 %v1320_v28, %v1319_v62  ;;  %v1716_v49 = vadd.f32 %v1715_v19, %v1714_v3  ;;  %v1505_v62 = vmul.f32 %v10273_v37, %v10273_v37  ;;  %v10290_v3 = vmax.f32 %v929_v63, 0.0  ;;  %v16236_v19 = vld [vmem:[#allocation5_spill] sm:$0xff]  ;;  %v16238_v63 = vld [vmem:[#allocation6_spill] sm:$0xff] }
 0x254   :  { %v937_v56 = vadd.f32 %v10023_v13, %v16236_v19  ;;  %v1721_v1 = vsel %vm1144_vm1, %v1504_v38, 0.0 }
 0x255   :  { %v1323_v24 = vadd.f32 %v1322_v46, %v1321_v51  ;;  %v1718_v20 = vadd.f32 %v1717_v21, %v1716_v49  ;;  %v1326_v21 = vsel %vm1144_vm1, %v10273_v37, 0.0  ;;  %v1506_v46 = vmul.f32 %v10282_v22, %v10282_v22 }
 0x256   :  { %v10302_v51 = vmax.f32 %v932_v4, 0.0  ;;  %v939_v49 = vadd.f32 %v10023_v13, %v16238_v63  ;;  %v1507_v38 = vmul.f32 %v10290_v3, %v10290_v3  ;;  %v10315_v36 = vmax.f32 %v937_v56, 0.0  ;;  %v16242_v63 = vld [vmem:[#allocation9_spill] sm:$0xff] }
 0x257   :  { %v1325_v28 = vadd.f32 %v1324_v31, %v1323_v24  ;;  %v1720_v44 = vadd.f32 %v1719_v47, %v1718_v20  ;;  %v1723_v24 = vsel %vm1144_vm1, %v1505_v62, 0.0  ;;  %v1328_v47 = vsel %vm1144_vm1, %v10282_v22, 0.0  ;;  %v16240_v31 = vld [vmem:[#allocation7_spill] sm:$0xff] }
 0x258   :  { %16237 = vst [vmem:[#allocation5_spill] sm:$0xff] %v10302_v51  ;;  %v10311_v20 = vmax.f32 %v934_v8, 0.0  ;;  %v942_v19 = vadd.f32 %v10023_v13, %v16240_v31  ;;  %v1330_v62 = vsel %vm1144_vm1, %v10290_v3, 0.0  ;;  %v944_v22 = vadd.f32 %v10023_v13, %v16242_v63  ;;  %v16243_v31 = vld [vmem:[#allocation12_spill] sm:$0xff] }
 0x259   :  { %v1722_v5 = vadd.f32 %v1721_v1, %v1720_v44  ;;  %v1327_v14 = vadd.f32 %v1326_v21, %v1325_v28  ;;  %16241 = vst [vmem:[#allocation7_spill] sm:$0xff] %v10315_v36  ;;  %v1725_v44 = vsel %vm1144_vm1, %v1506_v46, 0.0  ;;  %v1508_v28 = vmul.f32 %v10302_v51, %v10302_v51 }
 0x25a   :  { %16239 = vst [vmem:[#allocation6_spill] sm:$0xff] %v10311_v20  ;;  %v10322_v1 = vmax.f32 %v939_v49, 0.0  ;;  %v1509_v56 = vmul.f32 %v10311_v20, %v10311_v20  ;;  %v10331_v46 = vmax.f32 %v942_v19, 0.0  ;;  %v1510_v49 = vmul.f32 %v10315_v36, %v10315_v36  ;;  %v10342_v19 = vpop.f32.mrf.mxu3 }
 0x25b   :  { %v1724_v4 = vadd.f32 %v1723_v24, %v1722_v5  ;;  %v1329_v37 = vadd.f32 %v1328_v47, %v1327_v14  ;;  %v1727_v5 = vsel %vm1144_vm1, %v1507_v38, 0.0  ;;  %v1332_v14 = vsel %vm1144_vm1, %v10302_v51, 0.0 }
 0x25c   :  { %v1334_v38 = vsel %vm1144_vm1, %v10311_v20, 0.0 }
 0x25d   :  { %v1726_v21 = vadd.f32 %v1725_v44, %v1724_v4  ;;  %v1331_v8 = vadd.f32 %v1330_v62, %v1329_v37  ;;  %v947_v37 = vadd.f32 %v10023_v13, %v16243_v31  ;;  %v1729_v4 = vsel %vm1144_vm1, %v1508_v28, 0.0 }
 0x25e   :  { %v1511_v44 = vmul.f32 %v10322_v1, %v10322_v1  ;;  %v1731_v28 = vsel %vm1144_vm1, %v1509_v56, 0.0  ;;  %v1512_v31 = vmul.f32 %v10331_v46, %v10331_v46  ;;  %v1340_v56 = vsel %vm1144_vm1, %v10331_v46, 0.0 }
 0x25f   :  { %v1728_v24 = vadd.f32 %v1727_v5, %v1726_v21  ;;  %v1333_v47 = vadd.f32 %v1332_v14, %v1331_v8  ;;  %v1336_v21 = vsel %vm1144_vm1, %v10315_v36, 0.0  ;;  %v10346_v8 = vmax.f32 %v944_v22, 0.0  ;;  %v16244_v5 = vld [vmem:[#allocation20_spill] sm:$0xff] }
 0x260   :  { %v949_v14 = vadd.f32 %v10023_v13, %v16244_v5  ;;  %v952_v22 = vadd.f32 %v10023_v13, %v9422_v27 }
 0x261   :  { %v1730_v62 = vadd.f32 %v1729_v4, %v1728_v24  ;;  %v1335_v63 = vadd.f32 %v1334_v38, %v1333_v47  ;;  %v1733_v24 = vsel %vm1144_vm1, %v1510_v49, 0.0  ;;  %v1338_v47 = vsel %vm1144_vm1, %v10322_v1, 0.0 }
 0x262   :  { %v10356_v4 = vmax.f32 %v947_v37, 0.0  ;;  %v1735_v38 = vsel %vm1144_vm1, %v1511_v44, 0.0  ;;  %v954_v49 = vadd.f32 %v10023_v13, %v9466_v29  ;;  %v1737_v37 = vsel %vm1144_vm1, %v1512_v31, 0.0 }
 0x263   :  { %v1337_v20 = vadd.f32 %v1336_v21, %v1335_v63  ;;  %v1732_v51 = vadd.f32 %v1731_v28, %v1730_v62  ;;  %v1513_v62 = vmul.f32 %v10346_v8, %v10346_v8  ;;  %v10365_v63 = vmax.f32 %v949_v14, 0.0 }
 0x264   :  { %v1342_v27 = vsel %vm1144_vm1, %v10346_v8, 0.0  ;;  %v957_v44 = vadd.f32 %v10023_v13, %v9512_v45  ;;  %v959_v14 = vadd.f32 %v10023_v13, %v9554_v26 }
 0x265   :  { %v1339_v5 = vadd.f32 %v1338_v47, %v1337_v20  ;;  %v1734_v36 = vadd.f32 %v1733_v24, %v1732_v51  ;;  %v1514_v51 = vmul.f32 %v10356_v4, %v10356_v4  ;;  %v10374_v20 = vmax.f32 %v952_v22, 0.0 }
 0x266   :  { %v1739_v31 = vsel %vm1144_vm1, %v1513_v62, 0.0  ;;  %v1515_v47 = vmul.f32 %v10365_v63, %v10365_v63  ;;  %v962_v22 = vadd.f32 %v10023_v13, %v9602_v53  ;;  %v1346_v62 = vsel %vm1144_vm1, %v10365_v63, 0.0 }
 0x267   :  { %v1341_v21 = vadd.f32 %v1340_v56, %v1339_v5  ;;  %v1736_v28 = vadd.f32 %v1735_v38, %v1734_v36  ;;  %v1344_v36 = vsel %vm1144_vm1, %v10356_v4, 0.0  ;;  %v10385_v38 = vmax.f32 %v954_v49, 0.0  ;;  %v10389_v56 = vpop.f32.mrf.mxu3 }
 0x268   :  { %v1741_v26 = vsel %vm1144_vm1, %v1514_v51, 0.0  ;;  %v1743_v53 = vsel %vm1144_vm1, %v1515_v47, 0.0 }
 0x269   :  { %v1343_v24 = vadd.f32 %v1342_v27, %v1341_v21  ;;  %v1738_v29 = vadd.f32 %v1737_v37, %v1736_v28  ;;  %16245 = vst [vmem:[#allocation9_spill] sm:$0xff] %v10385_v38  ;;  %v1516_v37 = vmul.f32 %v10374_v20, %v10374_v20  ;;  %v10396_v21 = vmax.f32 %v957_v44, 0.0 }
 0x26a   :  { %v10398_v28 = vmax.f32 %v959_v14, 0.0  ;;  %v1517_v51 = vmul.f32 %v10385_v38, %v10385_v38 }
 0x26b   :  { %v1345_v5 = vadd.f32 %v1344_v36, %v1343_v24  ;;  %v1740_v45 = vadd.f32 %v1739_v31, %v1738_v29  ;;  %v1348_v24 = vsel %vm1144_vm1, %v10374_v20, 0.0  ;;  %v964_v29 = vadd.f32 %v10023_v13, %v9646_v32 }
 0x26c   :  { %v10407_v31 = vmax.f32 %v962_v22, 0.0  ;;  %v1745_v14 = vsel %vm1144_vm1, %v1516_v37, 0.0  ;;  %v1518_v47 = vmul.f32 %v10396_v21, %v10396_v21  ;;  %v1747_v22 = vsel %vm1144_vm1, %v1517_v51, 0.0 }
 0x26d   :  { %v1347_v49 = vadd.f32 %v1346_v62, %v1345_v5  ;;  %v1742_v27 = vadd.f32 %v1741_v26, %v1740_v45  ;;  %v1350_v5 = vsel %vm1144_vm1, %v10385_v38, 0.0  ;;  %v967_v45 = vadd.f32 %v10023_v13, %v9694_v33 }
 0x26e   :  { %v1519_v26 = vmul.f32 %v10398_v28, %v10398_v28  ;;  %v10421_v37 = vmax.f32 %v964_v29, 0.0  ;;  %v1749_v38 = vsel %vm1144_vm1, %v1518_v47, 0.0  ;;  %v972_v51 = vadd.f32 %v10023_v13, %v9778_v48 }
 0x26f   :  { %v1349_v36 = vadd.f32 %v1348_v24, %v1347_v49  ;;  %v1744_v44 = vadd.f32 %v1743_v53, %v1742_v27  ;;  %v1352_v49 = vsel %vm1144_vm1, %v10396_v21, 0.0  ;;  %v969_v27 = vadd.f32 %v10023_v13, %v9732_v23  ;;  %v10435_v23 = vpop.f32.mrf.mxu3 }
 0x270   :  { %16246 = vst [vmem:[#allocation12_spill] sm:$0xff] %v10421_v37  ;;  %v1520_v53 = vmul.f32 %v10407_v31, %v10407_v31  ;;  %v1751_v29 = vsel %vm1144_vm1, %v1519_v26, 0.0  ;;  %v1521_v47 = vmul.f32 %v10421_v37, %v10421_v37 }
 0x271   :  { %v1351_v62 = vadd.f32 %v1350_v5, %v1349_v36  ;;  %v1746_v32 = vadd.f32 %v1745_v14, %v1744_v44  ;;  %v1354_v36 = vsel %vm1144_vm1, %v10398_v28, 0.0  ;;  %v10430_v44 = vmax.f32 %v967_v45, 0.0 }
 0x272   :  { %v974_v45 = vadd.f32 %v10023_v13, %v9815_v42 }
 0x273   :  { %v1353_v24 = vadd.f32 %v1352_v49, %v1351_v62  ;;  %v1748_v33 = vadd.f32 %v1747_v22, %v1746_v32  ;;  %v1356_v62 = vsel %vm1144_vm1, %v10407_v31, 0.0  ;;  %v10441_v32 = vmax.f32 %v969_v27, 0.0 }
 0x274   :  { %v1753_v22 = vsel %vm1144_vm1, %v1520_v53, 0.0  ;;  %v1522_v26 = vmul.f32 %v10430_v44, %v10430_v44  ;;  %v979_v27 = vadd.f32 %v10023_v13, %v9902_v60  ;;  %v1755_v53 = vsel %vm1144_vm1, %v1521_v47, 0.0 }
 0x275   :  { %v1355_v14 = vadd.f32 %v1354_v36, %v1353_v24  ;;  %v1750_v5 = vadd.f32 %v1749_v38, %v1748_v33  ;;  %v1358_v38 = vsel %vm1144_vm1, %v10421_v37, 0.0  ;;  %v10450_v24 = vmax.f32 %v972_v51, 0.0 }
 0x276   :  { %v977_v33 = vadd.f32 %v10023_v13, %v9850_v16  ;;  %v1362_v51 = vsel %vm1144_vm1, %v10441_v32, 0.0  ;;  %v1757_v37 = vsel %vm1144_vm1, %v1522_v26, 0.0  ;;  %v982_v47 = vadd.f32 %v10023_v13, %v9953_v6 }
 0x277   :  { %v1357_v48 = vadd.f32 %v1356_v62, %v1355_v14  ;;  %v1752_v49 = vadd.f32 %v1751_v29, %v1750_v5  ;;  %v1360_v29 = vsel %vm1144_vm1, %v10430_v44, 0.0  ;;  %v1523_v14 = vmul.f32 %v10441_v32, %v10441_v32 }
 0x278   :  { %v10461_v5 = vmax.f32 %v974_v45, 0.0  ;;  %v1524_v60 = vmul.f32 %v10450_v24, %v10450_v24 }
 0x279   :  { %v1754_v36 = vadd.f32 %v1753_v22, %v1752_v49  ;;  %v1359_v42 = vadd.f32 %v1358_v38, %v1357_v48  ;;  %v10468_v22 = vmax.f32 %v977_v33, 0.0  ;;  %v10472_v48 = vmax.f32 %v979_v27, 0.0  ;;  %v10483_v27 = vpop.f32.mrf.mxu3 }
 0x27a   :  { %v1759_v38 = vsel %vm1144_vm1, %v1523_v14, 0.0  ;;  %v1525_v26 = vmul.f32 %v10461_v5, %v10461_v5  ;;  %v1366_v33 = vsel %vm1144_vm1, %v10461_v5, 0.0  ;;  %v10488_v14 = vmax.f32 %v982_v47, 0.0 }
 0x27b   :  { %v1361_v62 = vadd.f32 %v1360_v29, %v1359_v42  ;;  %v1756_v16 = vadd.f32 %v1755_v53, %v1754_v36  ;;  %16247 = vst [vmem:[#allocation20_spill] sm:$0xff] %v10468_v22  ;;  %v1364_v42 = vsel %vm1144_vm1, %v10450_v24, 0.0  ;;  %v984_v36 = vadd.f32 %v10023_v13, %v10004_v11 }
 0x27c   :  { %v1526_v29 = vmul.f32 %v10468_v22, %v10468_v22  ;;  %v1527_v11 = vmul.f32 %v10472_v48, %v10472_v48  ;;  %v989_v47 = vadd.f32 %v10023_v13, %v10105_v55 }
 0x27d   :  { %v1363_v49 = vadd.f32 %v1362_v51, %v1361_v62  ;;  %v1758_v45 = vadd.f32 %v1757_v37, %v1756_v16  ;;  %v1761_v37 = vsel %vm1144_vm1, %v1524_v60, 0.0  ;;  %v987_v51 = vadd.f32 %v10023_v13, %v10058_v30 }
 0x27e   :  { %v1368_v60 = vsel %vm1144_vm1, %v10468_v22, 0.0  ;;  %v992_v30 = vadd.f32 %v10023_v13, %v10154_v52  ;;  %v1372_v52 = vsel %vm1144_vm1, %v10488_v14, 0.0 }
 0x27f   :  { %v1365_v53 = vadd.f32 %v1364_v42, %v1363_v49  ;;  %v1760_v6 = vadd.f32 %v1759_v38, %v1758_v45  ;;  %v8748_v49 = vld [vmem:[%s15702_s2 + $0x38] sm:$0xff]  ;;  %v1763_v45 = vsel %vm1144_vm1, %v1525_v26, 0.0  ;;  %v10500_v38 = vmax.f32 %v984_v36, 0.0 }
 0x280   :  { %6236 = vmatpush.bf16.msrb.mxu1 %v8748_v49  ;;  %v1528_v26 = vmul.f32 %v10488_v14, %v10488_v14  ;;  %v1767_v36 = vsel %vm1144_vm1, %v1527_v11, 0.0  ;;  %v10522_v49 = vmax.f32 %v992_v30, 0.0 }
 0x281   :  { %v1367_v62 = vadd.f32 %v1366_v33, %v1365_v53  ;;  %v1762_v16 = vadd.f32 %v1761_v37, %v1760_v6  ;;  %v1765_v53 = vsel %vm1144_vm1, %v1526_v29, 0.0  ;;  %v1370_v6 = vsel %vm1144_vm1, %v10472_v48, 0.0  ;;  %v1011_v30 = vpop.f32.mrf.mxu3 }
 0x282   :  { %v10511_v37 = vmax.f32 %v987_v51, 0.0  ;;  %v994_v29 = vadd.f32 %v10023_v13, %v10203_v7  ;;  %v1374_v11 = vsel %vm1144_vm1, %v10500_v38, 0.0  ;;  %v999_v7 = vadd.f32 %v10023_v13, %v10295_v61 }
 0x283   :  { %v1369_v42 = vadd.f32 %v1368_v60, %v1367_v62  ;;  %v1764_v33 = vadd.f32 %v1763_v45, %v1762_v16  ;;  %v1529_v62 = vmul.f32 %v10500_v38, %v10500_v38  ;;  %v10518_v16 = vmax.f32 %v989_v47, 0.0 }
 0x284   :  { %16248 = vst [vmem:[#allocation85_spill] sm:$0xff] %v10511_v37  ;;  %v1769_v60 = vsel %vm1144_vm1, %v1528_v26, 0.0 }
 0x285   :  { %v1371_v22 = vadd.f32 %v1370_v6, %v1369_v42  ;;  %v1766_v55 = vadd.f32 %v1765_v53, %v1764_v33  ;;  %v1530_v42 = vmul.f32 %v10511_v37, %v10511_v37  ;;  %v997_v33 = vadd.f32 %v10023_v13, %v10250_v12 }
 0x286   :  { %v1376_v6 = vsel %vm1144_vm1, %v10511_v37, 0.0  ;;  %v1531_v26 = vmul.f32 %v10518_v16, %v10518_v16  ;;  %v1378_v61 = vsel %vm1144_vm1, %v10518_v16, 0.0  ;;  %v10549_v37 = vmax.f32 %v999_v7, 0.0 }
 0x287   :  { %v1373_v45 = vadd.f32 %v1372_v52, %v1371_v22  ;;  %v1768_v51 = vadd.f32 %v1767_v36, %v1766_v55  ;;  %v1771_v22 = vsel %vm1144_vm1, %v1529_v62, 0.0  ;;  %v10538_v36 = vmax.f32 %v994_v29, 0.0 }
 0x288   :  { %v1532_v55 = vmul.f32 %v10522_v49, %v10522_v49  ;;  %v1002_v62 = vadd.f32 %v10023_v13, %v10342_v19  ;;  %16251 = vst [vmem:[#allocation88_spill] sm:$0xff] %v10549_v37  ;;  %v1775_v29 = vsel %vm1144_vm1, %v1531_v26, 0.0 }
 0x289   :  { %v1375_v47 = vadd.f32 %v1374_v11, %v1373_v45  ;;  %v1770_v53 = vadd.f32 %v1769_v60, %v1768_v51  ;;  %16249 = vst [vmem:[#allocation86_spill] sm:$0xff] %v10538_v36  ;;  %v1773_v45 = vsel %vm1144_vm1, %v1530_v42, 0.0  ;;  %v10545_v51 = vmax.f32 %v997_v33, 0.0 }
 0x28a   :  { %v1533_v42 = vmul.f32 %v10538_v36, %v10538_v36  ;;  %v1777_v33 = vsel %vm1144_vm1, %v1532_v55, 0.0  ;;  %v1382_v19 = vsel %vm1144_vm1, %v10538_v36, 0.0  ;;  %v10563_v26 = vmax.f32 %v1002_v62, 0.0 }
 0x28b   :  { %v1377_v12 = vadd.f32 %v1376_v6, %v1375_v47  ;;  %v1772_v52 = vadd.f32 %v1771_v22, %v1770_v53  ;;  %16250 = vst [vmem:[#allocation87_spill] sm:$0xff] %v10545_v51  ;;  %v1380_v47 = vsel %vm1144_vm1, %v10522_v49, 0.0  ;;  %v1004_v53 = vadd.f32 %v10023_v13, %v10389_v56 }
 0x28c   :  { %v1534_v7 = vmul.f32 %v10545_v51, %v10545_v51  ;;  %16252 = vst [vmem:[#allocation89_spill] sm:$0xff] %v10563_v26  ;;  %v1535_v56 = vmul.f32 %v10549_v37, %v10549_v37  ;;  %v1779_v55 = vsel %vm1144_vm1, %v1533_v42, 0.0  ;;  %v1536_v42 = vmul.f32 %v10563_v26, %v10563_v26 }
 0x28d   :  { %v1379_v60 = vadd.f32 %v1378_v61, %v1377_v12  ;;  %v1774_v11 = vadd.f32 %v1773_v45, %v1772_v52  ;;  %v1007_v12 = vadd.f32 %v10023_v13, %v10435_v23  ;;  %v1384_v61 = vsel %vm1144_vm1, %v10545_v51, 0.0 }
 0x28e   :  { %v1386_v23 = vsel %vm1144_vm1, %v10549_v37, 0.0 }
 0x28f   :  { %v1381_v22 = vadd.f32 %v1380_v47, %v1379_v60  ;;  %v1776_v6 = vadd.f32 %v1775_v29, %v1774_v11  ;;  %v10572_v60 = vmax.f32 %v1004_v53, 0.0  ;;  %v1009_v11 = vadd.f32 %v10023_v13, %v10483_v27  ;;  %v1013_v47 = vpop.f32.mrf.mxu3 }
 0x290   :  { %v1012_v53 = vadd.f32 %v10023_v13, %v1011_v30  ;;  %v1783_v27 = vsel %vm1144_vm1, %v1535_v56, 0.0 }
 0x291   :  { %v1383_v52 = vadd.f32 %v1382_v19, %v1381_v22  ;;  %v1778_v45 = vadd.f32 %v1777_v33, %v1776_v6  ;;  %16253 = vst [vmem:[#allocation90_spill] sm:$0xff] %v10572_v60  ;;  %v8930_v33 = vmov 1024.0   ;;  %v1781_v22 = vsel %vm1144_vm1, %v1534_v7, 0.0 }
 0x292   :  { %8885 = vrcp.f32 %v8930_v33  ;;  %v10581_v19 = vmax.f32 %v1007_v12, 0.0  ;;  %v1014_v7 = vadd.f32 %v10023_v13, %v1013_v47  ;;  %v1785_v12 = vsel %vm1144_vm1, %v1536_v42, 0.0 }
 0x293   :  { %v1780_v62 = vadd.f32 %v1779_v55, %v1778_v45  ;;  %v1385_v29 = vadd.f32 %v1384_v61, %v1383_v52  ;;  %v1388_v52 = vsel %vm1144_vm1, %v10563_v26, 0.0  ;;  %v1537_v45 = vmul.f32 %v10572_v60, %v10572_v60 }
 0x294   :  { %16254 = vst [vmem:[#allocation91_spill] sm:$0xff] %v10581_v19  ;;  %v10589_v55 = vmax.f32 %v1009_v11, 0.0  ;;  %v1390_v30 = vsel %vm1144_vm1, %v10572_v60, 0.0  ;;  %v1538_v56 = vmul.f32 %v10581_v19, %v10581_v19  ;;  %v1392_v13 = vsel %vm1144_vm1, %v10581_v19, 0.0 }
 0x295   :  { %v1782_v6 = vadd.f32 %v1781_v22, %v1780_v62  ;;  %v1387_v51 = vadd.f32 %v1386_v23, %v1385_v29  ;;  %v10597_v62 = vmax.f32 %v1012_v53, 0.0  ;;  %v1787_v11 = vsel %vm1144_vm1, %v1537_v45, 0.0 }
 0x296   :  { %16255 = vst [vmem:[#allocation92_spill] sm:$0xff] %v10589_v55  ;;  %v1143_v47 = vmax.f32 %v1014_v7, 0.0  ;;  %v1394_v53 = vsel %vm1144_vm1, %v10589_v55, 0.0 }
 0x297   :  { %v1784_v61 = vadd.f32 %v1783_v27, %v1782_v6  ;;  %v1389_v33 = vadd.f32 %v1388_v52, %v1387_v51  ;;  %16256 = vst [vmem:[#allocation93_spill] sm:$0xff] %v10597_v62  ;;  %v1539_v51 = vmul.f32 %v10589_v55, %v10589_v55  ;;  %v1789_v27 = vsel %vm1144_vm1, %v1538_v56, 0.0 }
 0x298   :  { %v8886_v29 = vpop.eup %8885  ;;  %v1540_v52 = vmul.f32 %v10597_v62, %v10597_v62  ;;  %v1541_v19 = vmul.f32 %v1143_v47, %v1143_v47  ;;  %v1398_v56 = vsel %vm1144_vm1, %v1143_v47, 0.0 }
 0x299   :  { %v1786_v23 = vadd.f32 %v1785_v12, %v1784_v61  ;;  %v1391_v22 = vadd.f32 %v1390_v30, %v1389_v33  ;;  %v1407_v61 = vmul.f32 1024.0, %v8886_v29  ;;  %v1791_v12 = vsel %vm1144_vm1, %v1539_v51, 0.0 }
 0x29a   :  { %v1396_v30 = vsel %vm1144_vm1, %v10597_v62, 0.0  ;;  %v1795_v60 = vsel %vm1144_vm1, %v1541_v19, 0.0  ;;  %vm1411_vm2 = vweird.f32 %v8886_v29 }
 0x29b   :  { %v1788_v42 = vadd.f32 %v1787_v11, %v1786_v23  ;;  %v1393_v6 = vadd.f32 %v1392_v13, %v1391_v22  ;;  %v1793_v22 = vsel %vm1144_vm1, %v1540_v52, 0.0  ;;  %v1408_v11 = vsub.f32 1.0, %v1407_v61 }
 0x29d   :  { %v1790_v33 = vadd.f32 %v1789_v27, %v1788_v42  ;;  %v1395_v45 = vadd.f32 %v1394_v53, %v1393_v6  ;;  %v1409_v6 = vmul.f32 %v8886_v29, %v1408_v11 }
 0x29f   :  { %v1792_v7 = vadd.f32 %v1791_v12, %v1790_v33  ;;  %v1397_v23 = vadd.f32 %v1396_v30, %v1395_v45  ;;  %v1410_v62 = vadd.f32 %v8886_v29, %v1409_v6 }
 0x2a1   :  { %v1794_v13 = vadd.f32 %v1793_v22, %v1792_v7  ;;  %v1399_v55 = vadd.f32 %v1398_v56, %v1397_v23  ;;  %v1412_v12 = vsel %vm1411_vm2, %v8886_v29, %v1410_v62 }
 0x2a3   :  { %v1400_v26 = vrot.slane %v1399_v55, 4  ;;  %v1796_v42 = vadd.f32 %v1795_v60, %v1794_v13 }
 0x2a5   :  { %v1401_v27 = vadd.f32 %v1400_v26, %v1399_v55  ;;  %v1797_v51 = vrot.slane %v1796_v42, 4 }
 0x2a7   :  { %v1402_v53 = vrot.slane %v1401_v27, 2  ;;  %v1798_v37 = vadd.f32 %v1797_v51, %v1796_v42 }
 0x2a9   :  { %v1403_v36 = vadd.f32 %v1402_v53, %v1401_v27  ;;  %v1799_v33 = vrot.slane %v1798_v37, 2  ;;  %v27_v27 = vld [vmem:[%s15705_s5 + $0x2] ss:$0 sm:$0xff] }
 0x2ab   :  { %v1404_v45 = vrot.slane %v1403_v36, 1  ;;  %v1800_v52 = vadd.f32 %v1799_v33, %v1798_v37  ;;  %v26_v37 = vld [vmem:[%s15705_s5 + $0x1] ss:$0 sm:$0xff] }
 0x2ad   :  { %v1405_v30 = vadd.f32 %v1404_v45, %v1403_v36  ;;  %v1801_v61 = vrot.slane %v1800_v52, 1  ;;  %v16257_v45 = vld [vmem:[#allocation13_spill] sm:$0xff] }
 0x2af   :  { %v1413_v7 = vmul.f32 %v1412_v12, %v1405_v30  ;;  %v1802_v23 = vadd.f32 %v1801_v61, %v1800_v52  ;;  %v16259_v61 = vld [vmem:[#allocation14_spill] sm:$0xff] }
 0x2b1   :  { %v1803_v22 = vmul.f32 %v1802_v23, %v1412_v12  ;;  %v1804_v19 = vmul.f32 %v1413_v7, %v1413_v7  ;;  %v16258_v12 = vld [vmem:[#allocation10_spill] sm:$0xff] }
 0x2b3   :  { %v1805_v56 = vsub.f32 %v1803_v22, %v1804_v19  ;;  %v16260_v22 = vld [vmem:[#allocation16_spill] sm:$0xff] }
 0x2b5   :  { %v1806_v60 = vmax.f32 %v1805_v56, 0.0  ;;  %v16262_v56 = vld [vmem:[#allocation18_spill] sm:$0xff] }
 0x2b7   :  { %v1807_v11 = vadd.f32 1e-05, %v1806_v60 }
 0x2b9   :  { %8887 = vrsqrt.f32 %v1807_v11  ;;  %vm1814_vm4 = vweird.f32 %v1807_v11 }
 0x2bf   :  { %v8888_v26 = vpop.eup %8887 }
 0x2c0   :  { %v1809_v55 = vmul.f32 %v8888_v26, %v1807_v11  ;;  %vm1815_vm3 = vweird.f32 %v8888_v26  ;;  %v16263_v11 = vld [vmem:[#allocation21_spill] sm:$0xff] }
 0x2c1   :  { %vm1816_vm5 = vmor %vm1814_vm4, %vm1815_vm3 }
 0x2c2   :  { %v1810_v13 = vmul.f32 %v8888_v26, %v1809_v55 }
 0x2c4   :  { %v1811_v42 = vmul.f32 0.5, %v1810_v13 }
 0x2c6   :  { %v1812_v6 = vsub.f32 1.5, %v1811_v42  ;;  %v16266_v42 = vld [vmem:[#allocation23_spill] sm:$0xff] }
 0x2c8   :  { %v1813_v36 = vmul.f32 %v8888_v26, %v1812_v6 }
 0x2ca   :  { %v1817_v62 = vsel %vm1816_vm5, %v8888_v26, %v1813_v36 }
 0x2cb   :  { %v10618_v29 = vmul.f32 %v1817_v62, %v26_v37  ;;  %v16267_v37 = vld [vmem:[#allocation24_spill] sm:$0xff]  ;;  %v16268_v62 = vld [vmem:[#allocation25_spill] sm:$0xff] }
 0x2cd   :  { %v1819_v51 = vmul.f32 %v10618_v29, %v1413_v7  ;;  %v1948_v53 = vmul.f32 %v10618_v29, %v1143_v47  ;;  %v10629_v52 = vmul.f32 %v10618_v29, %v16257_v45  ;;  %v10633_v30 = vmul.f32 %v10618_v29, %v16258_v12  ;;  %v16261_v7 = vld [vmem:[#allocation17_spill] sm:$0xff]  ;;  %v16270_v45 = vld [vmem:[#allocation27_spill] sm:$0xff]  ;;  %v16272_v12 = vld [vmem:[#allocation28_spill] sm:$0xff] }
 0x2ce   :  { %v10637_v23 = vmul.f32 %v10618_v29, %v16259_v61  ;;  %v10641_v19 = vmul.f32 %v10618_v29, %v16260_v22  ;;  %v10645_v47 = vmul.f32 %v10618_v29, %v16261_v7  ;;  %v10649_v60 = vmul.f32 %v10618_v29, %v16262_v56  ;;  %v16274_v22 = vld [vmem:[#allocation29_spill] sm:$0xff]  ;;  %v16276_v56 = vld [vmem:[#allocation30_spill] sm:$0xff] }
 0x2cf   :  { %v10625_v33 = vsub.f32 %v27_v27, %v1819_v51  ;;  %v10653_v26 = vmul.f32 %v10618_v29, %v16263_v11  ;;  %v10660_v13 = vmul.f32 %v10618_v29, %v9394_v10  ;;  %v10664_v6 = vmul.f32 %v10618_v29, %v16266_v42  ;;  %v16269_v51 = vld [vmem:[#allocation26_spill] sm:$0xff]  ;;  %v16278_v42 = vld [vmem:[#allocation31_spill] sm:$0xff] }
 0x2d0   :  { %v10668_v36 = vmul.f32 %v10618_v29, %v16267_v37  ;;  %v10672_v27 = vmul.f32 %v10618_v29, %v16268_v62  ;;  %v10680_v10 = vmul.f32 %v10618_v29, %v16270_v45  ;;  %v10684_v61 = vmul.f32 %v10618_v29, %v16272_v12  ;;  %v16279_v62 = vld [vmem:[#allocation32_spill] sm:$0xff]  ;;  %v16280_v45 = vld [vmem:[#allocation33_spill] sm:$0xff] }
 0x2d1   :  { %v10656_v55 = vadd.f32 %v1948_v53, %v10625_v33  ;;  %16265 = vst [vmem:[#allocation10_spill] sm:$0xff] %v10660_v13  ;;  %v10676_v53 = vmul.f32 %v10618_v29, %v16269_v51  ;;  %v10688_v7 = vmul.f32 %v10618_v29, %v16274_v22  ;;  %v10692_v11 = vmul.f32 %v10618_v29, %v16276_v56  ;;  %v16291_v13 = vld [vmem:[#allocation39_spill] sm:$0xff] }
 0x2d2   :  { %16271 = vst [vmem:[#allocation14_spill] sm:$0xff] %v10680_v10  ;;  %v10696_v37 = vmul.f32 %v10618_v29, %v16278_v42  ;;  %v10700_v51 = vmul.f32 %v10618_v29, %v16279_v62  ;;  %v10704_v12 = vmul.f32 %v10618_v29, %v16280_v45  ;;  %v10716_v42 = vmul.f32 %v10618_v29, %v9550_v59  ;;  %v16289_v10 = vld [vmem:[#allocation38_spill] sm:$0xff] }
 0x2d3   :  { %16264 = vst [vmem:[#allocation13_spill] sm:$0xff] %v10656_v55  ;;  %v16281_v55 = vld [vmem:[#allocation34_spill] sm:$0xff] }
 0x2d4   :  { %16273 = vst [vmem:[#allocation16_spill] sm:$0xff] %v10684_v61  ;;  %v10708_v22 = vmul.f32 %v10618_v29, %v16281_v55  ;;  %v16287_v61 = vld [vmem:[#allocation37_spill] sm:$0xff]  ;;  %v10728_v55 = vmul.f32 %v10618_v29, %v16289_v10 }
 0x2d5   :  { %16275 = vst [vmem:[#allocation17_spill] sm:$0xff] %v10688_v7  ;;  %v16282_v7 = vld [vmem:[#allocation35_spill] sm:$0xff]  ;;  %v10724_v45 = vmul.f32 %v10618_v29, %v16287_v61 }
 0x2d6   :  { %16277 = vst [vmem:[#allocation18_spill] sm:$0xff] %v10692_v11  ;;  %v10712_v56 = vmul.f32 %v10618_v29, %v16282_v7  ;;  %v16285_v11 = vld [vmem:[#allocation36_spill] sm:$0xff]  ;;  %v10732_v7 = vmul.f32 %v10618_v29, %v16291_v13 }
 0x2d7   :  { %16284 = vst [vmem:[#allocation23_spill] sm:$0xff] %v10716_v42  ;;  %v10720_v62 = vmul.f32 %v10618_v29, %v16285_v11  ;;  %v16294_v42 = vld [vmem:[#allocation41_spill] sm:$0xff] }
 0x2d8   :  { %16283 = vst [vmem:[#allocation21_spill] sm:$0xff] %v10712_v56  ;;  %v16292_v56 = vld [vmem:[#allocation40_spill] sm:$0xff]  ;;  %v10740_v11 = vmul.f32 %v10618_v29, %v16294_v42 }
 0x2d9   :  { %16286 = vst [vmem:[#allocation24_spill] sm:$0xff] %v10720_v62  ;;  %v10736_v59 = vmul.f32 %v10618_v29, %v16292_v56  ;;  %v16296_v62 = vld [vmem:[#allocation42_spill] sm:$0xff]  ;;  %v10756_v56 = vmul.f32 %v10618_v29, %v9667_v40 }
 0x2da   :  { %16288 = vst [vmem:[#allocation25_spill] sm:$0xff] %v10724_v45  ;;  %v10744_v61 = vmul.f32 %v10618_v29, %v16296_v62  ;;  %v16298_v45 = vld [vmem:[#allocation43_spill] sm:$0xff] }
 0x2db   :  { %16290 = vst [vmem:[#allocation26_spill] sm:$0xff] %v10728_v55  ;;  %v10748_v10 = vmul.f32 %v10618_v29, %v16298_v45  ;;  %v16300_v55 = vld [vmem:[#allocation44_spill] sm:$0xff] }
 0x2dc   :  { %16293 = vst [vmem:[#allocation27_spill] sm:$0xff] %v10736_v59  ;;  %v10752_v13 = vmul.f32 %v10618_v29, %v16300_v55  ;;  %v16303_v59 = vld [vmem:[#allocation45_spill] sm:$0xff] }
 0x2dd   :  { %16295 = vst [vmem:[#allocation28_spill] sm:$0xff] %v10740_v11  ;;  %v10760_v42 = vmul.f32 %v10618_v29, %v16303_v59  ;;  %v16305_v11 = vld [vmem:[#allocation46_spill] sm:$0xff] }
 0x2de   :  { %16297 = vst [vmem:[#allocation29_spill] sm:$0xff] %v10744_v61  ;;  %v10764_v62 = vmul.f32 %v10618_v29, %v16305_v11  ;;  %v16307_v61 = vld [vmem:[#allocation47_spill] sm:$0xff] }
 0x2df   :  { %16299 = vst [vmem:[#allocation30_spill] sm:$0xff] %v10748_v10  ;;  %v10768_v45 = vmul.f32 %v10618_v29, %v16307_v61  ;;  %v16309_v10 = vld [vmem:[#allocation48_spill] sm:$0xff] }
 0x2e0   :  { %16301 = vst [vmem:[#allocation31_spill] sm:$0xff] %v10752_v13  ;;  %v10772_v55 = vmul.f32 %v10618_v29, %v16309_v10  ;;  %v16311_v13 = vld [vmem:[#allocation49_spill] sm:$0xff] }
 0x2e1   :  { %16302 = vst [vmem:[#allocation32_spill] sm:$0xff] %v10756_v56  ;;  %v10776_v40 = vmul.f32 %v10618_v29, %v16311_v13  ;;  %v16313_v56 = vld [vmem:[#allocation50_spill] sm:$0xff] }
 0x2e2   :  { %16304 = vst [vmem:[#allocation33_spill] sm:$0xff] %v10760_v42  ;;  %v10780_v59 = vmul.f32 %v10618_v29, %v16313_v56  ;;  %v16315_v42 = vld [vmem:[#allocation51_spill] sm:$0xff] }
 0x2e3   :  { %16306 = vst [vmem:[#allocation34_spill] sm:$0xff] %v10764_v62  ;;  %v10784_v11 = vmul.f32 %v10618_v29, %v16315_v42  ;;  %v16317_v62 = vld [vmem:[#allocation52_spill] sm:$0xff] }
 0x2e4   :  { %16308 = vst [vmem:[#allocation35_spill] sm:$0xff] %v10768_v45  ;;  %v10788_v61 = vmul.f32 %v10618_v29, %v16317_v62  ;;  %v16319_v45 = vld [vmem:[#allocation53_spill] sm:$0xff] }
 0x2e5   :  { %16310 = vst [vmem:[#allocation36_spill] sm:$0xff] %v10772_v55  ;;  %v10792_v10 = vmul.f32 %v10618_v29, %v16319_v45  ;;  %v16320_v55 = vld [vmem:[#allocation54_spill] sm:$0xff] }
 0x2e6   :  { %16312 = vst [vmem:[#allocation37_spill] sm:$0xff] %v10776_v40  ;;  %v10796_v13 = vmul.f32 %v10618_v29, %v16320_v55  ;;  %v16321_v40 = vld [vmem:[#allocation55_spill] sm:$0xff]  ;;  %v10816_v55 = vmul.f32 %v10618_v29, %v9822_v43 }
 0x2e7   :  { %16314 = vst [vmem:[#allocation38_spill] sm:$0xff] %v10780_v59  ;;  %v10800_v56 = vmul.f32 %v10618_v29, %v16321_v40  ;;  %v16322_v59 = vld [vmem:[#allocation56_spill] sm:$0xff]  ;;  %v10820_v40 = vmul.f32 %v10618_v29, %v9857_v54 }
 0x2e8   :  { %16316 = vst [vmem:[#allocation39_spill] sm:$0xff] %v10784_v11  ;;  %v10804_v42 = vmul.f32 %v10618_v29, %v16322_v59  ;;  %v16324_v11 = vld [vmem:[#allocation57_spill] sm:$0xff]  ;;  %v10824_v59 = vmul.f32 %v10618_v29, %v9842_v9 }
 0x2e9   :  { %16318 = vst [vmem:[#allocation40_spill] sm:$0xff] %v10788_v61  ;;  %v10808_v62 = vmul.f32 %v10618_v29, %v16324_v11  ;;  %v16326_v61 = vld [vmem:[#allocation58_spill] sm:$0xff] }
 0x2ea   :  { %16323 = vst [vmem:[#allocation41_spill] sm:$0xff] %v10804_v42  ;;  %v10812_v45 = vmul.f32 %v10618_v29, %v16326_v61  ;;  %v16331_v42 = vld [vmem:[#allocation59_spill] sm:$0xff] }
 0x2eb   :  { %16325 = vst [vmem:[#allocation42_spill] sm:$0xff] %v10808_v62  ;;  %v10828_v11 = vmul.f32 %v10618_v29, %v16331_v42  ;;  %v16333_v62 = vld [vmem:[#allocation60_spill] sm:$0xff] }
 0x2ec   :  { %16327 = vst [vmem:[#allocation43_spill] sm:$0xff] %v10812_v45  ;;  %v10832_v61 = vmul.f32 %v10618_v29, %v16333_v62  ;;  %v16335_v45 = vld [vmem:[#allocation61_spill] sm:$0xff] }
 0x2ed   :  { %16328 = vst [vmem:[#allocation44_spill] sm:$0xff] %v10816_v55  ;;  %v10836_v43 = vmul.f32 %v10618_v29, %v16335_v45  ;;  %v16336_v55 = vld [vmem:[#allocation62_spill] sm:$0xff] }
 0x2ee   :  { %16329 = vst [vmem:[#allocation45_spill] sm:$0xff] %v10820_v40  ;;  %v10840_v54 = vmul.f32 %v10618_v29, %v16336_v55  ;;  %v16338_v40 = vld [vmem:[#allocation63_spill] sm:$0xff]  ;;  %v10860_v55 = vmul.f32 %v10618_v29, %v9938_v34 }
 0x2ef   :  { %16330 = vst [vmem:[#allocation46_spill] sm:$0xff] %v10824_v59  ;;  %v10844_v9 = vmul.f32 %v10618_v29, %v16338_v40  ;;  %v16340_v59 = vld [vmem:[#allocation64_spill] sm:$0xff] }
 0x2f0   :  { %16332 = vst [vmem:[#allocation47_spill] sm:$0xff] %v10828_v11  ;;  %v10848_v42 = vmul.f32 %v10618_v29, %v16340_v59  ;;  %v16342_v11 = vld [vmem:[#allocation65_spill] sm:$0xff] }
 0x2f1   :  { %16334 = vst [vmem:[#allocation48_spill] sm:$0xff] %v10832_v61  ;;  %v10852_v62 = vmul.f32 %v10618_v29, %v16342_v11  ;;  %v16344_v61 = vld [vmem:[#allocation66_spill] sm:$0xff]  ;;  %v10872_v11 = vmul.f32 %v10618_v29, %v9967_v57 }
 0x2f2   :  { %16337 = vst [vmem:[#allocation49_spill] sm:$0xff] %v10840_v54  ;;  %v10856_v45 = vmul.f32 %v10618_v29, %v16344_v61  ;;  %v16345_v54 = vld [vmem:[#allocation67_spill] sm:$0xff] }
 0x2f3   :  { %16339 = vst [vmem:[#allocation50_spill] sm:$0xff] %v10844_v9  ;;  %v10864_v40 = vmul.f32 %v10618_v29, %v16345_v54  ;;  %v16347_v9 = vld [vmem:[#allocation8_spill] sm:$0xff]  ;;  %v10884_v54 = vmul.f32 %v10618_v29, %v9998_v41 }
 0x2f4   :  { %16341 = vst [vmem:[#allocation51_spill] sm:$0xff] %v10848_v42  ;;  %v10868_v59 = vmul.f32 %v10618_v29, %v16347_v9  ;;  %v16352_v42 = vld [vmem:[#allocation22_spill] sm:$0xff] }
 0x2f5   :  { %16343 = vst [vmem:[#allocation52_spill] sm:$0xff] %v10852_v62  ;;  %v16350_v62 = vld [vmem:[#allocation15_spill] sm:$0xff]  ;;  %v10880_v34 = vmul.f32 %v10618_v29, %v16352_v42 }
 0x2f6   :  { %16346 = vst [vmem:[#allocation53_spill] sm:$0xff] %v10864_v40  ;;  %v10876_v61 = vmul.f32 %v10618_v29, %v16350_v62  ;;  %v16355_v40 = vld [vmem:[#allocation68_spill] sm:$0xff]  ;;  %v10896_v62 = vmul.f32 %v10618_v29, %v10032_v39 }
 0x2f7   :  { %16348 = vst [vmem:[#allocation54_spill] sm:$0xff] %v10868_v59  ;;  %v10888_v9 = vmul.f32 %v10618_v29, %v16355_v40  ;;  %v16356_v59 = vld [vmem:[#allocation69_spill] sm:$0xff] }
 0x2f8   :  { %16349 = vst [vmem:[#allocation55_spill] sm:$0xff] %v10872_v11  ;;  %v10892_v57 = vmul.f32 %v10618_v29, %v16356_v59  ;;  %v16363_v11 = vld [vmem:[#allocation73_spill] sm:$0xff] }
 0x2f9   :  { %16351 = vst [vmem:[#allocation56_spill] sm:$0xff] %v10876_v61  ;;  %v16358_v61 = vld [vmem:[#allocation70_spill] sm:$0xff]  ;;  %v10912_v59 = vmul.f32 %v10618_v29, %v16363_v11  ;;  %v10932_v11 = vmul.f32 %v10618_v29, %v10121_v0  ;;  %v10952_v0 = vmul.f32 %v10618_v29, %v10170_v18 }
 0x2fa   :  { %16353 = vst [vmem:[#allocation57_spill] sm:$0xff] %v10880_v34  ;;  %v10900_v42 = vmul.f32 %v10618_v29, %v16358_v61  ;;  %v16359_v34 = vld [vmem:[#allocation71_spill] sm:$0xff]  ;;  %v10920_v61 = vmul.f32 %v10618_v29, %v10092_v25  ;;  %v10940_v25 = vmul.f32 %v10618_v29, %v10132_v17  ;;  %v10960_v17 = vmul.f32 %v10618_v29, %v10181_v15 }
 0x2fb   :  { %16354 = vst [vmem:[#allocation58_spill] sm:$0xff] %v10884_v54  ;;  %v10904_v41 = vmul.f32 %v10618_v29, %v16359_v34  ;;  %v16361_v54 = vld [vmem:[#allocation72_spill] sm:$0xff]  ;;  %v10924_v34 = vmul.f32 %v10618_v29, %v10100_v50  ;;  %v10944_v50 = vmul.f32 %v10618_v29, %v10145_v58  ;;  %v10964_v58 = vmul.f32 %v10618_v29, %v10197_v2 }
 0x2fc   :  { %16357 = vst [vmem:[#allocation59_spill] sm:$0xff] %v10892_v57  ;;  %v10908_v40 = vmul.f32 %v10618_v29, %v16361_v54  ;;  %v16365_v57 = vld [vmem:[#allocation74_spill] sm:$0xff] }
 0x2fd   :  { %16360 = vst [vmem:[#allocation60_spill] sm:$0xff] %v10904_v41  ;;  %v10916_v39 = vmul.f32 %v10618_v29, %v16365_v57  ;;  %v16367_v41 = vld [vmem:[#allocation11_spill] sm:$0xff] }
 0x2fe   :  { %16362 = vst [vmem:[#allocation61_spill] sm:$0xff] %v10908_v40  ;;  %v10928_v54 = vmul.f32 %v10618_v29, %v16367_v41  ;;  %v16374_v40 = vld [vmem:[#allocation76_spill] sm:$0xff] }
 0x2ff   :  { %16364 = vst [vmem:[#allocation62_spill] sm:$0xff] %v10912_v59  ;;  %v16368_v59 = vld [vmem:[#allocation19_spill] sm:$0xff] }
 0x300   :  { %16366 = vst [vmem:[#allocation63_spill] sm:$0xff] %v10916_v39  ;;  %v10936_v57 = vmul.f32 %v10618_v29, %v16368_v59  ;;  %v16372_v39 = vld [vmem:[#allocation75_spill] sm:$0xff]  ;;  %v10956_v59 = vmul.f32 %v10618_v29, %v16374_v40  ;;  %v10976_v40 = vmul.f32 %v10618_v29, %v10226_v35 }
 0x301   :  { %16370 = vst [vmem:[#allocation65_spill] sm:$0xff] %v10940_v25  ;;  %v10948_v41 = vmul.f32 %v10618_v29, %v16372_v39  ;;  %v16381_v25 = vld [vmem:[#allocation79_spill] sm:$0xff] }
 0x302   :  { %16369 = vst [vmem:[#allocation64_spill] sm:$0xff] %v10936_v57  ;;  %v10980_v15 = vmul.f32 %v10618_v29, %v16381_v25  ;;  %v16383_v57 = vld [vmem:[#allocation80_spill] sm:$0xff] }
 0x303   :  { %16371 = vst [vmem:[#allocation66_spill] sm:$0xff] %v10944_v50  ;;  %v16376_v50 = vld [vmem:[#allocation77_spill] sm:$0xff]  ;;  %v10984_v2 = vmul.f32 %v10618_v29, %v16383_v57  ;;  %v11004_v57 = vmul.f32 %v10618_v29, %v10290_v3  ;;  %v11024_v3 = vmul.f32 %v10618_v29, %v10331_v46 }
 0x304   :  { %16373 = vst [vmem:[#allocation67_spill] sm:$0xff] %v10948_v41  ;;  %v10968_v39 = vmul.f32 %v10618_v29, %v16376_v50  ;;  %v16378_v41 = vld [vmem:[#allocation78_spill] sm:$0xff] }
 0x305   :  { %16375 = vst [vmem:[#allocation8_spill] sm:$0xff] %v10964_v58  ;;  %v10972_v18 = vmul.f32 %v10618_v29, %v16378_v41  ;;  %v16384_v58 = vld [vmem:[#allocation81_spill] sm:$0xff] }
 0x306   :  { %16377 = vst [vmem:[#allocation15_spill] sm:$0xff] %v10968_v39  ;;  %v10988_v50 = vmul.f32 %v10618_v29, %v16384_v58  ;;  %v16386_v39 = vld [vmem:[#allocation82_spill] sm:$0xff] }
 0x307   :  { %16379 = vst [vmem:[#allocation22_spill] sm:$0xff] %v10972_v18  ;;  %v10992_v41 = vmul.f32 %v10618_v29, %v16386_v39  ;;  %v16388_v18 = vld [vmem:[#allocation83_spill] sm:$0xff] }
 0x308   :  { %16380 = vst [vmem:[#allocation68_spill] sm:$0xff] %v10976_v40  ;;  %v10996_v35 = vmul.f32 %v10618_v29, %v16388_v18  ;;  %v16389_v40 = vld [vmem:[#allocation84_spill] sm:$0xff] }
 0x309   :  { %16382 = vst [vmem:[#allocation69_spill] sm:$0xff] %v10980_v15  ;;  %v11000_v25 = vmul.f32 %v10618_v29, %v16389_v40  ;;  %v16392_v15 = vld [vmem:[#allocation5_spill] sm:$0xff]  ;;  %v11020_v40 = vmul.f32 %v10618_v29, %v10322_v1  ;;  %v11040_v1 = vmul.f32 %v10618_v29, %v10374_v20 }
 0x30a   :  { %16385 = vst [vmem:[#allocation70_spill] sm:$0xff] %v10988_v50  ;;  %v11008_v58 = vmul.f32 %v10618_v29, %v16392_v15  ;;  %v16394_v50 = vld [vmem:[#allocation6_spill] sm:$0xff]  ;;  %v11028_v15 = vmul.f32 %v10618_v29, %v10346_v8  ;;  %v11048_v8 = vmul.f32 %v10618_v29, %v10396_v21  ;;  %v11068_v21 = vmul.f32 %v10618_v29, %v10441_v32 }
 0x30b   :  { %16387 = vst [vmem:[#allocation71_spill] sm:$0xff] %v10992_v41  ;;  %v11012_v39 = vmul.f32 %v10618_v29, %v16394_v50  ;;  %v16396_v41 = vld [vmem:[#allocation7_spill] sm:$0xff]  ;;  %v11032_v50 = vmul.f32 %v10618_v29, %v10356_v4  ;;  %v11052_v4 = vmul.f32 %v10618_v29, %v10398_v28  ;;  %v11072_v28 = vmul.f32 %v10618_v29, %v10450_v24 }
 0x30c   :  { %16390 = vst [vmem:[#allocation72_spill] sm:$0xff] %v11000_v25  ;;  %v11016_v18 = vmul.f32 %v10618_v29, %v16396_v41  ;;  %v11036_v41 = vmul.f32 %v10618_v29, %v10365_v63  ;;  %v11056_v63 = vmul.f32 %v10618_v29, %v10407_v31  ;;  %v11076_v31 = vmul.f32 %v10618_v29, %v10461_v5  ;;  %v16402_v25 = vld [vmem:[#allocation85_spill] sm:$0xff] }
 0x30d   :  { %16391 = vst [vmem:[#allocation73_spill] sm:$0xff] %v11004_v57  ;;  %v16399_v57 = vld [vmem:[#allocation20_spill] sm:$0xff]  ;;  %v11088_v32 = vmul.f32 %v10618_v29, %v10488_v14  ;;  %v11092_v24 = vmul.f32 %v10618_v29, %v10500_v38  ;;  %v11096_v5 = vmul.f32 %v10618_v29, %v16402_v25  ;;  %v11116_v25 = vadd.f32 %v10629_v52, %v10625_v33 }
 0x30e   :  { %16393 = vst [vmem:[#allocation74_spill] sm:$0xff] %v11008_v58  ;;  %v16398_v58 = vld [vmem:[#allocation12_spill] sm:$0xff] }
 0x30f   :  { %16395 = vst [vmem:[#allocation11_spill] sm:$0xff] %v11012_v39  ;;  %v16397_v39 = vld [vmem:[#allocation9_spill] sm:$0xff]  ;;  %v11060_v20 = vmul.f32 %v10618_v29, %v16398_v58  ;;  %v11080_v58 = vmul.f32 %v10618_v29, %v16399_v57  ;;  %v11100_v57 = vmul.f32 %v10618_v29, %v10518_v16 }
 0x310   :  { %v11044_v46 = vmul.f32 %v10618_v29, %v16397_v39  ;;  %v11064_v39 = vmul.f32 %v10618_v29, %v10430_v44  ;;  %v11084_v44 = vmul.f32 %v10618_v29, %v10472_v48  ;;  %16401 = vst [vmem:[#allocation75_spill] sm:$0xff] %v11088_v32  ;;  %v11104_v48 = vmul.f32 %v10618_v29, %v10522_v49  ;;  %v16405_v32 = vld [vmem:[#allocation87_spill] sm:$0xff] }
 0x311   :  { %16403 = vst [vmem:[#allocation76_spill] sm:$0xff] %v11096_v5  ;;  %v11112_v38 = vmul.f32 %v10618_v29, %v16405_v32  ;;  %v16408_v5 = vld [vmem:[#allocation88_spill] sm:$0xff]  ;;  %v11124_v49 = vadd.f32 %v10633_v30, %v10625_v33  ;;  %v11132_v32 = vadd.f32 %v10641_v19, %v10625_v33 }
 0x312   :  { %16400 = vst [vmem:[#allocation19_spill] sm:$0xff] %v11084_v44  ;;  %v16404_v44 = vld [vmem:[#allocation86_spill] sm:$0xff]  ;;  %v11120_v16 = vmul.f32 %v10618_v29, %v16408_v5 }
 0x313   :  { %v11108_v14 = vmul.f32 %v10618_v29, %v16404_v44  ;;  %16406 = vst [vmem:[#allocation77_spill] sm:$0xff] %v11112_v38  ;;  %v11128_v44 = vadd.f32 %v10637_v23, %v10625_v33  ;;  %v16413_v38 = vld [vmem:[#allocation89_spill] sm:$0xff]  ;;  %v11148_v23 = vadd.f32 %v10664_v6, %v10625_v33 }
 0x314   :  { %16407 = vst [vmem:[#allocation78_spill] sm:$0xff] %v11116_v25  ;;  %v11136_v52 = vmul.f32 %v10618_v29, %v16413_v38  ;;  %v16414_v25 = vld [vmem:[#allocation90_spill] sm:$0xff]  ;;  %v11156_v38 = vadd.f32 %v10668_v36, %v10625_v33  ;;  %v11176_v36 = vadd.f32 %v10649_v60, %v10625_v33  ;;  %v11196_v60 = vadd.f32 %v10708_v22, %v10625_v33 }
 0x315   :  { %16409 = vst [vmem:[#allocation79_spill] sm:$0xff] %v11120_v16  ;;  %v11140_v5 = vmul.f32 %v10618_v29, %v16414_v25  ;;  %v16415_v16 = vld [vmem:[#allocation91_spill] sm:$0xff]  ;;  %v11160_v25 = vadd.f32 %v10672_v27, %v10625_v33  ;;  %v11180_v27 = vadd.f32 %v10696_v37, %v10625_v33 }
 0x316   :  { %16410 = vst [vmem:[#allocation80_spill] sm:$0xff] %v11124_v49  ;;  %v11144_v30 = vmul.f32 %v10618_v29, %v16415_v16  ;;  %v11164_v16 = vadd.f32 %v10676_v53, %v10625_v33  ;;  %v11184_v53 = vadd.f32 %v10653_v26, %v10625_v33 }
 0x317   :  { %16411 = vst [vmem:[#allocation81_spill] sm:$0xff] %v11128_v44  ;;  %v16417_v44 = vld [vmem:[#allocation92_spill] sm:$0xff] }
 0x318   :  { %16412 = vst [vmem:[#allocation82_spill] sm:$0xff] %v11132_v32  ;;  %v11152_v19 = vmul.f32 %v10618_v29, %v16417_v44  ;;  %v16421_v32 = vld [vmem:[#allocation93_spill] sm:$0xff]  ;;  %v11172_v44 = vadd.f32 %v10645_v47, %v10625_v33  ;;  %v11192_v47 = vadd.f32 %v10704_v12, %v10625_v33 }
 0x319   :  { %16416 = vst [vmem:[#allocation83_spill] sm:$0xff] %v11148_v23  ;;  %v11168_v6 = vmul.f32 %v10618_v29, %v16421_v32  ;;  %v11188_v29 = vadd.f32 %v10700_v51, %v10625_v33  ;;  %v16429_v32 = vld [vmem:[#allocation10_spill] sm:$0xff] }
 0x31a   :  { %16418 = vst [vmem:[#allocation84_spill] sm:$0xff] %v11156_v38  ;;  %v11200_v37 = vadd.f32 %v16429_v32, %v10625_v33  ;;  %v16433_v38 = vld [vmem:[#allocation16_spill] sm:$0xff]  ;;  %v11220_v32 = vadd.f32 %v10732_v7, %v10625_v33 }
 0x31b   :  { %16419 = vst [vmem:[#allocation5_spill] sm:$0xff] %v11160_v25  ;;  %v11208_v51 = vadd.f32 %v16433_v38, %v10625_v33 }
 0x31c   :  { %16420 = vst [vmem:[#allocation6_spill] sm:$0xff] %v11164_v16  ;;  %v16431_v16 = vld [vmem:[#allocation14_spill] sm:$0xff] }
 0x31d   :  { %16422 = vst [vmem:[#allocation7_spill] sm:$0xff] %v11172_v44  ;;  %v11204_v26 = vadd.f32 %v16431_v16, %v10625_v33 }
 0x31e   :  { %16423 = vst [vmem:[#allocation9_spill] sm:$0xff] %v11176_v36 }
 0x31f   :  { %16424 = vst [vmem:[#allocation12_spill] sm:$0xff] %v11180_v27  ;;  %v16442_v27 = vld [vmem:[#allocation28_spill] sm:$0xff] }
 0x320   :  { %16425 = vst [vmem:[#allocation20_spill] sm:$0xff] %v11184_v53  ;;  %v11228_v38 = vadd.f32 %v16442_v27, %v10625_v33 }
 0x321   :  { %16426 = vst [vmem:[#allocation85_spill] sm:$0xff] %v11188_v29  ;;  %v16435_v29 = vld [vmem:[#allocation26_spill] sm:$0xff] }
 0x322   :  { %16427 = vst [vmem:[#allocation86_spill] sm:$0xff] %v11192_v47  ;;  %v11212_v12 = vadd.f32 %v16435_v29, %v10625_v33  ;;  %v16437_v47 = vld [vmem:[#allocation17_spill] sm:$0xff] }
 0x323   :  { %16428 = vst [vmem:[#allocation87_spill] sm:$0xff] %v11196_v60  ;;  %v11216_v22 = vadd.f32 %v16437_v47, %v10625_v33  ;;  %v16440_v60 = vld [vmem:[#allocation27_spill] sm:$0xff] }
 0x324   :  { %16430 = vst [vmem:[#allocation88_spill] sm:$0xff] %v11200_v37  ;;  %v11224_v16 = vadd.f32 %v16440_v60, %v10625_v33 }
 0x325   :  { %16432 = vst [vmem:[#allocation89_spill] sm:$0xff] %v11204_v26 }
 0x326   :  { %16434 = vst [vmem:[#allocation90_spill] sm:$0xff] %v11208_v51  ;;  %v16444_v51 = vld [vmem:[#allocation18_spill] sm:$0xff] }
 0x327   :  { %16436 = vst [vmem:[#allocation91_spill] sm:$0xff] %v11212_v12  ;;  %v11232_v29 = vadd.f32 %v16444_v51, %v10625_v33  ;;  %v16446_v12 = vld [vmem:[#allocation21_spill] sm:$0xff] }
 0x328   :  { %16438 = vst [vmem:[#allocation92_spill] sm:$0xff] %v11216_v22  ;;  %v11236_v47 = vadd.f32 %v16446_v12, %v10625_v33  ;;  %v16448_v22 = vld [vmem:[#allocation23_spill] sm:$0xff] }
 0x329   :  { %16439 = vst [vmem:[#allocation93_spill] sm:$0xff] %v11220_v32  ;;  %v11240_v7 = vadd.f32 %v16448_v22, %v10625_v33  ;;  %v16450_v32 = vld [vmem:[#allocation33_spill] sm:$0xff] }
 0x32a   :  { %16441 = vst [vmem:[#allocation10_spill] sm:$0xff] %v11224_v16  ;;  %v11244_v60 = vadd.f32 %v16450_v32, %v10625_v33  ;;  %v16452_v16 = vld [vmem:[#allocation24_spill] sm:$0xff] }
 0x32b   :  { %16443 = vst [vmem:[#allocation14_spill] sm:$0xff] %v11228_v38  ;;  %v11248_v27 = vadd.f32 %v16452_v16, %v10625_v33  ;;  %v16454_v38 = vld [vmem:[#allocation34_spill] sm:$0xff] }
 0x32c   :  { %16445 = vst [vmem:[#allocation16_spill] sm:$0xff] %v11232_v29  ;;  %v11252_v51 = vadd.f32 %v16454_v38, %v10625_v33  ;;  %v16456_v29 = vld [vmem:[#allocation35_spill] sm:$0xff] }
 0x32d   :  { %16447 = vst [vmem:[#allocation26_spill] sm:$0xff] %v11236_v47  ;;  %v11256_v12 = vadd.f32 %v16456_v29, %v10625_v33  ;;  %v16458_v47 = vld [vmem:[#allocation36_spill] sm:$0xff]  ;;  %v11276_v29 = vadd.f32 %v10792_v10, %v10625_v33 }
 0x32e   :  { %16449 = vst [vmem:[#allocation17_spill] sm:$0xff] %v11240_v7  ;;  %v11260_v22 = vadd.f32 %v16458_v47, %v10625_v33  ;;  %v16460_v7 = vld [vmem:[#allocation25_spill] sm:$0xff] }
 0x32f   :  { %16451 = vst [vmem:[#allocation27_spill] sm:$0xff] %v11244_v60  ;;  %v11264_v32 = vadd.f32 %v16460_v7, %v10625_v33  ;;  %v16462_v60 = vld [vmem:[#allocation29_spill] sm:$0xff]  ;;  %v11284_v7 = vadd.f32 %v10796_v13, %v10625_v33 }
 0x330   :  { %16453 = vst [vmem:[#allocation28_spill] sm:$0xff] %v11248_v27  ;;  %v11268_v16 = vadd.f32 %v16462_v60, %v10625_v33  ;;  %v16464_v27 = vld [vmem:[#allocation30_spill] sm:$0xff]  ;;  %v11288_v60 = vadd.f32 %v10800_v56, %v10625_v33 }
 0x331   :  { %16455 = vst [vmem:[#allocation18_spill] sm:$0xff] %v11252_v51  ;;  %v11272_v38 = vadd.f32 %v16464_v27, %v10625_v33  ;;  %v16477_v51 = vld [vmem:[#allocation38_spill] sm:$0xff] }
 0x332   :  { %16457 = vst [vmem:[#allocation21_spill] sm:$0xff] %v11256_v12  ;;  %v16467_v12 = vld [vmem:[#allocation31_spill] sm:$0xff]  ;;  %v11304_v13 = vadd.f32 %v16477_v51, %v10625_v33  ;;  %v11324_v51 = vadd.f32 %v10836_v43, %v10625_v33  ;;  %v16614_v23 = vld [vmem:[#allocation10_spill] sm:$0xff] }
 0x333   :  { %16459 = vst [vmem:[#allocation23_spill] sm:$0xff] %v11260_v22  ;;  %v11280_v47 = vadd.f32 %v16467_v12, %v10625_v33  ;;  %v16471_v22 = vld [vmem:[#allocation41_spill] sm:$0xff] }
 0x334   :  { %16461 = vst [vmem:[#allocation33_spill] sm:$0xff] %v11264_v32  ;;  %v11292_v27 = vadd.f32 %v16471_v22, %v10625_v33 }
 0x335   :  { %16463 = vst [vmem:[#allocation24_spill] sm:$0xff] %v11268_v16 }
 0x336   :  { %16465 = vst [vmem:[#allocation34_spill] sm:$0xff] %v11272_v38  ;;  %v16473_v38 = vld [vmem:[#allocation32_spill] sm:$0xff] }
 0x337   :  { %16466 = vst [vmem:[#allocation35_spill] sm:$0xff] %v11276_v29  ;;  %v11296_v10 = vadd.f32 %v16473_v38, %v10625_v33  ;;  %v16475_v29 = vld [vmem:[#allocation37_spill] sm:$0xff] }
 0x338   :  { %16468 = vst [vmem:[#allocation36_spill] sm:$0xff] %v11280_v47  ;;  %v11300_v12 = vadd.f32 %v16475_v29, %v10625_v33 }
 0x339   :  { %16469 = vst [vmem:[#allocation25_spill] sm:$0xff] %v11284_v7  ;;  %v16479_v7 = vld [vmem:[#allocation46_spill] sm:$0xff]  ;;  %v16617_v26 = vld [vmem:[#allocation21_spill] sm:$0xff] }
 0x33a   :  { %16470 = vst [vmem:[#allocation29_spill] sm:$0xff] %v11288_v60  ;;  %v11308_v56 = vadd.f32 %v16479_v7, %v10625_v33  ;;  %v16481_v60 = vld [vmem:[#allocation39_spill] sm:$0xff] }
 0x33b   :  { %16472 = vst [vmem:[#allocation30_spill] sm:$0xff] %v11292_v27  ;;  %v11312_v22 = vadd.f32 %v16481_v60, %v10625_v33  ;;  %v16483_v27 = vld [vmem:[#allocation47_spill] sm:$0xff] }
 0x33c   :  { %16474 = vst [vmem:[#allocation31_spill] sm:$0xff] %v11296_v10  ;;  %v11316_v38 = vadd.f32 %v16483_v27, %v10625_v33  ;;  %v16485_v10 = vld [vmem:[#allocation48_spill] sm:$0xff] }
 0x33d   :  { %16476 = vst [vmem:[#allocation41_spill] sm:$0xff] %v11300_v12  ;;  %v11320_v29 = vadd.f32 %v16485_v10, %v10625_v33  ;;  %v11340_v10 = vadd.f32 %v10856_v45, %v10625_v33 }
 0x33e   :  { %16478 = vst [vmem:[#allocation32_spill] sm:$0xff] %v11304_v13  ;;  %v16488_v13 = vld [vmem:[#allocation40_spill] sm:$0xff] }
 0x33f   :  { %16480 = vst [vmem:[#allocation37_spill] sm:$0xff] %v11308_v56  ;;  %v11328_v7 = vadd.f32 %v16488_v13, %v10625_v33  ;;  %v16490_v56 = vld [vmem:[#allocation42_spill] sm:$0xff]  ;;  %v11348_v13 = vadd.f32 %v10860_v55, %v10625_v33 }
 0x340   :  { %16482 = vst [vmem:[#allocation38_spill] sm:$0xff] %v11312_v22  ;;  %v11332_v60 = vadd.f32 %v16490_v56, %v10625_v33  ;;  %v16492_v22 = vld [vmem:[#allocation43_spill] sm:$0xff] }
 0x341   :  { %16484 = vst [vmem:[#allocation46_spill] sm:$0xff] %v11316_v38  ;;  %v11336_v27 = vadd.f32 %v16492_v22, %v10625_v33  ;;  %v16622_v12 = vld [vmem:[#allocation29_spill] sm:$0xff] }
 0x342   :  { %16486 = vst [vmem:[#allocation39_spill] sm:$0xff] %v11320_v29  ;;  %v16495_v29 = vld [vmem:[#allocation44_spill] sm:$0xff] }
 0x343   :  { %16487 = vst [vmem:[#allocation47_spill] sm:$0xff] %v11324_v51  ;;  %v11344_v43 = vadd.f32 %v16495_v29, %v10625_v33  ;;  %v16498_v51 = vld [vmem:[#allocation53_spill] sm:$0xff] }
 0x344   :  { %16489 = vst [vmem:[#allocation48_spill] sm:$0xff] %v11328_v7  ;;  %v11352_v56 = vadd.f32 %v16498_v51, %v10625_v33  ;;  %v11372_v51 = vadd.f32 %v10888_v9, %v10625_v33 }
 0x345   :  { %16491 = vst [vmem:[#allocation40_spill] sm:$0xff] %v11332_v60  ;;  %v16500_v60 = vld [vmem:[#allocation54_spill] sm:$0xff] }
 0x346   :  { %16493 = vst [vmem:[#allocation42_spill] sm:$0xff] %v11336_v27  ;;  %v11356_v22 = vadd.f32 %v16500_v60, %v10625_v33  ;;  %v16502_v27 = vld [vmem:[#allocation45_spill] sm:$0xff] }
 0x347   :  { %16494 = vst [vmem:[#allocation43_spill] sm:$0xff] %v11340_v10  ;;  %v11360_v45 = vadd.f32 %v16502_v27, %v10625_v33  ;;  %v16504_v10 = vld [vmem:[#allocation49_spill] sm:$0xff]  ;;  %v16620_v53 = vld [vmem:[#allocation38_spill] sm:$0xff] }
 0x348   :  { %16496 = vst [vmem:[#allocation44_spill] sm:$0xff] %v11344_v43  ;;  %v11364_v29 = vadd.f32 %v16504_v10, %v10625_v33  ;;  %v16506_v43 = vld [vmem:[#allocation50_spill] sm:$0xff]  ;;  %v11384_v10 = vadd.f32 %v10896_v62, %v10625_v33  ;;  %v11404_v62 = vadd.f32 %v10920_v61, %v10625_v33  ;;  %v16623_v36 = vld [vmem:[#allocation37_spill] sm:$0xff] }
 0x349   :  { %16497 = vst [vmem:[#allocation94_spill] sm:$0xff] %v11348_v13  ;;  %v11368_v55 = vadd.f32 %v16506_v43, %v10625_v33  ;;  %v16509_v13 = vld [vmem:[#allocation51_spill] sm:$0xff]  ;;  %v11388_v43 = vadd.f32 %v10900_v42, %v10625_v33 }
 0x34a   :  { %16499 = vst [vmem:[#allocation53_spill] sm:$0xff] %v11352_v56  ;;  %v11376_v60 = vadd.f32 %v16509_v13, %v10625_v33  ;;  %v16518_v56 = vld [vmem:[#allocation56_spill] sm:$0xff] }
 0x34b   :  { %16501 = vst [vmem:[#allocation54_spill] sm:$0xff] %v11356_v22  ;;  %v16510_v22 = vld [vmem:[#allocation59_spill] sm:$0xff] }
 0x34c   :  { %16503 = vst [vmem:[#allocation45_spill] sm:$0xff] %v11360_v45  ;;  %v11380_v27 = vadd.f32 %v16510_v22, %v10625_v33  ;;  %v16514_v45 = vld [vmem:[#allocation52_spill] sm:$0xff]  ;;  %v11400_v22 = vadd.f32 %v16518_v56, %v10625_v33  ;;  %v11420_v56 = vadd.f32 %v10932_v11, %v10625_v33 }
 0x34d   :  { %16505 = vst [vmem:[#allocation49_spill] sm:$0xff] %v11364_v29  ;;  %v11392_v9 = vadd.f32 %v16514_v45, %v10625_v33  ;;  %v11412_v45 = vadd.f32 %v10924_v34, %v10625_v33 }
 0x34e   :  { %16507 = vst [vmem:[#allocation50_spill] sm:$0xff] %v11368_v55  ;;  %v16626_v16 = vld [vmem:[#allocation43_spill] sm:$0xff] }
 0x34f   :  { %16508 = vst [vmem:[#allocation95_spill] sm:$0xff] %v11372_v51  ;;  %v16516_v51 = vld [vmem:[#allocation55_spill] sm:$0xff] }
 0x350   :  { %16511 = vst [vmem:[#allocation51_spill] sm:$0xff] %v11380_v27  ;;  %v11396_v13 = vadd.f32 %v16516_v51, %v10625_v33  ;;  %v11416_v51 = vadd.f32 %v10928_v54, %v10625_v33  ;;  %v11436_v54 = vadd.f32 %v10952_v0, %v10625_v33 }
 0x351   :  { %16512 = vst [vmem:[#allocation59_spill] sm:$0xff] %v11384_v10  ;;  %v16521_v10 = vld [vmem:[#allocation57_spill] sm:$0xff] }
 0x352   :  { %16513 = vst [vmem:[#allocation96_spill] sm:$0xff] %v11388_v43  ;;  %v11408_v42 = vadd.f32 %v16521_v10, %v10625_v33  ;;  %v16627_v7 = vld [vmem:[#allocation53_spill] sm:$0xff] }
 0x353   :  { %16515 = vst [vmem:[#allocation52_spill] sm:$0xff] %v11392_v9 }
 0x354   :  { %16517 = vst [vmem:[#allocation55_spill] sm:$0xff] %v11396_v13  ;;  %v16528_v13 = vld [vmem:[#allocation60_spill] sm:$0xff] }
 0x355   :  { %16519 = vst [vmem:[#allocation56_spill] sm:$0xff] %v11400_v22  ;;  %v16526_v22 = vld [vmem:[#allocation58_spill] sm:$0xff]  ;;  %v11428_v10 = vadd.f32 %v16528_v13, %v10625_v33  ;;  %v11448_v13 = vadd.f32 %v10960_v17, %v10625_v33  ;;  %v11468_v17 = vadd.f32 %v10984_v2, %v10625_v33 }
 0x356   :  { %16520 = vst [vmem:[#allocation97_spill] sm:$0xff] %v11404_v62  ;;  %v11424_v61 = vadd.f32 %v16526_v22, %v10625_v33  ;;  %v11444_v22 = vadd.f32 %v10956_v59, %v10625_v33  ;;  %v16628_v29 = vld [vmem:[#allocation95_spill] sm:$0xff] }
 0x357   :  { %16522 = vst [vmem:[#allocation57_spill] sm:$0xff] %v11408_v42  ;;  %v16530_v42 = vld [vmem:[#allocation61_spill] sm:$0xff] }
 0x358   :  { %16523 = vst [vmem:[#allocation98_spill] sm:$0xff] %v11412_v45  ;;  %v11432_v34 = vadd.f32 %v16530_v42, %v10625_v33  ;;  %v16533_v45 = vld [vmem:[#allocation62_spill] sm:$0xff]  ;;  %v16629_v9 = vld [vmem:[#allocation59_spill] sm:$0xff] }
 0x359   :  { %16524 = vst [vmem:[#allocation99_spill] sm:$0xff] %v11416_v51  ;;  %v11440_v11 = vadd.f32 %v16533_v45, %v10625_v33  ;;  %v16543_v51 = vld [vmem:[#allocation65_spill] sm:$0xff]  ;;  %v16830_v55 = vrot.slane %v16629_v9, 4 }
 0x35a   :  { %16525 = vst [vmem:[#allocation100_spill] sm:$0xff] %v11420_v56  ;;  %v16537_v56 = vld [vmem:[#allocation8_spill] sm:$0xff]  ;;  %v11464_v59 = vadd.f32 %v16543_v51, %v10625_v33  ;;  %v11484_v51 = vadd.f32 %v10996_v35, %v10625_v33  ;;  %v11504_v35 = vadd.f32 %v11020_v40, %v10625_v33  ;;  %v11524_v40 = vadd.f32 %v11040_v1, %v10625_v33 }
 0x35b   :  { %16527 = vst [vmem:[#allocation58_spill] sm:$0xff] %v11424_v61  ;;  %v11452_v42 = vadd.f32 %v16537_v56, %v10625_v33  ;;  %v16539_v61 = vld [vmem:[#allocation63_spill] sm:$0xff]  ;;  %v11544_v1 = vadd.f32 %v11060_v20, %v10625_v33  ;;  %v11564_v20 = vadd.f32 %v11080_v58, %v10625_v33  ;;  %v11584_v58 = vadd.f32 %v11100_v57, %v10625_v33 }
 0x35c   :  { %16529 = vst [vmem:[#allocation60_spill] sm:$0xff] %v11428_v10  ;;  %v11456_v0 = vadd.f32 %v16539_v61, %v10625_v33  ;;  %v11604_v57 = vadd.f32 %v11136_v52, %v10625_v33  ;;  %v11624_v52 = vadd.f32 %v11152_v19, %v10625_v33 }
 0x35d   :  { %16531 = vst [vmem:[#allocation61_spill] sm:$0xff] %v11432_v34 }
 0x35e   :  { %16532 = vst [vmem:[#allocation101_spill] sm:$0xff] %v11436_v54  ;;  %v16541_v54 = vld [vmem:[#allocation64_spill] sm:$0xff] }
 0x35f   :  { %16534 = vst [vmem:[#allocation62_spill] sm:$0xff] %v11440_v11  ;;  %v11460_v45 = vadd.f32 %v16541_v54, %v10625_v33 }
 0x360   :  { %16535 = vst [vmem:[#allocation102_spill] sm:$0xff] %v11444_v22  ;;  %v16550_v22 = vld [vmem:[#allocation71_spill] sm:$0xff] }
 0x361   :  { %16536 = vst [vmem:[#allocation103_spill] sm:$0xff] %v11448_v13  ;;  %v16546_v13 = vld [vmem:[#allocation66_spill] sm:$0xff]  ;;  %v11480_v54 = vadd.f32 %v16550_v22, %v10625_v33  ;;  %v11500_v22 = vadd.f32 %v11016_v18, %v10625_v33  ;;  %v11520_v18 = vadd.f32 %v11036_v41, %v10625_v33  ;;  %v11540_v41 = vadd.f32 %v11056_v63, %v10625_v33  ;;  %v16630_v10 = vld [vmem:[#allocation99_spill] sm:$0xff] }
 0x362   :  { %16538 = vst [vmem:[#allocation8_spill] sm:$0xff] %v11452_v42  ;;  %v11472_v56 = vadd.f32 %v16546_v13, %v10625_v33  ;;  %v16548_v42 = vld [vmem:[#allocation70_spill] sm:$0xff]  ;;  %v11560_v63 = vadd.f32 %v11076_v31, %v10625_v33 }
 0x363   :  { %16540 = vst [vmem:[#allocation63_spill] sm:$0xff] %v11456_v0  ;;  %v11476_v61 = vadd.f32 %v16548_v42, %v10625_v33 }
 0x364   :  { %16542 = vst [vmem:[#allocation64_spill] sm:$0xff] %v11460_v45 }
 0x365   :  { %16544 = vst [vmem:[#allocation65_spill] sm:$0xff] %v11464_v59  ;;  %v16553_v59 = vld [vmem:[#allocation67_spill] sm:$0xff]  ;;  %v16632_v43 = vld [vmem:[#allocation101_spill] sm:$0xff] }
 0x366   :  { %16545 = vst [vmem:[#allocation104_spill] sm:$0xff] %v11468_v17  ;;  %v11488_v2 = vadd.f32 %v16553_v59, %v10625_v33  ;;  %v16555_v17 = vld [vmem:[#allocation15_spill] sm:$0xff]  ;;  %v11508_v59 = vadd.f32 %v11024_v3, %v10625_v33  ;;  %v11528_v3 = vadd.f32 %v11044_v46, %v10625_v33  ;;  %v11548_v46 = vadd.f32 %v11064_v39, %v10625_v33 }
 0x367   :  { %16547 = vst [vmem:[#allocation66_spill] sm:$0xff] %v11472_v56  ;;  %v11492_v13 = vadd.f32 %v16555_v17, %v10625_v33  ;;  %v16556_v56 = vld [vmem:[#allocation22_spill] sm:$0xff]  ;;  %v11512_v17 = vadd.f32 %v11028_v15, %v10625_v33  ;;  %v11532_v15 = vadd.f32 %v11048_v8, %v10625_v33  ;;  %v11552_v8 = vadd.f32 %v11068_v21, %v10625_v33 }
 0x368   :  { %16549 = vst [vmem:[#allocation70_spill] sm:$0xff] %v11476_v61  ;;  %v11496_v42 = vadd.f32 %v16556_v56, %v10625_v33  ;;  %v11516_v56 = vadd.f32 %v11032_v50, %v10625_v33  ;;  %v11536_v50 = vadd.f32 %v11052_v4, %v10625_v33  ;;  %v11556_v4 = vadd.f32 %v11072_v28, %v10625_v33  ;;  %v16589_v61 = vld [vmem:[#allocation68_spill] sm:$0xff]  ;;  %v16633_v11 = vld [vmem:[#allocation102_spill] sm:$0xff]  ;;  %v16634_v62 = vld [vmem:[#allocation103_spill] sm:$0xff] }
 0x369   :  { %16551 = vst [vmem:[#allocation71_spill] sm:$0xff] %v11480_v54  ;;  %v11576_v28 = vadd.f32 %v11092_v24, %v10625_v33 }
 0x36a   :  { %16552 = vst [vmem:[#allocation105_spill] sm:$0xff] %v11484_v51  ;;  %v16584_v51 = vld [vmem:[#allocation79_spill] sm:$0xff] }
 0x36b   :  { %16554 = vst [vmem:[#allocation67_spill] sm:$0xff] %v11488_v2  ;;  %v16590_v2 = vld [vmem:[#allocation69_spill] sm:$0xff] }
 0x36c   :  { %16557 = vst [vmem:[#allocation15_spill] sm:$0xff] %v11496_v42 }
 0x36d   :  { %16558 = vst [vmem:[#allocation22_spill] sm:$0xff] %v11504_v35  ;;  %v16636_v45 = vld [vmem:[#allocation104_spill] sm:$0xff] }
 0x36e   :  { %16559 = vst [vmem:[#allocation106_spill] sm:$0xff] %v11512_v17  ;;  %v16631_v34 = vld [vmem:[#allocation66_spill] sm:$0xff] }
 0x36f   :  { %16560 = vst [vmem:[#allocation107_spill] sm:$0xff] %v11520_v18 }
 0x370   :  { %16561 = vst [vmem:[#allocation108_spill] sm:$0xff] %v11524_v40 }
 0x371   :  { %16562 = vst [vmem:[#allocation109_spill] sm:$0xff] %v11528_v3 }
 0x372   :  { %16563 = vst [vmem:[#allocation110_spill] sm:$0xff] %v11532_v15 }
 0x373   :  { %16564 = vst [vmem:[#allocation111_spill] sm:$0xff] %v11536_v50  ;;  %v16574_v50 = vld [vmem:[#allocation75_spill] sm:$0xff] }
 0x374   :  { %16565 = vst [vmem:[#allocation112_spill] sm:$0xff] %v11540_v41  ;;  %v11572_v21 = vadd.f32 %v16574_v50, %v10625_v33  ;;  %v11592_v50 = vadd.f32 %v11108_v14, %v10625_v33  ;;  %v11612_v14 = vadd.f32 %v11144_v30, %v10625_v33 }
 0x375   :  { %16566 = vst [vmem:[#allocation113_spill] sm:$0xff] %v11544_v1  ;;  %v16572_v1 = vld [vmem:[#allocation19_spill] sm:$0xff] }
 0x376   :  { %16567 = vst [vmem:[#allocation114_spill] sm:$0xff] %v11548_v46  ;;  %v11568_v39 = vadd.f32 %v16572_v1, %v10625_v33  ;;  %v11588_v1 = vadd.f32 %v11104_v48, %v10625_v33  ;;  %v11608_v48 = vadd.f32 %v11140_v5, %v10625_v33  ;;  %v11628_v5 = vadd.f32 %v11168_v6, %v10625_v33 }
 0x377   :  { %16568 = vst [vmem:[#allocation115_spill] sm:$0xff] %v11552_v8  ;;  %v16577_v8 = vld [vmem:[#allocation76_spill] sm:$0xff]  ;;  %v16650_v6 = vrot.slane %v11124_v49, 2 }
 0x378   :  { %16569 = vst [vmem:[#allocation116_spill] sm:$0xff] %v11556_v4  ;;  %v11580_v31 = vadd.f32 %v16577_v8, %v10625_v33  ;;  %v11600_v8 = vadd.f32 %v16584_v51, %v10625_v33  ;;  %v11620_v51 = vadd.f32 %v16590_v2, %v10625_v33 }
 0x379   :  { %16570 = vst [vmem:[#allocation117_spill] sm:$0xff] %v11560_v63  ;;  %v16582_v63 = vld [vmem:[#allocation77_spill] sm:$0xff] }
 0x37a   :  { %16571 = vst [vmem:[#allocation118_spill] sm:$0xff] %v11564_v20  ;;  %v11596_v24 = vadd.f32 %v16582_v63, %v10625_v33  ;;  %v11616_v63 = vadd.f32 %v16589_v61, %v10625_v33 }
 0x37b   :  { %16573 = vst [vmem:[#allocation19_spill] sm:$0xff] %v11568_v39  ;;  %v16638_v39 = vmov %v11588_v1 }
 0x37c   :  { %16575 = vst [vmem:[#allocation75_spill] sm:$0xff] %v11572_v21 }
 0x37d   :  { %16576 = vst [vmem:[#allocation119_spill] sm:$0xff] %v11576_v28  ;;  %v16640_v28 = vmov %v11596_v24 }
 0x37e   :  { %16578 = vst [vmem:[#allocation76_spill] sm:$0xff] %v11580_v31 }
 0x37f   :  { %16579 = vst [vmem:[#allocation120_spill] sm:$0xff] %v11584_v58 }
 0x380   :  { %16580 = vst [vmem:[#allocation121_spill] sm:$0xff] %v11588_v1 }
 0x381   :  { %16581 = vst [vmem:[#allocation122_spill] sm:$0xff] %v11592_v50 }
 0x382   :  { %16583 = vst [vmem:[#allocation77_spill] sm:$0xff] %v11596_v24 }
 0x383   :  { %16585 = vst [vmem:[#allocation79_spill] sm:$0xff] %v11600_v8  ;;  %v16596_v8 = vld [vmem:[#allocation73_spill] sm:$0xff] }
 0x384   :  { %16586 = vst [vmem:[#allocation123_spill] sm:$0xff] %v11604_v57  ;;  %v11636_v61 = vadd.f32 %v16596_v8, %v10625_v33  ;;  %v16600_v57 = vld [vmem:[#allocation11_spill] sm:$0xff] }
 0x385   :  { %16587 = vst [vmem:[#allocation124_spill] sm:$0xff] %v11608_v48  ;;  %v16594_v48 = vld [vmem:[#allocation72_spill] sm:$0xff]  ;;  %v11644_v19 = vadd.f32 %v16600_v57, %v10625_v33  ;;  %v11895_v57 = vrot.slane %v16650_v6, 9  ;;  %v16668_v6 = vrot.slane %v11172_v44, 6 }
 0x386   :  { %16588 = vst [vmem:[#allocation125_spill] sm:$0xff] %v11612_v14  ;;  %v11632_v30 = vadd.f32 %v16594_v48, %v10625_v33  ;;  %v16598_v14 = vld [vmem:[#allocation74_spill] sm:$0xff] }
 0x387   :  { %16591 = vst [vmem:[#allocation68_spill] sm:$0xff] %v11620_v51  ;;  %v11640_v2 = vadd.f32 %v16598_v14, %v10625_v33  ;;  %v16604_v33 = vld [vmem:[#allocation82_spill] sm:$0xff] }
 0x388   :  { %16592 = vst [vmem:[#allocation69_spill] sm:$0xff] %v11624_v52  ;;  %v16602_v52 = vld [vmem:[#allocation78_spill] sm:$0xff] }
 0x389   :  { %16593 = vst [vmem:[#allocation126_spill] sm:$0xff] %v11628_v5  ;;  %v16644_v50 = vrot.slane %v16602_v52, 2  ;;  %v16646_v1 = vrot.slane %v16602_v52, 4  ;;  %v16648_v58 = vrot.slane %v16602_v52, 6  ;;  %v16652_v5 = vrot.slane %v11124_v49, 4 }
 0x38a   :  { %16595 = vst [vmem:[#allocation72_spill] sm:$0xff] %v11632_v30 }
 0x38b   :  { %16597 = vst [vmem:[#allocation73_spill] sm:$0xff] %v11636_v61  ;;  %v16603_v61 = vld [vmem:[#allocation81_spill] sm:$0xff]  ;;  %v11882_v21 = vrot.slane %v16644_v50, 9  ;;  %v11886_v8 = vrot.slane %v16646_v1, 9  ;;  %v11890_v14 = vrot.slane %v16648_v58, 9  ;;  %v11899_v48 = vrot.slane %v16652_v5, 9 }
 0x38c   :  { %16599 = vst [vmem:[#allocation74_spill] sm:$0xff] %v11640_v2  ;;  %v16658_v24 = vrot.slane %v16603_v61, 6  ;;  %v16662_v50 = vrot.slane %v16604_v33, 4 }
 0x38d   :  { %16601 = vst [vmem:[#allocation11_spill] sm:$0xff] %v11644_v19  ;;  %v16610_v19 = vld [vmem:[#allocation26_spill] sm:$0xff] }
 0x38e   :  { %16645 = vst [vmem:[#allocation78_spill] sm:$0xff] %v11882_v21  ;;  %v16654_v21 = vrot.slane %v16603_v61, 2 }
 0x38f   :  { %16647 = vst [vmem:[#allocation37_spill] sm:$0xff] %v11886_v8  ;;  %v16656_v8 = vrot.slane %v16603_v61, 4 }
 0x390   :  { %16649 = vst [vmem:[#allocation95_spill] sm:$0xff] %v11890_v14  ;;  %v11904_v1 = vrot.slane %v16654_v21, 9  ;;  %v11912_v14 = vrot.slane %v16658_v24, 9  ;;  %v16692_v21 = vld [vmem:[#allocation85_spill] sm:$0xff] }
 0x391   :  { %16651 = vst [vmem:[#allocation101_spill] sm:$0xff] %v11895_v57  ;;  %v11908_v58 = vrot.slane %v16656_v8, 9  ;;  %v16660_v57 = vrot.slane %v16604_v33, 2 }
 0x392   :  { %16653 = vst [vmem:[#allocation103_spill] sm:$0xff] %v11899_v48  ;;  %v11921_v48 = vrot.slane %v16662_v50, 9 }
 0x393   :  { %16655 = vst [vmem:[#allocation121_spill] sm:$0xff] %v11904_v1  ;;  %v11917_v5 = vrot.slane %v16660_v57, 9  ;;  %v16664_v1 = vrot.slane %v11172_v44, 2  ;;  %v16670_v57 = vld [vmem:[#allocation9_spill] sm:$0xff] }
 0x394   :  { %16657 = vst [vmem:[#allocation127_spill] sm:$0xff] %v11908_v58  ;;  %v16666_v58 = vrot.slane %v11172_v44, 4  ;;  %v16671_v33 = vrot.slane %v16670_v57, 4  ;;  %v16680_v57 = vrot.slane %v11200_v37, 4 }
 0x395   :  { %16659 = vst [vmem:[#allocation128_spill] sm:$0xff] %v11912_v14  ;;  %v11926_v8 = vrot.slane %v16664_v1, 9  ;;  %v11934_v14 = vrot.slane %v16668_v6, 9 }
 0x396   :  { %16661 = vst [vmem:[#allocation129_spill] sm:$0xff] %v11917_v5  ;;  %v11930_v24 = vrot.slane %v16666_v58, 9  ;;  %v11939_v50 = vrot.slane %v16671_v33, 9  ;;  %v11957_v33 = vrot.slane %v16680_v57, 9 }
 0x397   :  { %16663 = vst [vmem:[#allocation130_spill] sm:$0xff] %v11921_v48  ;;  %v16673_v48 = vld [vmem:[#allocation20_spill] sm:$0xff] }
 0x398   :  { %16665 = vst [vmem:[#allocation131_spill] sm:$0xff] %v11926_v8  ;;  %v16674_v61 = vrot.slane %v16673_v48, 2  ;;  %v16676_v8 = vrot.slane %v16673_v48, 4 }
 0x399   :  { %16667 = vst [vmem:[#allocation132_spill] sm:$0xff] %v11930_v24  ;;  %v16678_v24 = vrot.slane %v16673_v48, 6 }
 0x39a   :  { %16669 = vst [vmem:[#allocation133_spill] sm:$0xff] %v11934_v14  ;;  %v11944_v1 = vrot.slane %v16674_v61, 9  ;;  %v11948_v58 = vrot.slane %v16676_v8, 9  ;;  %v16685_v8 = vld [vmem:[#allocation12_spill] sm:$0xff] }
 0x39b   :  { %16672 = vst [vmem:[#allocation134_spill] sm:$0xff] %v11939_v50  ;;  %v11952_v6 = vrot.slane %v16678_v24, 9  ;;  %v16682_v50 = vld [vmem:[#allocation83_spill] sm:$0xff]  ;;  %v16686_v48 = vrot.slane %v16685_v8, 2  ;;  %v16688_v5 = vrot.slane %v16685_v8, 4  ;;  %v16690_v57 = vrot.slane %v16685_v8, 6 }
 0x39c   :  { %16675 = vst [vmem:[#allocation135_spill] sm:$0xff] %v11944_v1  ;;  %v16693_v1 = vrot.slane %v16692_v21, 2 }
 0x39d   :  { %16677 = vst [vmem:[#allocation136_spill] sm:$0xff] %v11948_v58  ;;  %v11966_v24 = vrot.slane %v16686_v48, 9  ;;  %v16695_v58 = vrot.slane %v16692_v21, 4  ;;  %v16697_v48 = vld [vmem:[#allocation86_spill] sm:$0xff] }
 0x39e   :  { %16679 = vst [vmem:[#allocation137_spill] sm:$0xff] %v11952_v6  ;;  %v11970_v6 = vrot.slane %v16688_v5, 9  ;;  %v11979_v61 = vrot.slane %v16693_v1, 9  ;;  %v16698_v44 = vrot.slane %v16697_v48, 2  ;;  %v16702_v14 = vrot.slane %v16697_v48, 6  ;;  %v16704_v1 = vld [vmem:[#allocation87_spill] sm:$0xff] }
 0x39f   :  { %16681 = vst [vmem:[#allocation138_spill] sm:$0xff] %v11957_v33  ;;  %v11974_v33 = vrot.slane %v16690_v57, 9  ;;  %v11983_v49 = vrot.slane %v16695_v58, 9  ;;  %v16705_v21 = vrot.slane %v16704_v1, 2 }
 0x3a0   :  { %16687 = vst [vmem:[#allocation12_spill] sm:$0xff] %v11966_v24  ;;  %v11988_v5 = vrot.slane %v16698_v44, 9  ;;  %v16707_v24 = vrot.slane %v16704_v1, 4  ;;  %v16736_v44 = vld [vmem:[#allocation18_spill] sm:$0xff] }
 0x3a1   :  { %16689 = vst [vmem:[#allocation139_spill] sm:$0xff] %v11970_v6  ;;  %v16700_v6 = vrot.slane %v16697_v48, 4  ;;  %v12001_v58 = vrot.slane %v16705_v21, 9  ;;  %v16715_v21 = vld [vmem:[#allocation17_spill] sm:$0xff] }
 0x3a2   :  { %16691 = vst [vmem:[#allocation140_spill] sm:$0xff] %v11974_v33  ;;  %v11996_v33 = vrot.slane %v16702_v14, 9  ;;  %v16716_v1 = vrot.slane %v16715_v21, 4  ;;  %v16725_v21 = vrot.slane %v11264_v32, 4 }
 0x3a3   :  { %16694 = vst [vmem:[#allocation141_spill] sm:$0xff] %v11979_v61  ;;  %v11992_v57 = vrot.slane %v16700_v6, 9  ;;  %v16713_v61 = vrot.slane %v16610_v19, 6 }
 0x3a4   :  { %16696 = vst [vmem:[#allocation142_spill] sm:$0xff] %v11983_v49  ;;  %v12005_v49 = vrot.slane %v16707_v24, 9  ;;  %v12023_v24 = vrot.slane %v16716_v1, 9  ;;  %v12041_v1 = vrot.slane %v16725_v21, 9 }
 0x3a5   :  { %16699 = vst [vmem:[#allocation143_spill] sm:$0xff] %v11988_v5  ;;  %v16709_v5 = vrot.slane %v16610_v19, 2 }
 0x3a6   :  { %16701 = vst [vmem:[#allocation144_spill] sm:$0xff] %v11992_v57  ;;  %v16711_v57 = vrot.slane %v16610_v19, 4 }
 0x3a7   :  { %16703 = vst [vmem:[#allocation145_spill] sm:$0xff] %v11996_v33  ;;  %v12010_v6 = vrot.slane %v16709_v5, 9  ;;  %v12018_v33 = vrot.slane %v16713_v61, 9 }
 0x3a8   :  { %16706 = vst [vmem:[#allocation146_spill] sm:$0xff] %v12001_v58  ;;  %v12014_v14 = vrot.slane %v16711_v57, 9 }
 0x3a9   :  { %16708 = vst [vmem:[#allocation147_spill] sm:$0xff] %v12005_v49  ;;  %v16718_v49 = vld [vmem:[#allocation28_spill] sm:$0xff] }
 0x3aa   :  { %16710 = vst [vmem:[#allocation148_spill] sm:$0xff] %v12010_v6  ;;  %v16719_v48 = vrot.slane %v16718_v49, 2  ;;  %v16721_v6 = vrot.slane %v16718_v49, 4 }
 0x3ab   :  { %16712 = vst [vmem:[#allocation149_spill] sm:$0xff] %v12014_v14  ;;  %v16723_v14 = vrot.slane %v16718_v49, 6 }
 0x3ac   :  { %16714 = vst [vmem:[#allocation150_spill] sm:$0xff] %v12018_v33  ;;  %v12028_v5 = vrot.slane %v16719_v48, 9  ;;  %v12032_v57 = vrot.slane %v16721_v6, 9  ;;  %v16729_v6 = vld [vmem:[#allocation27_spill] sm:$0xff]  ;;  %v16745_v33 = vrot.slane %v16617_v26, 4 }
 0x3ad   :  { %16717 = vst [vmem:[#allocation151_spill] sm:$0xff] %v12023_v24  ;;  %v12036_v61 = vrot.slane %v16723_v14, 9  ;;  %v16727_v24 = vld [vmem:[#allocation91_spill] sm:$0xff]  ;;  %v16730_v49 = vrot.slane %v16729_v6, 2  ;;  %v16732_v58 = vrot.slane %v16729_v6, 4  ;;  %v16734_v21 = vrot.slane %v16729_v6, 6 }
 0x3ae   :  { %16720 = vst [vmem:[#allocation152_spill] sm:$0xff] %v12028_v5  ;;  %v16737_v5 = vrot.slane %v16736_v44, 2 }
 0x3af   :  { %16722 = vst [vmem:[#allocation153_spill] sm:$0xff] %v12032_v57  ;;  %v12050_v14 = vrot.slane %v16730_v49, 9  ;;  %v16739_v57 = vrot.slane %v16736_v44, 4  ;;  %v16741_v49 = vrot.slane %v16736_v44, 6 }
 0x3b0   :  { %16724 = vst [vmem:[#allocation154_spill] sm:$0xff] %v12036_v61  ;;  %v12054_v61 = vrot.slane %v16732_v58, 9  ;;  %v12063_v48 = vrot.slane %v16737_v5, 9  ;;  %v16747_v5 = vrot.slane %v16617_v26, 6 }
 0x3b1   :  { %16726 = vst [vmem:[#allocation155_spill] sm:$0xff] %v12041_v1  ;;  %v12058_v1 = vrot.slane %v16734_v21, 9  ;;  %v12067_v19 = vrot.slane %v16739_v57, 9  ;;  %v16749_v57 = vld [vmem:[#allocation23_spill] sm:$0xff] }
 0x3b2   :  { %16731 = vst [vmem:[#allocation156_spill] sm:$0xff] %v12050_v14  ;;  %v12071_v14 = vrot.slane %v16741_v49, 9  ;;  %v16750_v44 = vrot.slane %v16749_v57, 2  ;;  %v16752_v58 = vrot.slane %v16749_v57, 4 }
 0x3b3   :  { %16733 = vst [vmem:[#allocation157_spill] sm:$0xff] %v12054_v61  ;;  %v16743_v61 = vrot.slane %v16617_v26, 2 }
 0x3b4   :  { %16735 = vst [vmem:[#allocation158_spill] sm:$0xff] %v12058_v1  ;;  %v12080_v1 = vrot.slane %v16745_v33, 9  ;;  %v12089_v49 = vrot.slane %v16750_v44, 9  ;;  %v16756_v33 = vld [vmem:[#allocation41_spill] sm:$0xff] }
 0x3b5   :  { %16738 = vst [vmem:[#allocation159_spill] sm:$0xff] %v12063_v48  ;;  %v12076_v21 = vrot.slane %v16743_v61, 9  ;;  %v12084_v48 = vrot.slane %v16747_v5, 9  ;;  %v16754_v61 = vrot.slane %v16749_v57, 6  ;;  %v16757_v26 = vrot.slane %v16756_v33, 2 }
 0x3b6   :  { %16740 = vst [vmem:[#allocation160_spill] sm:$0xff] %v12067_v19  ;;  %v16759_v19 = vrot.slane %v16756_v33, 4  ;;  %v16761_v44 = vrot.slane %v16756_v33, 6 }
 0x3b7   :  { %16742 = vst [vmem:[#allocation161_spill] sm:$0xff] %v12071_v14  ;;  %v12093_v14 = vrot.slane %v16752_v58, 9  ;;  %v12102_v5 = vrot.slane %v16757_v26, 9  ;;  %v16763_v58 = vld [vmem:[#allocation32_spill] sm:$0xff] }
 0x3b8   :  { %16744 = vst [vmem:[#allocation162_spill] sm:$0xff] %v12076_v21  ;;  %v12097_v21 = vrot.slane %v16754_v61, 9  ;;  %v16764_v57 = vrot.slane %v16763_v58, 2 }
 0x3b9   :  { %16746 = vst [vmem:[#allocation163_spill] sm:$0xff] %v12080_v1  ;;  %v16766_v1 = vrot.slane %v16763_v58, 4 }
 0x3ba   :  { %16748 = vst [vmem:[#allocation164_spill] sm:$0xff] %v12084_v48  ;;  %v12106_v48 = vrot.slane %v16759_v19, 9  ;;  %v12115_v61 = vrot.slane %v16764_v57, 9  ;;  %v16774_v57 = vld [vmem:[#allocation48_spill] sm:$0xff] }
 0x3bb   :  { %16751 = vst [vmem:[#allocation165_spill] sm:$0xff] %v12089_v49  ;;  %v12110_v49 = vrot.slane %v16761_v44, 9  ;;  %v16775_v58 = vrot.slane %v16774_v57, 2  ;;  %v16777_v26 = vrot.slane %v16774_v57, 4 }
 0x3bc   :  { %16753 = vst [vmem:[#allocation166_spill] sm:$0xff] %v12093_v14  ;;  %v16772_v14 = vrot.slane %v16620_v53, 6 }
 0x3bd   :  { %16755 = vst [vmem:[#allocation167_spill] sm:$0xff] %v12097_v21  ;;  %v12119_v21 = vrot.slane %v16766_v1, 9  ;;  %v12137_v1 = vrot.slane %v16775_v58, 9  ;;  %v16784_v58 = vrot.slane %v16623_v36, 4 }
 0x3be   :  { %16758 = vst [vmem:[#allocation168_spill] sm:$0xff] %v12102_v5  ;;  %v16768_v5 = vrot.slane %v16620_v53, 2 }
 0x3bf   :  { %16760 = vst [vmem:[#allocation169_spill] sm:$0xff] %v12106_v48  ;;  %v16770_v48 = vrot.slane %v16620_v53, 4  ;;  %v16790_v53 = vrot.slane %v11316_v38, 4 }
 0x3c0   :  { %16762 = vst [vmem:[#allocation170_spill] sm:$0xff] %v12110_v49  ;;  %v12124_v19 = vrot.slane %v16768_v5, 9  ;;  %v12132_v49 = vrot.slane %v16772_v14, 9  ;;  %v16779_v5 = vld [vmem:[#allocation35_spill] sm:$0xff] }
 0x3c1   :  { %16765 = vst [vmem:[#allocation171_spill] sm:$0xff] %v12115_v61  ;;  %v12128_v44 = vrot.slane %v16770_v48, 9  ;;  %v16782_v61 = vrot.slane %v16623_v36, 2  ;;  %v12167_v14 = vrot.slane %v16790_v53, 9 }
 0x3c2   :  { %16767 = vst [vmem:[#allocation172_spill] sm:$0xff] %v12119_v21  ;;  %v12141_v21 = vrot.slane %v16777_v26, 9  ;;  %v16786_v26 = vrot.slane %v16623_v36, 6 }
 0x3c3   :  { %16769 = vst [vmem:[#allocation173_spill] sm:$0xff] %v12124_v19 }
 0x3c4   :  { %16771 = vst [vmem:[#allocation174_spill] sm:$0xff] %v12128_v44  ;;  %v16788_v44 = vrot.slane %v11316_v38, 2 }
 0x3c5   :  { %16773 = vst [vmem:[#allocation175_spill] sm:$0xff] %v12132_v49  ;;  %v12150_v49 = vrot.slane %v16782_v61, 9  ;;  %v16792_v61 = vld [vmem:[#allocation39_spill] sm:$0xff] }
 0x3c6   :  { %16776 = vst [vmem:[#allocation176_spill] sm:$0xff] %v12137_v1  ;;  %v12154_v1 = vrot.slane %v16784_v58, 9  ;;  %v12163_v19 = vrot.slane %v16788_v44, 9  ;;  %v16793_v48 = vrot.slane %v16792_v61, 2  ;;  %v16797_v33 = vrot.slane %v16792_v61, 6  ;;  %v16799_v44 = vld [vmem:[#allocation47_spill] sm:$0xff] }
 0x3c7   :  { %16778 = vst [vmem:[#allocation177_spill] sm:$0xff] %v12141_v21  ;;  %v12158_v21 = vrot.slane %v16786_v26, 9  ;;  %v16800_v38 = vrot.slane %v16799_v44, 2  ;;  %v16802_v6 = vrot.slane %v16799_v44, 4  ;;  %v16826_v44 = vrot.slane %v11380_v27, 4 }
 0x3c8   :  { %16783 = vst [vmem:[#allocation178_spill] sm:$0xff] %v12150_v49  ;;  %v12172_v58 = vrot.slane %v16793_v48, 9  ;;  %v16804_v48 = vld [vmem:[#allocation49_spill] sm:$0xff] }
 0x3c9   :  { %16785 = vst [vmem:[#allocation179_spill] sm:$0xff] %v12154_v1  ;;  %v16795_v1 = vrot.slane %v16792_v61, 4  ;;  %v12185_v53 = vrot.slane %v16800_v38, 9  ;;  %v16805_v49 = vrot.slane %v16804_v48, 2  ;;  %v16832_v38 = vrot.slane %v16629_v9, 6 }
 0x3ca   :  { %16787 = vst [vmem:[#allocation180_spill] sm:$0xff] %v12158_v21  ;;  %v12180_v21 = vrot.slane %v16797_v33, 9 }
 0x3cb   :  { %16789 = vst [vmem:[#allocation181_spill] sm:$0xff] %v12163_v19  ;;  %v12176_v26 = vrot.slane %v16795_v1, 9  ;;  %v12194_v1 = vrot.slane %v16805_v49, 9  ;;  %v16809_v19 = vrot.slane %v16804_v48, 6 }
 0x3cc   :  { %16791 = vst [vmem:[#allocation182_spill] sm:$0xff] %v12167_v14  ;;  %v12189_v14 = vrot.slane %v16802_v6, 9  ;;  %v16811_v6 = vrot.slane %v11376_v60, 2 }
 0x3cd   :  { %16794 = vst [vmem:[#allocation39_spill] sm:$0xff] %v12172_v58  ;;  %v16813_v58 = vrot.slane %v11376_v60, 4 }
 0x3ce   :  { %16796 = vst [vmem:[#allocation183_spill] sm:$0xff] %v12176_v26  ;;  %v16807_v26 = vrot.slane %v16804_v48, 4  ;;  %v16822_v48 = vrot.slane %v16628_v29, 6 }
 0x3cf   :  { %16798 = vst [vmem:[#allocation184_spill] sm:$0xff] %v12180_v21  ;;  %v12202_v21 = vrot.slane %v16809_v19, 9  ;;  %v12212_v49 = vrot.slane %v16813_v58, 9 }
 0x3d0   :  { %16801 = vst [vmem:[#allocation185_spill] sm:$0xff] %v12185_v53  ;;  %v12198_v33 = vrot.slane %v16807_v26, 9  ;;  %v16824_v53 = vrot.slane %v11380_v27, 2 }
 0x3d1   :  { %16803 = vst [vmem:[#allocation186_spill] sm:$0xff] %v12189_v14  ;;  %v12208_v14 = vrot.slane %v16811_v6, 9  ;;  %v12243_v6 = vrot.slane %v16826_v44, 9 }
 0x3d2   :  { %16806 = vst [vmem:[#allocation187_spill] sm:$0xff] %v12194_v1  ;;  %v16815_v1 = vrot.slane %v11376_v60, 6  ;;  %v12239_v19 = vrot.slane %v16824_v53, 9  ;;  %v16834_v53 = vld [vmem:[#allocation96_spill] sm:$0xff] }
 0x3d3   :  { %16808 = vst [vmem:[#allocation188_spill] sm:$0xff] %v12198_v33  ;;  %v12234_v33 = vrot.slane %v16822_v48, 9  ;;  %v12252_v48 = vrot.slane %v16830_v55, 9  ;;  %v16835_v27 = vrot.slane %v16834_v53, 2  ;;  %v16841_v55 = vld [vmem:[#allocation60_spill] sm:$0xff] }
 0x3d4   :  { %16810 = vst [vmem:[#allocation189_spill] sm:$0xff] %v12202_v21  ;;  %v12216_v26 = vrot.slane %v16815_v1, 9  ;;  %v16828_v21 = vrot.slane %v16629_v9, 2  ;;  %v16842_v9 = vrot.slane %v16841_v55, 2 }
 0x3d5   :  { %16812 = vst [vmem:[#allocation190_spill] sm:$0xff] %v12208_v14  ;;  %v16819_v14 = vrot.slane %v16628_v29, 2  ;;  %v12261_v44 = vrot.slane %v16835_v27, 9  ;;  %v16846_v27 = vrot.slane %v16841_v55, 6 }
 0x3d6   :  { %16814 = vst [vmem:[#allocation191_spill] sm:$0xff] %v12212_v49  ;;  %v16820_v49 = vrot.slane %v16628_v29, 4 }
 0x3d7   :  { %v12226_v58 = vrot.slane %v16819_v14, 9  ;;  %16823 = vst [vmem:[#allocation193_spill] sm:$0xff] %v12234_v33  ;;  %v12256_v33 = vrot.slane %v16832_v38, 9  ;;  %v16837_v14 = vrot.slane %v16834_v53, 4  ;;  %v12274_v38 = vrot.slane %v16842_v9, 9  ;;  %v16853_v9 = vld [vmem:[#allocation62_spill] sm:$0xff] }
 0x3d8   :  { %v12230_v1 = vrot.slane %v16820_v49, 9  ;;  %16825 = vst [vmem:[#allocation194_spill] sm:$0xff] %v12239_v19  ;;  %v12248_v49 = vrot.slane %v16828_v21, 9  ;;  %v16839_v21 = vrot.slane %v16834_v53, 6  ;;  %v16844_v19 = vrot.slane %v16841_v55, 4 }
 0x3d9   :  { %16827 = vst [vmem:[#allocation195_spill] sm:$0xff] %v12243_v6  ;;  %v12265_v6 = vrot.slane %v16837_v14, 9  ;;  %v16848_v14 = vld [vmem:[#allocation61_spill] sm:$0xff] }
 0x3da   :  { %16821 = vst [vmem:[#allocation192_spill] sm:$0xff] %v12230_v1  ;;  %v16849_v53 = vrot.slane %v16848_v14, 2  ;;  %v16854_v1 = vrot.slane %v16853_v9, 2 }
 0x3db   :  { %16829 = vst [vmem:[#allocation196_spill] sm:$0xff] %v12248_v49  ;;  %v12269_v49 = vrot.slane %v16839_v21, 9 }
 0x3dc   :  { %16831 = vst [vmem:[#allocation197_spill] sm:$0xff] %v12252_v48  ;;  %v12287_v21 = vrot.slane %v16849_v53, 9  ;;  %v16851_v48 = vrot.slane %v16848_v14, 4  ;;  %v16866_v53 = vrot.slane %v16632_v43, 2  ;;  %v16880_v14 = vrot.slane %v16634_v62, 6 }
 0x3dd   :  { %16833 = vst [vmem:[#allocation198_spill] sm:$0xff] %v12256_v33  ;;  %v12278_v33 = vrot.slane %v16844_v19, 9  ;;  %v12296_v19 = vrot.slane %v16854_v1, 9  ;;  %v16864_v1 = vld [vmem:[#allocation97_spill] sm:$0xff] }
 0x3de   :  { %16836 = vst [vmem:[#allocation199_spill] sm:$0xff] %v12261_v44  ;;  %v12282_v44 = vrot.slane %v16846_v27, 9 }
 0x3df   :  { %16838 = vst [vmem:[#allocation200_spill] sm:$0xff] %v12265_v6  ;;  %v16858_v6 = vrot.slane %v16853_v9, 6 }
 0x3e0   :  { %16840 = vst [vmem:[#allocation201_spill] sm:$0xff] %v12269_v49  ;;  %v12291_v49 = vrot.slane %v16851_v48, 9 }
 0x3e1   :  { %16843 = vst [vmem:[#allocation60_spill] sm:$0xff] %v12274_v38  ;;  %v16862_v38 = vrot.slane %v11456_v0, 4 }
 0x3e2   :  { %16845 = vst [vmem:[#allocation202_spill] sm:$0xff] %v12278_v33  ;;  %v16856_v33 = vrot.slane %v16853_v9, 4 }
 0x3e3   :  { %16847 = vst [vmem:[#allocation203_spill] sm:$0xff] %v12282_v44  ;;  %v12304_v44 = vrot.slane %v16858_v6, 9  ;;  %v16874_v6 = vrot.slane %v16633_v11, 4 }
 0x3e4   :  { %16850 = vst [vmem:[#allocation204_spill] sm:$0xff] %v12287_v21  ;;  %v12300_v27 = vrot.slane %v16856_v33, 9  ;;  %v16860_v21 = vrot.slane %v11456_v0, 2  ;;  %v16865_v33 = vld [vmem:[#allocation64_spill] sm:$0xff] }
 0x3e5   :  { %16852 = vst [vmem:[#allocation205_spill] sm:$0xff] %v12291_v49  ;;  %v12313_v49 = vrot.slane %v16862_v38, 9  ;;  %v16870_v38 = vrot.slane %v16632_v43, 6  ;;  %v12339_v9 = vrot.slane %v16874_v6, 9 }
 0x3e6   :  { %16855 = vst [vmem:[#allocation206_spill] sm:$0xff] %v12296_v19  ;;  %v12309_v48 = vrot.slane %v16860_v21, 9  ;;  %v16868_v21 = vrot.slane %v16632_v43, 4 }
 0x3e7   :  { %16857 = vst [vmem:[#allocation207_spill] sm:$0xff] %v12300_v27  ;;  %v16872_v27 = vrot.slane %v16633_v11, 2 }
 0x3e8   :  { %16859 = vst [vmem:[#allocation208_spill] sm:$0xff] %v12304_v44  ;;  %v12322_v44 = vrot.slane %v16866_v53, 9 }
 0x3e9   :  { %16861 = vst [vmem:[#allocation209_spill] sm:$0xff] %v12309_v48  ;;  %v12326_v48 = vrot.slane %v16868_v21, 9  ;;  %v12335_v19 = vrot.slane %v16872_v27, 9  ;;  %v16882_v27 = vld [vmem:[#allocation8_spill] sm:$0xff] }
 0x3ea   :  { %16863 = vst [vmem:[#allocation210_spill] sm:$0xff] %v12313_v49  ;;  %v12330_v49 = vrot.slane %v16870_v38, 9  ;;  %v16883_v11 = vrot.slane %v16882_v27, 2  ;;  %v16885_v53 = vrot.slane %v16882_v27, 4 }
 0x3eb   :  { %16867 = vst [vmem:[#allocation211_spill] sm:$0xff] %v12322_v44  ;;  %v16876_v44 = vrot.slane %v16634_v62, 2 }
 0x3ec   :  { %16869 = vst [vmem:[#allocation212_spill] sm:$0xff] %v12326_v48  ;;  %v16878_v48 = vrot.slane %v16634_v62, 4  ;;  %v12357_v6 = vrot.slane %v16883_v11, 9  ;;  %v16904_v11 = vrot.slane %v11500_v22, 2 }
 0x3ed   :  { %16871 = vst [vmem:[#allocation213_spill] sm:$0xff] %v12330_v49  ;;  %v12344_v21 = vrot.slane %v16876_v44, 9  ;;  %v12352_v49 = vrot.slane %v16880_v14, 9  ;;  %v16902_v44 = vrot.slane %v11620_v51, 4 }
 0x3ee   :  { %16873 = vst [vmem:[#allocation214_spill] sm:$0xff] %v12335_v19  ;;  %v12348_v38 = vrot.slane %v16878_v48, 9  ;;  %v16891_v19 = vrot.slane %v11492_v13, 6 }
 0x3ef   :  { %16875 = vst [vmem:[#allocation215_spill] sm:$0xff] %v12339_v9  ;;  %v12361_v9 = vrot.slane %v16885_v53, 9 }
 0x3f0   :  { %16877 = vst [vmem:[#allocation216_spill] sm:$0xff] %v12344_v21  ;;  %v16887_v21 = vrot.slane %v11492_v13, 2 }
 0x3f1   :  { %16879 = vst [vmem:[#allocation217_spill] sm:$0xff] %v12348_v38  ;;  %v16889_v38 = vrot.slane %v11492_v13, 4 }
 0x3f2   :  { %16881 = vst [vmem:[#allocation218_spill] sm:$0xff] %v12352_v49  ;;  %v12366_v48 = vrot.slane %v16887_v21, 9  ;;  %v12374_v49 = vrot.slane %v16891_v19, 9 }
 0x3f3   :  { %16884 = vst [vmem:[#allocation219_spill] sm:$0xff] %v12357_v6  ;;  %v12370_v14 = vrot.slane %v16889_v38, 9  ;;  %v16892_v6 = vrot.slane %v11496_v42, 4  ;;  %v16900_v42 = vrot.slane %v11620_v51, 2 }
 0x3f4   :  { %16886 = vst [vmem:[#allocation220_spill] sm:$0xff] %v12361_v9  ;;  %v16894_v9 = vrot.slane %v11616_v63, 2 }
 0x3f5   :  { %16888 = vst [vmem:[#allocation221_spill] sm:$0xff] %v12366_v48  ;;  %v12379_v53 = vrot.slane %v16892_v6, 9  ;;  %v16896_v48 = vrot.slane %v11616_v63, 4  ;;  %v12397_v6 = vrot.slane %v16900_v42, 9  ;;  %v16906_v42 = vrot.slane %v11500_v22, 4 }
 0x3f6   :  { %16890 = vst [vmem:[#allocation222_spill] sm:$0xff] %v12370_v14  ;;  %v12384_v21 = vrot.slane %v16894_v9, 9  ;;  %v16898_v14 = vrot.slane %v11616_v63, 6 }
 0x3f7   :  { %16893 = vst [vmem:[#allocation223_spill] sm:$0xff] %v12379_v53  ;;  %v12388_v38 = vrot.slane %v16896_v48, 9  ;;  %v12401_v53 = vrot.slane %v16902_v44, 9  ;;  %v16908_v44 = vrot.slane %v11500_v22, 6  ;;  %v16910_v48 = vrot.slane %v11504_v35, 2 }
 0x3f8   :  { %16895 = vst [vmem:[#allocation224_spill] sm:$0xff] %v12384_v21  ;;  %v12392_v19 = vrot.slane %v16898_v14, 9  ;;  %v16912_v14 = vrot.slane %v11504_v35, 4  ;;  %v16918_v21 = vrot.slane %v11508_v59, 6 }
 0x3f9   :  { %16897 = vst [vmem:[#allocation225_spill] sm:$0xff] %v12388_v38  ;;  %v12423_v9 = vrot.slane %v16910_v48, 9  ;;  %v16928_v48 = vrot.slane %v11516_v56, 6 }
 0x3fa   :  { %16899 = vst [vmem:[#allocation226_spill] sm:$0xff] %v12392_v19  ;;  %v12410_v19 = vrot.slane %v16904_v11, 9  ;;  %v12427_v38 = vrot.slane %v16912_v14, 9  ;;  %v16922_v11 = vrot.slane %v11512_v17, 4 }
 0x3fb   :  { %16901 = vst [vmem:[#allocation227_spill] sm:$0xff] %v12397_v6  ;;  %v12414_v6 = vrot.slane %v16906_v42, 9 }
 0x3fc   :  { %16903 = vst [vmem:[#allocation228_spill] sm:$0xff] %v12401_v53  ;;  %v12418_v53 = vrot.slane %v16908_v44, 9 }
 0x3fd   :  { %16905 = vst [vmem:[#allocation229_spill] sm:$0xff] %v12410_v19  ;;  %v16914_v19 = vrot.slane %v11508_v59, 2 }
 0x3fe   :  { %16907 = vst [vmem:[#allocation230_spill] sm:$0xff] %v12414_v6  ;;  %v16916_v6 = vrot.slane %v11508_v59, 4 }
 0x3ff   :  { %16909 = vst [vmem:[#allocation231_spill] sm:$0xff] %v12418_v53  ;;  %v12432_v42 = vrot.slane %v16914_v19, 9  ;;  %v12440_v53 = vrot.slane %v16918_v21, 9  ;;  %v16932_v19 = vrot.slane %v11520_v18, 4 }
 0x400   :  { %16911 = vst [vmem:[#allocation232_spill] sm:$0xff] %v12423_v9  ;;  %v12436_v44 = vrot.slane %v16916_v6, 9  ;;  %v16920_v9 = vrot.slane %v11512_v17, 2 }
 0x401   :  { %16913 = vst [vmem:[#allocation233_spill] sm:$0xff] %v12427_v38  ;;  %v12449_v38 = vrot.slane %v16922_v11, 9 }
 0x402   :  { %16915 = vst [vmem:[#allocation234_spill] sm:$0xff] %v12432_v42  ;;  %v12445_v14 = vrot.slane %v16920_v9, 9  ;;  %v16924_v42 = vrot.slane %v11516_v56, 2  ;;  %v16938_v9 = vrot.slane %v11524_v40, 6 }
 0x403   :  { %16917 = vst [vmem:[#allocation235_spill] sm:$0xff] %v12436_v44  ;;  %v16926_v44 = vrot.slane %v11516_v56, 4 }
 0x404   :  { %16919 = vst [vmem:[#allocation236_spill] sm:$0xff] %v12440_v53  ;;  %v12454_v6 = vrot.slane %v16924_v42, 9  ;;  %v12462_v53 = vrot.slane %v16928_v48, 9  ;;  %v16942_v42 = vrot.slane %v11528_v3, 4 }
 0x405   :  { %16921 = vst [vmem:[#allocation237_spill] sm:$0xff] %v12445_v14  ;;  %v12458_v21 = vrot.slane %v16926_v44, 9  ;;  %v16930_v14 = vrot.slane %v11520_v18, 2 }
 0x406   :  { %16923 = vst [vmem:[#allocation238_spill] sm:$0xff] %v12449_v38  ;;  %v12471_v38 = vrot.slane %v16932_v19, 9 }
 0x407   :  { %16925 = vst [vmem:[#allocation239_spill] sm:$0xff] %v12454_v6  ;;  %v12467_v11 = vrot.slane %v16930_v14, 9  ;;  %v16934_v6 = vrot.slane %v11524_v40, 2 }
 0x408   :  { %16927 = vst [vmem:[#allocation240_spill] sm:$0xff] %v12458_v21  ;;  %v16936_v21 = vrot.slane %v11524_v40, 4 }
 0x409   :  { %16929 = vst [vmem:[#allocation241_spill] sm:$0xff] %v12462_v53  ;;  %v12476_v44 = vrot.slane %v16934_v6, 9  ;;  %v12484_v53 = vrot.slane %v16938_v9, 9  ;;  %v16945_v9 = vld [vmem:[#allocation118_spill] sm:$0xff]  ;;  %v16952_v6 = vld [vmem:[#allocation19_spill] sm:$0xff] }
 0x40a   :  { %16931 = vst [vmem:[#allocation242_spill] sm:$0xff] %v12467_v11  ;;  %v12480_v48 = vrot.slane %v16936_v21, 9  ;;  %v16940_v11 = vrot.slane %v11528_v3, 2  ;;  %v16946_v14 = vrot.slane %v16945_v9, 2  ;;  %v16953_v21 = vrot.slane %v16952_v6, 2 }
 0x40b   :  { %16933 = vst [vmem:[#allocation243_spill] sm:$0xff] %v12471_v38  ;;  %v12493_v38 = vrot.slane %v16942_v42, 9  ;;  %v16950_v42 = vrot.slane %v16945_v9, 6 }
 0x40c   :  { %16935 = vst [vmem:[#allocation244_spill] sm:$0xff] %v12476_v44  ;;  %v12489_v19 = vrot.slane %v16940_v11, 9  ;;  %v12502_v18 = vrot.slane %v16946_v14, 9  ;;  %v16948_v11 = vrot.slane %v16945_v9, 4  ;;  %v12515_v46 = vrot.slane %v16953_v21, 9 }
 0x40d   :  { %16937 = vst [vmem:[#allocation245_spill] sm:$0xff] %v12480_v48  ;;  %v16944_v48 = vld [vmem:[#allocation116_spill] sm:$0xff]  ;;  %v16957_v14 = vrot.slane %v16952_v6, 6 }
 0x40e   :  { %16939 = vst [vmem:[#allocation246_spill] sm:$0xff] %v12484_v53  ;;  %v16955_v53 = vrot.slane %v16952_v6, 4 }
 0x40f   :  { %16941 = vst [vmem:[#allocation247_spill] sm:$0xff] %v12489_v19  ;;  %v12506_v19 = vrot.slane %v16948_v11, 9  ;;  %v16959_v11 = vld [vmem:[#allocation75_spill] sm:$0xff] }
 0x410   :  { %16943 = vst [vmem:[#allocation248_spill] sm:$0xff] %v12493_v38  ;;  %v12510_v38 = vrot.slane %v16950_v42, 9  ;;  %v12519_v40 = vrot.slane %v16955_v53, 9  ;;  %v16960_v9 = vrot.slane %v16959_v11, 2  ;;  %v16962_v44 = vrot.slane %v16959_v11, 4  ;;  %v16966_v53 = vld [vmem:[#allocation119_spill] sm:$0xff] }
 0x411   :  { %16947 = vst [vmem:[#allocation249_spill] sm:$0xff] %v12502_v18  ;;  %v12523_v18 = vrot.slane %v16957_v14, 9  ;;  %v16964_v21 = vrot.slane %v16959_v11, 6  ;;  %v16967_v6 = vrot.slane %v16966_v53, 2 }
 0x412   :  { %16949 = vst [vmem:[#allocation250_spill] sm:$0xff] %v12506_v19  ;;  %v12528_v42 = vrot.slane %v16960_v9, 9  ;;  %v16969_v19 = vrot.slane %v16966_v53, 4  ;;  %v16971_v9 = vrot.slane %v16966_v53, 6 }
 0x413   :  { %16951 = vst [vmem:[#allocation251_spill] sm:$0xff] %v12510_v38  ;;  %v12532_v38 = vrot.slane %v16962_v44, 9  ;;  %v12541_v14 = vrot.slane %v16967_v6, 9  ;;  %v16973_v44 = vld [vmem:[#allocation76_spill] sm:$0xff] }
 0x414   :  { %16954 = vst [vmem:[#allocation252_spill] sm:$0xff] %v12515_v46  ;;  %v12536_v46 = vrot.slane %v16964_v21, 9  ;;  %v16974_v11 = vrot.slane %v16973_v44, 2  ;;  %v16978_v6 = vrot.slane %v16973_v44, 6 }
 0x415   :  { %16956 = vst [vmem:[#allocation253_spill] sm:$0xff] %v12519_v40  ;;  %v16976_v40 = vrot.slane %v16973_v44, 4 }
 0x416   :  { %16958 = vst [vmem:[#allocation254_spill] sm:$0xff] %v12523_v18  ;;  %v12545_v18 = vrot.slane %v16969_v19, 9  ;;  %v12554_v21 = vrot.slane %v16974_v11, 9  ;;  %v16980_v19 = vld [vmem:[#allocation120_spill] sm:$0xff] }
 0x417   :  { %16961 = vst [vmem:[#allocation255_spill] sm:$0xff] %v12528_v42  ;;  %v12549_v42 = vrot.slane %v16971_v9, 9  ;;  %v16981_v53 = vrot.slane %v16980_v19, 2  ;;  %v16985_v11 = vrot.slane %v16980_v19, 6 }
 0x418   :  { %16963 = vst [vmem:[#allocation256_spill] sm:$0xff] %v12532_v38  ;;  %v16983_v38 = vrot.slane %v16980_v19, 4 }
 0x419   :  { %16965 = vst [vmem:[#allocation257_spill] sm:$0xff] %v12536_v46  ;;  %v12558_v46 = vrot.slane %v16976_v40, 9  ;;  %v12567_v9 = vrot.slane %v16981_v53, 9  ;;  %v16991_v53 = vrot.slane %v16638_v39, 6 }
 0x41a   :  { %16968 = vst [vmem:[#allocation258_spill] sm:$0xff] %v12541_v14  ;;  %v12562_v14 = vrot.slane %v16978_v6, 9 }
 0x41b   :  { %16970 = vst [vmem:[#allocation259_spill] sm:$0xff] %v12545_v18  ;;  %v16989_v18 = vrot.slane %v16638_v39, 4 }
 0x41c   :  { %16972 = vst [vmem:[#allocation260_spill] sm:$0xff] %v12549_v42  ;;  %v12571_v42 = vrot.slane %v16983_v38, 9  ;;  %v16993_v38 = vld [vmem:[#allocation122_spill] sm:$0xff] }
 0x41d   :  { %16975 = vst [vmem:[#allocation76_spill] sm:$0xff] %v12554_v21  ;;  %v12575_v21 = vrot.slane %v16985_v11, 9  ;;  %v16994_v19 = vrot.slane %v16993_v38, 2  ;;  %v16996_v40 = vrot.slane %v16993_v38, 4 }
 0x41e   :  { %16977 = vst [vmem:[#allocation261_spill] sm:$0xff] %v12558_v46  ;;  %v16987_v46 = vrot.slane %v16638_v39, 2 }
 0x41f   :  { %16979 = vst [vmem:[#allocation262_spill] sm:$0xff] %v12562_v14  ;;  %v12584_v14 = vrot.slane %v16989_v18, 9  ;;  %v12593_v11 = vrot.slane %v16994_v19, 9 }
 0x420   :  { %16982 = vst [vmem:[#allocation263_spill] sm:$0xff] %v12567_v9  ;;  %v12580_v6 = vrot.slane %v16987_v46, 9  ;;  %v12588_v9 = vrot.slane %v16991_v53, 9  ;;  %v16998_v46 = vrot.slane %v16993_v38, 6  ;;  %v17009_v53 = vrot.slane %v16602_v52, 6 }
 0x421   :  { %16984 = vst [vmem:[#allocation264_spill] sm:$0xff] %v12571_v42  ;;  %v17011_v42 = vld [vmem:[#allocation80_spill] sm:$0xff] }
 0x422   :  { %16986 = vst [vmem:[#allocation265_spill] sm:$0xff] %v12575_v21  ;;  %v12597_v21 = vrot.slane %v16996_v40, 9  ;;  %v17003_v40 = vrot.slane %v16602_v52, 2  ;;  %v17012_v4 = vrot.slane %v17011_v42, 9  ;;  %v17015_v31 = vrot.slane %v17011_v42, 4 }
 0x423   :  { %16988 = vst [vmem:[#allocation266_spill] sm:$0xff] %v12580_v6  ;;  %v12601_v6 = vrot.slane %v16998_v46, 9  ;;  %v17005_v46 = vld [vmem:[#allocation37_spill] sm:$0xff] }
 0x424   :  { %16990 = vst [vmem:[#allocation267_spill] sm:$0xff] %v12584_v14  ;;  %v17008_v14 = vld [vmem:[#allocation95_spill] sm:$0xff] }
 0x425   :  { %16992 = vst [vmem:[#allocation268_spill] sm:$0xff] %v12588_v9  ;;  %v17000_v9 = vrot.slane %v16602_v52, 9  ;;  %v12625_v20 = vmax.f32 %v17009_v53, %v17008_v14  ;;  %v17023_v53 = vld [vmem:[#allocation127_spill] sm:$0xff] }
 0x426   :  { %16995 = vst [vmem:[#allocation269_spill] sm:$0xff] %v12593_v11  ;;  %v17002_v11 = vld [vmem:[#allocation78_spill] sm:$0xff] }
 0x427   :  { %16997 = vst [vmem:[#allocation270_spill] sm:$0xff] %v12597_v21  ;;  %v12610_v19 = vmax.f32 %v16602_v52, %v17000_v9  ;;  %v12615_v21 = vmax.f32 %v17003_v40, %v17002_v11  ;;  %v12630_v9 = vmax.f32 %v17011_v42, %v17012_v4  ;;  %v17017_v40 = vld [vmem:[#allocation81_spill] sm:$0xff] }
 0x428   :  { %16999 = vst [vmem:[#allocation271_spill] sm:$0xff] %v12601_v6  ;;  %v17006_v6 = vrot.slane %v16602_v52, 4  ;;  %v17021_v52 = vrot.slane %v17017_v40, 2  ;;  %v17027_v42 = vrot.slane %v17017_v40, 6 }
 0x429   :  { %17001 = vst [vmem:[#allocation272_spill] sm:$0xff] %v12610_v19  ;;  %v17014_v19 = vld [vmem:[#allocation103_spill] sm:$0xff] }
 0x42a   :  { %17004 = vst [vmem:[#allocation78_spill] sm:$0xff] %v12615_v21  ;;  %v12620_v18 = vmax.f32 %v17006_v6, %v17005_v46  ;;  %v12635_v11 = vmax.f32 %v17015_v31, %v17014_v19  ;;  %v17018_v21 = vrot.slane %v17017_v40, 9  ;;  %v17020_v46 = vld [vmem:[#allocation121_spill] sm:$0xff]  ;;  %v17029_v19 = vld [vmem:[#allocation82_spill] sm:$0xff] }
 0x42b   :  { %17010 = vst [vmem:[#allocation95_spill] sm:$0xff] %v12625_v20  ;;  %v12645_v14 = vmax.f32 %v17021_v52, %v17020_v46  ;;  %v17024_v20 = vrot.slane %v17017_v40, 4  ;;  %v17035_v52 = vld [vmem:[#allocation7_spill] sm:$0xff] }
 0x42c   :  { %17007 = vst [vmem:[#allocation37_spill] sm:$0xff] %v12620_v18  ;;  %v12640_v6 = vmax.f32 %v17017_v40, %v17018_v21  ;;  %v17032_v18 = vld [vmem:[#allocation130_spill] sm:$0xff]  ;;  %v17039_v40 = vrot.slane %v17035_v52, 2 }
 0x42d   :  { %17013 = vst [vmem:[#allocation273_spill] sm:$0xff] %v12630_v9  ;;  %v12650_v4 = vmax.f32 %v17024_v20, %v17023_v53  ;;  %v17026_v9 = vld [vmem:[#allocation128_spill] sm:$0xff]  ;;  %v17038_v53 = vld [vmem:[#allocation131_spill] sm:$0xff] }
 0x42e   :  { %17016 = vst [vmem:[#allocation103_spill] sm:$0xff] %v12635_v11  ;;  %v12655_v31 = vmax.f32 %v17027_v42, %v17026_v9  ;;  %v17030_v11 = vrot.slane %v17029_v19, 9  ;;  %v12675_v42 = vmax.f32 %v17039_v40, %v17038_v53  ;;  %v17041_v9 = vld [vmem:[#allocation132_spill] sm:$0xff]  ;;  %v17051_v40 = vld [vmem:[#allocation135_spill] sm:$0xff] }
 0x42f   :  { %17019 = vst [vmem:[#allocation81_spill] sm:$0xff] %v12640_v6  ;;  %v17033_v6 = vrot.slane %v17029_v19, 4 }
 0x430   :  { %17022 = vst [vmem:[#allocation121_spill] sm:$0xff] %v12645_v14  ;;  %v12660_v21 = vmax.f32 %v17029_v19, %v17030_v11  ;;  %v17036_v14 = vrot.slane %v17035_v52, 9  ;;  %v17044_v19 = vrot.slane %v17035_v52, 6 }
 0x431   :  { %17025 = vst [vmem:[#allocation127_spill] sm:$0xff] %v12650_v4  ;;  %v12665_v46 = vmax.f32 %v17033_v6, %v17032_v18  ;;  %v17046_v6 = vld [vmem:[#allocation9_spill] sm:$0xff] }
 0x432   :  { %17028 = vst [vmem:[#allocation128_spill] sm:$0xff] %v12655_v31  ;;  %v12670_v20 = vmax.f32 %v17035_v52, %v17036_v14  ;;  %v17042_v31 = vrot.slane %v17035_v52, 4 }
 0x433   :  { %17031 = vst [vmem:[#allocation274_spill] sm:$0xff] %v12660_v21  ;;  %v17043_v21 = vld [vmem:[#allocation133_spill] sm:$0xff] }
 0x434   :  { %17034 = vst [vmem:[#allocation130_spill] sm:$0xff] %v12665_v46  ;;  %v12680_v11 = vmax.f32 %v17042_v31, %v17041_v9  ;;  %v12685_v18 = vmax.f32 %v17044_v19, %v17043_v21  ;;  %v17047_v46 = vrot.slane %v17046_v6, 9  ;;  %v17054_v9 = vld [vmem:[#allocation136_spill] sm:$0xff]  ;;  %v17056_v21 = vld [vmem:[#allocation137_spill] sm:$0xff] }
 0x435   :  { %17037 = vst [vmem:[#allocation7_spill] sm:$0xff] %v12670_v20  ;;  %v17049_v20 = vld [vmem:[#allocation20_spill] sm:$0xff] }
 0x436   :  { %17040 = vst [vmem:[#allocation131_spill] sm:$0xff] %v12675_v42  ;;  %v12690_v14 = vmax.f32 %v17046_v6, %v17047_v46  ;;  %v17050_v4 = vrot.slane %v17049_v20, 9  ;;  %v17052_v42 = vrot.slane %v17049_v20, 2  ;;  %v17055_v52 = vrot.slane %v17049_v20, 4 }
 0x437   :  { %17045 = vst [vmem:[#allocation132_spill] sm:$0xff] %v12685_v18  ;;  %v17057_v18 = vrot.slane %v17049_v20, 6  ;;  %v17059_v6 = vrot.slane %v11200_v37, 9 }
 0x438   :  { %17048 = vst [vmem:[#allocation133_spill] sm:$0xff] %v12690_v14  ;;  %v12695_v53 = vmax.f32 %v17049_v20, %v17050_v4  ;;  %v12700_v31 = vmax.f32 %v17052_v42, %v17051_v40  ;;  %v12705_v19 = vmax.f32 %v17055_v52, %v17054_v9  ;;  %v17061_v14 = vrot.slane %v16682_v50, 9  ;;  %v17065_v52 = vld [vmem:[#allocation89_spill] sm:$0xff] }
 0x439   :  { %v12710_v46 = vmax.f32 %v17057_v18, %v17056_v21  ;;  %v12715_v4 = vmax.f32 %v11200_v37, %v17059_v6  ;;  %v17063_v40 = vrot.slane %v11160_v25, 9  ;;  %v17068_v18 = vld [vmem:[#allocation92_spill] sm:$0xff]  ;;  %v17085_v37 = vld [vmem:[#allocation142_spill] sm:$0xff] }
 0x43a   :  { %17053 = vst [vmem:[#allocation20_spill] sm:$0xff] %v12700_v31  ;;  %v12720_v42 = vmax.f32 %v16682_v50, %v17061_v14  ;;  %v17066_v31 = vrot.slane %v17065_v52, 9  ;;  %v17069_v21 = vrot.slane %v17068_v18, 9  ;;  %v17074_v50 = vrot.slane %v16685_v8, 2 }
 0x43b   :  { %17058 = vst [vmem:[#allocation135_spill] sm:$0xff] %v12710_v46  ;;  %v12725_v9 = vmax.f32 %v11160_v25, %v17063_v40  ;;  %v17071_v46 = vrot.slane %v16685_v8, 9  ;;  %v17077_v25 = vrot.slane %v16685_v8, 4 }
 0x43c   :  { %17060 = vst [vmem:[#allocation136_spill] sm:$0xff] %v12715_v4  ;;  %v12730_v20 = vmax.f32 %v17065_v52, %v17066_v31  ;;  %v12735_v6 = vmax.f32 %v17068_v18, %v17069_v21  ;;  %v17080_v52 = vrot.slane %v16685_v8, 6 }
 0x43d   :  { %17062 = vst [vmem:[#allocation137_spill] sm:$0xff] %v12720_v42  ;;  %v12740_v14 = vmax.f32 %v16685_v8, %v17071_v46  ;;  %v17073_v42 = vld [vmem:[#allocation12_spill] sm:$0xff] }
 0x43e   :  { %17064 = vst [vmem:[#allocation275_spill] sm:$0xff] %v12725_v9  ;;  %v12745_v40 = vmax.f32 %v17074_v50, %v17073_v42  ;;  %v17076_v9 = vld [vmem:[#allocation139_spill] sm:$0xff]  ;;  %v17088_v42 = vld [vmem:[#allocation86_spill] sm:$0xff] }
 0x43f   :  { %17067 = vst [vmem:[#allocation276_spill] sm:$0xff] %v12730_v20  ;;  %v12750_v31 = vmax.f32 %v17077_v25, %v17076_v9  ;;  %v17079_v20 = vld [vmem:[#allocation140_spill] sm:$0xff]  ;;  %v17091_v9 = vld [vmem:[#allocation143_spill] sm:$0xff]  ;;  %v17092_v8 = vrot.slane %v17088_v42, 2 }
 0x440   :  { %17070 = vst [vmem:[#allocation277_spill] sm:$0xff] %v12735_v6  ;;  %v12755_v21 = vmax.f32 %v17080_v52, %v17079_v20  ;;  %v17082_v6 = vld [vmem:[#allocation85_spill] sm:$0xff]  ;;  %v17094_v20 = vld [vmem:[#allocation144_spill] sm:$0xff] }
 0x441   :  { %17072 = vst [vmem:[#allocation278_spill] sm:$0xff] %v12740_v14  ;;  %v17083_v18 = vrot.slane %v17082_v6, 9  ;;  %v17086_v14 = vrot.slane %v17082_v6, 4  ;;  %v12775_v52 = vmax.f32 %v17092_v8, %v17091_v9  ;;  %v17106_v8 = vld [vmem:[#allocation26_spill] sm:$0xff] }
 0x442   :  { %17075 = vst [vmem:[#allocation12_spill] sm:$0xff] %v12745_v40  ;;  %v17089_v40 = vrot.slane %v17088_v42, 9 }
 0x443   :  { %17078 = vst [vmem:[#allocation139_spill] sm:$0xff] %v12750_v31  ;;  %v12760_v46 = vmax.f32 %v17082_v6, %v17083_v18  ;;  %v12765_v50 = vmax.f32 %v17086_v14, %v17085_v37  ;;  %v17098_v6 = vrot.slane %v17088_v42, 6  ;;  %v17100_v14 = vld [vmem:[#allocation87_spill] sm:$0xff] }
 0x444   :  { %17081 = vst [vmem:[#allocation140_spill] sm:$0xff] %v12755_v21  ;;  %v12770_v25 = vmax.f32 %v17088_v42, %v17089_v40  ;;  %v17095_v21 = vrot.slane %v17088_v42, 4  ;;  %v17103_v31 = vld [vmem:[#allocation147_spill] sm:$0xff]  ;;  %v17110_v42 = vrot.slane %v17106_v8, 2 }
 0x445   :  { %17084 = vst [vmem:[#allocation279_spill] sm:$0xff] %v12760_v46  ;;  %v17097_v46 = vld [vmem:[#allocation145_spill] sm:$0xff] }
 0x446   :  { %17087 = vst [vmem:[#allocation142_spill] sm:$0xff] %v12765_v50  ;;  %v12780_v18 = vmax.f32 %v17095_v21, %v17094_v20  ;;  %v12785_v37 = vmax.f32 %v17098_v6, %v17097_v46  ;;  %v17101_v50 = vrot.slane %v17100_v14, 9  ;;  %v17109_v20 = vld [vmem:[#allocation148_spill] sm:$0xff]  ;;  %v17112_v46 = vld [vmem:[#allocation149_spill] sm:$0xff] }
 0x447   :  { %17090 = vst [vmem:[#allocation86_spill] sm:$0xff] %v12770_v25  ;;  %v17104_v25 = vrot.slane %v17100_v14, 4  ;;  %v12805_v6 = vmax.f32 %v17110_v42, %v17109_v20  ;;  %v17122_v42 = vld [vmem:[#allocation152_spill] sm:$0xff] }
 0x448   :  { %17093 = vst [vmem:[#allocation143_spill] sm:$0xff] %v12775_v52  ;;  %v12790_v40 = vmax.f32 %v17100_v14, %v17101_v50  ;;  %v17107_v52 = vrot.slane %v17106_v8, 9  ;;  %v17115_v14 = vrot.slane %v17106_v8, 6 }
 0x449   :  { %17096 = vst [vmem:[#allocation144_spill] sm:$0xff] %v12780_v18  ;;  %v12795_v9 = vmax.f32 %v17104_v25, %v17103_v31  ;;  %v17117_v25 = vld [vmem:[#allocation17_spill] sm:$0xff] }
 0x44a   :  { %17099 = vst [vmem:[#allocation145_spill] sm:$0xff] %v12785_v37  ;;  %v12800_v21 = vmax.f32 %v17106_v8, %v17107_v52  ;;  %v17113_v37 = vrot.slane %v17106_v8, 4 }
 0x44b   :  { %17102 = vst [vmem:[#allocation280_spill] sm:$0xff] %v12790_v40  ;;  %v17114_v40 = vld [vmem:[#allocation150_spill] sm:$0xff] }
 0x44c   :  { %17105 = vst [vmem:[#allocation147_spill] sm:$0xff] %v12795_v9  ;;  %v12810_v50 = vmax.f32 %v17113_v37, %v17112_v46  ;;  %v12815_v31 = vmax.f32 %v17115_v14, %v17114_v40  ;;  %v17118_v9 = vrot.slane %v17117_v25, 9  ;;  %v17125_v46 = vld [vmem:[#allocation153_spill] sm:$0xff]  ;;  %v17127_v40 = vld [vmem:[#allocation154_spill] sm:$0xff] }
 0x44d   :  { %17108 = vst [vmem:[#allocation26_spill] sm:$0xff] %v12800_v21  ;;  %v17120_v21 = vld [vmem:[#allocation28_spill] sm:$0xff] }
 0x44e   :  { %17111 = vst [vmem:[#allocation148_spill] sm:$0xff] %v12805_v6  ;;  %v12820_v52 = vmax.f32 %v17117_v25, %v17118_v9  ;;  %v17121_v18 = vrot.slane %v17120_v21, 9  ;;  %v17123_v6 = vrot.slane %v17120_v21, 2  ;;  %v17126_v8 = vrot.slane %v17120_v21, 4 }
 0x44f   :  { %17116 = vst [vmem:[#allocation149_spill] sm:$0xff] %v12815_v31  ;;  %v17128_v31 = vrot.slane %v17120_v21, 6  ;;  %v17130_v25 = vrot.slane %v11264_v32, 9 }
 0x450   :  { %17119 = vst [vmem:[#allocation150_spill] sm:$0xff] %v12820_v52  ;;  %v12825_v20 = vmax.f32 %v17120_v21, %v17121_v18  ;;  %v12830_v37 = vmax.f32 %v17123_v6, %v17122_v42  ;;  %v12835_v14 = vmax.f32 %v17126_v8, %v17125_v46  ;;  %v17132_v52 = vrot.slane %v16727_v24, 9  ;;  %v17136_v8 = vld [vmem:[#allocation24_spill] sm:$0xff] }
 0x451   :  { %v12840_v9 = vmax.f32 %v17128_v31, %v17127_v40  ;;  %v12845_v18 = vmax.f32 %v11264_v32, %v17130_v25  ;;  %v17134_v42 = vrot.slane %v16614_v23, 9  ;;  %v17139_v31 = vrot.slane %v11280_v47, 9  ;;  %v17141_v40 = vld [vmem:[#allocation27_spill] sm:$0xff] }
 0x452   :  { %17124 = vst [vmem:[#allocation28_spill] sm:$0xff] %v12830_v37  ;;  %v12850_v6 = vmax.f32 %v16727_v24, %v17132_v52  ;;  %v17137_v37 = vrot.slane %v17136_v8, 9  ;;  %v17145_v24 = vrot.slane %v17141_v40, 2  ;;  %v17156_v32 = vld [vmem:[#allocation159_spill] sm:$0xff] }
 0x453   :  { %17129 = vst [vmem:[#allocation152_spill] sm:$0xff] %v12840_v9  ;;  %v12855_v46 = vmax.f32 %v16614_v23, %v17134_v42  ;;  %v12865_v25 = vmax.f32 %v11280_v47, %v17139_v31  ;;  %v17142_v9 = vrot.slane %v17141_v40, 9  ;;  %v17148_v23 = vrot.slane %v17141_v40, 4 }
 0x454   :  { %17131 = vst [vmem:[#allocation153_spill] sm:$0xff] %v12845_v18  ;;  %v12860_v21 = vmax.f32 %v17136_v8, %v17137_v37  ;;  %v17151_v8 = vrot.slane %v17141_v40, 6 }
 0x455   :  { %17133 = vst [vmem:[#allocation154_spill] sm:$0xff] %v12850_v6  ;;  %v12870_v52 = vmax.f32 %v17141_v40, %v17142_v9  ;;  %v17144_v6 = vld [vmem:[#allocation156_spill] sm:$0xff] }
 0x456   :  { %17135 = vst [vmem:[#allocation281_spill] sm:$0xff] %v12855_v46  ;;  %v12875_v42 = vmax.f32 %v17145_v24, %v17144_v6  ;;  %v17147_v46 = vld [vmem:[#allocation157_spill] sm:$0xff]  ;;  %v17159_v6 = vld [vmem:[#allocation160_spill] sm:$0xff] }
 0x457   :  { %17138 = vst [vmem:[#allocation282_spill] sm:$0xff] %v12860_v21  ;;  %v12880_v37 = vmax.f32 %v17148_v23, %v17147_v46  ;;  %v17150_v21 = vld [vmem:[#allocation158_spill] sm:$0xff]  ;;  %v17162_v46 = vld [vmem:[#allocation21_spill] sm:$0xff] }
 0x458   :  { %17140 = vst [vmem:[#allocation283_spill] sm:$0xff] %v12865_v25  ;;  %v12885_v31 = vmax.f32 %v17151_v8, %v17150_v21  ;;  %v17153_v25 = vld [vmem:[#allocation18_spill] sm:$0xff]  ;;  %v17166_v40 = vrot.slane %v17162_v46, 2 }
 0x459   :  { %17143 = vst [vmem:[#allocation27_spill] sm:$0xff] %v12870_v52  ;;  %v17154_v47 = vrot.slane %v17153_v25, 9  ;;  %v17157_v52 = vrot.slane %v17153_v25, 2  ;;  %v17165_v21 = vld [vmem:[#allocation162_spill] sm:$0xff] }
 0x45a   :  { %17146 = vst [vmem:[#allocation156_spill] sm:$0xff] %v12875_v42  ;;  %v17160_v42 = vrot.slane %v17153_v25, 4 }
 0x45b   :  { %17149 = vst [vmem:[#allocation157_spill] sm:$0xff] %v12880_v37  ;;  %v12890_v9 = vmax.f32 %v17153_v25, %v17154_v47  ;;  %v12895_v24 = vmax.f32 %v17157_v52, %v17156_v32  ;;  %v17163_v37 = vrot.slane %v17162_v46, 9  ;;  %v12910_v47 = vmax.f32 %v17166_v40, %v17165_v21  ;;  %v17171_v52 = vld [vmem:[#allocation164_spill] sm:$0xff]  ;;  %v17177_v25 = vld [vmem:[#allocation165_spill] sm:$0xff]  ;;  %v17180_v40 = vld [vmem:[#allocation166_spill] sm:$0xff] }
 0x45c   :  { %17152 = vst [vmem:[#allocation158_spill] sm:$0xff] %v12885_v31  ;;  %v12900_v23 = vmax.f32 %v17160_v42, %v17159_v6  ;;  %v17168_v31 = vld [vmem:[#allocation163_spill] sm:$0xff] }
 0x45d   :  { %17155 = vst [vmem:[#allocation284_spill] sm:$0xff] %v12890_v9  ;;  %v12905_v8 = vmax.f32 %v17162_v46, %v17163_v37  ;;  %v17169_v9 = vrot.slane %v17162_v46, 4  ;;  %v17174_v6 = vld [vmem:[#allocation23_spill] sm:$0xff] }
 0x45e   :  { %17158 = vst [vmem:[#allocation159_spill] sm:$0xff] %v12895_v24  ;;  %v17172_v24 = vrot.slane %v17162_v46, 6  ;;  %v17186_v46 = vld [vmem:[#allocation168_spill] sm:$0xff] }
 0x45f   :  { %17161 = vst [vmem:[#allocation160_spill] sm:$0xff] %v12900_v23  ;;  %v12915_v32 = vmax.f32 %v17169_v9, %v17168_v31  ;;  %v17175_v23 = vrot.slane %v17174_v6, 9  ;;  %v17183_v9 = vld [vmem:[#allocation41_spill] sm:$0xff] }
 0x460   :  { %17164 = vst [vmem:[#allocation21_spill] sm:$0xff] %v12905_v8  ;;  %v12920_v42 = vmax.f32 %v17172_v24, %v17171_v52  ;;  %v17178_v8 = vrot.slane %v17174_v6, 2  ;;  %v17187_v52 = vrot.slane %v17183_v9, 2 }
 0x461   :  { %17167 = vst [vmem:[#allocation162_spill] sm:$0xff] %v12910_v47  ;;  %v12925_v37 = vmax.f32 %v17174_v6, %v17175_v23  ;;  %v17181_v47 = vrot.slane %v17174_v6, 4  ;;  %v17198_v6 = vld [vmem:[#allocation38_spill] sm:$0xff] }
 0x462   :  { %17170 = vst [vmem:[#allocation163_spill] sm:$0xff] %v12915_v32  ;;  %v12930_v21 = vmax.f32 %v17178_v8, %v17177_v25  ;;  %v17184_v32 = vrot.slane %v17183_v9, 9  ;;  %v12945_v23 = vmax.f32 %v17187_v52, %v17186_v46  ;;  %v17192_v8 = vld [vmem:[#allocation170_spill] sm:$0xff]  ;;  %v17200_v52 = vld [vmem:[#allocation173_spill] sm:$0xff] }
 0x463   :  { %17173 = vst [vmem:[#allocation164_spill] sm:$0xff] %v12920_v42  ;;  %v12935_v31 = vmax.f32 %v17181_v47, %v17180_v40  ;;  %v17189_v42 = vld [vmem:[#allocation169_spill] sm:$0xff]  ;;  %v17195_v40 = vld [vmem:[#allocation32_spill] sm:$0xff] }
 0x464   :  { %17176 = vst [vmem:[#allocation285_spill] sm:$0xff] %v12925_v37  ;;  %v12940_v24 = vmax.f32 %v17183_v9, %v17184_v32  ;;  %v17190_v37 = vrot.slane %v17183_v9, 4 }
 0x465   :  { %17179 = vst [vmem:[#allocation165_spill] sm:$0xff] %v12930_v21  ;;  %v17193_v21 = vrot.slane %v17183_v9, 6  ;;  %v17204_v9 = vrot.slane %v17198_v6, 4 }
 0x466   :  { %17182 = vst [vmem:[#allocation166_spill] sm:$0xff] %v12935_v31  ;;  %v12950_v25 = vmax.f32 %v17190_v37, %v17189_v42  ;;  %v17196_v31 = vrot.slane %v17195_v40, 9  ;;  %v17203_v37 = vld [vmem:[#allocation174_spill] sm:$0xff] }
 0x467   :  { %17185 = vst [vmem:[#allocation41_spill] sm:$0xff] %v12940_v24  ;;  %v12955_v47 = vmax.f32 %v17193_v21, %v17192_v8  ;;  %v17199_v24 = vrot.slane %v17198_v6, 9  ;;  %v12975_v21 = vmax.f32 %v17204_v9, %v17203_v37  ;;  %v17206_v8 = vld [vmem:[#allocation175_spill] sm:$0xff]  ;;  %v17215_v9 = vrot.slane %v16623_v36, 9 }
 0x468   :  { %17188 = vst [vmem:[#allocation168_spill] sm:$0xff] %v12945_v23  ;;  %v12960_v32 = vmax.f32 %v17195_v40, %v17196_v31  ;;  %v17201_v23 = vrot.slane %v17198_v6, 2 }
 0x469   :  { %17191 = vst [vmem:[#allocation169_spill] sm:$0xff] %v12950_v25  ;;  %v12965_v46 = vmax.f32 %v17198_v6, %v17199_v24  ;;  %v17207_v25 = vrot.slane %v17198_v6, 6  ;;  %v13000_v6 = vmax.f32 %v16623_v36, %v17215_v9 }
 0x46a   :  { %17194 = vst [vmem:[#allocation170_spill] sm:$0xff] %v12955_v47  ;;  %v12970_v42 = vmax.f32 %v17201_v23, %v17200_v52  ;;  %v17211_v47 = vrot.slane %v16779_v5, 9  ;;  %v17213_v52 = vrot.slane %v16622_v12, 9 }
 0x46b   :  { %17197 = vst [vmem:[#allocation286_spill] sm:$0xff] %v12960_v32  ;;  %v12980_v31 = vmax.f32 %v17207_v25, %v17206_v8  ;;  %v17209_v32 = vrot.slane %v16774_v57, 9  ;;  %v17216_v25 = vld [vmem:[#allocation178_spill] sm:$0xff]  ;;  %v17217_v8 = vrot.slane %v16623_v36, 2 }
 0x46c   :  { %17202 = vst [vmem:[#allocation38_spill] sm:$0xff] %v12970_v42  ;;  %v12990_v23 = vmax.f32 %v16779_v5, %v17211_v47  ;;  %v12995_v37 = vmax.f32 %v16622_v12, %v17213_v52  ;;  %v17222_v5 = vrot.slane %v16623_v36, 6 }
 0x46d   :  { %17205 = vst [vmem:[#allocation173_spill] sm:$0xff] %v12975_v21  ;;  %v12985_v24 = vmax.f32 %v16774_v57, %v17209_v32  ;;  %v13005_v32 = vmax.f32 %v17217_v8, %v17216_v25  ;;  %v17220_v21 = vrot.slane %v16623_v36, 4  ;;  %v17228_v8 = vld [vmem:[#allocation39_spill] sm:$0xff]  ;;  %v17232_v36 = vrot.slane %v16792_v61, 4  ;;  %v17239_v57 = vld [vmem:[#allocation49_spill] sm:$0xff] }
 0x46e   :  { %17208 = vst [vmem:[#allocation174_spill] sm:$0xff] %v12980_v31  ;;  %v17227_v31 = vrot.slane %v16792_v61, 9  ;;  %v17240_v40 = vrot.slane %v17239_v57, 9 }
 0x46f   :  { %17210 = vst [vmem:[#allocation175_spill] sm:$0xff] %v12985_v24  ;;  %v17219_v24 = vld [vmem:[#allocation179_spill] sm:$0xff] }
 0x470   :  { %17212 = vst [vmem:[#allocation287_spill] sm:$0xff] %v12990_v23  ;;  %v13010_v47 = vmax.f32 %v17220_v21, %v17219_v24  ;;  %v17221_v23 = vld [vmem:[#allocation180_spill] sm:$0xff]  ;;  %v13025_v25 = vmax.f32 %v16792_v61, %v17227_v31  ;;  %v17231_v24 = vld [vmem:[#allocation183_spill] sm:$0xff] }
 0x471   :  { %17214 = vst [vmem:[#allocation288_spill] sm:$0xff] %v12995_v37  ;;  %v13015_v52 = vmax.f32 %v17222_v5, %v17221_v23  ;;  %v17224_v37 = vld [vmem:[#allocation46_spill] sm:$0xff]  ;;  %v13035_v5 = vmax.f32 %v17232_v36, %v17231_v24  ;;  %v17233_v23 = vld [vmem:[#allocation184_spill] sm:$0xff] }
 0x472   :  { %17218 = vst [vmem:[#allocation178_spill] sm:$0xff] %v13005_v32  ;;  %v17225_v12 = vrot.slane %v17224_v37, 9  ;;  %v17229_v32 = vrot.slane %v16792_v61, 2  ;;  %v17245_v36 = vld [vmem:[#allocation188_spill] sm:$0xff] }
 0x473   :  { %17223 = vst [vmem:[#allocation179_spill] sm:$0xff] %v13015_v52  ;;  %v17234_v52 = vrot.slane %v16792_v61, 6  ;;  %v17246_v61 = vrot.slane %v17239_v57, 4 }
 0x474   :  { %v13020_v9 = vmax.f32 %v17224_v37, %v17225_v12  ;;  %v13030_v21 = vmax.f32 %v17229_v32, %v17228_v8  ;;  %v17236_v37 = vld [vmem:[#allocation47_spill] sm:$0xff]  ;;  %v13050_v32 = vmax.f32 %v17239_v57, %v17240_v40 }
 0x475   :  { %v13040_v12 = vmax.f32 %v17234_v52, %v17233_v23  ;;  %v17237_v42 = vrot.slane %v17236_v37, 9  ;;  %v17242_v8 = vld [vmem:[#allocation187_spill] sm:$0xff]  ;;  %v13060_v52 = vmax.f32 %v17246_v61, %v17245_v36  ;;  %v17248_v23 = vld [vmem:[#allocation189_spill] sm:$0xff] }
 0x476   :  { %17226 = vst [vmem:[#allocation180_spill] sm:$0xff] %v13020_v9  ;;  %v17258_v61 = vld [vmem:[#allocation191_spill] sm:$0xff] }
 0x477   :  { %17230 = vst [vmem:[#allocation39_spill] sm:$0xff] %v13030_v21  ;;  %v13045_v31 = vmax.f32 %v17236_v37, %v17237_v42  ;;  %v17243_v21 = vrot.slane %v17239_v57, 2  ;;  %v17251_v37 = vld [vmem:[#allocation50_spill] sm:$0xff] }
 0x478   :  { %17235 = vst [vmem:[#allocation183_spill] sm:$0xff] %v13040_v12  ;;  %v17249_v12 = vrot.slane %v17239_v57, 6  ;;  %v17252_v9 = vrot.slane %v17251_v37, 9  ;;  %v17259_v57 = vrot.slane %v11376_v60, 4 }
 0x479   :  { %17238 = vst [vmem:[#allocation184_spill] sm:$0xff] %v13045_v31  ;;  %v13055_v24 = vmax.f32 %v17243_v21, %v17242_v8  ;;  %v17255_v8 = vld [vmem:[#allocation190_spill] sm:$0xff] }
 0x47a   :  { %17241 = vst [vmem:[#allocation49_spill] sm:$0xff] %v13050_v32  ;;  %v13065_v42 = vmax.f32 %v17249_v12, %v17248_v23  ;;  %v13070_v40 = vmax.f32 %v17251_v37, %v17252_v9  ;;  %v17254_v32 = vrot.slane %v11376_v60, 9  ;;  %v13085_v12 = vmax.f32 %v17259_v57, %v17258_v61 }
 0x47b   :  { %17244 = vst [vmem:[#allocation187_spill] sm:$0xff] %v13055_v24  ;;  %v17256_v24 = vrot.slane %v11376_v60, 2  ;;  %v17261_v23 = vrot.slane %v11376_v60, 6  ;;  %v17270_v57 = vrot.slane %v16628_v29, 9 }
 0x47c   :  { %17247 = vst [vmem:[#allocation188_spill] sm:$0xff] %v13060_v52  ;;  %v13075_v21 = vmax.f32 %v11376_v60, %v17254_v32 }
 0x47d   :  { %17250 = vst [vmem:[#allocation189_spill] sm:$0xff] %v13065_v42  ;;  %v13080_v36 = vmax.f32 %v17256_v24, %v17255_v8  ;;  %v13090_v9 = vmax.f32 %v17261_v23, %v12216_v26  ;;  %v17266_v42 = vrot.slane %v16626_v16, 9  ;;  %v17268_v8 = vrot.slane %v16627_v7, 9  ;;  %v17273_v23 = vld [vmem:[#allocation192_spill] sm:$0xff] }
 0x47e   :  { %17253 = vst [vmem:[#allocation289_spill] sm:$0xff] %v13070_v40  ;;  %v17263_v40 = vld [vmem:[#allocation52_spill] sm:$0xff]  ;;  %v13110_v60 = vmax.f32 %v16628_v29, %v17270_v57  ;;  %v17271_v26 = vrot.slane %v16628_v29, 2 }
 0x47f   :  { %17257 = vst [vmem:[#allocation190_spill] sm:$0xff] %v13080_v36  ;;  %v17264_v52 = vrot.slane %v17263_v40, 9  ;;  %v13100_v24 = vmax.f32 %v16626_v16, %v17266_v42  ;;  %v13105_v61 = vmax.f32 %v16627_v7, %v17268_v8  ;;  %v17281_v16 = vld [vmem:[#allocation59_spill] sm:$0xff] }
 0x480   :  { %17260 = vst [vmem:[#allocation191_spill] sm:$0xff] %v13085_v12  ;;  %v17276_v12 = vrot.slane %v16628_v29, 6 }
 0x481   :  { %17262 = vst [vmem:[#allocation290_spill] sm:$0xff] %v13090_v9  ;;  %v13095_v32 = vmax.f32 %v17263_v40, %v17264_v52  ;;  %v13115_v52 = vmax.f32 %v17271_v26, %v12226_v58  ;;  %v17282_v9 = vrot.slane %v17281_v16, 9  ;;  %v17283_v26 = vld [vmem:[#allocation196_spill] sm:$0xff]  ;;  %v17293_v40 = vld [vmem:[#allocation199_spill] sm:$0xff] }
 0x482   :  { %17267 = vst [vmem:[#allocation292_spill] sm:$0xff] %v13100_v24  ;;  %v17275_v24 = vld [vmem:[#allocation193_spill] sm:$0xff] }
 0x483   :  { %17265 = vst [vmem:[#allocation291_spill] sm:$0xff] %v13095_v32  ;;  %v17274_v32 = vrot.slane %v16628_v29, 4  ;;  %v13125_v8 = vmax.f32 %v17276_v12, %v17275_v24  ;;  %v13135_v58 = vmax.f32 %v17281_v16, %v17282_v9  ;;  %v17287_v29 = vrot.slane %v17281_v16, 4  ;;  %v17288_v24 = vld [vmem:[#allocation198_spill] sm:$0xff] }
 0x484   :  { %17269 = vst [vmem:[#allocation293_spill] sm:$0xff] %v13105_v61  ;;  %v17278_v61 = vld [vmem:[#allocation51_spill] sm:$0xff] }
 0x485   :  { %17272 = vst [vmem:[#allocation294_spill] sm:$0xff] %v13115_v52  ;;  %v13120_v42 = vmax.f32 %v17274_v32, %v17273_v23  ;;  %v17279_v7 = vrot.slane %v17278_v61, 9  ;;  %v17284_v52 = vrot.slane %v17281_v16, 2  ;;  %v17286_v23 = vld [vmem:[#allocation197_spill] sm:$0xff] }
 0x486   :  { %17277 = vst [vmem:[#allocation192_spill] sm:$0xff] %v13125_v8  ;;  %v13145_v12 = vmax.f32 %v17287_v29, %v17286_v23  ;;  %v17289_v8 = vrot.slane %v17281_v16, 6  ;;  %v17299_v29 = vrot.slane %v16841_v55, 9 }
 0x487   :  { %v13130_v57 = vmax.f32 %v17278_v61, %v17279_v7  ;;  %v13140_v32 = vmax.f32 %v17284_v52, %v17283_v26  ;;  %v17291_v61 = vld [vmem:[#allocation96_spill] sm:$0xff] }
 0x488   :  { %v13150_v7 = vmax.f32 %v17289_v8, %v17288_v24  ;;  %v17292_v36 = vrot.slane %v17291_v61, 9  ;;  %v17294_v37 = vrot.slane %v17291_v61, 2  ;;  %v17296_v26 = vld [vmem:[#allocation200_spill] sm:$0xff]  ;;  %v13170_v16 = vmax.f32 %v16841_v55, %v17299_v29 }
 0x489   :  { %17280 = vst [vmem:[#allocation193_spill] sm:$0xff] %v13130_v57  ;;  %v17301_v8 = vld [vmem:[#allocation60_spill] sm:$0xff]  ;;  %v17302_v24 = vrot.slane %v16841_v55, 2  ;;  %v17305_v57 = vrot.slane %v16841_v55, 4 }
 0x48a   :  { %17285 = vst [vmem:[#allocation59_spill] sm:$0xff] %v13140_v32  ;;  %v13155_v9 = vmax.f32 %v17291_v61, %v17292_v36  ;;  %v13160_v52 = vmax.f32 %v17294_v37, %v17293_v40  ;;  %v17297_v32 = vrot.slane %v17291_v61, 4  ;;  %v17307_v40 = vld [vmem:[#allocation203_spill] sm:$0xff]  ;;  %v17313_v61 = vld [vmem:[#allocation205_spill] sm:$0xff] }
 0x48b   :  { %17290 = vst [vmem:[#allocation196_spill] sm:$0xff] %v13150_v7  ;;  %v13175_v36 = vmax.f32 %v17302_v24, %v17301_v8  ;;  %v17304_v7 = vld [vmem:[#allocation202_spill] sm:$0xff] }
 0x48c   :  { %17295 = vst [vmem:[#allocation197_spill] sm:$0xff] %v13160_v52  ;;  %v13165_v23 = vmax.f32 %v17297_v32, %v17296_v26  ;;  %v13180_v37 = vmax.f32 %v17305_v57, %v17304_v7  ;;  %v17308_v52 = vrot.slane %v16841_v55, 6  ;;  %v17310_v26 = vld [vmem:[#allocation61_spill] sm:$0xff]  ;;  %v17316_v24 = vld [vmem:[#allocation62_spill] sm:$0xff] }
 0x48d   :  { %17300 = vst [vmem:[#allocation199_spill] sm:$0xff] %v13170_v16  ;;  %v17314_v16 = vrot.slane %v17310_v26, 4  ;;  %v17318_v7 = vld [vmem:[#allocation206_spill] sm:$0xff]  ;;  %v17319_v55 = vrot.slane %v17316_v24, 2 }
 0x48e   :  { %17298 = vst [vmem:[#allocation198_spill] sm:$0xff] %v13165_v23  ;;  %v13185_v32 = vmax.f32 %v17308_v52, %v17307_v40  ;;  %v17311_v23 = vrot.slane %v17310_v26, 9  ;;  %v17321_v40 = vld [vmem:[#allocation207_spill] sm:$0xff] }
 0x48f   :  { %17303 = vst [vmem:[#allocation200_spill] sm:$0xff] %v13175_v36  ;;  %v13195_v8 = vmax.f32 %v17314_v16, %v17313_v61  ;;  %v17317_v36 = vrot.slane %v17316_v24, 9  ;;  %v13205_v52 = vmax.f32 %v17319_v55, %v17318_v7  ;;  %v17326_v16 = vrot.slane %v11456_v0, 9 }
 0x490   :  { %17306 = vst [vmem:[#allocation60_spill] sm:$0xff] %v13180_v37  ;;  %v13190_v29 = vmax.f32 %v17310_v26, %v17311_v23  ;;  %v17324_v26 = vrot.slane %v17316_v24, 6  ;;  %v17328_v37 = vrot.slane %v11456_v0, 4  ;;  %v17330_v55 = vrot.slane %v16864_v1, 9 }
 0x491   :  { %17309 = vst [vmem:[#allocation202_spill] sm:$0xff] %v13185_v32  ;;  %v13200_v57 = vmax.f32 %v17316_v24, %v17317_v36  ;;  %v17322_v32 = vrot.slane %v17316_v24, 4  ;;  %v13220_v36 = vmax.f32 %v11456_v0, %v17326_v16  ;;  %v17336_v16 = vrot.slane %v16631_v34, 9 }
 0x492   :  { %17312 = vst [vmem:[#allocation203_spill] sm:$0xff] %v13190_v29  ;;  %v17323_v29 = vld [vmem:[#allocation208_spill] sm:$0xff]  ;;  %v17361_v0 = vrot.slane %v11492_v13, 9 }
 0x493   :  { %17315 = vst [vmem:[#allocation205_spill] sm:$0xff] %v13195_v8  ;;  %v13210_v23 = vmax.f32 %v17322_v32, %v17321_v40  ;;  %v13215_v61 = vmax.f32 %v17324_v26, %v17323_v29  ;;  %v17327_v8 = vld [vmem:[#allocation210_spill] sm:$0xff]  ;;  %v13230_v32 = vmax.f32 %v16864_v1, %v17330_v55  ;;  %v17332_v40 = vrot.slane %v16630_v10, 9 }
 0x494   :  { %17320 = vst [vmem:[#allocation62_spill] sm:$0xff] %v13205_v52  ;;  %v13225_v7 = vmax.f32 %v17328_v37, %v17327_v8  ;;  %v17334_v29 = vrot.slane %v16865_v33, 9  ;;  %v13245_v37 = vmax.f32 %v16631_v34, %v17336_v16  ;;  %v17338_v8 = vrot.slane %v16632_v43, 9 }
 0x495   :  { %17325 = vst [vmem:[#allocation206_spill] sm:$0xff] %v13215_v61  ;;  %v13235_v26 = vmax.f32 %v16630_v10, %v17332_v40  ;;  %v17343_v10 = vrot.slane %v16632_v43, 4  ;;  %v17345_v1 = vrot.slane %v16632_v43, 6  ;;  %v17350_v52 = vrot.slane %v16634_v62, 9 }
 0x496   :  { %17329 = vst [vmem:[#allocation207_spill] sm:$0xff] %v13225_v7  ;;  %v13240_v24 = vmax.f32 %v16865_v33, %v17334_v29  ;;  %v13250_v55 = vmax.f32 %v16632_v43, %v17338_v8  ;;  %v17340_v7 = vrot.slane %v16632_v43, 2  ;;  %v17355_v43 = vrot.slane %v16634_v62, 4  ;;  %v17382_v33 = vld [vmem:[#allocation228_spill] sm:$0xff] }
 0x497   :  { %17331 = vst [vmem:[#allocation208_spill] sm:$0xff] %v13230_v32  ;;  %v17339_v32 = vld [vmem:[#allocation211_spill] sm:$0xff]  ;;  %v17372_v34 = vrot.slane %v11616_v63, 9 }
 0x498   :  { %17333 = vst [vmem:[#allocation210_spill] sm:$0xff] %v13235_v26  ;;  %v13255_v40 = vmax.f32 %v17340_v7, %v17339_v32  ;;  %v17342_v26 = vld [vmem:[#allocation212_spill] sm:$0xff]  ;;  %v13275_v7 = vmax.f32 %v16634_v62, %v17350_v52 }
 0x499   :  { %17335 = vst [vmem:[#allocation295_spill] sm:$0xff] %v13240_v24  ;;  %v13260_v29 = vmax.f32 %v17343_v10, %v17342_v26  ;;  %v17344_v24 = vld [vmem:[#allocation213_spill] sm:$0xff]  ;;  %v17351_v32 = vld [vmem:[#allocation216_spill] sm:$0xff] }
 0x49a   :  { %17337 = vst [vmem:[#allocation296_spill] sm:$0xff] %v13245_v37  ;;  %v13265_v16 = vmax.f32 %v17345_v1, %v17344_v24  ;;  %v17347_v37 = vld [vmem:[#allocation102_spill] sm:$0xff]  ;;  %v17354_v26 = vld [vmem:[#allocation217_spill] sm:$0xff] }
 0x49b   :  { %17341 = vst [vmem:[#allocation211_spill] sm:$0xff] %v13255_v40  ;;  %v17348_v61 = vrot.slane %v17347_v37, 9  ;;  %v17352_v40 = vrot.slane %v16634_v62, 2  ;;  %v13285_v1 = vmax.f32 %v17355_v43, %v17354_v26  ;;  %v17356_v24 = vld [vmem:[#allocation218_spill] sm:$0xff] }
 0x49c   :  { %17346 = vst [vmem:[#allocation212_spill] sm:$0xff] %v13265_v16  ;;  %v17357_v16 = vrot.slane %v16634_v62, 6  ;;  %v17365_v43 = vld [vmem:[#allocation222_spill] sm:$0xff]  ;;  %v17366_v62 = vrot.slane %v11492_v13, 4 }
 0x49d   :  { %v13270_v8 = vmax.f32 %v17347_v37, %v17348_v61  ;;  %v13280_v10 = vmax.f32 %v17352_v40, %v17351_v32  ;;  %v17359_v37 = vrot.slane %v16882_v27, 9  ;;  %v13300_v40 = vmax.f32 %v11492_v13, %v17361_v0  ;;  %v17362_v32 = vld [vmem:[#allocation221_spill] sm:$0xff] }
 0x49e   :  { %v13290_v61 = vmax.f32 %v17357_v16, %v17356_v24  ;;  %v13310_v16 = vmax.f32 %v17366_v62, %v17365_v43  ;;  %v17367_v24 = vrot.slane %v11492_v13, 6  ;;  %v17376_v62 = vld [vmem:[#allocation225_spill] sm:$0xff] }
 0x49f   :  { %17349 = vst [vmem:[#allocation213_spill] sm:$0xff] %v13270_v8  ;;  %v13295_v52 = vmax.f32 %v16882_v27, %v17359_v37 }
 0x4a0   :  { %17353 = vst [vmem:[#allocation216_spill] sm:$0xff] %v13280_v10  ;;  %v17363_v10 = vrot.slane %v11492_v13, 2  ;;  %v13315_v37 = vmax.f32 %v17367_v24, %v12374_v49  ;;  %v17377_v13 = vrot.slane %v11616_v63, 4  ;;  %v17378_v24 = vld [vmem:[#allocation226_spill] sm:$0xff] }
 0x4a1   :  { %17358 = vst [vmem:[#allocation217_spill] sm:$0xff] %v13290_v61  ;;  %v17369_v61 = vld [vmem:[#allocation15_spill] sm:$0xff] }
 0x4a2   :  { %17360 = vst [vmem:[#allocation218_spill] sm:$0xff] %v13295_v52  ;;  %v13305_v26 = vmax.f32 %v17363_v10, %v17362_v32  ;;  %v17370_v27 = vrot.slane %v17369_v61, 9  ;;  %v13325_v10 = vmax.f32 %v11616_v63, %v17372_v34  ;;  %v17373_v32 = vld [vmem:[#allocation224_spill] sm:$0xff]  ;;  %v13335_v49 = vmax.f32 %v17377_v13, %v17376_v62 }
 0x4a3   :  { %17368 = vst [vmem:[#allocation222_spill] sm:$0xff] %v13315_v37  ;;  %v17379_v37 = vrot.slane %v11616_v63, 6  ;;  %v17387_v13 = vrot.slane %v11480_v54, 9 }
 0x4a4   :  { %17364 = vst [vmem:[#allocation221_spill] sm:$0xff] %v13305_v26  ;;  %v13320_v0 = vmax.f32 %v17369_v61, %v17370_v27  ;;  %v17374_v26 = vrot.slane %v11616_v63, 2  ;;  %v17381_v61 = vrot.slane %v11620_v51, 9 }
 0x4a5   :  { %v13340_v27 = vmax.f32 %v17379_v37, %v17378_v24  ;;  %v13360_v63 = vmax.f32 %v11480_v54, %v17387_v13  ;;  %v17389_v37 = vrot.slane %v11632_v30, 9  ;;  %v17391_v24 = vrot.slane %v11640_v2, 9 }
 0x4a6   :  { %17371 = vst [vmem:[#allocation297_spill] sm:$0xff] %v13320_v0  ;;  %v13330_v43 = vmax.f32 %v17374_v26, %v17373_v32  ;;  %v13345_v34 = vmax.f32 %v11620_v51, %v17381_v61  ;;  %v17383_v0 = vrot.slane %v11620_v51, 4  ;;  %v17385_v32 = vrot.slane %v16636_v45, 9 }
 0x4a7   :  { %17380 = vst [vmem:[#allocation225_spill] sm:$0xff] %v13340_v27  ;;  %v13365_v61 = vmax.f32 %v11632_v30, %v17389_v37  ;;  %v17398_v54 = vrot.slane %v11500_v22, 4  ;;  %v17413_v51 = vrot.slane %v11508_v59, 6 }
 0x4a8   :  { %17375 = vst [vmem:[#allocation224_spill] sm:$0xff] %v13330_v43  ;;  %v13350_v26 = vmax.f32 %v17383_v0, %v17382_v33  ;;  %v13355_v62 = vmax.f32 %v16636_v45, %v17385_v32  ;;  %v13370_v33 = vmax.f32 %v11640_v2, %v17391_v24  ;;  %v17393_v0 = vrot.slane %v11500_v22, 9  ;;  %v17412_v43 = vld [vmem:[#allocation236_spill] sm:$0xff] }
 0x4a9   :  { %17388 = vst [vmem:[#allocation298_spill] sm:$0xff] %v13360_v63  ;;  %v17397_v63 = vld [vmem:[#allocation230_spill] sm:$0xff]  ;;  %v17401_v45 = vrot.slane %v11500_v22, 6  ;;  %v17417_v2 = vrot.slane %v11516_v56, 9 }
 0x4aa   :  { %17384 = vst [vmem:[#allocation226_spill] sm:$0xff] %v13350_v26  ;;  %v13375_v32 = vmax.f32 %v11500_v22, %v17393_v0  ;;  %v17395_v26 = vrot.slane %v11500_v22, 2  ;;  %v13385_v37 = vmax.f32 %v17398_v54, %v17397_v63  ;;  %v8747_v0 = vld [vmem:[%s15702_s2 + $0x30] sm:$0xff]  ;;  %v17405_v54 = vrot.slane %v11508_v59, 9 }
 0x4ab   :  { %17386 = vst [vmem:[#allocation228_spill] sm:$0xff] %v13355_v62  ;;  %v17394_v62 = vld [vmem:[#allocation229_spill] sm:$0xff]  ;;  %v17407_v22 = vrot.slane %v11508_v59, 2  ;;  %6237 = vmatpush.bf16.msrb.mxu1 %v8747_v0  ;;  %v17431_v0 = vld [vmem:[#allocation108_spill] sm:$0xff] }
 0x4ac   :  { %17390 = vst [vmem:[#allocation299_spill] sm:$0xff] %v13365_v61  ;;  %v13380_v13 = vmax.f32 %v17395_v26, %v17394_v62  ;;  %v17400_v61 = vld [vmem:[#allocation231_spill] sm:$0xff]  ;;  %v17403_v26 = vrot.slane %v11504_v35, 9  ;;  %v13406_v63 = vmax.f32 %v11508_v59, %v17405_v54 }
 0x4ad   :  { %17392 = vst [vmem:[#allocation300_spill] sm:$0xff] %v13370_v33  ;;  %v13390_v24 = vmax.f32 %v17401_v45, %v17400_v61  ;;  %v8756_v33 = vld [vmem:[%s15702_s2 + $0x78] sm:$0xff]  ;;  %v17406_v45 = vld [vmem:[#allocation234_spill] sm:$0xff] }
 0x4ae   :  { %17396 = vst [vmem:[#allocation229_spill] sm:$0xff] %v13380_v13  ;;  %v13401_v62 = vmax.f32 %v11504_v35, %v17403_v26  ;;  %v13411_v61 = vmax.f32 %v17407_v22, %v17406_v45  ;;  %v17410_v13 = vrot.slane %v11508_v59, 4  ;;  %v13421_v26 = vmax.f32 %v17413_v51, %v17412_v43  ;;  %v17419_v22 = vld [vmem:[#allocation239_spill] sm:$0xff]  ;;  %v8746_v59 = vld [vmem:[%s15702_s2 + $0x28] sm:$0xff]  ;;  %v17422_v51 = vld [vmem:[#allocation240_spill] sm:$0xff]  ;;  %6265 = vmatpush.bf16.msrb.mxu2 %v8756_v33 }
 0x4af   :  { %17399 = vst [vmem:[#allocation230_spill] sm:$0xff] %v13385_v37  ;;  %v17415_v35 = vrot.slane %v11512_v17, 9  ;;  %v13431_v45 = vmax.f32 %v11516_v56, %v17417_v2  ;;  %v17423_v43 = vrot.slane %v11516_v56, 4  ;;  %v17441_v33 = vrot.slane %v11528_v3, 9  ;;  %6238 = vmatpush.bf16.msrb.mxu1 %v8746_v59  ;;  %v17473_v59 = vld [vmem:[#allocation75_spill] sm:$0xff] }
 0x4b0   :  { %17402 = vst [vmem:[#allocation231_spill] sm:$0xff] %v13390_v24  ;;  %v17409_v24 = vld [vmem:[#allocation235_spill] sm:$0xff] }
 0x4b1   :  { %17404 = vst [vmem:[#allocation301_spill] sm:$0xff] %v13401_v62  ;;  %v13416_v27 = vmax.f32 %v17410_v13, %v17409_v24  ;;  %v13426_v54 = vmax.f32 %v11512_v17, %v17415_v35  ;;  %v13444_v35 = vmax.f32 %v17423_v43, %v17422_v51  ;;  %v17425_v24 = vld [vmem:[#allocation241_spill] sm:$0xff]  ;;  %v17428_v17 = vld [vmem:[#allocation107_spill] sm:$0xff]  ;;  %v17433_v43 = vld [vmem:[#allocation244_spill] sm:$0xff] }
 0x4b2   :  { %17408 = vst [vmem:[#allocation234_spill] sm:$0xff] %v13411_v61  ;;  %v17420_v61 = vrot.slane %v11516_v56, 2  ;;  %v17429_v30 = vrot.slane %v17428_v17, 9  ;;  %v8755_v51 = vld [vmem:[%s15702_s2 + $0x70] sm:$0xff] }
 0x4b3   :  { %17411 = vst [vmem:[#allocation235_spill] sm:$0xff] %v13416_v27  ;;  %6266 = vmatpush.bf16.msrb.mxu2 %v8755_v51  ;;  %v17488_v51 = vld [vmem:[#allocation258_spill] sm:$0xff] }
 0x4b4   :  { %17414 = vst [vmem:[#allocation236_spill] sm:$0xff] %v13421_v26  ;;  %v13436_v13 = vmax.f32 %v17420_v61, %v17419_v22  ;;  %v17426_v26 = vrot.slane %v11516_v56, 6  ;;  %v13454_v61 = vmax.f32 %v17428_v17, %v17429_v30  ;;  %v17432_v22 = vrot.slane %v17431_v0, 9  ;;  %v17438_v17 = vld [vmem:[#allocation246_spill] sm:$0xff] }
 0x4b5   :  { %17416 = vst [vmem:[#allocation302_spill] sm:$0xff] %v13426_v54  ;;  %v17434_v56 = vrot.slane %v17431_v0, 2 }
 0x4b6   :  { %17418 = vst [vmem:[#allocation303_spill] sm:$0xff] %v13431_v45  ;;  %v13449_v2 = vmax.f32 %v17426_v26, %v17425_v24  ;;  %v17436_v24 = vld [vmem:[#allocation245_spill] sm:$0xff]  ;;  %v17443_v45 = vrot.slane %v11532_v15, 9 }
 0x4b7   :  { %17421 = vst [vmem:[#allocation239_spill] sm:$0xff] %v13436_v13  ;;  %v13459_v13 = vmax.f32 %v17431_v0, %v17432_v22  ;;  %v13467_v26 = vmax.f32 %v17434_v56, %v17433_v43  ;;  %v17445_v56 = vrot.slane %v11540_v41, 9 }
 0x4b8   :  { %17424 = vst [vmem:[#allocation240_spill] sm:$0xff] %v13444_v35  ;;  %v13482_v35 = vmax.f32 %v11528_v3, %v17441_v33  ;;  %v13487_v43 = vmax.f32 %v11532_v15, %v17443_v45  ;;  %v17452_v33 = vld [vmem:[#allocation118_spill] sm:$0xff]  ;;  %v17476_v15 = vld [vmem:[#allocation255_spill] sm:$0xff] }
 0x4b9   :  { %17427 = vst [vmem:[#allocation241_spill] sm:$0xff] %v13449_v2  ;;  %v17437_v2 = vrot.slane %v17431_v0, 4  ;;  %v17456_v3 = vrot.slane %v17452_v33, 2 }
 0x4ba   :  { %17430 = vst [vmem:[#allocation304_spill] sm:$0xff] %v13454_v61  ;;  %v17439_v61 = vrot.slane %v17431_v0, 6 }
 0x4bb   :  { %17435 = vst [vmem:[#allocation108_spill] sm:$0xff] %v13467_v26  ;;  %v13472_v30 = vmax.f32 %v17437_v2, %v17436_v24  ;;  %v13492_v2 = vmax.f32 %v11540_v41, %v17445_v56  ;;  %v17447_v24 = vld [vmem:[#allocation114_spill] sm:$0xff]  ;;  %v17459_v41 = vrot.slane %v17452_v33, 4 }
 0x4bc   :  { %v13477_v22 = vmax.f32 %v17439_v61, %v17438_v17  ;;  %17442 = vst [vmem:[#allocation245_spill] sm:$0xff] %v13482_v35  ;;  %v17448_v26 = vrot.slane %v17447_v24, 9  ;;  %v17450_v61 = vrot.slane %v16944_v48, 9 }
 0x4bd   :  { %17444 = vst [vmem:[#allocation246_spill] sm:$0xff] %v13487_v43  ;;  %v17455_v43 = vld [vmem:[#allocation249_spill] sm:$0xff] }
 0x4be   :  { %17440 = vst [vmem:[#allocation244_spill] sm:$0xff] %v13477_v22  ;;  %v13497_v17 = vmax.f32 %v17447_v24, %v17448_v26  ;;  %v13502_v0 = vmax.f32 %v16944_v48, %v17450_v61  ;;  %v17453_v22 = vrot.slane %v17452_v33, 9  ;;  %v13512_v56 = vmax.f32 %v17456_v3, %v17455_v43  ;;  %v17467_v43 = vld [vmem:[#allocation252_spill] sm:$0xff] }
 0x4bf   :  { %17446 = vst [vmem:[#allocation305_spill] sm:$0xff] %v13492_v2  ;;  %v17458_v2 = vld [vmem:[#allocation250_spill] sm:$0xff]  ;;  %v17462_v24 = vrot.slane %v17452_v33, 6 }
 0x4c0   :  { %17449 = vst [vmem:[#allocation306_spill] sm:$0xff] %v13497_v17  ;;  %v13507_v45 = vmax.f32 %v17452_v33, %v17453_v22  ;;  %v13517_v26 = vmax.f32 %v17459_v41, %v17458_v2  ;;  %v17461_v17 = vld [vmem:[#allocation251_spill] sm:$0xff]  ;;  %v8745_v22 = vld [vmem:[%s15702_s2 + $0x20] sm:$0xff] }
 0x4c1   :  { %17451 = vst [vmem:[#allocation307_spill] sm:$0xff] %v13502_v0  ;;  %v13522_v61 = vmax.f32 %v17462_v24, %v17461_v17  ;;  %v17464_v0 = vld [vmem:[#allocation19_spill] sm:$0xff]  ;;  %v17470_v2 = vld [vmem:[#allocation253_spill] sm:$0xff]  ;;  %v17474_v17 = vrot.slane %v17473_v59, 9  ;;  %6239 = vmatpush.bf16.msrb.mxu1 %v8745_v22  ;;  %v17522_v22 = vld [vmem:[#allocation268_spill] sm:$0xff] }
 0x4c2   :  { %17454 = vst [vmem:[#allocation118_spill] sm:$0xff] %v13507_v45  ;;  %v17465_v48 = vrot.slane %v17464_v0, 9  ;;  %v17471_v33 = vrot.slane %v17464_v0, 4 }
 0x4c3   :  { %17457 = vst [vmem:[#allocation249_spill] sm:$0xff] %v13512_v56  ;;  %v17468_v56 = vrot.slane %v17464_v0, 2 }
 0x4c4   :  { %17460 = vst [vmem:[#allocation250_spill] sm:$0xff] %v13517_v26  ;;  %v13530_v3 = vmax.f32 %v17464_v0, %v17465_v48  ;;  %v13540_v24 = vmax.f32 %v17471_v33, %v17470_v2  ;;  %v17477_v48 = vrot.slane %v17473_v59, 2  ;;  %v17479_v26 = vld [vmem:[#allocation256_spill] sm:$0xff]  ;;  %v17483_v2 = vrot.slane %v17473_v59, 6 }
 0x4c5   :  { %17463 = vst [vmem:[#allocation251_spill] sm:$0xff] %v13522_v61  ;;  %v13535_v41 = vmax.f32 %v17468_v56, %v17467_v43  ;;  %v13545_v61 = vmax.f32 %v17473_v59, %v17474_v17  ;;  %v17480_v56 = vrot.slane %v17473_v59, 4  ;;  %v17496_v59 = vld [vmem:[#allocation76_spill] sm:$0xff] }
 0x4c6   :  { %17466 = vst [vmem:[#allocation308_spill] sm:$0xff] %v13530_v3  ;;  %v13550_v3 = vmax.f32 %v17477_v48, %v17476_v15  ;;  %v17491_v48 = vld [vmem:[#allocation259_spill] sm:$0xff] }
 0x4c7   :  { %17469 = vst [vmem:[#allocation252_spill] sm:$0xff] %v13535_v41  ;;  %v13555_v43 = vmax.f32 %v17480_v56, %v17479_v26  ;;  %v17482_v41 = vld [vmem:[#allocation257_spill] sm:$0xff]  ;;  %v17494_v56 = vrot.slane %v16973_v44, 9 }
 0x4c8   :  { %17472 = vst [vmem:[#allocation253_spill] sm:$0xff] %v13540_v24  ;;  %v13560_v33 = vmax.f32 %v17483_v2, %v17482_v41  ;;  %v17485_v24 = vld [vmem:[#allocation119_spill] sm:$0xff]  ;;  %v17497_v2 = vrot.slane %v16973_v44, 2 }
 0x4c9   :  { %17475 = vst [vmem:[#allocation75_spill] sm:$0xff] %v13545_v61  ;;  %v17486_v0 = vrot.slane %v17485_v24, 9  ;;  %v17489_v45 = vrot.slane %v17485_v24, 2  ;;  %v13580_v41 = vmax.f32 %v16973_v44, %v17494_v56 }
 0x4ca   :  { %17478 = vst [vmem:[#allocation255_spill] sm:$0xff] %v13550_v3  ;;  %v17492_v3 = vrot.slane %v17485_v24, 4 }
 0x4cb   :  { %17481 = vst [vmem:[#allocation256_spill] sm:$0xff] %v13555_v43  ;;  %v13565_v17 = vmax.f32 %v17485_v24, %v17486_v0  ;;  %v13570_v15 = vmax.f32 %v17489_v45, %v17488_v51  ;;  %v13585_v0 = vmax.f32 %v17497_v2, %v17496_v59  ;;  %v17502_v51 = vld [vmem:[#allocation262_spill] sm:$0xff]  ;;  %v17508_v24 = vld [vmem:[#allocation263_spill] sm:$0xff]  ;;  %v17511_v2 = vld [vmem:[#allocation264_spill] sm:$0xff] }
 0x4cc   :  { %17484 = vst [vmem:[#allocation257_spill] sm:$0xff] %v13560_v33  ;;  %v13575_v26 = vmax.f32 %v17492_v3, %v17491_v48  ;;  %v17499_v33 = vld [vmem:[#allocation261_spill] sm:$0xff]  ;;  %v17505_v48 = vld [vmem:[#allocation120_spill] sm:$0xff] }
 0x4cd   :  { %17487 = vst [vmem:[#allocation309_spill] sm:$0xff] %v13565_v17  ;;  %v17500_v17 = vrot.slane %v16973_v44, 4  ;;  %v17564_v43 = vld [vmem:[#allocation285_spill] sm:$0xff] }
 0x4ce   :  { %17490 = vst [vmem:[#allocation258_spill] sm:$0xff] %v13570_v15  ;;  %v17503_v15 = vrot.slane %v16973_v44, 6  ;;  %v17514_v44 = vrot.slane %v16638_v39, 9 }
 0x4cf   :  { %17493 = vst [vmem:[#allocation259_spill] sm:$0xff] %v13575_v26  ;;  %v13590_v45 = vmax.f32 %v17500_v17, %v17499_v33  ;;  %v17506_v26 = vrot.slane %v17505_v48, 9  ;;  %v17512_v33 = vrot.slane %v17505_v48, 4 }
 0x4d0   :  { %17495 = vst [vmem:[#allocation310_spill] sm:$0xff] %v13580_v41  ;;  %v13595_v3 = vmax.f32 %v17503_v15, %v17502_v51  ;;  %v17509_v41 = vrot.slane %v17505_v48, 2  ;;  %v13615_v15 = vmax.f32 %v16638_v39, %v17514_v44  ;;  %v17516_v51 = vld [vmem:[#allocation266_spill] sm:$0xff] }
 0x4d1   :  { %17498 = vst [vmem:[#allocation76_spill] sm:$0xff] %v13585_v0  ;;  %v13600_v56 = vmax.f32 %v17505_v48, %v17506_v26  ;;  %v13610_v17 = vmax.f32 %v17512_v33, %v17511_v2  ;;  %v17517_v26 = vrot.slane %v16638_v39, 2  ;;  %v17519_v0 = vld [vmem:[#allocation267_spill] sm:$0xff]  ;;  %v17525_v33 = vrot.slane %v16993_v38, 9 }
 0x4d2   :  { %17501 = vst [vmem:[#allocation261_spill] sm:$0xff] %v13590_v45  ;;  %v13605_v59 = vmax.f32 %v17509_v41, %v17508_v24  ;;  %v17520_v24 = vrot.slane %v16638_v39, 4  ;;  %v17528_v48 = vrot.slane %v16993_v38, 2  ;;  %v17549_v45 = vld [vmem:[#allocation273_spill] sm:$0xff] }
 0x4d3   :  { %17504 = vst [vmem:[#allocation262_spill] sm:$0xff] %v13595_v3  ;;  %v13620_v3 = vmax.f32 %v17517_v26, %v17516_v51  ;;  %v13635_v44 = vmax.f32 %v16993_v38, %v17525_v33  ;;  %v17530_v26 = vld [vmem:[#allocation270_spill] sm:$0xff] }
 0x4d4   :  { %17507 = vst [vmem:[#allocation311_spill] sm:$0xff] %v13600_v56  ;;  %v13625_v41 = vmax.f32 %v17520_v24, %v17519_v0  ;;  %v17533_v24 = vrot.slane %v16640_v28, 9 }
 0x4d5   :  { %17510 = vst [vmem:[#allocation263_spill] sm:$0xff] %v13605_v59  ;;  %v17523_v59 = vrot.slane %v16638_v39, 6 }
 0x4d6   :  { %17513 = vst [vmem:[#allocation264_spill] sm:$0xff] %v13610_v17  ;;  %v17527_v17 = vld [vmem:[#allocation269_spill] sm:$0xff]  ;;  %v13650_v39 = vmax.f32 %v16640_v28, %v17533_v24  ;;  %v17546_v24 = vld [vmem:[#allocation127_spill] sm:$0xff] }
 0x4d7   :  { %17515 = vst [vmem:[#allocation312_spill] sm:$0xff] %v13615_v15  ;;  %v13630_v2 = vmax.f32 %v17523_v59, %v17522_v22  ;;  %v13640_v51 = vmax.f32 %v17528_v48, %v17527_v17  ;;  %v17535_v59 = vld [vmem:[#allocation123_spill] sm:$0xff]  ;;  %v17541_v17 = vld [vmem:[#allocation126_spill] sm:$0xff]  ;;  %v17556_v15 = vld [vmem:[#allocation280_spill] sm:$0xff] }
 0x4d8   :  { %17518 = vst [vmem:[#allocation266_spill] sm:$0xff] %v13620_v3  ;;  %v17531_v3 = vrot.slane %v16993_v38, 4  ;;  %v17536_v22 = vrot.slane %v17535_v59, 9 }
 0x4d9   :  { %17521 = vst [vmem:[#allocation267_spill] sm:$0xff] %v13625_v41  ;;  %v17554_v41 = vld [vmem:[#allocation144_spill] sm:$0xff] }
 0x4da   :  { %17524 = vst [vmem:[#allocation268_spill] sm:$0xff] %v13630_v2  ;;  %v13645_v0 = vmax.f32 %v17531_v3, %v17530_v26  ;;  %v13655_v33 = vmax.f32 %v17535_v59, %v17536_v22  ;;  %v17538_v2 = vld [vmem:[#allocation125_spill] sm:$0xff] }
 0x4db   :  { %17526 = vst [vmem:[#allocation313_spill] sm:$0xff] %v13635_v44  ;;  %v17539_v56 = vrot.slane %v17538_v2, 9  ;;  %v17544_v26 = vld [vmem:[#allocation81_spill] sm:$0xff]  ;;  %v17548_v44 = vld [vmem:[#allocation274_spill] sm:$0xff] }
 0x4dc   :  { %17529 = vst [vmem:[#allocation269_spill] sm:$0xff] %v13640_v51  ;;  %v17542_v51 = vrot.slane %v17541_v17, 9  ;;  %v5025_v22 = vmax.f32 %v17549_v45, %v17548_v44  ;;  %v17558_v45 = vld [vmem:[#allocation26_spill] sm:$0xff] }
 0x4dd   :  { %17532 = vst [vmem:[#allocation270_spill] sm:$0xff] %v13645_v0  ;;  %v13660_v48 = vmax.f32 %v17538_v2, %v17539_v56  ;;  %v17545_v0 = vld [vmem:[#allocation272_spill] sm:$0xff]  ;;  %v5031_v56 = vmax.f32 %v12680_v11, %v12705_v19  ;;  %v5061_v44 = vmax.f32 %v17558_v45, %v12825_v20  ;;  %v17561_v2 = vld [vmem:[#allocation27_spill] sm:$0xff]  ;;  %v5117_v20 = vmax.f32 %v13000_v6, %v13025_v25 }
 0x4de   :  { %17534 = vst [vmem:[#allocation314_spill] sm:$0xff] %v13650_v39  ;;  %v13665_v3 = vmax.f32 %v17541_v17, %v17542_v51  ;;  %v5021_v38 = vmax.f32 %v17545_v0, %v17544_v26  ;;  %v17547_v39 = vld [vmem:[#allocation37_spill] sm:$0xff]  ;;  %v17552_v51 = vld [vmem:[#allocation86_spill] sm:$0xff]  ;;  %v17555_v0 = vld [vmem:[#allocation139_spill] sm:$0xff] }
 0x4df   :  { %17537 = vst [vmem:[#allocation315_spill] sm:$0xff] %v13655_v33  ;;  %v5023_v28 = vmax.f32 %v17547_v39, %v17546_v24  ;;  %v17550_v33 = vld [vmem:[#allocation7_spill] sm:$0xff]  ;;  %v5055_v26 = vmax.f32 %v17555_v0, %v17554_v41  ;;  %v17565_v41 = vld [vmem:[#allocation284_spill] sm:$0xff] }
 0x4e0   :  { %17540 = vst [vmem:[#allocation316_spill] sm:$0xff] %v13660_v48  ;;  %v5029_v59 = vmax.f32 %v17550_v33, %v12695_v53  ;;  %v17557_v39 = vld [vmem:[#allocation279_spill] sm:$0xff]  ;;  %v5063_v53 = vmax.f32 %v12810_v50, %v12835_v14  ;;  %v17560_v33 = vld [vmem:[#allocation21_spill] sm:$0xff]  ;;  %v5089_v0 = vmax.f32 %v17565_v41, %v17564_v43  ;;  %v5119_v50 = vmax.f32 %v13010_v47, %v13035_v5  ;;  %v17571_v47 = vld [vmem:[#allocation60_spill] sm:$0xff] }
 0x4e1   :  { %17543 = vst [vmem:[#allocation317_spill] sm:$0xff] %v13665_v3  ;;  %v17553_v3 = vld [vmem:[#allocation278_spill] sm:$0xff]  ;;  %v5057_v24 = vmax.f32 %v17557_v39, %v17556_v15  ;;  %v5085_v4 = vmax.f32 %v17561_v2, %v17560_v33  ;;  %v17562_v48 = vld [vmem:[#allocation163_spill] sm:$0xff]  ;;  %v17566_v15 = vld [vmem:[#allocation41_spill] sm:$0xff]  ;;  %v5151_v43 = vmax.f32 %v13120_v42, %v13145_v12  ;;  %v5159_v5 = vmax.f32 %v17571_v47, %v13210_v23 }
 0x4e2   :  { %v5053_v17 = vmax.f32 %v17553_v3, %v17552_v51  ;;  %v17563_v3 = vld [vmem:[#allocation157_spill] sm:$0xff]  ;;  %v5093_v39 = vmax.f32 %v17566_v15, %v12965_v46  ;;  %v17570_v6 = vld [vmem:[#allocation199_spill] sm:$0xff]  ;;  %v5191_v12 = vmax.f32 %v13310_v16, %v13335_v49  ;;  %v5213_v23 = vmax.f32 %v13375_v32, %v13406_v63  ;;  %v17629_v49 = vld [vmem:[#allocation74_spill] sm:$0xff] }
 0x4e3   :  { %v5087_v51 = vmax.f32 %v17563_v3, %v17562_v48  ;;  %v17568_v2 = vld [vmem:[#allocation49_spill] sm:$0xff]  ;;  %v5149_v48 = vmax.f32 %v13110_v60, %v13135_v58  ;;  %v5157_v25 = vmax.f32 %v17570_v6, %v13200_v57  ;;  %v17572_v41 = vld [vmem:[#allocation203_spill] sm:$0xff]  ;;  %v5183_v60 = vmax.f32 %v13260_v29, %v13285_v1  ;;  %v17575_v1 = vld [vmem:[#allocation240_spill] sm:$0xff] }
 0x4e4   :  { %v5125_v33 = vmax.f32 %v17568_v2, %v13075_v21  ;;  %v17569_v46 = vld [vmem:[#allocation193_spill] sm:$0xff]  ;;  %v5161_v15 = vmax.f32 %v17572_v41, %v13220_v36  ;;  %v5181_v21 = vmax.f32 %v13250_v55, %v13275_v7  ;;  %v5189_v58 = vmax.f32 %v13300_v40, %v13325_v10  ;;  %v17574_v29 = vld [vmem:[#allocation303_spill] sm:$0xff]  ;;  %v17582_v41 = vld [vmem:[#allocation312_spill] sm:$0xff] }
 0x4e5   :  { %v5153_v3 = vmax.f32 %v17569_v46, %v13155_v9  ;;  %v17573_v9 = vld [vmem:[#allocation297_spill] sm:$0xff]  ;;  %v5221_v7 = vmax.f32 %v17574_v29, %v13459_v13  ;;  %v5223_v40 = vmax.f32 %v17575_v1, %v13472_v30  ;;  %v17584_v36 = vld [vmem:[#allocation267_spill] sm:$0xff]  ;;  %v13755_v45 = vperm.slane %v5021_v38, 0 }
 0x4e6   :  { %v5193_v57 = vmax.f32 %v17573_v9, %v13345_v34  ;;  %v17583_v9 = vld [vmem:[#allocation310_spill] sm:$0xff]  ;;  %v17585_v13 = vld [vmem:[#allocation261_spill] sm:$0xff]  ;;  %v17587_v30 = vld [vmem:[#allocation311_spill] sm:$0xff]  ;;  %v13757_v10 = vperm.slane %v5023_v28, 0  ;;  %v13759_v34 = vperm.slane %v5025_v22, 0  ;;  %v13761_v19 = vperm.slane %v5053_v17, 0 }
 0x4e7   :  { %v5253_v55 = vmax.f32 %v17583_v9, %v17582_v41  ;;  %v5255_v29 = vmax.f32 %v17585_v13, %v17584_v36  ;;  %v17586_v42 = vld [vmem:[#allocation313_spill] sm:$0xff]  ;;  %17588 = vst [vmem:[#allocation81_spill] sm:$0xff] %v13755_v45  ;;  %v13763_v63 = vperm.slane %v5055_v26, 0  ;;  %v13765_v47 = vperm.slane %v5057_v24, 0  ;;  %v17633_v16 = vld [vmem:[#allocation63_spill] sm:$0xff] }
 0x4e8   :  { %v5257_v1 = vmax.f32 %v17587_v30, %v17586_v42  ;;  %17589 = vst [vmem:[#allocation272_spill] sm:$0xff] %v13757_v10  ;;  %v13767_v54 = vperm.slane %v5085_v4, 0  ;;  %v13769_v41 = vperm.slane %v5087_v51, 0  ;;  %v13771_v36 = vperm.slane %v5089_v0, 0  ;;  %v17628_v2 = vld [vmem:[#allocation73_spill] sm:$0xff] }
 0x4e9   :  { %17590 = vst [vmem:[#allocation127_spill] sm:$0xff] %v13759_v34  ;;  %v13773_v9 = vperm.slane %v5117_v20, 0  ;;  %v13775_v38 = vperm.slane %v5119_v50, 0  ;;  %v13777_v28 = vperm.slane %v5149_v48, 0  ;;  %v13779_v22 = vperm.slane %v5151_v43, 0 }
 0x4ea   :  { %17591 = vst [vmem:[#allocation37_spill] sm:$0xff] %v13761_v19  ;;  %v13781_v17 = vperm.slane %v5153_v3, 0  ;;  %v13783_v26 = vperm.slane %v5181_v21, 0  ;;  %v13785_v24 = vperm.slane %v5183_v60, 0  ;;  %v13787_v4 = vperm.slane %v5213_v23, 0 }
 0x4eb   :  { %17592 = vst [vmem:[#allocation274_spill] sm:$0xff] %v13763_v63  ;;  %v13789_v51 = vperm.slane %v5029_v59, 0  ;;  %v13791_v0 = vperm.slane %v5031_v56, 0  ;;  %v13793_v20 = vperm.slane %v5061_v44, 0  ;;  %v13795_v50 = vperm.slane %v5063_v53, 0 }
 0x4ec   :  { %17593 = vst [vmem:[#allocation273_spill] sm:$0xff] %v13765_v47  ;;  %v13797_v48 = vperm.slane %v5093_v39, 0  ;;  %v13799_v43 = vperm.slane %v5125_v33, 0  ;;  %v13801_v3 = vperm.slane %v5157_v25, 0  ;;  %v13803_v21 = vperm.slane %v5159_v5, 0  ;;  %v17622_v5 = vld [vmem:[#allocation64_spill] sm:$0xff] }
 0x4ed   :  { %17594 = vst [vmem:[#allocation7_spill] sm:$0xff] %v13767_v54  ;;  %v13805_v60 = vperm.slane %v5161_v15, 0  ;;  %v13807_v42 = vperm.slane %v5189_v58, 0  ;;  %v13809_v59 = vperm.slane %v5191_v12, 0  ;;  %v13811_v56 = vperm.slane %v5193_v57, 0  ;;  %v17623_v58 = vld [vmem:[#allocation65_spill] sm:$0xff] }
 0x4ee   :  { %17595 = vst [vmem:[#allocation86_spill] sm:$0xff] %v13769_v41  ;;  %v13813_v44 = vperm.slane %v5221_v7, 0  ;;  %v13815_v53 = vperm.slane %v5223_v40, 0  ;;  %v13817_v39 = vperm.slane %v5253_v55, 0  ;;  %v13819_v33 = vperm.slane %v5255_v29, 0  ;;  %v17624_v57 = vld [vmem:[#allocation66_spill] sm:$0xff] }
 0x4ef   :  { %17596 = vst [vmem:[#allocation278_spill] sm:$0xff] %v13771_v36  ;;  %v13821_v25 = vperm.slane %v5257_v1, 0  ;;  %v2433_v23 = vrot.slane %v17622_v5, 2  ;;  %v2435_v15 = vrot.slane %v17622_v5, 6  ;;  %v2436_v13 = vrot.slane %v17623_v58, 2  ;;  %v17625_v40 = vld [vmem:[#allocation67_spill] sm:$0xff] }
 0x4f0   :  { %17597 = vst [vmem:[#allocation144_spill] sm:$0xff] %v13773_v9  ;;  %v2438_v12 = vrot.slane %v17623_v58, 6  ;;  %v2439_v30 = vrot.slane %v17624_v57, 2  ;;  %v2441_v7 = vrot.slane %v17624_v57, 6  ;;  %v2444_v55 = vrot.slane %v17625_v40, 6  ;;  %v17626_v29 = vld [vmem:[#allocation15_spill] sm:$0xff] }
 0x4f1   :  { %17598 = vst [vmem:[#allocation139_spill] sm:$0xff] %v13775_v38  ;;  %v2462_v62 = vrot.slane %v17626_v29, 6  ;;  %v17627_v1 = vld [vmem:[#allocation72_spill] sm:$0xff]  ;;  %v2484_v32 = vrot.slane %v17628_v2, 2  ;;  %v2486_v61 = vrot.slane %v17628_v2, 6  ;;  %v2487_v27 = vrot.slane %v17629_v49, 2 }
 0x4f2   :  { %17599 = vst [vmem:[#allocation280_spill] sm:$0xff] %v13777_v28  ;;  %v2481_v46 = vrot.slane %v17627_v1, 2  ;;  %v2483_v6 = vrot.slane %v17627_v1, 6  ;;  %v2489_v37 = vrot.slane %v17629_v49, 6  ;;  %v8057_v28 = vrot.slane %v2436_v13, 9  ;;  %v17636_v49 = vld [vmem:[#allocation68_spill] sm:$0xff] }
 0x4f3   :  { %17600 = vst [vmem:[#allocation279_spill] sm:$0xff] %v13779_v22  ;;  %v8055_v22 = vrot.slane %v2435_v15, 9  ;;  %v8059_v52 = vrot.slane %v2438_v12, 9  ;;  %v8061_v8 = vrot.slane %v2439_v30, 9  ;;  %v17637_v1 = vrot.slane %v17636_v49, 6  ;;  %v17638_v38 = vld [vmem:[#allocation204_spill] sm:$0xff] }
 0x4f4   :  { %17601 = vst [vmem:[#allocation26_spill] sm:$0xff] %v13781_v17  ;;  %v8053_v17 = vrot.slane %v2433_v23, 9  ;;  %v8117_v5 = vrot.slane %v2481_v46, 9  ;;  %v8123_v2 = vrot.slane %v2486_v61, 9  ;;  %v17642_v14 = vrot.slane %v17633_v16, 2 }
 0x4f5   :  { %17602 = vst [vmem:[#allocation21_spill] sm:$0xff] %v13783_v26  ;;  %v8099_v57 = vrot.slane %v17637_v1, 9  ;;  %v17643_v1 = vrot.slane %v17633_v16, 6  ;;  %v4816_v34 = vmax.f32 %v2435_v15, %v8055_v22  ;;  %v4818_v63 = vmax.f32 %v2436_v13, %v8057_v28 }
 0x4f6   :  { %17603 = vst [vmem:[#allocation27_spill] sm:$0xff] %v13785_v24  ;;  %v17634_v24 = vrot.slane %v17633_v16, 6  ;;  %v4814_v47 = vmax.f32 %v2433_v23, %v8053_v17  ;;  %v4820_v19 = vmax.f32 %v2438_v12, %v8059_v52  ;;  %v4822_v10 = vmax.f32 %v2439_v30, %v8061_v8 }
 0x4f7   :  { %17604 = vst [vmem:[#allocation163_spill] sm:$0xff] %v13787_v4  ;;  %v2442_v4 = vrot.slane %v17625_v40, 2  ;;  %v8127_v40 = vrot.slane %v2489_v37, 9  ;;  %v4884_v28 = vmax.f32 %v2486_v61, %v8123_v2  ;;  %v17654_v61 = vld [vmem:[#allocation225_spill] sm:$0xff] }
 0x4f8   :  { %17605 = vst [vmem:[#allocation157_spill] sm:$0xff] %v13789_v51  ;;  %v8035_v26 = vrot.slane %v17634_v24, 9  ;;  %v8125_v24 = vrot.slane %v2487_v27, 9  ;;  %v5174_v12 = vmax.f32 %v4814_v47, %v4822_v10 }
 0x4f9   :  { %17606 = vst [vmem:[#allocation285_spill] sm:$0xff] %v13791_v0  ;;  %v4888_v8 = vmax.f32 %v2489_v37, %v8127_v40 }
 0x4fa   :  { %17607 = vst [vmem:[#allocation284_spill] sm:$0xff] %v13793_v20  ;;  %v4886_v52 = vmax.f32 %v2487_v27, %v8125_v24  ;;  %v17655_v27 = vld [vmem:[#allocation222_spill] sm:$0xff] }
 0x4fb   :  { %17608 = vst [vmem:[#allocation41_spill] sm:$0xff] %v13795_v50  ;;  %v5192_v37 = vmax.f32 %v17655_v27, %v17654_v61 }
 0x4fc   :  { %17609 = vst [vmem:[#allocation49_spill] sm:$0xff] %v13797_v48  ;;  %v4796_v48 = vmax.f32 %v17643_v1, %v8035_v26  ;;  %v4878_v26 = vmax.f32 %v2481_v46, %v8117_v5  ;;  %v17652_v46 = vld [vmem:[#allocation224_spill] sm:$0xff] }
 0x4fd   :  { %17610 = vst [vmem:[#allocation193_spill] sm:$0xff] %v13799_v43  ;;  %v17656_v1 = vld [vmem:[#allocation40_spill] sm:$0xff] }
 0x4fe   :  { %17611 = vst [vmem:[#allocation199_spill] sm:$0xff] %v13801_v3  ;;  %v8091_v3 = vrot.slane %v2462_v62, 9 }
 0x4ff   :  { %17612 = vst [vmem:[#allocation60_spill] sm:$0xff] %v13803_v21 }
 0x500   :  { %17613 = vst [vmem:[#allocation203_spill] sm:$0xff] %v13805_v60  ;;  %v8065_v60 = vrot.slane %v2442_v4, 9 }
 0x501   :  { %17614 = vst [vmem:[#allocation297_spill] sm:$0xff] %v13807_v42  ;;  %v17635_v42 = vrot.slane %v17626_v29, 2 }
 0x502   :  { %17615 = vst [vmem:[#allocation303_spill] sm:$0xff] %v13809_v59  ;;  %v8067_v59 = vrot.slane %v2444_v55, 9  ;;  %v4826_v50 = vmax.f32 %v2442_v4, %v8065_v60  ;;  %v17648_v60 = vld [vmem:[#allocation62_spill] sm:$0xff] }
 0x503   :  { %17616 = vst [vmem:[#allocation240_spill] sm:$0xff] %v13811_v56  ;;  %v8063_v56 = vrot.slane %v2441_v7, 9  ;;  %v8089_v21 = vrot.slane %v17635_v42, 9  ;;  %v17641_v42 = vld [vmem:[#allocation209_spill] sm:$0xff] }
 0x504   :  { %17617 = vst [vmem:[#allocation312_spill] sm:$0xff] %v13813_v44  ;;  %v4794_v43 = vmax.f32 %v17642_v14, %v17641_v42  ;;  %v4828_v20 = vmax.f32 %v2444_v55, %v8067_v59  ;;  %v17647_v14 = vrot.slane %v17636_v49, 6  ;;  %v17649_v59 = vld [vmem:[#allocation200_spill] sm:$0xff] }
 0x505   :  { %17618 = vst [vmem:[#allocation310_spill] sm:$0xff] %v13815_v53  ;;  %v17631_v53 = vld [vmem:[#allocation61_spill] sm:$0xff]  ;;  %v4824_v45 = vmax.f32 %v2441_v7, %v8063_v56  ;;  %v5158_v23 = vmax.f32 %v17649_v59, %v17648_v60 }
 0x506   :  { %17619 = vst [vmem:[#allocation267_spill] sm:$0xff] %v13817_v39  ;;  %v17632_v44 = vrot.slane %v17631_v53, 6  ;;  %v17639_v9 = vrot.slane %v17631_v53, 2  ;;  %v17640_v54 = vrot.slane %v17631_v53, 6  ;;  %v4852_v53 = vmax.f32 %v2462_v62, %v8091_v3  ;;  %v17651_v62 = vld [vmem:[#allocation202_spill] sm:$0xff] }
 0x507   :  { %17620 = vst [vmem:[#allocation261_spill] sm:$0xff] %v13819_v33  ;;  %v4860_v16 = vmax.f32 %v17647_v14, %v8099_v57  ;;  %v5176_v30 = vmax.f32 %v4816_v34, %v4824_v45  ;;  %v5180_v57 = vmax.f32 %v4820_v19, %v4828_v20  ;;  %v5976_v34 = vperm.slane %v5174_v12, 0  ;;  %v17661_v12 = vld [vmem:[#allocation52_spill] sm:$0xff] }
 0x508   :  { %17621 = vst [vmem:[#allocation313_spill] sm:$0xff] %v13821_v25  ;;  %v17630_v25 = vld [vmem:[#allocation11_spill] sm:$0xff]  ;;  %v8027_v35 = vrot.slane %v17632_v44, 9  ;;  %v8119_v44 = vrot.slane %v2483_v6, 9  ;;  %v4786_v41 = vmax.f32 %v17639_v9, %v17638_v38  ;;  %v17644_v9 = vrot.slane %v17626_v29, 2 }
 0x509   :  { %v2490_v33 = vrot.slane %v17630_v25, 2  ;;  %v2492_v39 = vrot.slane %v17630_v25, 6  ;;  %v8121_v25 = vrot.slane %v2484_v32, 9 }
 0x50a   :  { %v4788_v31 = vmax.f32 %v17640_v54, %v8027_v35  ;;  %v4850_v38 = vmax.f32 %v17644_v9, %v8089_v21  ;;  %v17645_v54 = vld [vmem:[#allocation227_spill] sm:$0xff]  ;;  %v17646_v35 = vrot.slane %v17636_v49, 2  ;;  %v4880_v17 = vmax.f32 %v2483_v6, %v8119_v44  ;;  %v17650_v21 = vld [vmem:[#allocation206_spill] sm:$0xff]  ;;  %v17653_v6 = vld [vmem:[#allocation221_spill] sm:$0xff] }
 0x50b   :  { %v8129_v36 = vrot.slane %v2490_v33, 9  ;;  %v8131_v58 = vrot.slane %v2492_v39, 9  ;;  %v4882_v22 = vmax.f32 %v2484_v32, %v8121_v25  ;;  %v5160_v3 = vmax.f32 %v17651_v62, %v17650_v21  ;;  %v17660_v62 = vld [vmem:[#allocation50_spill] sm:$0xff] }
 0x50c   :  { %v4858_v0 = vmax.f32 %v17646_v35, %v17645_v54  ;;  %v5162_v15 = vmax.f32 %v4786_v41, %v4794_v43  ;;  %v5164_v13 = vmax.f32 %v4788_v31, %v4796_v48  ;;  %v5178_v49 = vmax.f32 %v4818_v63, %v4826_v50  ;;  %v17657_v35 = vld [vmem:[#allocation42_spill] sm:$0xff] }
 0x50d   :  { %v4890_v56 = vmax.f32 %v2490_v33, %v8129_v36  ;;  %v4892_v4 = vmax.f32 %v2492_v39, %v8131_v58  ;;  %v5190_v32 = vmax.f32 %v17653_v6, %v17652_v46  ;;  %v5196_v36 = vmax.f32 %v4852_v53, %v4860_v16 }
 0x50e   :  { %v5194_v2 = vmax.f32 %v4850_v38, %v4858_v0  ;;  %v5206_v39 = vmax.f32 %v4878_v26, %v4886_v52  ;;  %v5208_v33 = vmax.f32 %v4880_v17, %v4888_v8  ;;  %v5972_v31 = vperm.slane %v5158_v23, 0 }
 0x50f   :  { %v5210_v25 = vmax.f32 %v4882_v22, %v4890_v56  ;;  %v5212_v5 = vmax.f32 %v4884_v28, %v4892_v4  ;;  %v5973_v19 = vperm.slane %v5160_v3, 0  ;;  %v5974_v45 = vperm.slane %v5162_v15, 0  ;;  %v17658_v22 = vld [vmem:[#allocation44_spill] sm:$0xff]  ;;  %v17659_v4 = vld [vmem:[#allocation45_spill] sm:$0xff] }
 0x510   :  { %v5975_v10 = vperm.slane %v5164_v13, 0  ;;  %v5977_v63 = vperm.slane %v5176_v30, 0  ;;  %v5980_v47 = vperm.slane %v5190_v32, 0  ;;  %v5981_v41 = vperm.slane %v5192_v37, 0  ;;  %v17663_v32 = vld [vmem:[#allocation56_spill] sm:$0xff]  ;;  %v17664_v37 = vld [vmem:[#allocation57_spill] sm:$0xff] }
 0x511   :  { %v5982_v0 = vperm.slane %v5194_v2, 0  ;;  %v5978_v20 = vperm.slane %v5178_v49, 0  ;;  %v5979_v50 = vperm.slane %v5180_v57, 0  ;;  %v5983_v48 = vperm.slane %v5196_v36, 0  ;;  %v17662_v49 = vld [vmem:[#allocation55_spill] sm:$0xff] }
 0x512   :  { %v5984_v43 = vperm.slane %v5206_v39, 0  ;;  %v5985_v58 = vperm.slane %v5208_v33, 0  ;;  %v5986_v7 = vperm.slane %v5210_v25, 0  ;;  %v6032_v40 = vsel %vm5405_vm6, %v5973_v19, %v5972_v31  ;;  %v17665_v39 = vld [vmem:[#allocation58_spill] sm:$0xff] }
 0x513   :  { %v6039_v55 = vsel %vm5405_vm6, %v5981_v41, %v5980_v47  ;;  %v5987_v44 = vperm.slane %v5212_v5, 0  ;;  %v6033_v24 = vsel %vm5407_vm7, %v5974_v45, %v6032_v40  ;;  %v2337_v9 = vrot.slane %v17656_v1, 2  ;;  %v17666_v5 = vld [vmem:[#allocation32_spill] sm:$0xff] }
 0x514   :  { %v6040_v42 = vsel %vm5407_vm7, %v5982_v0, %v6039_v55  ;;  %v6034_v38 = vsel %vm5409_vm8, %v5975_v10, %v6033_v24  ;;  %v2339_v54 = vrot.slane %v17656_v1, 6  ;;  %v2340_v14 = vrot.slane %v17657_v35, 2  ;;  %v17668_v45 = vld [vmem:[#allocation48_spill] sm:$0xff] }
 0x515   :  { %v6041_v53 = vsel %vm5409_vm8, %v5983_v48, %v6040_v42  ;;  %v6035_v16 = vsel %vm5411_vm9, %v5976_v34, %v6034_v38  ;;  %v2342_v17 = vrot.slane %v17657_v35, 6  ;;  %v2343_v28 = vrot.slane %v17658_v22, 2 }
 0x516   :  { %v6042_v26 = vsel %vm5411_vm9, %v5984_v43, %v6041_v53  ;;  %v6036_v52 = vsel %vm5413_vm10, %v5977_v63, %v6035_v16  ;;  %v2345_v56 = vrot.slane %v17658_v22, 6  ;;  %v2346_v60 = vrot.slane %v17659_v4, 2 }
 0x517   :  { %v6043_v8 = vsel %vm5413_vm10, %v5985_v58, %v6042_v26  ;;  %v6037_v59 = vsel %vm5415_vm11, %v5978_v20, %v6036_v52  ;;  %v2348_v21 = vrot.slane %v17659_v4, 6  ;;  %v2366_v3 = vrot.slane %v17660_v62, 6 }
 0x518   :  { %v6044_v23 = vsel %vm5415_vm11, %v5986_v7, %v6043_v8  ;;  %v6038_v15 = vsel %vm5417_vm12, %v5979_v50, %v6037_v59  ;;  %v2372_v30 = vrot.slane %v17661_v12, 6  ;;  %v2385_v57 = vrot.slane %v17662_v49, 2 }
 0x519   :  { %v6045_v13 = vsel %vm5417_vm12, %v5987_v44, %v6044_v23  ;;  %v2387_v6 = vrot.slane %v17662_v49, 6  ;;  %v2388_v61 = vrot.slane %v17663_v32, 2  ;;  %v2390_v27 = vrot.slane %v17663_v32, 6  ;;  %v17672_v23 = vld [vmem:[#allocation171_spill] sm:$0xff] }
 0x51a   :  { %v8865_v46 = vpack.i.bf16 %v6045_v13, %v6038_v15  ;;  %v2391_v2 = vrot.slane %v17664_v37, 2  ;;  %v2393_v36 = vrot.slane %v17664_v37, 6  ;;  %v2394_v33 = vrot.slane %v17665_v39, 2 }
 0x51b   :  { %v2396_v25 = vrot.slane %v17665_v39, 6  ;;  %v17667_v31 = vrot.slane %v17666_v5, 6  ;;  %v17669_v10 = vrot.slane %v17668_v45, 6  ;;  %v7925_v63 = vrot.slane %v2337_v9, 9 }
 0x51c   :  { %8866 = vrot.lane.b32.xlu2 %v8865_v46, %s8931_s20  ;;  %v7927_v47 = vrot.slane %v2339_v54, 9  ;;  %v7929_v41 = vrot.slane %v2340_v14, 9  ;;  %v7931_v0 = vrot.slane %v2342_v17, 9  ;;  %v7933_v20 = vrot.slane %v2343_v28, 9 }
 0x51d   :  { %v7899_v19 = vrot.slane %v17667_v31, 9  ;;  %v7907_v34 = vrot.slane %v17669_v10, 9  ;;  %v7935_v50 = vrot.slane %v2345_v56, 9  ;;  %v7937_v48 = vrot.slane %v2346_v60, 9  ;;  %v17675_v10 = vld [vmem:[#allocation176_spill] sm:$0xff] }
 0x51e   :  { %v7939_v43 = vrot.slane %v2348_v21, 9  ;;  %v17670_v58 = vrot.slane %v17660_v62, 2  ;;  %v7963_v40 = vrot.slane %v2366_v3, 9  ;;  %v17671_v55 = vrot.slane %v17661_v12, 2 }
 0x51f   :  { %v7971_v24 = vrot.slane %v2372_v30, 9  ;;  %v7989_v42 = vrot.slane %v2385_v57, 9  ;;  %v7991_v38 = vrot.slane %v2387_v6, 9  ;;  %v7993_v53 = vrot.slane %v2388_v61, 9 }
 0x520   :  { %v7961_v7 = vrot.slane %v17670_v58, 9  ;;  %v7969_v44 = vrot.slane %v17671_v55, 9  ;;  %v7995_v16 = vrot.slane %v2390_v27, 9  ;;  %v7997_v26 = vrot.slane %v2391_v2, 9 }
 0x521   :  { %v7999_v52 = vrot.slane %v2393_v36, 9  ;;  %v8001_v8 = vrot.slane %v2394_v33, 9  ;;  %v8003_v59 = vrot.slane %v2396_v25, 9  ;;  %v17673_v15 = vrot.slane %v17666_v5, 2 }
 0x522   :  { %v17674_v46 = vmov %v17667_v31  ;;  %v17676_v58 = vrot.slane %v17668_v45, 2  ;;  %v17677_v29 = vrot.slane %v17668_v45, 6  ;;  %v4686_v37 = vmax.f32 %v2337_v9, %v7925_v63 }
 0x523   :  { %v4658_v13 = vmax.f32 %v17673_v15, %v17672_v23  ;;  %v4660_v31 = vmax.f32 %v17674_v46, %v7899_v19  ;;  %v4688_v32 = vmax.f32 %v2339_v54, %v7927_v47  ;;  %v4690_v49 = vmax.f32 %v2340_v14, %v7929_v41 }
 0x524   :  { %v4666_v55 = vmax.f32 %v17676_v58, %v17675_v10  ;;  %v4668_v39 = vmax.f32 %v17677_v29, %v7907_v34  ;;  %v4692_v4 = vmax.f32 %v2342_v17, %v7931_v0  ;;  %v4694_v22 = vmax.f32 %v2343_v28, %v7933_v20  ;;  %v17680_v28 = vld [vmem:[#allocation38_spill] sm:$0xff] }
 0x525   :  { %v4696_v35 = vmax.f32 %v2345_v56, %v7935_v50  ;;  %v4698_v1 = vmax.f32 %v2346_v60, %v7937_v48  ;;  %v4700_v51 = vmax.f32 %v2348_v21, %v7939_v43  ;;  %v17678_v23 = vrot.slane %v17660_v62, 2  ;;  %v17681_v56 = vld [vmem:[#allocation168_spill] sm:$0xff]  ;;  %v17682_v21 = vld [vmem:[#allocation174_spill] sm:$0xff] }
 0x526   :  { %v4724_v5 = vmax.f32 %v2366_v3, %v7963_v40  ;;  %v17679_v19 = vrot.slane %v17661_v12, 2  ;;  %v4732_v18 = vmax.f32 %v2372_v30, %v7971_v24  ;;  %v4750_v10 = vmax.f32 %v2385_v57, %v7989_v42  ;;  %v17683_v34 = vld [vmem:[#allocation170_spill] sm:$0xff]  ;;  %v17685_v57 = vld [vmem:[#allocation187_spill] sm:$0xff] }
 0x527   :  { %v4722_v15 = vmax.f32 %v17678_v23, %v7961_v7  ;;  %v4752_v58 = vmax.f32 %v2387_v6, %v7991_v38  ;;  %v4754_v45 = vmax.f32 %v2388_v61, %v7993_v53  ;;  %v4756_v29 = vmax.f32 %v2390_v27, %v7995_v16  ;;  %v17684_v30 = vld [vmem:[#allocation190_spill] sm:$0xff]  ;;  %v17687_v27 = vld [vmem:[#allocation189_spill] sm:$0xff] }
 0x528   :  { %v4730_v46 = vmax.f32 %v17679_v19, %v7969_v44  ;;  %v4758_v9 = vmax.f32 %v2391_v2, %v7997_v26  ;;  %v4760_v54 = vmax.f32 %v2393_v36, %v7999_v52  ;;  %v4762_v14 = vmax.f32 %v2394_v33, %v8001_v8  ;;  %v17686_v61 = vld [vmem:[#allocation290_spill] sm:$0xff]  ;;  %v17688_v52 = vld [vmem:[#allocation9_spill] sm:$0xff] }
 0x529   :  { %v4764_v17 = vmax.f32 %v2396_v25, %v8003_v59  ;;  %v5094_v60 = vmax.f32 %v17681_v56, %v17680_v28  ;;  %v5096_v63 = vmax.f32 %v17683_v34, %v17682_v21  ;;  %v5098_v47 = vmax.f32 %v4658_v13, %v4666_v55  ;;  %v17689_v59 = vld [vmem:[#allocation88_spill] sm:$0xff]  ;;  %v17690_v23 = vld [vmem:[#allocation89_spill] sm:$0xff] }
 0x52a   :  { %v5100_v3 = vmax.f32 %v4660_v31, %v4668_v39  ;;  %v5110_v41 = vmax.f32 %v4686_v37, %v4694_v22  ;;  %v5112_v0 = vmax.f32 %v4688_v32, %v4696_v35  ;;  %v5114_v20 = vmax.f32 %v4690_v49, %v4698_v1  ;;  %v17693_v34 = vld [vmem:[#allocation16_spill] sm:$0xff] }
 0x52b   :  { %v5126_v6 = vmax.f32 %v17685_v57, %v17684_v30  ;;  %v5128_v2 = vmax.f32 %v17687_v27, %v17686_v61  ;;  %v5130_v36 = vmax.f32 %v4722_v15, %v4730_v46  ;;  %v5116_v33 = vmax.f32 %v4692_v4, %v4700_v51  ;;  %v17695_v30 = vld [vmem:[#allocation33_spill] sm:$0xff]  ;;  %v17696_v61 = vld [vmem:[#allocation24_spill] sm:$0xff] }
 0x52c   :  { %v5132_v25 = vmax.f32 %v4724_v5, %v4732_v18  ;;  %v5142_v50 = vmax.f32 %v4750_v10, %v4758_v9  ;;  %v5144_v48 = vmax.f32 %v4752_v58, %v4760_v54  ;;  %v5146_v43 = vmax.f32 %v4754_v45, %v4762_v14  ;;  %v17691_v58 = vld [vmem:[#allocation90_spill] sm:$0xff] }
 0x52d   :  { %v5148_v7 = vmax.f32 %v4756_v29, %v4764_v17  ;;  %v5956_v40 = vperm.slane %v5094_v60, 0  ;;  %v5957_v44 = vperm.slane %v5096_v63, 0  ;;  %v5958_v24 = vperm.slane %v5098_v47, 0  ;;  %v17692_v17 = vld [vmem:[#allocation92_spill] sm:$0xff] }
 0x52e   :  { %v5959_v39 = vperm.slane %v5100_v3, 0  ;;  %v5960_v22 = vperm.slane %v5110_v41, 0  ;;  %v5961_v35 = vperm.slane %v5112_v0, 0  ;;  %v5962_v1 = vperm.slane %v5114_v20, 0  ;;  %v17694_v0 = vld [vmem:[#allocation17_spill] sm:$0xff] }
 0x52f   :  { %v5964_v49 = vperm.slane %v5126_v6, 0  ;;  %v5965_v32 = vperm.slane %v5128_v2, 0  ;;  %v5966_v37 = vperm.slane %v5130_v36, 0  ;;  %v5963_v42 = vperm.slane %v5116_v33, 0  ;;  %v17697_v36 = vld [vmem:[#allocation34_spill] sm:$0xff] }
 0x530   :  { %v5967_v38 = vperm.slane %v5132_v25, 0  ;;  %v5968_v53 = vperm.slane %v5142_v50, 0  ;;  %v5969_v16 = vperm.slane %v5144_v48, 0  ;;  %v5970_v51 = vperm.slane %v5146_v43, 0  ;;  %v17698_v50 = vld [vmem:[#allocation36_spill] sm:$0xff] }
 0x531   :  { %v5971_v18 = vperm.slane %v5148_v7, 0  ;;  %v6018_v4 = vsel %vm5405_vm6, %v5957_v44, %v5956_v40  ;;  %v6025_v5 = vsel %vm5405_vm6, %v5965_v32, %v5964_v49  ;;  %v2222_v8 = vrot.slane %v17688_v52, 6  ;;  %v17699_v7 = vld [vmem:[#allocation31_spill] sm:$0xff] }
 0x532   :  { %v6019_v45 = vsel %vm5407_vm7, %v5958_v24, %v6018_v4  ;;  %v6026_v26 = vsel %vm5407_vm7, %v5966_v37, %v6025_v5  ;;  %v2228_v13 = vrot.slane %v17689_v59, 6  ;;  %v2241_v15 = vrot.slane %v17690_v23, 2 }
 0x533   :  { %v6020_v31 = vsel %vm5409_vm8, %v5959_v39, %v6019_v45  ;;  %v6027_v55 = vsel %vm5409_vm8, %v5967_v38, %v6026_v26  ;;  %v2243_v19 = vrot.slane %v17690_v23, 6  ;;  %v2244_v29 = vrot.slane %v17691_v58, 2 }
 0x534   :  { %v6021_v46 = vsel %vm5411_vm9, %v5960_v22, %v6020_v31  ;;  %v6028_v10 = vsel %vm5411_vm9, %v5968_v53, %v6027_v55  ;;  %v2246_v9 = vrot.slane %v17691_v58, 6  ;;  %v2247_v28 = vrot.slane %v17692_v17, 2 }
 0x535   :  { %v6022_v54 = vsel %vm5413_vm10, %v5961_v35, %v6021_v46  ;;  %v6029_v14 = vsel %vm5413_vm10, %v5969_v16, %v6028_v10  ;;  %v2249_v56 = vrot.slane %v17692_v17, 6  ;;  %v2250_v63 = vrot.slane %v17693_v34, 2 }
 0x536   :  { %v6023_v60 = vsel %vm5415_vm11, %v5962_v1, %v6022_v54  ;;  %v6030_v21 = vsel %vm5415_vm11, %v5970_v51, %v6029_v14  ;;  %v2252_v47 = vrot.slane %v17693_v34, 6  ;;  %v2270_v20 = vrot.slane %v17694_v0, 6 }
 0x537   :  { %v6024_v3 = vsel %vm5417_vm12, %v5963_v42, %v6023_v60  ;;  %v6031_v41 = vsel %vm5417_vm12, %v5971_v18, %v6030_v21  ;;  %v2276_v57 = vrot.slane %v17695_v30, 6  ;;  %v2289_v27 = vrot.slane %v17696_v61, 2 }
 0x538   :  { %v8855_v6 = vpack.i.bf16 %v6031_v41, %v6024_v3  ;;  %v2291_v2 = vrot.slane %v17696_v61, 6  ;;  %v2292_v33 = vrot.slane %v17697_v36, 2  ;;  %v2294_v25 = vrot.slane %v17697_v36, 6 }
 0x539   :  { %v2295_v48 = vrot.slane %v17698_v50, 2  ;;  %v2297_v43 = vrot.slane %v17698_v50, 6  ;;  %v2298_v40 = vrot.slane %v17699_v7, 2  ;;  %v2300_v44 = vrot.slane %v17699_v7, 6 }
 0x53a   :  { %8856 = vrot.lane.b32.xlu1 %v8855_v6, %s8931_s20  ;;  %v17700_v24 = vrot.slane %v17688_v52, 2  ;;  %v7771_v22 = vrot.slane %v2222_v8, 9  ;;  %v17701_v35 = vrot.slane %v17689_v59, 2  ;;  %v7779_v49 = vrot.slane %v2228_v13, 9  ;;  %v17707_v52 = vld [vmem:[#allocation33_spill] sm:$0xff] }
 0x53b   :  { %v7797_v32 = vrot.slane %v2241_v15, 9  ;;  %v7799_v37 = vrot.slane %v2243_v19, 9  ;;  %v7801_v42 = vrot.slane %v2244_v29, 9  ;;  %v7803_v38 = vrot.slane %v2246_v9, 9 }
 0x53c   :  { %v7769_v39 = vrot.slane %v17700_v24, 9  ;;  %v7777_v1 = vrot.slane %v17701_v35, 9  ;;  %v7805_v53 = vrot.slane %v2247_v28, 9  ;;  %v7807_v16 = vrot.slane %v2249_v56, 9 }
 0x53d   :  { %v7809_v51 = vrot.slane %v2250_v63, 9  ;;  %v7811_v18 = vrot.slane %v2252_v47, 9  ;;  %v17702_v4 = vrot.slane %v17694_v0, 2  ;;  %v7835_v45 = vrot.slane %v2270_v20, 9 }
 0x53e   :  { %v17703_v26 = vrot.slane %v17695_v30, 2  ;;  %v7843_v55 = vrot.slane %v2276_v57, 9  ;;  %v7861_v46 = vrot.slane %v2289_v27, 9  ;;  %v7863_v10 = vrot.slane %v2291_v2, 9 }
 0x53f   :  { %v7833_v5 = vrot.slane %v17702_v4, 9  ;;  %v7865_v54 = vrot.slane %v2292_v33, 9  ;;  %v7867_v14 = vrot.slane %v2294_v25, 9  ;;  %v7869_v60 = vrot.slane %v2295_v48, 9 }
 0x540   :  { %v7841_v31 = vrot.slane %v17703_v26, 9  ;;  %v7871_v21 = vrot.slane %v2297_v43, 9  ;;  %v7873_v3 = vrot.slane %v2298_v40, 9  ;;  %v7875_v41 = vrot.slane %v2300_v44, 9 }
 0x541   :  { %v17704_v6 = vmov %v17700_v24  ;;  %v4532_v35 = vmax.f32 %v2222_v8, %v7771_v22  ;;  %v17705_v12 = vrot.slane %v17689_v59, 2  ;;  %v4540_v62 = vmax.f32 %v2228_v13, %v7779_v49 }
 0x542   :  { %v4530_v24 = vmax.f32 %v17704_v6, %v7769_v39  ;;  %v4558_v11 = vmax.f32 %v2241_v15, %v7797_v32  ;;  %v4560_v50 = vmax.f32 %v2243_v19, %v7799_v37  ;;  %v4562_v26 = vmax.f32 %v2244_v29, %v7801_v42  ;;  %v17709_v29 = vld [vmem:[#allocation20_spill] sm:$0xff] }
 0x543   :  { %v4538_v4 = vmax.f32 %v17705_v12, %v7777_v1  ;;  %v4564_v61 = vmax.f32 %v2246_v9, %v7803_v38  ;;  %v4566_v17 = vmax.f32 %v2247_v28, %v7805_v53  ;;  %v4568_v23 = vmax.f32 %v2249_v56, %v7807_v16  ;;  %v17710_v9 = vld [vmem:[#allocation131_spill] sm:$0xff]  ;;  %v17712_v1 = vld [vmem:[#allocation132_spill] sm:$0xff] }
 0x544   :  { %v4570_v7 = vmax.f32 %v2250_v63, %v7809_v51  ;;  %v4572_v36 = vmax.f32 %v2252_v47, %v7811_v18  ;;  %v17706_v34 = vrot.slane %v17694_v0, 2  ;;  %v4596_v30 = vmax.f32 %v2270_v20, %v7835_v45  ;;  %v17711_v47 = vld [vmem:[#allocation135_spill] sm:$0xff]  ;;  %v17713_v42 = vld [vmem:[#allocation28_spill] sm:$0xff] }
 0x545   :  { %v17708_v6 = vrot.slane %v17707_v52, 2  ;;  %v4604_v8 = vmax.f32 %v2276_v57, %v7843_v55  ;;  %v4622_v22 = vmax.f32 %v2289_v27, %v7861_v46  ;;  %v4624_v59 = vmax.f32 %v2291_v2, %v7863_v10  ;;  %v17714_v57 = vld [vmem:[#allocation148_spill] sm:$0xff] }
 0x546   :  { %v4594_v58 = vmax.f32 %v17706_v34, %v7833_v5  ;;  %v4626_v12 = vmax.f32 %v2292_v33, %v7865_v54  ;;  %v4628_v13 = vmax.f32 %v2294_v25, %v7867_v14  ;;  %v4630_v15 = vmax.f32 %v2295_v48, %v7869_v60  ;;  %v17715_v25 = vld [vmem:[#allocation152_spill] sm:$0xff]  ;;  %v17716_v48 = vld [vmem:[#allocation149_spill] sm:$0xff] }
 0x547   :  { %v4602_v39 = vmax.f32 %v17708_v6, %v7841_v31  ;;  %v4632_v19 = vmax.f32 %v2297_v43, %v7871_v21  ;;  %v5030_v28 = vmax.f32 %v17710_v9, %v17709_v29  ;;  %v4634_v56 = vmax.f32 %v2298_v40, %v7873_v3  ;;  %v17717_v21 = vld [vmem:[#allocation97_spill] sm:$0xff]  ;;  %v17719_v6 = vld [vmem:[#allocation99_spill] sm:$0xff]  ;;  %v17721_v9 = vld [vmem:[#allocation104_spill] sm:$0xff] }
 0x548   :  { %v4636_v63 = vmax.f32 %v2300_v44, %v7875_v41  ;;  %v5032_v49 = vmax.f32 %v17712_v1, %v17711_v47  ;;  %v5034_v34 = vmax.f32 %v4530_v24, %v4538_v4  ;;  %v5036_v20 = vmax.f32 %v4532_v35, %v4540_v62  ;;  %v17718_v41 = vld [vmem:[#allocation98_spill] sm:$0xff] }
 0x549   :  { %v5046_v32 = vmax.f32 %v4558_v11, %v4566_v17  ;;  %v5048_v37 = vmax.f32 %v4560_v50, %v4568_v23  ;;  %v5062_v27 = vmax.f32 %v17714_v57, %v17713_v42  ;;  %v5050_v2 = vmax.f32 %v4562_v26, %v4570_v7 }
 0x54a   :  { %v5052_v33 = vmax.f32 %v4564_v61, %v4572_v36  ;;  %v5064_v43 = vmax.f32 %v17716_v48, %v17715_v25  ;;  %v5066_v38 = vmax.f32 %v4594_v58, %v4602_v39  ;;  %v5068_v53 = vmax.f32 %v4596_v30, %v4604_v8 }
 0x54b   :  { %v5078_v16 = vmax.f32 %v4622_v22, %v4630_v15  ;;  %v5080_v40 = vmax.f32 %v4624_v59, %v4632_v19  ;;  %v5940_v44 = vperm.slane %v5030_v28, 0  ;;  %v5082_v51 = vmax.f32 %v4626_v12, %v4634_v56  ;;  %v17720_v12 = vld [vmem:[#allocation100_spill] sm:$0xff]  ;;  %v17722_v56 = vld [vmem:[#allocation70_spill] sm:$0xff] }
 0x54c   :  { %v5084_v18 = vmax.f32 %v4628_v13, %v4636_v63  ;;  %v5941_v5 = vperm.slane %v5032_v49, 0  ;;  %v5942_v45 = vperm.slane %v5034_v34, 0  ;;  %v5943_v62 = vperm.slane %v5036_v20, 0  ;;  %v17723_v34 = vld [vmem:[#allocation71_spill] sm:$0xff] }
 0x54d   :  { %v5944_v11 = vperm.slane %v5046_v32, 0  ;;  %v5945_v23 = vperm.slane %v5048_v37, 0  ;;  %v5948_v17 = vperm.slane %v5062_v27, 0  ;;  %v5946_v50 = vperm.slane %v5050_v2, 0  ;;  %v17724_v37 = vld [vmem:[#allocation105_spill] sm:$0xff]  ;;  %v17725_v27 = vld [vmem:[#allocation51_spill] sm:$0xff] }
 0x54e   :  { %v5947_v31 = vperm.slane %v5052_v33, 0  ;;  %v5949_v7 = vperm.slane %v5064_v43, 0  ;;  %v5950_v61 = vperm.slane %v5066_v38, 0  ;;  %v5951_v36 = vperm.slane %v5068_v53, 0 }
 0x54f   :  { %v5952_v55 = vperm.slane %v5078_v16, 0  ;;  %v5953_v46 = vperm.slane %v5080_v40, 0  ;;  %v6004_v58 = vsel %vm5405_vm6, %v5941_v5, %v5940_v44  ;;  %v5954_v30 = vperm.slane %v5082_v51, 0 }
 0x550   :  { %v5955_v59 = vperm.slane %v5084_v18, 0  ;;  %v6005_v10 = vsel %vm5407_vm7, %v5942_v45, %v6004_v58  ;;  %v6011_v54 = vsel %vm5405_vm6, %v5949_v7, %v5948_v17  ;;  %v2423_v3 = vrot.slane %v17717_v21, 6  ;;  %v17729_v45 = vld [vmem:[#allocation102_spill] sm:$0xff] }
 0x551   :  { %v6006_v14 = vsel %vm5409_vm8, %v5943_v62, %v6005_v10  ;;  %v6012_v60 = vsel %vm5407_vm7, %v5950_v61, %v6011_v54  ;;  %v2424_v24 = vrot.slane %v17718_v41, 2  ;;  %v2426_v26 = vrot.slane %v17718_v41, 6  ;;  %v17735_v54 = vld [vmem:[#allocation194_spill] sm:$0xff] }
 0x552   :  { %v6007_v35 = vsel %vm5411_vm9, %v5944_v11, %v6006_v14  ;;  %v6013_v4 = vsel %vm5409_vm8, %v5951_v36, %v6012_v60  ;;  %v2429_v39 = vrot.slane %v17719_v6, 6  ;;  %v2430_v13 = vrot.slane %v17720_v12, 2 }
 0x553   :  { %v6008_v8 = vsel %vm5413_vm10, %v5945_v23, %v6007_v35  ;;  %v6014_v22 = vsel %vm5411_vm9, %v5952_v55, %v6013_v4  ;;  %v2432_v15 = vrot.slane %v17720_v12, 6  ;;  %v2471_v28 = vrot.slane %v17721_v9, 6  ;;  %v17731_v23 = vld [vmem:[#allocation8_spill] sm:$0xff] }
 0x554   :  { %v6009_v19 = vsel %vm5415_vm11, %v5946_v50, %v6008_v8  ;;  %v6015_v29 = vsel %vm5413_vm10, %v5953_v46, %v6014_v22  ;;  %v2472_v63 = vrot.slane %v17722_v56, 2  ;;  %v2474_v49 = vrot.slane %v17722_v56, 6  ;;  %v17738_v8 = vld [vmem:[#allocation201_spill] sm:$0xff]  ;;  %v17739_v22 = vld [vmem:[#allocation96_spill] sm:$0xff] }
 0x555   :  { %v6010_v47 = vsel %vm5417_vm12, %v5947_v31, %v6009_v19  ;;  %v6016_v1 = vsel %vm5415_vm11, %v5954_v30, %v6015_v29  ;;  %v2477_v20 = vrot.slane %v17723_v34, 6  ;;  %v2478_v42 = vrot.slane %v17724_v37, 2 }
 0x556   :  { %v6017_v32 = vsel %vm5417_vm12, %v5955_v59, %v6016_v1  ;;  %v2480_v57 = vrot.slane %v17724_v37, 6  ;;  %v17726_v2 = vrot.slane %v17725_v27, 6  ;;  %v17727_v48 = vrot.slane %v17717_v21, 2  ;;  %v17784_v37 = vld [vmem:[#allocation181_spill] sm:$0xff] }
 0x557   :  { %v8845_v25 = vpack.i.bf16 %v6017_v32, %v6010_v47  ;;  %v8039_v38 = vrot.slane %v2423_v3, 9  ;;  %v8041_v53 = vrot.slane %v2424_v24, 9  ;;  %v8043_v16 = vrot.slane %v2426_v26, 9 }
 0x558   :  { %v8011_v33 = vrot.slane %v17726_v2, 9  ;;  %v8037_v43 = vrot.slane %v17727_v48, 9  ;;  %v17728_v40 = vrot.slane %v17719_v6, 2  ;;  %v8047_v51 = vrot.slane %v2429_v39, 9 }
 0x559   :  { %v8049_v18 = vrot.slane %v2430_v13, 9  ;;  %8846 = vrot.lane.b32.xlu0 %v8845_v25, %s8931_s20  ;;  %v8051_v5 = vrot.slane %v2432_v15, 9  ;;  %v17730_v62 = vrot.slane %v17729_v45, 6  ;;  %v17732_v17 = vrot.slane %v17731_v23, 6 }
 0x55a   :  { %v8045_v44 = vrot.slane %v17728_v40, 9  ;;  %v17733_v31 = vrot.slane %v17721_v9, 2  ;;  %v8103_v61 = vrot.slane %v2471_v28, 9  ;;  %v8105_v36 = vrot.slane %v2472_v63, 9 }
 0x55b   :  { %v8075_v11 = vrot.slane %v17730_v62, 9  ;;  %v8083_v50 = vrot.slane %v17732_v17, 9  ;;  %v8107_v55 = vrot.slane %v2474_v49, 9  ;;  %v17734_v46 = vrot.slane %v17723_v34, 2 }
 0x55c   :  { %v8101_v7 = vrot.slane %v17733_v31, 9  ;;  %v8111_v30 = vrot.slane %v2477_v20, 9  ;;  %v8113_v59 = vrot.slane %v2478_v42, 9  ;;  %v8115_v10 = vrot.slane %v2480_v57, 9 }
 0x55d   :  { %v8109_v58 = vrot.slane %v17734_v46, 9  ;;  %v17736_v14 = vrot.slane %v17725_v27, 2  ;;  %v17737_v35 = vmov %v17726_v2  ;;  %v17740_v19 = vrot.slane %v17739_v22, 6  ;;  %v17743_v46 = vld [vmem:[#allocation214_spill] sm:$0xff] }
 0x55e   :  { %v4772_v4 = vmax.f32 %v17737_v35, %v8011_v33  ;;  %v17741_v47 = vmov %v17727_v48  ;;  %v4800_v32 = vmax.f32 %v2423_v3, %v8039_v38  ;;  %v4802_v2 = vmax.f32 %v2424_v24, %v8041_v53 }
 0x55f   :  { %v4770_v60 = vmax.f32 %v17736_v14, %v17735_v54  ;;  %v4780_v29 = vmax.f32 %v17740_v19, %v17738_v8  ;;  %v4798_v1 = vmax.f32 %v17741_v47, %v8037_v43  ;;  %v4804_v25 = vmax.f32 %v2426_v26, %v8043_v16  ;;  %v17746_v8 = vld [vmem:[#allocation219_spill] sm:$0xff]  ;;  %v17753_v47 = vld [vmem:[#allocation196_spill] sm:$0xff] }
 0x560   :  { %v17742_v48 = vmov %v17728_v40  ;;  %v4808_v62 = vmax.f32 %v2429_v39, %v8047_v51  ;;  %v4810_v17 = vmax.f32 %v2430_v13, %v8049_v18  ;;  %v4812_v31 = vmax.f32 %v2432_v15, %v8051_v5  ;;  %v17751_v5 = vld [vmem:[#allocation59_spill] sm:$0xff] }
 0x561   :  { %v4806_v40 = vmax.f32 %v17742_v48, %v8045_v44  ;;  %v17744_v54 = vrot.slane %v17729_v45, 2  ;;  %v17745_v14 = vrot.slane %v17729_v45, 6  ;;  %v17747_v22 = vrot.slane %v17731_v23, 2  ;;  %v17754_v48 = vld [vmem:[#allocation192_spill] sm:$0xff] }
 0x562   :  { %v17748_v3 = vrot.slane %v17731_v23, 6  ;;  %v17749_v26 = vrot.slane %v17721_v9, 2  ;;  %v4864_v39 = vmax.f32 %v2471_v28, %v8103_v61  ;;  %v4866_v13 = vmax.f32 %v2472_v63, %v8105_v36  ;;  %v17756_v63 = vld [vmem:[#allocation216_spill] sm:$0xff]  ;;  %v17758_v36 = vld [vmem:[#allocation217_spill] sm:$0xff] }
 0x563   :  { %v4834_v33 = vmax.f32 %v17744_v54, %v17743_v46  ;;  %v4836_v35 = vmax.f32 %v17745_v14, %v8075_v11  ;;  %v4842_v43 = vmax.f32 %v17747_v22, %v17746_v8  ;;  %v4868_v15 = vmax.f32 %v2474_v49, %v8107_v55  ;;  %v17752_v11 = vld [vmem:[#allocation294_spill] sm:$0xff]  ;;  %v17755_v54 = vld [vmem:[#allocation197_spill] sm:$0xff]  ;;  %v17757_v49 = vld [vmem:[#allocation211_spill] sm:$0xff] }
 0x564   :  { %v4844_v24 = vmax.f32 %v17748_v3, %v8083_v50  ;;  %v4862_v38 = vmax.f32 %v17749_v26, %v8101_v7  ;;  %v17750_v53 = vrot.slane %v17723_v34, 2  ;;  %v4872_v44 = vmax.f32 %v2477_v20, %v8111_v30  ;;  %v17759_v55 = vld [vmem:[#allocation212_spill] sm:$0xff] }
 0x565   :  { %v4874_v51 = vmax.f32 %v2478_v42, %v8113_v59  ;;  %v4876_v18 = vmax.f32 %v2480_v57, %v8115_v10  ;;  %v5150_v19 = vmax.f32 %v17752_v11, %v17751_v5  ;;  %v5152_v46 = vmax.f32 %v17754_v48, %v17753_v47  ;;  %v17762_v11 = vld [vmem:[#allocation29_spill] sm:$0xff] }
 0x566   :  { %v4870_v16 = vmax.f32 %v17750_v53, %v8109_v58  ;;  %v5154_v50 = vmax.f32 %v4770_v60, %v17755_v54  ;;  %v5156_v14 = vmax.f32 %v4772_v4, %v4780_v29  ;;  %v5166_v8 = vmax.f32 %v4798_v1, %v4806_v40 }
 0x567   :  { %v5168_v7 = vmax.f32 %v4800_v32, %v4808_v62  ;;  %v5170_v28 = vmax.f32 %v4802_v2, %v4810_v17  ;;  %v5182_v61 = vmax.f32 %v17757_v49, %v17756_v63  ;;  %v5184_v20 = vmax.f32 %v17759_v55, %v17758_v36  ;;  %v17765_v63 = vld [vmem:[#allocation94_spill] sm:$0xff] }
 0x568   :  { %v5186_v42 = vmax.f32 %v4834_v33, %v4842_v43  ;;  %v5172_v57 = vmax.f32 %v4804_v25, %v4812_v31  ;;  %v5188_v58 = vmax.f32 %v4836_v35, %v4844_v24  ;;  %v5198_v30 = vmax.f32 %v4862_v38, %v4870_v16 }
 0x569   :  { %v5200_v59 = vmax.f32 %v4864_v39, %v4872_v44  ;;  %v5202_v10 = vmax.f32 %v4866_v13, %v4874_v51  ;;  %v5204_v22 = vmax.f32 %v4868_v15, %v4876_v18  ;;  %v5572_v3 = vperm.slane %v5150_v19, 0  ;;  %v17760_v39 = vld [vmem:[#allocation35_spill] sm:$0xff]  ;;  %v17761_v15 = vld [vmem:[#allocation25_spill] sm:$0xff] }
 0x56a   :  { %v5573_v26 = vperm.slane %v5152_v46, 0  ;;  %v5574_v60 = vperm.slane %v5154_v50, 0  ;;  %v5575_v4 = vperm.slane %v5156_v14, 0  ;;  %v5576_v29 = vperm.slane %v5166_v8, 0  ;;  %v17763_v46 = vld [vmem:[#allocation30_spill] sm:$0xff] }
 0x56b   :  { %v5577_v1 = vperm.slane %v5168_v7, 0  ;;  %v5578_v32 = vperm.slane %v5170_v28, 0  ;;  %v5580_v2 = vperm.slane %v5182_v61, 0  ;;  %v5581_v40 = vperm.slane %v5184_v20, 0  ;;  %v17764_v7 = vld [vmem:[#allocation43_spill] sm:$0xff]  ;;  %v17766_v20 = vld [vmem:[#allocation53_spill] sm:$0xff] }
 0x56c   :  { %v5582_v62 = vperm.slane %v5186_v42, 0  ;;  %v5579_v17 = vperm.slane %v5172_v57, 0  ;;  %v5583_v53 = vperm.slane %v5188_v58, 0  ;;  %v5584_v5 = vperm.slane %v5198_v30, 0  ;;  %v17767_v30 = vld [vmem:[#allocation54_spill] sm:$0xff] }
 0x56d   :  { %v5585_v33 = vperm.slane %v5200_v59, 0  ;;  %v5586_v25 = vperm.slane %v5202_v10, 0  ;;  %v5587_v31 = vperm.slane %v5204_v22, 0  ;;  %v5632_v35 = vsel %vm5405_vm6, %v5573_v26, %v5572_v3 }
 0x56e   :  { %v5639_v43 = vsel %vm5405_vm6, %v5581_v40, %v5580_v2  ;;  %v5633_v24 = vsel %vm5407_vm7, %v5574_v60, %v5632_v35  ;;  %v2327_v13 = vrot.slane %v17760_v39, 6  ;;  %v2328_v16 = vrot.slane %v17761_v15, 2 }
 0x56f   :  { %v5640_v38 = vsel %vm5407_vm7, %v5582_v62, %v5639_v43  ;;  %v5634_v44 = vsel %vm5409_vm8, %v5575_v4, %v5633_v24  ;;  %v2330_v18 = vrot.slane %v17761_v15, 6  ;;  %v2333_v19 = vrot.slane %v17762_v11, 6 }
 0x570   :  { %v5641_v51 = vsel %vm5409_vm8, %v5583_v53, %v5640_v38  ;;  %v5635_v47 = vsel %vm5411_vm9, %v5576_v29, %v5634_v44  ;;  %v2334_v54 = vrot.slane %v17763_v46, 2  ;;  %v2336_v50 = vrot.slane %v17763_v46, 6 }
 0x571   :  { %v5642_v48 = vsel %vm5411_vm9, %v5584_v5, %v5641_v51  ;;  %v5636_v14 = vsel %vm5413_vm10, %v5577_v1, %v5635_v47  ;;  %v2375_v28 = vrot.slane %v17764_v7, 6  ;;  %v2376_v49 = vrot.slane %v17765_v63, 2 }
 0x572   :  { %v5643_v8 = vsel %vm5413_vm10, %v5585_v33, %v5642_v48  ;;  %v5637_v61 = vsel %vm5415_vm11, %v5578_v32, %v5636_v14  ;;  %v2378_v55 = vrot.slane %v17765_v63, 6  ;;  %v2381_v42 = vrot.slane %v17766_v20, 6  ;;  %v17772_v33 = vld [vmem:[#allocation47_spill] sm:$0xff] }
 0x573   :  { %v5644_v36 = vsel %vm5415_vm11, %v5586_v25, %v5643_v8  ;;  %v5638_v57 = vsel %vm5417_vm12, %v5579_v17, %v5637_v61  ;;  %v2382_v59 = vrot.slane %v17767_v30, 2  ;;  %v2384_v10 = vrot.slane %v17767_v30, 6  ;;  %v17770_v17 = vld [vmem:[#allocation46_spill] sm:$0xff]  ;;  %v17776_v61 = vld [vmem:[#allocation161_spill] sm:$0xff] }
 0x574   :  { %v5645_v58 = vsel %vm5417_vm12, %v5587_v31, %v5644_v36  ;;  %v17768_v3 = vrot.slane %v17760_v39, 2  ;;  %v7911_v60 = vrot.slane %v2327_v13, 9  ;;  %v7913_v4 = vrot.slane %v2328_v16, 9  ;;  %v17777_v36 = vld [vmem:[#allocation18_spill] sm:$0xff] }
 0x575   :  { %v8870_v22 = vpack.i.bf16 %v5645_v58, %v5638_v57  ;;  %v7915_v29 = vrot.slane %v2330_v18, 9  ;;  %v17769_v1 = vrot.slane %v17762_v11, 2  ;;  %v7919_v2 = vrot.slane %v2333_v19, 9 }
 0x576   :  { %v7909_v26 = vrot.slane %v17768_v3, 9  ;;  %v7921_v40 = vrot.slane %v2334_v54, 9  ;;  %v7923_v62 = vrot.slane %v2336_v50, 9  ;;  %v17771_v53 = vrot.slane %v17770_v17, 6  ;;  %v17780_v3 = vld [vmem:[#allocation23_spill] sm:$0xff] }
 0x577   :  { %v7917_v32 = vrot.slane %v17769_v1, 9  ;;  %8871 = vrot.lane.b32.xlu2 %v8870_v22, %s8931_s20  ;;  %v17773_v25 = vrot.slane %v17772_v33, 6  ;;  %v17774_v35 = vrot.slane %v17764_v7, 2  ;;  %v7975_v24 = vrot.slane %v2375_v28, 9  ;;  %v17779_v22 = vld [vmem:[#allocation167_spill] sm:$0xff] }
 0x578   :  { %v7947_v5 = vrot.slane %v17771_v53, 9  ;;  %v7977_v38 = vrot.slane %v2376_v49, 9  ;;  %v7979_v44 = vrot.slane %v2378_v55, 9  ;;  %v17775_v51 = vrot.slane %v17766_v20, 2 }
 0x579   :  { %v7955_v31 = vrot.slane %v17773_v25, 9  ;;  %v7973_v43 = vrot.slane %v17774_v35, 9  ;;  %v7983_v48 = vrot.slane %v2381_v42, 9  ;;  %v7985_v14 = vrot.slane %v2382_v59, 9 }
 0x57a   :  { %v7981_v47 = vrot.slane %v17775_v51, 9  ;;  %v7987_v8 = vrot.slane %v2384_v10, 9  ;;  %v17778_v57 = vrot.slane %v17777_v36, 6  ;;  %v17781_v1 = vrot.slane %v17780_v3, 6 }
 0x57b   :  { %v17782_v25 = vrot.slane %v17760_v39, 2  ;;  %v4672_v23 = vmax.f32 %v2327_v13, %v7911_v60  ;;  %v4674_v45 = vmax.f32 %v2328_v16, %v7913_v4  ;;  %v4676_v27 = vmax.f32 %v2330_v18, %v7915_v29  ;;  %v17792_v29 = vld [vmem:[#allocation162_spill] sm:$0xff] }
 0x57c   :  { %v4644_v58 = vmax.f32 %v17778_v57, %v17776_v61  ;;  %v4652_v53 = vmax.f32 %v17781_v1, %v17779_v22  ;;  %v17783_v34 = vrot.slane %v17762_v11, 2  ;;  %v4680_v9 = vmax.f32 %v2333_v19, %v7919_v2  ;;  %v17787_v22 = vld [vmem:[#allocation185_spill] sm:$0xff] }
 0x57d   :  { %v4670_v35 = vmax.f32 %v17782_v25, %v7909_v26  ;;  %v4682_v6 = vmax.f32 %v2334_v54, %v7921_v40  ;;  %v4684_v21 = vmax.f32 %v2336_v50, %v7923_v62  ;;  %v17785_v36 = vrot.slane %v17770_v17, 2  ;;  %v17795_v25 = vld [vmem:[#allocation158_spill] sm:$0xff] }
 0x57e   :  { %v4678_v51 = vmax.f32 %v17783_v34, %v7917_v32  ;;  %v17786_v57 = vrot.slane %v17770_v17, 6  ;;  %v17788_v1 = vrot.slane %v17772_v33, 2  ;;  %v17789_v13 = vrot.slane %v17772_v33, 6  ;;  %v17793_v32 = vld [vmem:[#allocation156_spill] sm:$0xff] }
 0x57f   :  { %v4706_v61 = vmax.f32 %v17785_v36, %v17784_v37  ;;  %v17790_v18 = vrot.slane %v17764_v7, 2  ;;  %v4736_v19 = vmax.f32 %v2375_v28, %v7975_v24  ;;  %v4738_v54 = vmax.f32 %v2376_v49, %v7977_v38  ;;  %v17798_v49 = vld [vmem:[#allocation39_spill] sm:$0xff] }
 0x580   :  { %v4708_v3 = vmax.f32 %v17786_v57, %v7947_v5  ;;  %v4714_v26 = vmax.f32 %v17788_v1, %v17787_v22  ;;  %v4716_v16 = vmax.f32 %v17789_v13, %v7955_v31  ;;  %v4740_v50 = vmax.f32 %v2378_v55, %v7979_v44  ;;  %v17794_v5 = vld [vmem:[#allocation164_spill] sm:$0xff]  ;;  %v17796_v57 = vld [vmem:[#allocation165_spill] sm:$0xff]  ;;  %v17797_v31 = vld [vmem:[#allocation159_spill] sm:$0xff] }
 0x581   :  { %v4734_v34 = vmax.f32 %v17790_v18, %v7973_v43  ;;  %v17791_v60 = vrot.slane %v17766_v20, 2  ;;  %v4744_v37 = vmax.f32 %v2381_v42, %v7983_v48  ;;  %v5086_v2 = vmax.f32 %v17793_v32, %v17792_v29  ;;  %v17799_v55 = vld [vmem:[#allocation178_spill] sm:$0xff]  ;;  %v17800_v42 = vld [vmem:[#allocation183_spill] sm:$0xff] }
 0x582   :  { %v4746_v40 = vmax.f32 %v2382_v59, %v7985_v14  ;;  %v4748_v62 = vmax.f32 %v2384_v10, %v7987_v8  ;;  %v5088_v36 = vmax.f32 %v17795_v25, %v17794_v5  ;;  %v5090_v22 = vmax.f32 %v17797_v31, %v17796_v57  ;;  %v8754_v31 = vld [vmem:[%s15702_s2 + $0x68] sm:$0xff] }
 0x583   :  { %v4742_v4 = vmax.f32 %v17791_v60, %v7981_v47  ;;  %v5092_v1 = vmax.f32 %v4644_v58, %v4652_v53  ;;  %v5102_v43 = vmax.f32 %v4670_v35, %v4678_v51  ;;  %v5104_v28 = vmax.f32 %v4672_v23, %v4680_v9  ;;  %v17801_v47 = vld [vmem:[#allocation179_spill] sm:$0xff]  ;;  %6267 = vmatpush.bf16.msrb.mxu2 %v8754_v31 }
 0x584   :  { %v5118_v24 = vmax.f32 %v17799_v55, %v17798_v49  ;;  %v5106_v38 = vmax.f32 %v4674_v45, %v4682_v6  ;;  %v5108_v44 = vmax.f32 %v4676_v27, %v4684_v21  ;;  %v5120_v48 = vmax.f32 %v17801_v47, %v17800_v42  ;;  %v17807_v42 = vld [vmem:[#allocation93_spill] sm:$0xff] }
 0x585   :  { %v5122_v13 = vmax.f32 %v4706_v61, %v4714_v26  ;;  %v5124_v59 = vmax.f32 %v4708_v3, %v4716_v16  ;;  %v5134_v10 = vmax.f32 %v4734_v34, %v4742_v4  ;;  %v5136_v14 = vmax.f32 %v4736_v19, %v4744_v37  ;;  %v17803_v37 = vld [vmem:[#allocation84_spill] sm:$0xff] }
 0x586   :  { %v5556_v8 = vperm.slane %v5086_v2, 0  ;;  %v5138_v18 = vmax.f32 %v4738_v54, %v4746_v40  ;;  %v5140_v60 = vmax.f32 %v4740_v50, %v4748_v62  ;;  %v5557_v29 = vperm.slane %v5088_v36, 0  ;;  %v17802_v50 = vld [vmem:[#allocation83_spill] sm:$0xff]  ;;  %v17804_v36 = vld [vmem:[#allocation5_spill] sm:$0xff] }
 0x587   :  { %v5558_v32 = vperm.slane %v5090_v22, 0  ;;  %v5559_v58 = vperm.slane %v5092_v1, 0  ;;  %v5560_v53 = vperm.slane %v5102_v43, 0  ;;  %v5561_v9 = vperm.slane %v5104_v28, 0  ;;  %v17805_v43 = vld [vmem:[#allocation6_spill] sm:$0xff] }
 0x588   :  { %v5564_v23 = vperm.slane %v5118_v24, 0  ;;  %v5562_v35 = vperm.slane %v5106_v38, 0  ;;  %v5563_v51 = vperm.slane %v5108_v44, 0  ;;  %v5565_v6 = vperm.slane %v5120_v48, 0  ;;  %v17806_v38 = vld [vmem:[#allocation91_spill] sm:$0xff] }
 0x589   :  { %v5566_v21 = vperm.slane %v5122_v13, 0  ;;  %v5567_v27 = vperm.slane %v5124_v59, 0  ;;  %v5568_v45 = vperm.slane %v5134_v10, 0  ;;  %v5569_v5 = vperm.slane %v5136_v14, 0  ;;  %v17808_v10 = vld [vmem:[#allocation10_spill] sm:$0xff] }
 0x58a   :  { %v5618_v61 = vsel %vm5405_vm6, %v5557_v29, %v5556_v8  ;;  %v5570_v3 = vperm.slane %v5138_v18, 0  ;;  %v5571_v26 = vperm.slane %v5140_v60, 0  ;;  %v5625_v34 = vsel %vm5405_vm6, %v5565_v6, %v5564_v23  ;;  %v17809_v18 = vld [vmem:[#allocation14_spill] sm:$0xff] }
 0x58b   :  { %v5619_v16 = vsel %vm5407_vm7, %v5558_v32, %v5618_v61  ;;  %v5626_v54 = vsel %vm5407_vm7, %v5566_v21, %v5625_v34  ;;  %v2231_v4 = vrot.slane %v17802_v50, 6  ;;  %v2232_v2 = vrot.slane %v17803_v37, 2  ;;  %v17810_v32 = vld [vmem:[#allocation80_spill] sm:$0xff]  ;;  %v17812_v23 = vld [vmem:[#allocation82_spill] sm:$0xff] }
 0x58c   :  { %v5620_v19 = vsel %vm5409_vm8, %v5559_v58, %v5619_v16  ;;  %v5627_v62 = vsel %vm5409_vm8, %v5567_v27, %v5626_v54  ;;  %v2234_v25 = vrot.slane %v17803_v37, 6  ;;  %v2237_v57 = vrot.slane %v17804_v36, 6 }
 0x58d   :  { %v5621_v40 = vsel %vm5411_vm9, %v5560_v53, %v5620_v19  ;;  %v5628_v1 = vsel %vm5411_vm9, %v5568_v45, %v5627_v62  ;;  %v2238_v28 = vrot.slane %v17805_v43, 2  ;;  %v2240_v49 = vrot.slane %v17805_v43, 6  ;;  %v17816_v19 = vld [vmem:[#allocation85_spill] sm:$0xff]  ;;  %v17818_v62 = vld [vmem:[#allocation87_spill] sm:$0xff] }
 0x58e   :  { %v5622_v22 = vsel %vm5413_vm10, %v5561_v9, %v5621_v40  ;;  %v5629_v24 = vsel %vm5413_vm10, %v5569_v5, %v5628_v1  ;;  %v2279_v44 = vrot.slane %v17806_v38, 6  ;;  %v2280_v47 = vrot.slane %v17807_v42, 2 }
 0x58f   :  { %v5623_v55 = vsel %vm5415_vm11, %v5562_v35, %v5622_v22  ;;  %v5630_v13 = vsel %vm5415_vm11, %v5570_v3, %v5629_v24  ;;  %v2282_v59 = vrot.slane %v17807_v42, 6  ;;  %v2285_v14 = vrot.slane %v17808_v10, 6 }
 0x590   :  { %v5624_v48 = vsel %vm5417_vm12, %v5563_v51, %v5623_v55  ;;  %v5631_v8 = vsel %vm5417_vm12, %v5571_v26, %v5630_v13  ;;  %v2286_v60 = vrot.slane %v17809_v18, 2  ;;  %v2288_v29 = vrot.slane %v17809_v18, 6 }
 0x591   :  { %v17811_v58 = vrot.slane %v17810_v32, 6  ;;  %v8860_v9 = vpack.i.bf16 %v5631_v8, %v5624_v48  ;;  %v17813_v35 = vrot.slane %v17812_v23, 6  ;;  %v17814_v51 = vrot.slane %v17802_v50, 2 }
 0x592   :  { %v7783_v27 = vrot.slane %v2231_v4, 9  ;;  %v7785_v45 = vrot.slane %v2232_v2, 9  ;;  %v7787_v5 = vrot.slane %v2234_v25, 9  ;;  %v17815_v61 = vrot.slane %v17804_v36, 2 }
 0x593   :  { %v7755_v53 = vrot.slane %v17811_v58, 9  ;;  %v7763_v6 = vrot.slane %v17813_v35, 9  ;;  %v7781_v21 = vrot.slane %v17814_v51, 9  ;;  %v7791_v26 = vrot.slane %v2237_v57, 9  ;;  %8861 = vrot.lane.b32.xlu1 %v8860_v9, %s8931_s20 }
 0x594   :  { %v7789_v3 = vrot.slane %v17815_v61, 9  ;;  %v7793_v16 = vrot.slane %v2238_v28, 9  ;;  %v7795_v34 = vrot.slane %v2240_v49, 9  ;;  %v17817_v54 = vrot.slane %v17816_v19, 6  ;;  %v17822_v61 = vld [vmem:[#allocation101_spill] sm:$0xff] }
 0x595   :  { %v17819_v31 = vrot.slane %v17818_v62, 6  ;;  %v17820_v1 = vrot.slane %v17806_v38, 2  ;;  %v7847_v24 = vrot.slane %v2279_v44, 9  ;;  %v7849_v48 = vrot.slane %v2280_v47, 9 }
 0x596   :  { %v7819_v40 = vrot.slane %v17817_v54, 9  ;;  %v7851_v13 = vrot.slane %v2282_v59, 9  ;;  %v17821_v8 = vrot.slane %v17808_v10, 2  ;;  %v7855_v35 = vrot.slane %v2285_v14, 9 }
 0x597   :  { %v7827_v22 = vrot.slane %v17819_v31, 9  ;;  %v7845_v55 = vrot.slane %v17820_v1, 9  ;;  %v7857_v51 = vrot.slane %v2286_v60, 9  ;;  %v7859_v9 = vrot.slane %v2288_v29, 9  ;;  %v17825_v31 = vld [vmem:[#allocation129_spill] sm:$0xff] }
 0x598   :  { %v7853_v58 = vrot.slane %v17821_v8, 9  ;;  %v17823_v56 = vrot.slane %v17810_v32, 2  ;;  %v17824_v54 = vrot.slane %v17810_v32, 6  ;;  %v17826_v33 = vrot.slane %v17812_v23, 2 }
 0x599   :  { %v17827_v17 = vrot.slane %v17812_v23, 6  ;;  %v17828_v7 = vrot.slane %v17802_v50, 2  ;;  %v4544_v11 = vmax.f32 %v2231_v4, %v7783_v27  ;;  %v4546_v39 = vmax.f32 %v2232_v2, %v7785_v45 }
 0x59a   :  { %v4514_v12 = vmax.f32 %v17823_v56, %v17822_v61  ;;  %v4516_v41 = vmax.f32 %v17824_v54, %v7755_v53  ;;  %v4522_v1 = vmax.f32 %v17826_v33, %v17825_v31  ;;  %v4548_v30 = vmax.f32 %v2234_v25, %v7787_v5  ;;  %v17830_v53 = vld [vmem:[#allocation141_spill] sm:$0xff] }
 0x59b   :  { %v4524_v20 = vmax.f32 %v17827_v17, %v7763_v6  ;;  %v4542_v8 = vmax.f32 %v17828_v7, %v7781_v21  ;;  %v17829_v63 = vrot.slane %v17804_v36, 2  ;;  %v4552_v56 = vmax.f32 %v2237_v57, %v7791_v26  ;;  %v17833_v17 = vld [vmem:[#allocation146_spill] sm:$0xff]  ;;  %v17838_v5 = vld [vmem:[#allocation121_spill] sm:$0xff] }
 0x59c   :  { %v4554_v61 = vmax.f32 %v2238_v28, %v7793_v16  ;;  %v4556_v32 = vmax.f32 %v2240_v49, %v7795_v34  ;;  %v17831_v54 = vrot.slane %v17816_v19, 2  ;;  %v17832_v33 = vrot.slane %v17816_v19, 6  ;;  %v17840_v16 = vld [vmem:[#allocation128_spill] sm:$0xff]  ;;  %v17841_v34 = vld [vmem:[#allocation95_spill] sm:$0xff] }
 0x59d   :  { %v4550_v46 = vmax.f32 %v17829_v63, %v7789_v3  ;;  %v17834_v6 = vrot.slane %v17818_v62, 2  ;;  %v17835_v4 = vrot.slane %v17818_v62, 6  ;;  %v17836_v25 = vrot.slane %v17806_v38, 2  ;;  %v17839_v3 = vld [vmem:[#allocation78_spill] sm:$0xff] }
 0x59e   :  { %v4578_v15 = vmax.f32 %v17831_v54, %v17830_v53  ;;  %v4580_v23 = vmax.f32 %v17832_v33, %v7819_v40  ;;  %v4608_v57 = vmax.f32 %v2279_v44, %v7847_v24  ;;  %v4610_v28 = vmax.f32 %v2280_v47, %v7849_v48  ;;  %v17843_v44 = vld [vmem:[#allocation12_spill] sm:$0xff] }
 0x59f   :  { %v4586_v7 = vmax.f32 %v17834_v6, %v17833_v17  ;;  %v4588_v2 = vmax.f32 %v17835_v4, %v7827_v22  ;;  %v4606_v63 = vmax.f32 %v17836_v25, %v7845_v55  ;;  %v4612_v49 = vmax.f32 %v2282_v59, %v7851_v13  ;;  %v17842_v55 = vld [vmem:[#allocation143_spill] sm:$0xff]  ;;  %v17844_v59 = vld [vmem:[#allocation145_spill] sm:$0xff]  ;;  %v17845_v24 = vld [vmem:[#allocation140_spill] sm:$0xff] }
 0x5a0   :  { %v17837_v21 = vrot.slane %v17808_v10, 2  ;;  %v4616_v45 = vmax.f32 %v2285_v14, %v7855_v35  ;;  %v5022_v26 = vmax.f32 %v17839_v3, %v17838_v5  ;;  %v5024_v19 = vmax.f32 %v17841_v34, %v17840_v16  ;;  %v17848_v3 = vld [vmem:[#allocation112_spill] sm:$0xff] }
 0x5a1   :  { %v4618_v40 = vmax.f32 %v2286_v60, %v7857_v51  ;;  %v4620_v31 = vmax.f32 %v2288_v29, %v7859_v9  ;;  %v5026_v62 = vmax.f32 %v4514_v12, %v4522_v1  ;;  %v5028_v22 = vmax.f32 %v4516_v41, %v4524_v20 }
 0x5a2   :  { %v4614_v27 = vmax.f32 %v17837_v21, %v7853_v58  ;;  %v5038_v53 = vmax.f32 %v4542_v8, %v4550_v46  ;;  %v5040_v54 = vmax.f32 %v4544_v11, %v4552_v56  ;;  %v5054_v47 = vmax.f32 %v17843_v44, %v17842_v55  ;;  %v17851_v55 = vld [vmem:[#allocation79_spill] sm:$0xff] }
 0x5a3   :  { %v5056_v48 = vmax.f32 %v17845_v24, %v17844_v59  ;;  %v5042_v13 = vmax.f32 %v4546_v39, %v4554_v61  ;;  %v5044_v14 = vmax.f32 %v4548_v30, %v4556_v32  ;;  %v5058_v58 = vmax.f32 %v4578_v15, %v4586_v7 }
 0x5a4   :  { %v5060_v35 = vmax.f32 %v4580_v23, %v4588_v2  ;;  %v5070_v33 = vmax.f32 %v4606_v63, %v4614_v27  ;;  %v5072_v17 = vmax.f32 %v4608_v57, %v4616_v45  ;;  %v5540_v6 = vperm.slane %v5022_v26, 0  ;;  %v17846_v57 = vld [vmem:[#allocation110_spill] sm:$0xff] }
 0x5a5   :  { %v5541_v4 = vperm.slane %v5024_v19, 0  ;;  %v5074_v60 = vmax.f32 %v4610_v28, %v4618_v40  ;;  %v5076_v29 = vmax.f32 %v4612_v49, %v4620_v31  ;;  %v5542_v12 = vperm.slane %v5026_v62, 0  ;;  %v17847_v49 = vld [vmem:[#allocation111_spill] sm:$0xff]  ;;  %v17849_v19 = vld [vmem:[#allocation113_spill] sm:$0xff] }
 0x5a6   :  { %v5543_v41 = vperm.slane %v5028_v22, 0  ;;  %v5544_v46 = vperm.slane %v5038_v53, 0  ;;  %v5545_v11 = vperm.slane %v5040_v54, 0  ;;  %v5548_v20 = vperm.slane %v5054_v47, 0  ;;  %v17850_v53 = vld [vmem:[#allocation77_spill] sm:$0xff] }
 0x5a7   :  { %v5549_v51 = vperm.slane %v5056_v48, 0  ;;  %v5546_v9 = vperm.slane %v5042_v13, 0  ;;  %v5547_v1 = vperm.slane %v5044_v14, 0  ;;  %v5550_v8 = vperm.slane %v5058_v58, 0  ;;  %v17852_v48 = vld [vmem:[#allocation123_spill] sm:$0xff]  ;;  %v17853_v58 = vld [vmem:[#allocation124_spill] sm:$0xff] }
 0x5a8   :  { %v5551_v56 = vperm.slane %v5060_v35, 0  ;;  %v5552_v39 = vperm.slane %v5070_v33, 0  ;;  %v5553_v30 = vperm.slane %v5072_v17, 0  ;;  %v5604_v15 = vsel %vm5405_vm6, %v5541_v4, %v5540_v6  ;;  %v17854_v17 = vld [vmem:[#allocation22_spill] sm:$0xff] }
 0x5a9   :  { %v5611_v61 = vsel %vm5405_vm6, %v5549_v51, %v5548_v20  ;;  %v5554_v32 = vperm.slane %v5074_v60, 0  ;;  %v5555_v23 = vperm.slane %v5076_v29, 0  ;;  %v5605_v7 = vsel %vm5407_vm7, %v5542_v12, %v5604_v15  ;;  %v17856_v60 = vld [vmem:[#allocation106_spill] sm:$0xff] }
 0x5aa   :  { %v5612_v2 = vsel %vm5407_vm7, %v5550_v8, %v5611_v61  ;;  %v5606_v25 = vsel %vm5409_vm8, %v5543_v41, %v5605_v7  ;;  %v2519_v28 = vrot.slane %v17846_v57, 6  ;;  %v2520_v21 = vrot.slane %v17847_v49, 2 }
 0x5ab   :  { %v5613_v63 = vsel %vm5409_vm8, %v5551_v56, %v5612_v2  ;;  %v5607_v27 = vsel %vm5411_vm9, %v5544_v46, %v5606_v25  ;;  %v2522_v5 = vrot.slane %v17847_v49, 6  ;;  %v2525_v26 = vrot.slane %v17848_v3, 6 }
 0x5ac   :  { %v5614_v45 = vsel %vm5411_vm9, %v5552_v39, %v5613_v63  ;;  %v5608_v16 = vsel %vm5413_vm10, %v5545_v11, %v5607_v27  ;;  %v2526_v40 = vrot.slane %v17849_v19, 2  ;;  %v2528_v31 = vrot.slane %v17849_v19, 6 }
 0x5ad   :  { %v5615_v34 = vsel %vm5413_vm10, %v5553_v30, %v5614_v45  ;;  %v5609_v62 = vsel %vm5415_vm11, %v5546_v9, %v5608_v16  ;;  %v2567_v54 = vrot.slane %v17850_v53, 6  ;;  %v2568_v44 = vrot.slane %v17851_v55, 2  ;;  %v17862_v45 = vld [vmem:[#allocation232_spill] sm:$0xff] }
 0x5ae   :  { %v5616_v22 = vsel %vm5415_vm11, %v5554_v32, %v5615_v34  ;;  %v5610_v47 = vsel %vm5417_vm12, %v5547_v1, %v5609_v62  ;;  %v2570_v24 = vrot.slane %v17851_v55, 6  ;;  %v2573_v13 = vrot.slane %v17852_v48, 6 }
 0x5af   :  { %v5617_v59 = vsel %vm5417_vm12, %v5555_v23, %v5616_v22  ;;  %v2574_v35 = vrot.slane %v17853_v58, 2  ;;  %v2576_v33 = vrot.slane %v17853_v58, 6  ;;  %v17855_v6 = vrot.slane %v17854_v17, 6 }
 0x5b0   :  { %v8850_v14 = vpack.i.bf16 %v5617_v59, %v5610_v47  ;;  %v17857_v29 = vrot.slane %v17856_v60, 6  ;;  %v17858_v41 = vrot.slane %v17846_v57, 2  ;;  %v8167_v11 = vrot.slane %v2519_v28, 9  ;;  %v17865_v47 = vld [vmem:[#allocation237_spill] sm:$0xff] }
 0x5b1   :  { %v8139_v4 = vrot.slane %v17855_v6, 9  ;;  %v8169_v20 = vrot.slane %v2520_v21, 9  ;;  %v8171_v51 = vrot.slane %v2522_v5, 9  ;;  %v17859_v9 = vrot.slane %v17848_v3, 2 }
 0x5b2   :  { %v8147_v12 = vrot.slane %v17857_v29, 9  ;;  %v8165_v46 = vrot.slane %v17858_v41, 9  ;;  %8851 = vrot.lane.b32.xlu0 %v8850_v14, %s8931_s20  ;;  %v8175_v8 = vrot.slane %v2525_v26, 9  ;;  %v8177_v56 = vrot.slane %v2526_v40, 9 }
 0x5b3   :  { %v8173_v1 = vrot.slane %v17859_v9, 9  ;;  %v8179_v39 = vrot.slane %v2528_v31, 9  ;;  %v17860_v30 = vrot.slane %v17850_v53, 2  ;;  %v8231_v61 = vrot.slane %v2567_v54, 9 }
 0x5b4   :  { %v8233_v32 = vrot.slane %v2568_v44, 9  ;;  %v8235_v23 = vrot.slane %v2570_v24, 9  ;;  %v17861_v7 = vrot.slane %v17852_v48, 2  ;;  %v8239_v25 = vrot.slane %v2573_v13, 9 }
 0x5b5   :  { %v8229_v15 = vrot.slane %v17860_v30, 9  ;;  %v8241_v63 = vrot.slane %v2574_v35, 9  ;;  %v8243_v27 = vrot.slane %v2576_v33, 9  ;;  %v17863_v16 = vrot.slane %v17854_v17, 2 }
 0x5b6   :  { %v8237_v2 = vrot.slane %v17861_v7, 9  ;;  %v17864_v62 = vmov %v17855_v6  ;;  %v17866_v59 = vrot.slane %v17856_v60, 2  ;;  %v17867_v6 = vmov %v17857_v29 }
 0x5b7   :  { %v4898_v34 = vmax.f32 %v17863_v16, %v17862_v45  ;;  %v4900_v22 = vmax.f32 %v17864_v62, %v8139_v4  ;;  %v4908_v29 = vmax.f32 %v17867_v6, %v8147_v12  ;;  %v4926_v9 = vmax.f32 %v17858_v41, %v8165_v46  ;;  %v17869_v4 = vld [vmem:[#allocation254_spill] sm:$0xff]  ;;  %v17870_v62 = vld [vmem:[#allocation19_spill] sm:$0xff] }
 0x5b8   :  { %v4906_v14 = vmax.f32 %v17866_v59, %v17865_v47  ;;  %v4928_v30 = vmax.f32 %v2519_v28, %v8167_v11  ;;  %v4930_v7 = vmax.f32 %v2520_v21, %v8169_v20  ;;  %v4932_v58 = vmax.f32 %v2522_v5, %v8171_v51  ;;  %v17872_v47 = vld [vmem:[#allocation260_spill] sm:$0xff]  ;;  %v17873_v59 = vld [vmem:[#allocation119_spill] sm:$0xff]  ;;  %v17878_v20 = vld [vmem:[#allocation229_spill] sm:$0xff] }
 0x5b9   :  { %v17868_v55 = vrot.slane %v17848_v3, 2  ;;  %v4936_v45 = vmax.f32 %v2525_v26, %v8175_v8  ;;  %v4938_v16 = vmax.f32 %v2526_v40, %v8177_v56  ;;  %v4940_v17 = vmax.f32 %v2528_v31, %v8179_v39  ;;  %v17877_v31 = vld [vmem:[#allocation234_spill] sm:$0xff] }
 0x5ba   :  { %v17871_v49 = vrot.slane %v17870_v62, 6  ;;  %v17874_v60 = vrot.slane %v17873_v59, 6  ;;  %v17875_v6 = vrot.slane %v17850_v53, 2  ;;  %v4992_v28 = vmax.f32 %v2567_v54, %v8231_v61  ;;  %v17882_v54 = vld [vmem:[#allocation249_spill] sm:$0xff]  ;;  %v17884_v61 = vld [vmem:[#allocation251_spill] sm:$0xff] }
 0x5bb   :  { %v4934_v19 = vmax.f32 %v17868_v55, %v8173_v1  ;;  %v4994_v21 = vmax.f32 %v2568_v44, %v8233_v32  ;;  %v4996_v5 = vmax.f32 %v2570_v24, %v8235_v23  ;;  %v17876_v11 = vrot.slane %v17852_v48, 2  ;;  %v17879_v1 = vld [vmem:[#allocation236_spill] sm:$0xff]  ;;  %v17883_v24 = vld [vmem:[#allocation257_spill] sm:$0xff]  ;;  %v17885_v23 = vld [vmem:[#allocation258_spill] sm:$0xff] }
 0x5bc   :  { %v4964_v10 = vmax.f32 %v17871_v49, %v17869_v4  ;;  %v4972_v12 = vmax.f32 %v17874_v60, %v17872_v47  ;;  %v4990_v46 = vmax.f32 %v17875_v6, %v8229_v15  ;;  %v5000_v26 = vmax.f32 %v2573_v13, %v8239_v25  ;;  %v17880_v49 = vld [vmem:[#allocation231_spill] sm:$0xff]  ;;  %v17886_v13 = vld [vmem:[#allocation252_spill] sm:$0xff] }
 0x5bd   :  { %v4998_v55 = vmax.f32 %v17876_v11, %v8237_v2  ;;  %v5002_v40 = vmax.f32 %v2574_v35, %v8241_v63  ;;  %v5214_v51 = vmax.f32 %v17878_v20, %v17877_v31  ;;  %v5216_v8 = vmax.f32 %v17880_v49, %v17879_v1  ;;  %v17881_v15 = vld [vmem:[#allocation255_spill] sm:$0xff]  ;;  %v8753_v49 = vld [vmem:[%s15702_s2 + $0x60] sm:$0xff] }
 0x5be   :  { %v5004_v56 = vmax.f32 %v2576_v33, %v8243_v27  ;;  %v5218_v39 = vmax.f32 %v4898_v34, %v4906_v14  ;;  %v5220_v60 = vmax.f32 %v4900_v22, %v4908_v29  ;;  %v5230_v41 = vmax.f32 %v4926_v9, %v4934_v19  ;;  %v8744_v1 = vld [vmem:[%s15702_s2 + $0x18] sm:$0xff]  ;;  %6268 = vmatpush.bf16.msrb.mxu2 %v8753_v49 }
 0x5bf   :  { %v5232_v4 = vmax.f32 %v4928_v30, %v4936_v45  ;;  %v5246_v44 = vmax.f32 %v17882_v54, %v17881_v15  ;;  %v5248_v32 = vmax.f32 %v17884_v61, %v17883_v24  ;;  %v5250_v35 = vmax.f32 %v17886_v13, %v17885_v23  ;;  %v17891_v24 = vld [vmem:[#allocation125_spill] sm:$0xff]  ;;  %6240 = vmatpush.bf16.msrb.mxu1 %v8744_v1  ;;  %v8752_v23 = vld [vmem:[%s15702_s2 + $0x58] sm:$0xff] }
 0x5c0   :  { %v5234_v2 = vmax.f32 %v4930_v7, %v4938_v16  ;;  %v5236_v25 = vmax.f32 %v4932_v58, %v4940_v17  ;;  %v5252_v63 = vmax.f32 %v4964_v10, %v4972_v12  ;;  %v5262_v62 = vmax.f32 %v4990_v46, %v4998_v55 }
 0x5c1   :  { %v5264_v47 = vmax.f32 %v4992_v28, %v5000_v26  ;;  %v5266_v59 = vmax.f32 %v4994_v21, %v5002_v40  ;;  %v5588_v33 = vperm.slane %v5214_v51, 0  ;;  %v5589_v27 = vperm.slane %v5216_v8, 0  ;;  %v17887_v28 = vld [vmem:[#allocation114_spill] sm:$0xff]  ;;  %v17888_v26 = vld [vmem:[#allocation115_spill] sm:$0xff] }
 0x5c2   :  { %v5268_v34 = vmax.f32 %v4996_v5, %v5004_v56  ;;  %v5590_v19 = vperm.slane %v5218_v39, 0  ;;  %v5591_v22 = vperm.slane %v5220_v60, 0  ;;  %v5592_v14 = vperm.slane %v5230_v41, 0  ;;  %v17889_v39 = vld [vmem:[#allocation116_spill] sm:$0xff]  ;;  %v17890_v41 = vld [vmem:[#allocation117_spill] sm:$0xff]  ;;  %6269 = vmatpush.bf16.msrb.mxu2 %v8752_v23 }
 0x5c3   :  { %v5593_v29 = vperm.slane %v5232_v4, 0  ;;  %v5596_v9 = vperm.slane %v5246_v44, 0  ;;  %v5597_v30 = vperm.slane %v5248_v32, 0  ;;  %v5598_v45 = vperm.slane %v5250_v35, 0  ;;  %v8743_v32 = vld [vmem:[%s15702_s2 + $0x10] sm:$0xff] }
 0x5c4   :  { %v5594_v6 = vperm.slane %v5234_v2, 0  ;;  %v5595_v11 = vperm.slane %v5236_v25, 0  ;;  %v5599_v31 = vperm.slane %v5252_v63, 0  ;;  %v5600_v20 = vperm.slane %v5262_v62, 0  ;;  %v17892_v2 = vld [vmem:[#allocation69_spill] sm:$0xff]  ;;  %6241 = vmatpush.bf16.msrb.mxu1 %v8743_v32 }
 0x5c5   :  { %v5601_v7 = vperm.slane %v5264_v47, 0  ;;  %v5602_v58 = vperm.slane %v5266_v59, 0  ;;  %v5646_v10 = vsel %vm5405_vm6, %v5589_v27, %v5588_v33  ;;  %v5653_v17 = vsel %vm5405_vm6, %v5597_v30, %v5596_v9  ;;  %v17893_v59 = vld [vmem:[#allocation126_spill] sm:$0xff]  ;;  %v17894_v27 = vld [vmem:[#allocation13_spill] sm:$0xff] }
 0x5c6   :  { %v5603_v16 = vperm.slane %v5268_v34, 0  ;;  %v5647_v12 = vsel %vm5407_vm7, %v5590_v19, %v5646_v10  ;;  %v5654_v46 = vsel %vm5407_vm7, %v5598_v45, %v5653_v17  ;;  %v2531_v21 = vrot.slane %v17887_v28, 6  ;;  %v17897_v30 = vld [vmem:[#allocation109_spill] sm:$0xff]  ;;  %v8751_v10 = vld [vmem:[%s15702_s2 + $0x50] sm:$0xff] }
 0x5c7   :  { %v5648_v5 = vsel %vm5409_vm8, %v5591_v22, %v5647_v12  ;;  %v5655_v55 = vsel %vm5409_vm8, %v5599_v31, %v5654_v46  ;;  %v2532_v40 = vrot.slane %v17888_v26, 2  ;;  %v2534_v51 = vrot.slane %v17888_v26, 6  ;;  %6270 = vmatpush.bf16.msrb.mxu2 %v8751_v10 }
 0x5c8   :  { %v5649_v8 = vsel %vm5411_vm9, %v5592_v14, %v5648_v5  ;;  %v5656_v56 = vsel %vm5411_vm9, %v5600_v20, %v5655_v55  ;;  %v2537_v60 = vrot.slane %v17889_v39, 6  ;;  %v2538_v4 = vrot.slane %v17890_v41, 2  ;;  %v17895_v14 = vld [vmem:[#allocation107_spill] sm:$0xff]  ;;  %v8742_v55 = vld [vmem:[%s15702_s2 + $0x8] sm:$0xff] }
 0x5c9   :  { %v5650_v15 = vsel %vm5413_vm10, %v5593_v29, %v5649_v8  ;;  %v5657_v54 = vsel %vm5413_vm10, %v5601_v7, %v5656_v56  ;;  %v2540_v44 = vrot.slane %v17890_v41, 6  ;;  %v2579_v61 = vrot.slane %v17891_v24, 6  ;;  %6242 = vmatpush.bf16.msrb.mxu1 %v8742_v55 }
 0x5ca   :  { %v5651_v13 = vsel %vm5415_vm11, %v5594_v6, %v5650_v15  ;;  %v5658_v35 = vsel %vm5415_vm11, %v5602_v58, %v5657_v54  ;;  %v2580_v25 = vrot.slane %v17892_v2, 2  ;;  %v2582_v63 = vrot.slane %v17892_v2, 6 }
 0x5cb   :  { %v5652_v62 = vsel %vm5417_vm12, %v5595_v11, %v5651_v13  ;;  %v5659_v47 = vsel %vm5417_vm12, %v5603_v16, %v5658_v35  ;;  %v2585_v33 = vrot.slane %v17893_v59, 6  ;;  %v2586_v34 = vrot.slane %v17894_v27, 2 }
 0x5cc   :  { %v8880_v19 = vpack.i.bf16 %v5659_v47, %v5652_v62  ;;  %v2588_v22 = vrot.slane %v17894_v27, 6  ;;  %v17896_v29 = vrot.slane %v17895_v14, 6  ;;  %v17898_v45 = vrot.slane %v17897_v30, 6  ;;  %v17903_v62 = vld [vmem:[#allocation242_spill] sm:$0xff] }
 0x5cd   :  { %v17899_v31 = vrot.slane %v17887_v28, 2  ;;  %v8183_v7 = vrot.slane %v2531_v21, 9  ;;  %v8185_v11 = vrot.slane %v2532_v40, 9  ;;  %v8187_v58 = vrot.slane %v2534_v51, 9 }
 0x5ce   :  { %v8155_v9 = vrot.slane %v17896_v29, 9  ;;  %v8163_v6 = vrot.slane %v17898_v45, 9  ;;  %8881 = vrot.lane.b32.xlu1 %v8880_v19, %s8931_s20  ;;  %v17900_v17 = vrot.slane %v17889_v39, 2  ;;  %v8191_v12 = vrot.slane %v2537_v60, 9 }
 0x5cf   :  { %v8181_v20 = vrot.slane %v17899_v31, 9  ;;  %v8193_v46 = vrot.slane %v2538_v4, 9  ;;  %v8195_v5 = vrot.slane %v2540_v44, 9  ;;  %v17901_v1 = vrot.slane %v17891_v24, 2  ;;  %v17905_v31 = vld [vmem:[#allocation247_spill] sm:$0xff] }
 0x5d0   :  { %v8189_v16 = vrot.slane %v17900_v17, 9  ;;  %v8247_v8 = vrot.slane %v2579_v61, 9  ;;  %v8249_v56 = vrot.slane %v2580_v25, 9  ;;  %v8251_v15 = vrot.slane %v2582_v63, 9 }
 0x5d1   :  { %v8245_v49 = vrot.slane %v17901_v1, 9  ;;  %v17902_v54 = vrot.slane %v17893_v59, 2  ;;  %v8255_v23 = vrot.slane %v2585_v33, 9  ;;  %v8257_v13 = vrot.slane %v2586_v34, 9 }
 0x5d2   :  { %v8259_v35 = vrot.slane %v2588_v22, 9  ;;  %v17904_v47 = vrot.slane %v17895_v14, 2  ;;  %v4916_v45 = vmax.f32 %v17896_v29, %v8155_v9  ;;  %v17906_v17 = vrot.slane %v17897_v30, 2  ;;  %v8741_v9 = vld [vmem:[%s15702_s2] sm:$0xff] }
 0x5d3   :  { %v8253_v32 = vrot.slane %v17902_v54, 9  ;;  %v17907_v48 = vrot.slane %v17897_v30, 6  ;;  %v8750_v54 = vld [vmem:[%s15702_s2 + $0x48] sm:$0xff]  ;;  %v17908_v3 = vrot.slane %v17887_v28, 2  ;;  %v4944_v27 = vmax.f32 %v2531_v21, %v8183_v7  ;;  %v17911_v14 = vld [vmem:[#allocation120_spill] sm:$0xff]  ;;  %v17913_v21 = vld [vmem:[#allocation271_spill] sm:$0xff]  ;;  %6243 = vmatpush.bf16.msrb.mxu1 %v8741_v9 }
 0x5d4   :  { %v4914_v19 = vmax.f32 %v17904_v47, %v17903_v62  ;;  %v4922_v1 = vmax.f32 %v17906_v17, %v17905_v31  ;;  %v4946_v62 = vmax.f32 %v2532_v40, %v8185_v11  ;;  %v4948_v47 = vmax.f32 %v2534_v51, %v8187_v58  ;;  %v14376_v17 = vpop.permute.xlu2 %8866  ;;  %v17910_v30 = vld [vmem:[#allocation265_spill] sm:$0xff]  ;;  %v17914_v40 = vld [vmem:[#allocation122_spill] sm:$0xff]  ;;  %6271 = vmatpush.bf16.msrb.mxu2 %v8750_v54 }
 0x5d5   :  { %v4924_v53 = vmax.f32 %v17907_v48, %v8163_v6  ;;  %v4942_v57 = vmax.f32 %v17908_v3, %v8181_v20  ;;  %v17909_v29 = vrot.slane %v17889_v39, 2  ;;  %v4952_v48 = vmax.f32 %v2537_v60, %v8191_v12  ;;  %v17919_v12 = vld [vmem:[#allocation239_spill] sm:$0xff]  ;;  %v17925_v54 = vld [vmem:[#allocation262_spill] sm:$0xff] }
 0x5d6   :  { %v4954_v6 = vmax.f32 %v2538_v4, %v8193_v46  ;;  %v4956_v10 = vmax.f32 %v2540_v44, %v8195_v5  ;;  %v17912_v28 = vrot.slane %v17911_v14, 6  ;;  %v17915_v51 = vrot.slane %v17914_v40, 6  ;;  %v8749_v14 = vld [vmem:[%s15702_s2 + $0x40] sm:$0xff] }
 0x5d7   :  { %v4950_v31 = vmax.f32 %v17909_v29, %v8189_v16  ;;  %v17916_v7 = vrot.slane %v17891_v24, 2  ;;  %v5008_v58 = vmax.f32 %v2579_v61, %v8247_v8  ;;  %v5010_v55 = vmax.f32 %v2580_v25, %v8249_v56  ;;  %v17918_v16 = vld [vmem:[#allocation108_spill] sm:$0xff]  ;;  %v17921_v29 = vld [vmem:[#allocation241_spill] sm:$0xff] }
 0x5d8   :  { %v4980_v3 = vmax.f32 %v17912_v28, %v17910_v30  ;;  %v4988_v20 = vmax.f32 %v17915_v51, %v17913_v21  ;;  %v5012_v39 = vmax.f32 %v2582_v63, %v8251_v15  ;;  %v17917_v60 = vrot.slane %v17893_v59, 2  ;;  %v17920_v5 = vld [vmem:[#allocation244_spill] sm:$0xff]  ;;  %6272 = vmatpush.bf16.msrb.mxu2 %v8749_v14 }
 0x5d9   :  { %v5006_v11 = vmax.f32 %v17916_v7, %v8245_v49  ;;  %v5016_v44 = vmax.f32 %v2585_v33, %v8255_v23  ;;  %v5018_v28 = vmax.f32 %v2586_v34, %v8257_v13  ;;  %v5020_v30 = vmax.f32 %v2588_v22, %v8259_v35  ;;  %v17922_v33 = vld [vmem:[#allocation266_spill] sm:$0xff]  ;;  %v17923_v15 = vld [vmem:[#allocation76_spill] sm:$0xff]  ;;  %v17926_v34 = vld [vmem:[#allocation269_spill] sm:$0xff] }
 0x5da   :  { %v5014_v4 = vmax.f32 %v17917_v60, %v8253_v32  ;;  %v5222_v46 = vmax.f32 %v17919_v12, %v17918_v16  ;;  %v5224_v49 = vmax.f32 %v17921_v29, %v17920_v5  ;;  %v5226_v61 = vmax.f32 %v4914_v19, %v4922_v1  ;;  %v17924_v23 = vld [vmem:[#allocation268_spill] sm:$0xff]  ;;  %v17927_v22 = vld [vmem:[#allocation263_spill] sm:$0xff] }
 0x5db   :  { %v5228_v25 = vmax.f32 %v4916_v45, %v4924_v53  ;;  %v5238_v63 = vmax.f32 %v4942_v57, %v4950_v31  ;;  %v5240_v8 = vmax.f32 %v4944_v27, %v4952_v48  ;;  %v5242_v56 = vmax.f32 %v4946_v62, %v4954_v6 }
 0x5dc   :  { %v5254_v32 = vmax.f32 %v17923_v15, %v17922_v33  ;;  %v5256_v21 = vmax.f32 %v17925_v54, %v17924_v23  ;;  %v5258_v13 = vmax.f32 %v17927_v22, %v17926_v34  ;;  %v5244_v35 = vmax.f32 %v4948_v47, %v4956_v10  ;;  %v14401_v10 = vpop.permute.xlu2 %8871  ;;  %v17928_v33 = vld [vmem:[#allocation90_spill] sm:$0xff] }
 0x5dd   :  { %v5260_v40 = vmax.f32 %v4980_v3, %v4988_v20  ;;  %v5270_v51 = vmax.f32 %v5006_v11, %v5014_v4  ;;  %v5272_v7 = vmax.f32 %v5008_v58, %v5016_v44  ;;  %v5274_v9 = vmax.f32 %v5010_v55, %v5018_v28  ;;  %v14405_v58 = vpop.permute.xlu0 %8846  ;;  %v17930_v34 = vld [vmem:[#allocation34_spill] sm:$0xff] }
 0x5de   :  { %v5276_v19 = vmax.f32 %v5012_v39, %v5020_v30  ;;  %v5988_v53 = vperm.slane %v5222_v46, 0  ;;  %v5989_v57 = vperm.slane %v5224_v49, 0  ;;  %v5990_v27 = vperm.slane %v5226_v61, 0 }
 0x5df   :  { %v5991_v45 = vperm.slane %v5228_v25, 0  ;;  %v5992_v1 = vperm.slane %v5238_v63, 0  ;;  %v5993_v62 = vperm.slane %v5240_v8, 0  ;;  %v5994_v31 = vperm.slane %v5242_v56, 0 }
 0x5e0   :  { %v5996_v48 = vperm.slane %v5254_v32, 0  ;;  %v5997_v6 = vperm.slane %v5256_v21, 0  ;;  %v5998_v60 = vperm.slane %v5258_v13, 0  ;;  %v5995_v16 = vperm.slane %v5244_v35, 0  ;;  %v17929_v32 = vld [vmem:[#allocation16_spill] sm:$0xff]  ;;  %v17931_v13 = vld [vmem:[#allocation31_spill] sm:$0xff] }
 0x5e1   :  { %v5999_v12 = vperm.slane %v5260_v40, 0  ;;  %v6000_v5 = vperm.slane %v5270_v51, 0  ;;  %v6001_v47 = vperm.slane %v5272_v7, 0  ;;  %v6002_v3 = vperm.slane %v5274_v9, 0  ;;  %v17932_v7 = vld [vmem:[#allocation89_spill] sm:$0xff] }
 0x5e2   :  { %v6003_v20 = vperm.slane %v5276_v19, 0  ;;  %v6046_v39 = vsel %vm5405_vm6, %v5989_v57, %v5988_v53  ;;  %v6053_v11 = vsel %vm5405_vm6, %v5997_v6, %v5996_v48  ;;  %v8869_v44 = vunpack.i.h.bf16 %v14376_v17  ;;  %v17936_v6 = vld [vmem:[#allocation24_spill] sm:$0xff] }
 0x5e3   :  { %v6047_v55 = vsel %vm5407_vm7, %v5990_v27, %v6046_v39  ;;  %v6054_v4 = vsel %vm5407_vm7, %v5998_v60, %v6053_v11  ;;  %v8868_v14 = vunpack.i.l.bf16 %v14376_v17  ;;  %v8874_v46 = vunpack.i.h.bf16 %v14401_v10 }
 0x5e4   :  { %v6048_v28 = vsel %vm5409_vm8, %v5991_v45, %v6047_v55  ;;  %v6055_v30 = vsel %vm5409_vm8, %v5999_v12, %v6054_v4  ;;  %v8873_v29 = vunpack.i.l.bf16 %v14401_v10  ;;  %v8849_v25 = vunpack.i.h.bf16 %v14405_v58  ;;  %v17934_v45 = vld [vmem:[#allocation92_spill] sm:$0xff]  ;;  %v17940_v55 = vld [vmem:[#allocation134_spill] sm:$0xff]  ;;  %v17941_v4 = vld [vmem:[#allocation9_spill] sm:$0xff] }
 0x5e5   :  { %v6049_v49 = vsel %vm5411_vm9, %v5992_v1, %v6048_v28  ;;  %v6056_v61 = vsel %vm5411_vm9, %v6000_v5, %v6055_v30  ;;  %v8848_v63 = vunpack.i.l.bf16 %v14405_v58  ;;  %v2245_v15 = vrot.slane %v17928_v33, 4 }
 0x5e6   :  { %v6050_v8 = vsel %vm5413_vm10, %v5993_v62, %v6049_v49  ;;  %v6057_v56 = vsel %vm5413_vm10, %v6001_v47, %v6056_v61  ;;  %v2251_v23 = vrot.slane %v17929_v32, 4  ;;  %v2293_v22 = vrot.slane %v17930_v34, 4  ;;  %v17938_v47 = vld [vmem:[#allocation36_spill] sm:$0xff]  ;;  %v17943_v49 = vld [vmem:[#allocation138_spill] sm:$0xff] }
 0x5e7   :  { %v6051_v54 = vsel %vm5415_vm11, %v5994_v31, %v6050_v8  ;;  %v6058_v21 = vsel %vm5415_vm11, %v6002_v3, %v6057_v56  ;;  %v2299_v35 = vrot.slane %v17931_v13, 4  ;;  %v17933_v9 = vrot.slane %v17932_v7, 4  ;;  %v17944_v61 = vld [vmem:[#allocation88_spill] sm:$0xff] }
 0x5e8   :  { %v6052_v40 = vsel %vm5417_vm12, %v5995_v16, %v6051_v54  ;;  %v6059_v51 = vsel %vm5417_vm12, %v6003_v20, %v6058_v21  ;;  %v7800_v53 = vrot.slane %v17928_v33, 9  ;;  %v7802_v27 = vrot.slane %v2245_v15, 9 }
 0x5e9   :  { %v7798_v19 = vrot.slane %v17933_v9, 9  ;;  %v8875_v57 = vpack.i.bf16 %v6059_v51, %v6052_v40  ;;  %v17935_v1 = vrot.slane %v17934_v45, 4  ;;  %v7808_v31 = vrot.slane %v17929_v32, 9 }
 0x5ea   :  { %v7810_v48 = vrot.slane %v2251_v23, 9  ;;  %v17937_v60 = vrot.slane %v17936_v6, 4  ;;  %v7864_v16 = vrot.slane %v17930_v34, 9  ;;  %v7866_v5 = vrot.slane %v2293_v22, 9 }
 0x5eb   :  { %v7806_v62 = vrot.slane %v17935_v1, 9  ;;  %8876 = vrot.lane.b32.xlu0 %v8875_v57, %s8931_s20  ;;  %v17939_v3 = vrot.slane %v17938_v47, 4  ;;  %v7872_v39 = vrot.slane %v17931_v13, 9  ;;  %v7874_v11 = vrot.slane %v2299_v35, 9 }
 0x5ec   :  { %v7862_v12 = vrot.slane %v17937_v60, 9  ;;  %v17942_v28 = vrot.slane %v17941_v4, 4  ;;  %v17945_v8 = vrot.slane %v17944_v61, 4  ;;  %v17946_v54 = vmov %v17933_v9 }
 0x5ed   :  { %v7870_v20 = vrot.slane %v17939_v3, 9  ;;  %v4559_v21 = vmax.f32 %v17946_v54, %v7798_v19  ;;  %v4561_v40 = vmax.f32 %v17928_v33, %v7800_v53  ;;  %v4563_v51 = vmax.f32 %v2245_v15, %v7802_v27  ;;  %v17948_v3 = vld [vmem:[#allocation151_spill] sm:$0xff] }
 0x5ee   :  { %v4531_v30 = vmax.f32 %v17942_v28, %v17940_v55  ;;  %v4539_v56 = vmax.f32 %v17945_v8, %v17943_v49  ;;  %v17947_v9 = vmov %v17935_v1  ;;  %v4569_v1 = vmax.f32 %v17929_v32, %v7808_v31  ;;  %v17950_v28 = vld [vmem:[#allocation155_spill] sm:$0xff] }
 0x5ef   :  { %v4567_v57 = vmax.f32 %v17947_v9, %v7806_v62  ;;  %v4571_v60 = vmax.f32 %v2251_v23, %v7810_v48  ;;  %v17949_v4 = vrot.slane %v17694_v0, 4  ;;  %v17951_v61 = vrot.slane %v17707_v52, 4  ;;  %v17954_v62 = vld [vmem:[#allocation277_spill] sm:$0xff]  ;;  %v17955_v0 = vld [vmem:[#allocation276_spill] sm:$0xff]  ;;  %v17956_v9 = vld [vmem:[#allocation283_spill] sm:$0xff] }
 0x5f0   :  { %v17952_v7 = vrot.slane %v17936_v6, 4  ;;  %v4625_v33 = vmax.f32 %v17930_v34, %v7864_v16  ;;  %v4627_v15 = vmax.f32 %v2293_v22, %v7866_v5  ;;  %v17953_v53 = vrot.slane %v17938_v47, 4  ;;  %v17957_v6 = vld [vmem:[#allocation282_spill] sm:$0xff]  ;;  %v17958_v16 = vld [vmem:[#allocation133_spill] sm:$0xff]  ;;  %v17959_v5 = vld [vmem:[#allocation136_spill] sm:$0xff] }
 0x5f1   :  { %v4595_v55 = vmax.f32 %v17949_v4, %v17948_v3  ;;  %v4603_v49 = vmax.f32 %v17951_v61, %v17950_v28  ;;  %v4633_v32 = vmax.f32 %v17931_v13, %v7872_v39  ;;  %v4635_v23 = vmax.f32 %v2299_v35, %v7874_v11  ;;  %v17964_v28 = vld [vmem:[#allocation157_spill] sm:$0xff] }
 0x5f2   :  { %v4623_v19 = vmax.f32 %v17952_v7, %v7862_v12  ;;  %v4631_v27 = vmax.f32 %v17953_v53, %v7870_v20  ;;  %v5035_v45 = vmax.f32 %v4531_v30, %v4539_v56  ;;  %v5045_v31 = vmax.f32 %v17955_v0, %v17954_v62  ;;  %v17961_v56 = vld [vmem:[#allocation150_spill] sm:$0xff]  ;;  %v17965_v61 = vld [vmem:[#allocation285_spill] sm:$0xff]  ;;  %v17966_v7 = vld [vmem:[#allocation284_spill] sm:$0xff] }
 0x5f3   :  { %v5047_v48 = vmax.f32 %v4559_v21, %v4567_v57  ;;  %v5049_v8 = vmax.f32 %v4561_v40, %v4569_v1  ;;  %v5051_v52 = vmax.f32 %v4563_v51, %v4571_v60  ;;  %v5067_v54 = vmax.f32 %v4595_v55, %v4603_v49  ;;  %v17962_v21 = vld [vmem:[#allocation153_spill] sm:$0xff] }
 0x5f4   :  { %v5077_v12 = vmax.f32 %v17957_v6, %v17956_v9  ;;  %v5079_v3 = vmax.f32 %v4623_v19, %v4631_v27  ;;  %v5081_v34 = vmax.f32 %v4625_v33, %v4633_v32  ;;  %v5083_v22 = vmax.f32 %v4627_v15, %v4635_v23  ;;  %v17967_v19 = vld [vmem:[#allocation41_spill] sm:$0xff] }
 0x5f5   :  { %v17960_v47 = vmax.f32 %v17958_v16, %v17959_v5  ;;  %v5751_v13 = vperm.slane %v5035_v45, 0  ;;  %v5752_v35 = vperm.slane %v5045_v31, 0  ;;  %v5753_v39 = vperm.slane %v5047_v48, 0 }
 0x5f6   :  { %v5754_v11 = vperm.slane %v5049_v8, 0  ;;  %v5755_v30 = vperm.slane %v5051_v52, 0  ;;  %v17963_v40 = vmax.f32 %v17961_v56, %v17962_v21  ;;  %v5759_v57 = vperm.slane %v5067_v54, 0 }
 0x5f7   :  { %v5750_v20 = vperm.slane %v17960_v47, 0  ;;  %v5760_v1 = vperm.slane %v5077_v12, 0  ;;  %v5761_v60 = vperm.slane %v5079_v3, 0  ;;  %v5762_v4 = vperm.slane %v5081_v34, 0 }
 0x5f8   :  { %v5758_v51 = vperm.slane %v17963_v40, 0  ;;  %v5763_v55 = vperm.slane %v5083_v22, 0  ;;  %v5812_v49 = vsel %vm5405_vm6, %v17965_v61, %v17964_v28  ;;  %v5819_v33 = vsel %vm5405_vm6, %v17967_v19, %v17966_v7 }
 0x5f9   :  { %v2233_v15 = vrot.slane %v17803_v37, 4  ;;  %v5813_v53 = vsel %vm5407_vm7, %v5750_v20, %v5812_v49  ;;  %v2239_v32 = vrot.slane %v17805_v43, 4  ;;  %v2281_v23 = vrot.slane %v17807_v42, 4 }
 0x5fa   :  { %v5820_v27 = vsel %vm5407_vm7, %v5758_v51, %v5819_v33  ;;  %v5814_v45 = vsel %vm5409_vm8, %v5751_v13, %v5813_v53  ;;  %v2287_v0 = vrot.slane %v17809_v18, 4  ;;  %v17968_v31 = vrot.slane %v17802_v50, 4  ;;  %v17971_v51 = vld [vmem:[#allocation10_spill] sm:$0xff] }
 0x5fb   :  { %v5821_v62 = vsel %vm5409_vm8, %v5759_v57, %v5820_v27  ;;  %v5815_v8 = vsel %vm5411_vm9, %v5752_v35, %v5814_v45  ;;  %v7784_v54 = vrot.slane %v17803_v37, 9  ;;  %v7786_v9 = vrot.slane %v2233_v15, 9 }
 0x5fc   :  { %v7782_v48 = vrot.slane %v17968_v31, 9  ;;  %v5822_v52 = vsel %vm5411_vm9, %v5760_v1, %v5821_v62  ;;  %v5816_v6 = vsel %vm5413_vm10, %v5753_v39, %v5815_v8  ;;  %v17969_v3 = vrot.slane %v17804_v36, 4  ;;  %v14527_v62 = vpop.permute.xlu1 %8856  ;;  %v17977_v36 = vld [vmem:[#allocation130_spill] sm:$0xff] }
 0x5fd   :  { %v5823_v12 = vsel %vm5413_vm10, %v5761_v60, %v5822_v52  ;;  %v7792_v22 = vrot.slane %v17805_v43, 9  ;;  %v5817_v16 = vsel %vm5415_vm11, %v5754_v11, %v5816_v6  ;;  %v7794_v47 = vrot.slane %v2239_v32, 9  ;;  %v17983_v6 = vld [vmem:[#allocation281_spill] sm:$0xff] }
 0x5fe   :  { %v7790_v34 = vrot.slane %v17969_v3, 9  ;;  %v5824_v5 = vsel %vm5415_vm11, %v5762_v4, %v5823_v12  ;;  %v17970_v20 = vrot.slane %v17806_v38, 4  ;;  %v5818_v35 = vsel %vm5417_vm12, %v5755_v30, %v5817_v16  ;;  %v17984_v12 = vld [vmem:[#allocation154_spill] sm:$0xff] }
 0x5ff   :  { %v5825_v56 = vsel %vm5417_vm12, %v5763_v55, %v5824_v5  ;;  %v7848_v39 = vrot.slane %v17807_v42, 9  ;;  %v7850_v21 = vrot.slane %v2281_v23, 9  ;;  %v6092_v40 = vsel %vm1144_vm1, %v5818_v35, %v8848_v63 }
 0x600   :  { %v7846_v13 = vrot.slane %v17970_v20, 9  ;;  %v6093_v11 = vsel %vm1144_vm1, %v5825_v56, %v8849_v25  ;;  %v17972_v57 = vrot.slane %v17971_v51, 4  ;;  %v7856_v60 = vrot.slane %v17809_v18, 9 }
 0x601   :  { %v6101_v4 = vpack.c.bf16 %v6093_v11, %v6092_v40  ;;  %v7858_v30 = vrot.slane %v2287_v0, 9  ;;  %v17973_v55 = vmov %v17968_v31  ;;  %v4545_v61 = vmax.f32 %v17803_v37, %v7784_v54  ;;  %v17978_v31 = vld [vmem:[#allocation103_spill] sm:$0xff]  ;;  %v17985_v40 = vld [vmem:[#allocation81_spill] sm:$0xff]  ;;  %v17986_v11 = vld [vmem:[#allocation272_spill] sm:$0xff] }
 0x602   :  { %v7854_v1 = vrot.slane %v17972_v57, 9  ;;  %v4543_v28 = vmax.f32 %v17973_v55, %v7782_v48  ;;  %v4547_v49 = vmax.f32 %v2233_v15, %v7786_v9  ;;  %v17974_v7 = vmov %v17969_v3  ;;  %v17981_v9 = vld [vmem:[#allocation147_spill] sm:$0xff] }
 0x603   :  { %v4551_v63 = vmax.f32 %v17974_v7, %v7790_v34  ;;  %v4553_v58 = vmax.f32 %v17805_v43, %v7792_v22  ;;  %v4555_v19 = vmax.f32 %v2239_v32, %v7794_v47  ;;  %6273 = vmatmul.bf16.vlgmr.msrb.gmra.mxu2 %v6101_v4  ;;  %v17975_v25 = vmov %v17970_v20  ;;  %v17979_v43 = vld [vmem:[#allocation275_spill] sm:$0xff]  ;;  %v17980_v32 = vld [vmem:[#allocation137_spill] sm:$0xff] }
 0x604   :  { %v4607_v33 = vmax.f32 %v17975_v25, %v7846_v13  ;;  %v4609_v53 = vmax.f32 %v17807_v42, %v7848_v39  ;;  %v4611_v27 = vmax.f32 %v2281_v23, %v7850_v21  ;;  %v17976_v45 = vmov %v17972_v57  ;;  %v17982_v42 = vld [vmem:[#allocation142_spill] sm:$0xff]  ;;  %v17987_v57 = vld [vmem:[#allocation37_spill] sm:$0xff]  ;;  %v17989_v55 = vld [vmem:[#allocation127_spill] sm:$0xff] }
 0x605   :  { %v4615_v50 = vmax.f32 %v17976_v45, %v7854_v1  ;;  %v4617_v37 = vmax.f32 %v17809_v18, %v7856_v60  ;;  %v4619_v15 = vmax.f32 %v2287_v0, %v7858_v30  ;;  %v5027_v48 = vmax.f32 %v17978_v31, %v17977_v36  ;;  %v17988_v1 = vld [vmem:[#allocation274_spill] sm:$0xff]  ;;  %v17993_v45 = vld [vmem:[#allocation44_spill] sm:$0xff] }
 0x606   :  { %v5037_v8 = vmax.f32 %v17980_v32, %v17979_v43  ;;  %v5039_v52 = vmax.f32 %v4543_v28, %v4551_v63  ;;  %v5041_v38 = vmax.f32 %v4545_v61, %v4553_v58  ;;  %v5043_v54 = vmax.f32 %v4547_v49, %v4555_v19  ;;  %v17990_v61 = vld [vmem:[#allocation273_spill] sm:$0xff]  ;;  %v17991_v58 = vld [vmem:[#allocation40_spill] sm:$0xff]  ;;  %v17992_v25 = vld [vmem:[#allocation42_spill] sm:$0xff] }
 0x607   :  { %v5059_v23 = vmax.f32 %v17982_v42, %v17981_v9  ;;  %v5069_v3 = vmax.f32 %v17984_v12, %v17983_v6  ;;  %v5071_v34 = vmax.f32 %v4607_v33, %v4615_v50  ;;  %v5073_v22 = vmax.f32 %v4609_v53, %v4617_v37  ;;  %v17994_v37 = vld [vmem:[#allocation45_spill] sm:$0xff]  ;;  %v17996_v32 = vld [vmem:[#allocation56_spill] sm:$0xff]  ;;  %v17998_v42 = vld [vmem:[#allocation58_spill] sm:$0xff] }
 0x608   :  { %v5075_v16 = vmax.f32 %v4611_v27, %v4619_v15  ;;  %v8859_v18 = vunpack.i.h.bf16 %v14527_v62  ;;  %v8858_v0 = vunpack.i.l.bf16 %v14527_v62  ;;  %v5344_v5 = vperm.slane %v5027_v48, 0  ;;  %v17995_v48 = vld [vmem:[#allocation55_spill] sm:$0xff] }
 0x609   :  { %v5345_v47 = vperm.slane %v5037_v8, 0  ;;  %v5346_v20 = vperm.slane %v5039_v52, 0  ;;  %v5347_v13 = vperm.slane %v5041_v38, 0  ;;  %v5348_v35 = vperm.slane %v5043_v54, 0  ;;  %v17997_v54 = vld [vmem:[#allocation57_spill] sm:$0xff] }
 0x60a   :  { %v5352_v56 = vperm.slane %v5059_v23, 0  ;;  %v5353_v39 = vperm.slane %v5069_v3, 0  ;;  %v5354_v21 = vperm.slane %v5071_v34, 0  ;;  %v5406_v51 = vsel %vm5405_vm6, %v17986_v11, %v17985_v40 }
 0x60b   :  { %v5419_v60 = vsel %vm5405_vm6, %v17988_v1, %v17987_v57  ;;  %v5355_v4 = vperm.slane %v5073_v22, 0  ;;  %v5356_v30 = vperm.slane %v5075_v16, 0  ;;  %v5408_v28 = vsel %vm5407_vm7, %v17989_v55, %v5406_v51 }
 0x60c   :  { %v5420_v49 = vsel %vm5407_vm7, %v17990_v61, %v5419_v60  ;;  %v5410_v7 = vsel %vm5409_vm8, %v5344_v5, %v5408_v28  ;;  %v2338_v19 = vrot.slane %v17991_v58, 4  ;;  %v2341_v33 = vrot.slane %v17992_v25, 4  ;;  %v18006_v61 = vld [vmem:[#allocation177_spill] sm:$0xff] }
 0x60d   :  { %v5421_v63 = vsel %vm5409_vm8, %v5352_v56, %v5420_v49  ;;  %v5412_v53 = vsel %vm5411_vm9, %v5345_v47, %v5410_v7  ;;  %v2344_v50 = vrot.slane %v17993_v45, 4  ;;  %v2347_v15 = vrot.slane %v17994_v37, 4  ;;  %v18007_v49 = vld [vmem:[#allocation48_spill] sm:$0xff] }
 0x60e   :  { %v5422_v27 = vsel %vm5411_vm9, %v5353_v39, %v5421_v63  ;;  %v5414_v36 = vsel %vm5413_vm10, %v5346_v20, %v5412_v53  ;;  %v2386_v43 = vrot.slane %v17995_v48, 4  ;;  %v2389_v8 = vrot.slane %v17996_v32, 4  ;;  %v17999_v20 = vld [vmem:[#allocation50_spill] sm:$0xff]  ;;  %v18001_v39 = vld [vmem:[#allocation52_spill] sm:$0xff] }
 0x60f   :  { %v5423_v31 = vsel %vm5413_vm10, %v5354_v21, %v5422_v27  ;;  %v5416_v52 = vsel %vm5415_vm11, %v5347_v13, %v5414_v36  ;;  %v2392_v9 = vrot.slane %v17997_v54, 4  ;;  %v2395_v23 = vrot.slane %v17998_v42, 4 }
 0x610   :  { %v5424_v38 = vsel %vm5415_vm11, %v5355_v4, %v5423_v31  ;;  %v14567_v6 = vsel %vm5417_vm12, %v5348_v35, %v5416_v52  ;;  %v7926_v3 = vrot.slane %v2338_v19, 9  ;;  %v7928_v34 = vrot.slane %v17992_v25, 9  ;;  %v18003_v4 = vld [vmem:[#allocation172_spill] sm:$0xff] }
 0x611   :  { %v14570_v12 = vsel %vm5417_vm12, %v5356_v30, %v5424_v38  ;;  %v7930_v22 = vrot.slane %v2341_v33, 9  ;;  %v7934_v16 = vrot.slane %v2344_v50, 9  ;;  %v7936_v5 = vrot.slane %v17994_v37, 9  ;;  %v18004_v30 = vld [vmem:[#allocation32_spill] sm:$0xff] }
 0x612   :  { %v7938_v47 = vrot.slane %v2347_v15, 9  ;;  %v18000_v13 = vrot.slane %v17999_v20, 4  ;;  %v18002_v21 = vrot.slane %v18001_v39, 4  ;;  %v7990_v11 = vrot.slane %v2386_v43, 9 }
 0x613   :  { %v7992_v35 = vrot.slane %v17996_v32, 9  ;;  %v7994_v51 = vrot.slane %v2389_v8, 9  ;;  %v7998_v57 = vrot.slane %v2392_v9, 9  ;;  %v8000_v1 = vrot.slane %v17998_v42, 9 }
 0x614   :  { %v7962_v56 = vrot.slane %v18000_v13, 9  ;;  %v7970_v40 = vrot.slane %v18002_v21, 9  ;;  %v8002_v60 = vrot.slane %v2395_v23, 9  ;;  %v18005_v55 = vrot.slane %v18004_v30, 4 }
 0x615   :  { %v18008_v7 = vrot.slane %v18007_v49, 4  ;;  %v18009_v53 = vrot.slane %v17991_v58, 9  ;;  %v4687_v36 = vmax.f32 %v2338_v19, %v7926_v3  ;;  %v4689_v31 = vmax.f32 %v17992_v25, %v7928_v34 }
 0x616   :  { %v4659_v28 = vmax.f32 %v18005_v55, %v18003_v4  ;;  %v14590_v52 = vmax.f32 %v2341_v33, %v7930_v22  ;;  %v18010_v38 = vrot.slane %v17993_v45, 9  ;;  %v4695_v21 = vmax.f32 %v2344_v50, %v7934_v16  ;;  %v18015_v16 = vld [vmem:[#allocation173_spill] sm:$0xff] }
 0x617   :  { %v4667_v63 = vmax.f32 %v18008_v7, %v18006_v61  ;;  %v4685_v27 = vmax.f32 %v17991_v58, %v18009_v53  ;;  %v4697_v4 = vmax.f32 %v17994_v37, %v7936_v5  ;;  %v4699_v30 = vmax.f32 %v2347_v15, %v7938_v47  ;;  %v14600_v58 = vpop.permute.xlu1 %8861  ;;  %v18016_v5 = vld [vmem:[#allocation169_spill] sm:$0xff] }
 0x618   :  { %v4693_v13 = vmax.f32 %v17993_v45, %v18010_v38  ;;  %v18011_v55 = vrot.slane %v17999_v20, 4  ;;  %v18012_v49 = vrot.slane %v18001_v39, 4  ;;  %v18013_v19 = vrot.slane %v17995_v48, 9  ;;  %v18017_v20 = vld [vmem:[#allocation175_spill] sm:$0xff] }
 0x619   :  { %v4751_v33 = vmax.f32 %v2386_v43, %v7990_v11  ;;  %v18014_v3 = vrot.slane %v17997_v54, 9  ;;  %v4759_v50 = vmax.f32 %v2392_v9, %v7998_v57  ;;  %v4753_v37 = vmax.f32 %v17996_v32, %v7992_v35  ;;  %v18020_v9 = vld [vmem:[#allocation188_spill] sm:$0xff]  ;;  %v18021_v32 = vld [vmem:[#allocation291_spill] sm:$0xff] }
 0x61a   :  { %v4723_v61 = vmax.f32 %v18011_v55, %v7962_v56  ;;  %v4731_v7 = vmax.f32 %v18012_v49, %v7970_v40  ;;  %v4749_v25 = vmax.f32 %v17995_v48, %v18013_v19  ;;  %v4755_v15 = vmax.f32 %v2389_v8, %v7994_v51  ;;  %v18018_v56 = vld [vmem:[#allocation286_spill] sm:$0xff]  ;;  %v18022_v8 = vld [vmem:[#allocation289_spill] sm:$0xff] }
 0x61b   :  { %v4757_v45 = vmax.f32 %v17997_v54, %v18014_v3  ;;  %v4761_v34 = vmax.f32 %v17998_v42, %v8000_v1  ;;  %v4763_v22 = vmax.f32 %v2395_v23, %v8002_v60  ;;  %v5095_v47 = vmax.f32 %v18016_v5, %v18015_v16  ;;  %v18019_v54 = vld [vmem:[#allocation191_spill] sm:$0xff]  ;;  %v18028_v5 = vld [vmem:[#allocation54_spill] sm:$0xff] }
 0x61c   :  { %v5097_v39 = vmax.f32 %v18018_v56, %v18017_v20  ;;  %v5099_v40 = vmax.f32 %v4659_v28, %v4667_v63  ;;  %v5109_v48 = vmax.f32 %v4685_v27, %v4693_v13  ;;  %v8864_v43 = vunpack.i.h.bf16 %v14600_v58 }
 0x61d   :  { %v5111_v11 = vmax.f32 %v4687_v36, %v4695_v21  ;;  %v5113_v53 = vmax.f32 %v4689_v31, %v4697_v4  ;;  %v5127_v57 = vmax.f32 %v18020_v9, %v18019_v54  ;;  %v5129_v35 = vmax.f32 %v18022_v8, %v18021_v32 }
 0x61e   :  { %v5131_v42 = vmax.f32 %v4723_v61, %v4731_v7  ;;  %v5141_v23 = vmax.f32 %v4749_v25, %v4757_v45  ;;  %v5143_v51 = vmax.f32 %v4751_v33, %v4759_v50  ;;  %v8863_v1 = vunpack.i.l.bf16 %v14600_v58  ;;  %v18023_v7 = vld [vmem:[#allocation49_spill] sm:$0xff]  ;;  %v18026_v50 = vld [vmem:[#allocation30_spill] sm:$0xff] }
 0x61f   :  { %v5115_v60 = vmax.f32 %v14590_v52, %v4699_v30  ;;  %v5145_v38 = vmax.f32 %v4753_v37, %v4761_v34  ;;  %v5765_v28 = vperm.slane %v5095_v47, 0  ;;  %v5147_v63 = vmax.f32 %v4755_v15, %v4763_v22  ;;  %v18024_v33 = vld [vmem:[#allocation193_spill] sm:$0xff]  ;;  %v18027_v22 = vld [vmem:[#allocation94_spill] sm:$0xff] }
 0x620   :  { %v5766_v27 = vperm.slane %v5097_v39, 0  ;;  %v5767_v13 = vperm.slane %v5099_v40, 0  ;;  %v5768_v36 = vperm.slane %v5109_v48, 0  ;;  %v5769_v31 = vperm.slane %v5111_v11, 0  ;;  %v18025_v30 = vld [vmem:[#allocation25_spill] sm:$0xff]  ;;  %v18029_v39 = vld [vmem:[#allocation35_spill] sm:$0xff] }
 0x621   :  { %v5770_v21 = vperm.slane %v5113_v53, 0  ;;  %v5773_v4 = vperm.slane %v5127_v57, 0  ;;  %v5774_v55 = vperm.slane %v5129_v35, 0  ;;  %v5775_v49 = vperm.slane %v5131_v42, 0  ;;  %v18031_v57 = vld [vmem:[#allocation29_spill] sm:$0xff] }
 0x622   :  { %v5776_v19 = vperm.slane %v5141_v23, 0  ;;  %v5777_v3 = vperm.slane %v5143_v51, 0  ;;  %v5778_v61 = vperm.slane %v5145_v38, 0  ;;  %v5826_v25 = vsel %vm5405_vm6, %v5765_v28, %v18023_v7  ;;  %v18035_v7 = vld [vmem:[#allocation53_spill] sm:$0xff] }
 0x623   :  { %v5833_v52 = vsel %vm5405_vm6, %v5773_v4, %v18024_v33  ;;  %v2329_v45 = vrot.slane %v18025_v30, 4  ;;  %v2335_v37 = vrot.slane %v18026_v50, 4  ;;  %v5827_v15 = vsel %vm5407_vm7, %v5766_v27, %v5826_v25  ;;  %v18033_v27 = vld [vmem:[#allocation43_spill] sm:$0xff] }
 0x624   :  { %v5834_v34 = vsel %vm5407_vm7, %v5774_v55, %v5833_v52  ;;  %v2377_v16 = vrot.slane %v18027_v22, 4  ;;  %v2383_v47 = vrot.slane %v18028_v5, 4  ;;  %v5828_v20 = vsel %vm5409_vm8, %v5767_v13, %v5827_v15 }
 0x625   :  { %v5835_v56 = vsel %vm5409_vm8, %v5775_v49, %v5834_v34  ;;  %v18030_v40 = vrot.slane %v18029_v39, 4  ;;  %v7912_v11 = vrot.slane %v18025_v30, 9  ;;  %v5829_v53 = vsel %vm5411_vm9, %v5768_v36, %v5828_v20 }
 0x626   :  { %v5836_v54 = vsel %vm5411_vm9, %v5776_v19, %v5835_v56  ;;  %v7914_v9 = vrot.slane %v2329_v45, 9  ;;  %v18032_v32 = vrot.slane %v18031_v57, 4  ;;  %v5830_v35 = vsel %vm5413_vm10, %v5769_v31, %v5829_v53  ;;  %v18047_v57 = vld [vmem:[#allocation166_spill] sm:$0xff] }
 0x627   :  { %v7910_v48 = vrot.slane %v18030_v40, 9  ;;  %v5837_v42 = vsel %vm5413_vm10, %v5777_v3, %v5836_v54  ;;  %v7920_v23 = vrot.slane %v18026_v50, 9  ;;  %v7922_v51 = vrot.slane %v2335_v37, 9 }
 0x628   :  { %v7918_v8 = vrot.slane %v18032_v32, 9  ;;  %v5771_v38 = vperm.slane %v5115_v60, 0  ;;  %v5779_v28 = vperm.slane %v5147_v63, 0  ;;  %v18034_v13 = vrot.slane %v18033_v27, 4 }
 0x629   :  { %v7976_v36 = vrot.slane %v18027_v22, 9  ;;  %v5831_v55 = vsel %vm5415_vm11, %v5770_v21, %v5830_v35  ;;  %v5838_v49 = vsel %vm5415_vm11, %v5778_v61, %v5837_v42  ;;  %v7978_v19 = vrot.slane %v2377_v16, 9  ;;  %v18039_v61 = vld [vmem:[#allocation182_spill] sm:$0xff]  ;;  %v18043_v35 = vld [vmem:[#allocation47_spill] sm:$0xff] }
 0x62a   :  { %v7974_v4 = vrot.slane %v18034_v13, 9  ;;  %v18036_v25 = vrot.slane %v18035_v7, 4  ;;  %v7984_v3 = vrot.slane %v18028_v5, 9  ;;  %v7986_v33 = vrot.slane %v2383_v47, 9 }
 0x62b   :  { %v18037_v52 = vmov %v18030_v40  ;;  %v4673_v63 = vmax.f32 %v18025_v30, %v7912_v11  ;;  %v4675_v15 = vmax.f32 %v2329_v45, %v7914_v9  ;;  %v18038_v34 = vmov %v18032_v32  ;;  %v18040_v40 = vld [vmem:[#allocation46_spill] sm:$0xff] }
 0x62c   :  { %v7982_v31 = vrot.slane %v18036_v25, 9  ;;  %v4671_v60 = vmax.f32 %v18037_v52, %v7910_v48  ;;  %v4679_v20 = vmax.f32 %v18038_v34, %v7918_v8  ;;  %v4681_v21 = vmax.f32 %v18026_v50, %v7920_v23  ;;  %v18042_v32 = vld [vmem:[#allocation186_spill] sm:$0xff]  ;;  %v18048_v8 = vld [vmem:[#allocation160_spill] sm:$0xff] }
 0x62d   :  { %v4683_v56 = vmax.f32 %v2335_v37, %v7922_v51  ;;  %v18041_v53 = vrot.slane %v18040_v40, 4  ;;  %v18044_v42 = vrot.slane %v18043_v35, 4  ;;  %v18045_v39 = vrot.slane %v18033_v27, 4  ;;  %v18049_v51 = vld [vmem:[#allocation288_spill] sm:$0xff] }
 0x62e   :  { %v4737_v30 = vmax.f32 %v18027_v22, %v7976_v36  ;;  %v4739_v45 = vmax.f32 %v2377_v16, %v7978_v19  ;;  %v18046_v11 = vmov %v18036_v25  ;;  %v4745_v50 = vmax.f32 %v18028_v5, %v7984_v3  ;;  %v18050_v25 = vld [vmem:[#allocation287_spill] sm:$0xff]  ;;  %v18051_v22 = vld [vmem:[#allocation293_spill] sm:$0xff]  ;;  %v18052_v16 = vld [vmem:[#allocation292_spill] sm:$0xff] }
 0x62f   :  { %v4707_v54 = vmax.f32 %v18041_v53, %v18039_v61  ;;  %v4715_v13 = vmax.f32 %v18044_v42, %v18042_v32  ;;  %v4735_v48 = vmax.f32 %v18045_v39, %v7974_v4  ;;  %v4743_v9 = vmax.f32 %v18046_v11, %v7982_v31  ;;  %v8852_v32 = vpop.permute.xlu0 %8851  ;;  %v18056_v42 = vld [vmem:[#allocation7_spill] sm:$0xff]  ;;  %v18060_v39 = vld [vmem:[#allocation65_spill] sm:$0xff]  ;;  %v18061_v11 = vld [vmem:[#allocation278_spill] sm:$0xff] }
 0x630   :  { %v4747_v37 = vmax.f32 %v2383_v47, %v7986_v33  ;;  %v5091_v23 = vmax.f32 %v18048_v8, %v18047_v57  ;;  %v5101_v52 = vmax.f32 %v18050_v25, %v18049_v51  ;;  %v5103_v34 = vmax.f32 %v4671_v60, %v4679_v20  ;;  %v18053_v60 = vld [vmem:[#allocation180_spill] sm:$0xff]  ;;  %v18062_v8 = vld [vmem:[#allocation67_spill] sm:$0xff]  ;;  %v18063_v51 = vld [vmem:[#allocation73_spill] sm:$0xff] }
 0x631   :  { %v5105_v61 = vmax.f32 %v4673_v63, %v4681_v21  ;;  %v14674_v27 = vsel %vm5417_vm12, %v5771_v38, %v5831_v55  ;;  %v5123_v4 = vmax.f32 %v4707_v54, %v4715_v13  ;;  %v5133_v36 = vmax.f32 %v18052_v16, %v18051_v22  ;;  %v18054_v63 = vld [vmem:[#allocation184_spill] sm:$0xff]  ;;  %v18057_v13 = vld [vmem:[#allocation86_spill] sm:$0xff] }
 0x632   :  { %v5135_v19 = vmax.f32 %v4735_v48, %v4743_v9  ;;  %v14679_v7 = vsel %vm5417_vm12, %v5779_v28, %v5838_v49  ;;  %v5107_v5 = vmax.f32 %v4675_v15, %v4683_v56  ;;  %v5137_v47 = vmax.f32 %v4737_v30, %v4745_v50  ;;  %v18058_v49 = vld [vmem:[#allocation144_spill] sm:$0xff]  ;;  %v18059_v15 = vld [vmem:[#allocation139_spill] sm:$0xff] }
 0x633   :  { %v5139_v31 = vmax.f32 %v4739_v45, %v4747_v37  ;;  %v5360_v3 = vperm.slane %v5091_v23, 0  ;;  %v5361_v33 = vperm.slane %v5101_v52, 0  ;;  %v5362_v40 = vperm.slane %v5103_v34, 0 }
 0x634   :  { %v5363_v53 = vperm.slane %v5105_v61, 0  ;;  %v18055_v20 = vmax.f32 %v18053_v60, %v18054_v63  ;;  %v5368_v55 = vperm.slane %v5123_v4, 0  ;;  %v5369_v21 = vperm.slane %v5133_v36, 0  ;;  %v18065_v63 = vld [vmem:[#allocation64_spill] sm:$0xff] }
 0x635   :  { %v5370_v54 = vperm.slane %v5135_v19, 0  ;;  %v5371_v35 = vperm.slane %v5137_v47, 0  ;;  %v5426_v28 = vsel %vm5405_vm6, %v18057_v13, %v18056_v42  ;;  %v5433_v56 = vsel %vm5405_vm6, %v18059_v15, %v18058_v49  ;;  %v18064_v19 = vld [vmem:[#allocation11_spill] sm:$0xff]  ;;  %v18069_v13 = vld [vmem:[#allocation72_spill] sm:$0xff]  ;;  %v18071_v15 = vld [vmem:[#allocation74_spill] sm:$0xff] }
 0x636   :  { %v5367_v38 = vperm.slane %v18055_v20, 0  ;;  %v2437_v48 = vrot.slane %v18060_v39, 4  ;;  %v8854_v30 = vunpack.i.h.bf16 %v8852_v32  ;;  %v8853_v45 = vunpack.i.l.bf16 %v8852_v32 }
 0x637   :  { %v5427_v9 = vsel %vm5407_vm7, %v18061_v11, %v5426_v28  ;;  %v2443_v23 = vrot.slane %v18062_v8, 4  ;;  %v2485_v25 = vrot.slane %v18063_v51, 4  ;;  %v2491_v47 = vrot.slane %v18064_v19, 4 }
 0x638   :  { %v5434_v50 = vsel %vm5407_vm7, %v5367_v38, %v5433_v56  ;;  %v5428_v37 = vsel %vm5409_vm8, %v5360_v3, %v5427_v9  ;;  %v6085_v52 = vsel %vm1144_vm1, %v14570_v12, %v8854_v30  ;;  %v6084_v34 = vsel %vm1144_vm1, %v14567_v6, %v8853_v45 }
 0x639   :  { %v5435_v57 = vsel %vm5409_vm8, %v5368_v55, %v5434_v50  ;;  %v5429_v61 = vsel %vm5411_vm9, %v5361_v33, %v5428_v37  ;;  %v6100_v22 = vpack.c.bf16 %v6085_v52, %v6084_v34  ;;  %v5364_v3 = vperm.slane %v5107_v5, 0 }
 0x63a   :  { %v5436_v4 = vsel %vm5411_vm9, %v5369_v21, %v5435_v57  ;;  %v5430_v16 = vsel %vm5413_vm10, %v5362_v40, %v5429_v61  ;;  %v5372_v60 = vperm.slane %v5139_v31, 0  ;;  %v18066_v20 = vrot.slane %v18065_v63, 4  ;;  %v18067_v21 = vld [vmem:[#allocation66_spill] sm:$0xff]  ;;  %v18075_v61 = vld [vmem:[#allocation223_spill] sm:$0xff] }
 0x63b   :  { %v5437_v36 = vsel %vm5413_vm10, %v5370_v54, %v5436_v4  ;;  %v8056_v12 = vrot.slane %v18060_v39, 9  ;;  %6244 = vmatmul.bf16.vlgmr.msrb.gmra.mxu1 %v6100_v22  ;;  %v5431_v6 = vsel %vm5415_vm11, %v5363_v53, %v5430_v16  ;;  %v8058_v55 = vrot.slane %v2437_v48, 9  ;;  %v18076_v4 = vld [vmem:[#allocation15_spill] sm:$0xff] }
 0x63c   :  { %v8054_v38 = vrot.slane %v18066_v20, 9  ;;  %v5438_v33 = vsel %vm5415_vm11, %v5371_v35, %v5437_v36  ;;  %v18068_v32 = vrot.slane %v18067_v21, 4  ;;  %v8064_v54 = vrot.slane %v18062_v8, 9  ;;  %v18081_v21 = vld [vmem:[#allocation205_spill] sm:$0xff] }
 0x63d   :  { %v8066_v42 = vrot.slane %v2443_v23, 9  ;;  %v18070_v5 = vrot.slane %v18069_v13, 4  ;;  %v8120_v28 = vrot.slane %v18063_v51, 9  ;;  %v8122_v49 = vrot.slane %v2485_v25, 9  ;;  %v18084_v13 = vld [vmem:[#allocation226_spill] sm:$0xff] }
 0x63e   :  { %v8062_v40 = vrot.slane %v18068_v32, 9  ;;  %v18072_v56 = vrot.slane %v18071_v15, 4  ;;  %v8128_v53 = vrot.slane %v18064_v19, 9  ;;  %v8130_v45 = vrot.slane %v2491_v47, 9 }
 0x63f   :  { %v8118_v31 = vrot.slane %v18070_v5, 9  ;;  %v18073_v35 = vmov %v18066_v20  ;;  %v4817_v9 = vmax.f32 %v18060_v39, %v8056_v12  ;;  %v4819_v50 = vmax.f32 %v2437_v48, %v8058_v55  ;;  %v18080_v55 = vld [vmem:[#allocation207_spill] sm:$0xff] }
 0x640   :  { %v8126_v30 = vrot.slane %v18072_v56, 9  ;;  %v4815_v11 = vmax.f32 %v18073_v35, %v8054_v38  ;;  %v18074_v37 = vmov %v18068_v32  ;;  %v4825_v52 = vmax.f32 %v18062_v8, %v8064_v54  ;;  %v18085_v35 = vld [vmem:[#allocation300_spill] sm:$0xff] }
 0x641   :  { %v4823_v57 = vmax.f32 %v18074_v37, %v8062_v40  ;;  %v4827_v34 = vmax.f32 %v2443_v23, %v8066_v42  ;;  %v18077_v22 = vrot.slane %v18076_v4, 4  ;;  %v18078_v36 = vmov %v18070_v5  ;;  %v18082_v23 = vld [vmem:[#allocation296_spill] sm:$0xff]  ;;  %v18083_v40 = vld [vmem:[#allocation295_spill] sm:$0xff] }
 0x642   :  { %v4879_v20 = vmax.f32 %v18078_v36, %v8118_v31  ;;  %v4881_v32 = vmax.f32 %v18063_v51, %v8120_v28  ;;  %v4883_v63 = vmax.f32 %v2485_v25, %v8122_v49  ;;  %v18079_v38 = vmov %v18072_v56  ;;  %v18086_v51 = vld [vmem:[#allocation299_spill] sm:$0xff] }
 0x643   :  { %v4851_v16 = vmax.f32 %v18077_v22, %v18075_v61  ;;  %v4887_v39 = vmax.f32 %v18079_v38, %v8126_v30  ;;  %v4889_v48 = vmax.f32 %v18064_v19, %v8128_v53  ;;  %v4891_v12 = vmax.f32 %v2491_v47, %v8130_v45  ;;  %v18089_v22 = vld [vmem:[#allocation297_spill] sm:$0xff]  ;;  %v18091_v36 = vld [vmem:[#allocation203_spill] sm:$0xff] }
 0x644   :  { %v5163_v8 = vmax.f32 %v18081_v21, %v18080_v55  ;;  %v5173_v54 = vmax.f32 %v18083_v40, %v18082_v23  ;;  %v5175_v42 = vmax.f32 %v4815_v11, %v4823_v57  ;;  %v5177_v5 = vmax.f32 %v4817_v9, %v4825_v52  ;;  %v18087_v52 = vld [vmem:[#allocation199_spill] sm:$0xff] }
 0x645   :  { %v5179_v56 = vmax.f32 %v4819_v50, %v4827_v34  ;;  %v5195_v31 = vmax.f32 %v4851_v16, %v18084_v13  ;;  %v5205_v25 = vmax.f32 %v18086_v51, %v18085_v35  ;;  %v5432_v28 = vsel %vm5417_vm12, %v5364_v3, %v5431_v6  ;;  %v18088_v34 = vld [vmem:[#allocation60_spill] sm:$0xff]  ;;  %v18090_v3 = vld [vmem:[#allocation303_spill] sm:$0xff] }
 0x646   :  { %v5207_v49 = vmax.f32 %v4879_v20, %v4887_v39  ;;  %v5209_v15 = vmax.f32 %v4881_v32, %v4889_v48  ;;  %v5211_v19 = vmax.f32 %v4883_v63, %v4891_v12  ;;  %v5439_v47 = vsel %vm5417_vm12, %v5372_v60, %v5438_v33  ;;  %v18092_v33 = vld [vmem:[#allocation240_spill] sm:$0xff]  ;;  %v18093_v32 = vld [vmem:[#allocation98_spill] sm:$0xff]  ;;  %v8772_v12 = vld [vmem:[%s15703_s3 + $0x74] sm:$0xf0] }
 0x647   :  { %v5783_v30 = vperm.slane %v5163_v8, 0  ;;  %v5784_v53 = vperm.slane %v5173_v54, 0  ;;  %v5785_v45 = vperm.slane %v5175_v42, 0  ;;  %v5786_v37 = vperm.slane %v5177_v5, 0  ;;  %v8414_v48 = vld [vmem:[%s15703_s3 + $0x70] sm:$0xf] }
 0x648   :  { %v5787_v61 = vperm.slane %v5179_v56, 0  ;;  %v5791_v11 = vperm.slane %v5195_v31, 0  ;;  %v5792_v9 = vperm.slane %v5205_v25, 0  ;;  %v5793_v50 = vperm.slane %v5207_v49, 0  ;;  %v18095_v54 = vld [vmem:[#allocation70_spill] sm:$0xff]  ;;  %v18097_v56 = vld [vmem:[#allocation97_spill] sm:$0xff] }
 0x649   :  { %v5794_v57 = vperm.slane %v5209_v15, 0  ;;  %v5840_v4 = vsel %vm5405_vm6, %v18088_v34, %v18087_v52  ;;  %v5847_v6 = vsel %vm5405_vm6, %v18090_v3, %v18089_v22  ;;  %v5795_v16 = vperm.slane %v5211_v19, 0  ;;  %v18099_v19 = vld [vmem:[#allocation99_spill] sm:$0xff] }
 0x64a   :  { %v5841_v60 = vsel %vm5407_vm7, %v18091_v36, %v5840_v4  ;;  %v5848_v20 = vsel %vm5407_vm7, %v18092_v33, %v5847_v6  ;;  %v2425_v63 = vrot.slane %v18093_v32, 4  ;;  %v6094_v38 = vsel %vm1144_vm1, %v14674_v27, %v8858_v0  ;;  %v18103_v4 = vld [vmem:[#allocation71_spill] sm:$0xff] }
 0x64b   :  { %v6095_v39 = vsel %vm1144_vm1, %v14679_v7, %v8859_v18  ;;  %v6086_v55 = vsel %vm1144_vm1, %v5432_v28, %v8863_v1  ;;  %v6087_v0 = vsel %vm1144_vm1, %v5439_v47, %v8864_v43  ;;  %v8415_v27 = vor.u32 %v8772_v12, %v8414_v48  ;;  %v18094_v7 = vld [vmem:[#allocation100_spill] sm:$0xff]  ;;  %v18096_v43 = vld [vmem:[#allocation105_spill] sm:$0xff] }
 0x64c   :  { %v6103_v62 = vpack.c.bf16 %v6095_v39, %v6094_v38  ;;  %v5842_v18 = vsel %vm5409_vm8, %v5783_v30, %v5841_v60  ;;  %v2431_v21 = vrot.slane %v18094_v7, 4  ;;  %v6102_v8 = vpack.c.bf16 %v6087_v0, %v6086_v55  ;;  %v18105_v60 = vld [vmem:[#allocation195_spill] sm:$0xff] }
 0x64d   :  { %v5843_v23 = vsel %vm5411_vm9, %v5784_v53, %v5842_v18  ;;  %v5849_v40 = vsel %vm5409_vm8, %v5791_v11, %v5848_v20  ;;  %v2473_v42 = vrot.slane %v18095_v54, 4  ;;  %7019 = vmatpush.bf16.msrb.mxu3 %v8415_v27  ;;  %v2479_v5 = vrot.slane %v18096_v43, 4  ;;  %v18111_v27 = vld [vmem:[#allocation102_spill] sm:$0xff] }
 0x64e   :  { %6278 = vmatmul.bf16.gmra.mxu2 %v6103_v62  ;;  %v5844_v1 = vsel %vm5413_vm10, %v5785_v45, %v5843_v23  ;;  %v5850_v58 = vsel %vm5411_vm9, %v5792_v9, %v5849_v40  ;;  %v18098_v13 = vrot.slane %v18097_v56, 4  ;;  %6249 = vmatmul.bf16.gmra.mxu1 %v6102_v8  ;;  %v8040_v25 = vrot.slane %v18093_v32, 9  ;;  %v18101_v9 = vld [vmem:[#allocation104_spill] sm:$0xff]  ;;  %v18110_v62 = vld [vmem:[#allocation215_spill] sm:$0xff] }
 0x64f   :  { %v5845_v35 = vsel %vm5415_vm11, %v5786_v37, %v5844_v1  ;;  %v5851_v51 = vsel %vm5413_vm10, %v5793_v50, %v5850_v58  ;;  %v8042_v28 = vrot.slane %v2425_v63, 9  ;;  %v18100_v47 = vrot.slane %v18099_v19, 4  ;;  %v18113_v23 = vld [vmem:[#allocation220_spill] sm:$0xff] }
 0x650   :  { %v8038_v31 = vrot.slane %v18098_v13, 9  ;;  %v5846_v49 = vsel %vm5417_vm12, %v5787_v61, %v5845_v35  ;;  %v5852_v15 = vsel %vm5415_vm11, %v5794_v57, %v5851_v51  ;;  %v8048_v53 = vrot.slane %v18094_v7, 9  ;;  %v18114_v40 = vld [vmem:[#allocation8_spill] sm:$0xff]  ;;  %v18118_v51 = vld [vmem:[#allocation198_spill] sm:$0xff] }
 0x651   :  { %v8046_v30 = vrot.slane %v18100_v47, 9  ;;  %v5853_v45 = vsel %vm5417_vm12, %v5795_v16, %v5852_v15  ;;  %v6096_v37 = vsel %vm1144_vm1, %v5846_v49, %v8868_v14  ;;  %v8050_v11 = vrot.slane %v2431_v21, 9  ;;  %v18106_v14 = vld [vmem:[#allocation51_spill] sm:$0xff]  ;;  %v18120_v49 = vld [vmem:[#allocation208_spill] sm:$0xff] }
 0x652   :  { %v18102_v50 = vrot.slane %v18101_v9, 4  ;;  %v6097_v61 = vsel %vm1144_vm1, %v5853_v45, %v8869_v44  ;;  %v8104_v57 = vrot.slane %v18095_v54, 9  ;;  %v8106_v34 = vrot.slane %v2473_v42, 9  ;;  %v18121_v45 = vld [vmem:[#allocation298_spill] sm:$0xff] }
 0x653   :  { %v18104_v22 = vrot.slane %v18103_v4, 4  ;;  %v6105_v6 = vpack.c.bf16 %v6097_v61, %v6096_v37  ;;  %v8112_v16 = vrot.slane %v18096_v43, 9  ;;  %v8114_v36 = vrot.slane %v2479_v5, 9  ;;  %v18122_v37 = vld [vmem:[#allocation228_spill] sm:$0xff] }
 0x654   :  { %v8102_v52 = vrot.slane %v18102_v50, 9  ;;  %v18107_v33 = vrot.slane %v18106_v14, 4  ;;  %v18108_v38 = vmov %v18098_v13  ;;  %v4801_v17 = vmax.f32 %v18093_v32, %v8040_v25 }
 0x655   :  { %v8110_v3 = vrot.slane %v18104_v22, 9  ;;  %v4799_v39 = vmax.f32 %v18108_v38, %v8038_v31  ;;  %v4803_v44 = vmax.f32 %v2425_v63, %v8042_v28  ;;  %v18109_v48 = vmov %v18100_v47  ;;  %v18119_v28 = vld [vmem:[#allocation210_spill] sm:$0xff] }
 0x656   :  { %v4771_v20 = vmax.f32 %v18107_v33, %v18105_v60  ;;  %v4807_v12 = vmax.f32 %v18109_v48, %v8046_v30  ;;  %v4809_v55 = vmax.f32 %v18094_v7, %v8048_v53  ;;  %v4811_v0 = vmax.f32 %v2431_v21, %v8050_v11  ;;  %v18126_v33 = vld [vmem:[#allocation280_spill] sm:$0xff]  ;;  %v18130_v48 = vld [vmem:[#allocation27_spill] sm:$0xff] }
 0x657   :  { %v18112_v18 = vrot.slane %v18111_v27, 4  ;;  %v18115_v1 = vrot.slane %v18114_v40, 4  ;;  %v18116_v56 = vmov %v18102_v50  ;;  %v4865_v32 = vmax.f32 %v18095_v54, %v8104_v57  ;;  %v18123_v57 = vld [vmem:[#allocation213_spill] sm:$0xff] }
 0x658   :  { %v4863_v13 = vmax.f32 %v18116_v56, %v8102_v52  ;;  %v4867_v63 = vmax.f32 %v2473_v42, %v8106_v34  ;;  %v18117_v31 = vmov %v18104_v22  ;;  %v4873_v7 = vmax.f32 %v18096_v43, %v8112_v16  ;;  %v18124_v34 = vld [vmem:[#allocation218_spill] sm:$0xff] }
 0x659   :  { %v4835_v8 = vmax.f32 %v18112_v18, %v18110_v62  ;;  %v4843_v58 = vmax.f32 %v18115_v1, %v18113_v23  ;;  %v4871_v35 = vmax.f32 %v18117_v31, %v8110_v3  ;;  %v4875_v21 = vmax.f32 %v2479_v5, %v8114_v36 }
 0x65a   :  { %v5155_v25 = vmax.f32 %v4771_v20, %v18118_v51  ;;  %v5165_v15 = vmax.f32 %v18120_v49, %v18119_v28  ;;  %v5167_v19 = vmax.f32 %v4799_v39, %v4807_v12  ;;  %v5169_v47 = vmax.f32 %v4801_v17, %v4809_v55  ;;  %v18127_v20 = vld [vmem:[#allocation279_spill] sm:$0xff]  ;;  %v18128_v39 = vld [vmem:[#allocation26_spill] sm:$0xff] }
 0x65b   :  { %v5171_v30 = vmax.f32 %v4803_v44, %v4811_v0  ;;  %v5187_v53 = vmax.f32 %v4835_v8, %v4843_v58  ;;  %v5197_v11 = vmax.f32 %v18122_v37, %v18121_v45  ;;  %v5199_v54 = vmax.f32 %v4863_v13, %v4871_v35  ;;  %v18129_v44 = vld [vmem:[#allocation21_spill] sm:$0xff]  ;;  %v18132_v58 = vld [vmem:[#allocation114_spill] sm:$0xff]  ;;  %v18134_v35 = vld [vmem:[#allocation116_spill] sm:$0xff] }
 0x65c   :  { %v5201_v42 = vmax.f32 %v4865_v32, %v4873_v7  ;;  %v5203_v9 = vmax.f32 %v4867_v63, %v4875_v21  ;;  %v5376_v50 = vperm.slane %v5155_v25, 0  ;;  %v5377_v52 = vperm.slane %v5165_v15, 0  ;;  %v18131_v8 = vld [vmem:[#allocation13_spill] sm:$0xff] }
 0x65d   :  { %v5378_v61 = vperm.slane %v5167_v19, 0  ;;  %v5379_v43 = vperm.slane %v5169_v47, 0  ;;  %v5380_v5 = vperm.slane %v5171_v30, 0  ;;  %v18125_v4 = vmax.f32 %v18123_v57, %v18124_v34 }
 0x65e   :  { %v5384_v3 = vperm.slane %v5187_v53, 0  ;;  %v5385_v16 = vperm.slane %v5197_v11, 0  ;;  %v5386_v36 = vperm.slane %v5199_v54, 0  ;;  %v5387_v60 = vperm.slane %v5201_v42, 0  ;;  %6283 = vmatmul.bf16.gmra.mxu2 %v6105_v6 }
 0x65f   :  { %v5383_v22 = vperm.slane %v18125_v4, 0  ;;  %v5388_v14 = vperm.slane %v5203_v9, 0  ;;  %v5440_v38 = vsel %vm5405_vm6, %v18127_v20, %v18126_v33  ;;  %v5447_v12 = vsel %vm5405_vm6, %v18130_v48, %v18129_v44  ;;  %v18141_v4 = vld [vmem:[#allocation248_spill] sm:$0xff] }
 0x660   :  { %v5441_v17 = vsel %vm5407_vm7, %v18128_v39, %v5440_v38  ;;  %v2533_v55 = vrot.slane %v17888_v26, 4  ;;  %v2539_v0 = vrot.slane %v17890_v41, 4  ;;  %v2581_v18 = vrot.slane %v17892_v2, 4 }
 0x661   :  { %v5442_v62 = vsel %vm5409_vm8, %v5376_v50, %v5441_v17  ;;  %v5448_v27 = vsel %vm5407_vm7, %v5383_v22, %v5447_v12  ;;  %v2587_v23 = vrot.slane %v18131_v8, 4  ;;  %v18133_v56 = vrot.slane %v18132_v58, 4  ;;  %v18142_v22 = vld [vmem:[#allocation109_spill] sm:$0xff] }
 0x662   :  { %v5443_v40 = vsel %vm5411_vm9, %v5377_v52, %v5442_v62  ;;  %v5449_v1 = vsel %vm5409_vm8, %v5384_v3, %v5448_v27  ;;  %v8184_v32 = vrot.slane %v17888_v26, 9  ;;  %v8186_v31 = vrot.slane %v2533_v55, 9  ;;  %v18148_v27 = vld [vmem:[#allocation307_spill] sm:$0xff] }
 0x663   :  { %v8182_v13 = vrot.slane %v18133_v56, 9  ;;  %v5444_v63 = vsel %vm5413_vm10, %v5378_v61, %v5443_v40  ;;  %v5450_v6 = vsel %vm5411_vm9, %v5385_v16, %v5449_v1  ;;  %v18135_v7 = vrot.slane %v18134_v35, 4  ;;  %v18138_v61 = vld [vmem:[#allocation243_spill] sm:$0xff]  ;;  %v18149_v40 = vld [vmem:[#allocation306_spill] sm:$0xff] }
 0x664   :  { %v5445_v51 = vsel %vm5415_vm11, %v5379_v43, %v5444_v63  ;;  %v5451_v25 = vsel %vm5413_vm10, %v5386_v36, %v5450_v6  ;;  %v8192_v28 = vrot.slane %v17890_v41, 9  ;;  %v8194_v49 = vrot.slane %v2539_v0, 9  ;;  %v18139_v43 = vld [vmem:[#allocation107_spill] sm:$0xff]  ;;  %v18152_v63 = vld [vmem:[#allocation317_spill] sm:$0xff] }
 0x665   :  { %v8190_v21 = vrot.slane %v18135_v7, 9  ;;  %v5446_v15 = vsel %vm5417_vm12, %v5380_v5, %v5445_v51  ;;  %v5452_v19 = vsel %vm5415_vm11, %v5387_v60, %v5451_v25  ;;  %v18136_v47 = vrot.slane %v17891_v24, 4 }
 0x666   :  { %v8248_v53 = vrot.slane %v17892_v2, 9  ;;  %v5453_v45 = vsel %vm5417_vm12, %v5388_v14, %v5452_v19  ;;  %v6088_v37 = vsel %vm1144_vm1, %v5446_v15, %v8873_v29  ;;  %v8250_v11 = vrot.slane %v2581_v18, 9 }
 0x667   :  { %v8246_v30 = vrot.slane %v18136_v47, 9  ;;  %v18137_v54 = vrot.slane %v17893_v59, 4  ;;  %v6089_v9 = vsel %vm1144_vm1, %v5453_v45, %v8874_v46  ;;  %v8256_v50 = vrot.slane %v18131_v8, 9 }
 0x668   :  { %v8258_v52 = vrot.slane %v2587_v23, 9  ;;  %v18140_v5 = vrot.slane %v18139_v43, 4  ;;  %v6104_v34 = vpack.c.bf16 %v6089_v9, %v6088_v37  ;;  %v18143_v3 = vrot.slane %v18142_v22, 4  ;;  %v18158_v9 = vld [vmem:[#allocation310_spill] sm:$0xff]  ;;  %v18162_v22 = vld [vmem:[#allocation111_spill] sm:$0xff] }
 0x669   :  { %v8254_v42 = vrot.slane %v18137_v54, 9  ;;  %v18144_v16 = vmov %v18133_v56  ;;  %v4945_v60 = vmax.f32 %v17888_v26, %v8184_v32  ;;  %v4947_v10 = vmax.f32 %v2533_v55, %v8186_v31  ;;  %v18150_v56 = vld [vmem:[#allocation270_spill] sm:$0xff]  ;;  %v8877_v32 = vpop.permute.xlu0 %8876 }
 0x66a   :  { %v4915_v57 = vmax.f32 %v18140_v5, %v18138_v61  ;;  %v4923_v29 = vmax.f32 %v18143_v3, %v18141_v4  ;;  %v4943_v36 = vmax.f32 %v18144_v16, %v8182_v13  ;;  %v18145_v46 = vmov %v18135_v7  ;;  %6254 = vmatmul.bf16.gmra.mxu1 %v6104_v34  ;;  %v18151_v13 = vld [vmem:[#allocation264_spill] sm:$0xff]  ;;  %v18155_v7 = vld [vmem:[#allocation245_spill] sm:$0xff] }
 0x66b   :  { %v4951_v14 = vmax.f32 %v18145_v46, %v8190_v21  ;;  %v4953_v33 = vmax.f32 %v17890_v41, %v8192_v28  ;;  %v4955_v20 = vmax.f32 %v2539_v0, %v8194_v49  ;;  %v18146_v38 = vmov %v18136_v47  ;;  %v8406_v28 = vld [vmem:[%s15703_s3 + $0x60] sm:$0xf]  ;;  %v8770_v49 = vld [vmem:[%s15703_s3 + $0x64] sm:$0xf0] }
 0x66c   :  { %v5007_v39 = vmax.f32 %v18146_v38, %v8246_v30  ;;  %v5009_v17 = vmax.f32 %v17892_v2, %v8248_v53  ;;  %v5011_v44 = vmax.f32 %v2581_v18, %v8250_v11  ;;  %v18147_v48 = vmov %v18137_v54  ;;  %v18153_v2 = vld [vmem:[#allocation316_spill] sm:$0xff]  ;;  %v18160_v61 = vld [vmem:[#allocation261_spill] sm:$0xff] }
 0x66d   :  { %v5015_v12 = vmax.f32 %v18147_v48, %v8254_v42  ;;  %v5017_v62 = vmax.f32 %v18131_v8, %v8256_v50  ;;  %v5019_v26 = vmax.f32 %v2587_v23, %v8258_v52  ;;  %v5227_v55 = vmax.f32 %v4915_v57, %v4923_v29  ;;  %v18154_v23 = vld [vmem:[#allocation304_spill] sm:$0xff]  ;;  %v18159_v52 = vld [vmem:[#allocation267_spill] sm:$0xff]  ;;  %v18161_v34 = vld [vmem:[#allocation313_spill] sm:$0xff] }
 0x66e   :  { %v5237_v1 = vmax.f32 %v18149_v40, %v18148_v27  ;;  %v5239_v58 = vmax.f32 %v4943_v36, %v4951_v14  ;;  %v5241_v41 = vmax.f32 %v4945_v60, %v4953_v33  ;;  %v5243_v0 = vmax.f32 %v4947_v10, %v4955_v20  ;;  %v18157_v42 = vld [vmem:[#allocation312_spill] sm:$0xff]  ;;  %v18163_v29 = vld [vmem:[#allocation113_spill] sm:$0xff]  ;;  %v18164_v10 = vld [vmem:[#allocation79_spill] sm:$0xff] }
 0x66f   :  { %v5259_v24 = vmax.f32 %v18151_v13, %v18150_v56  ;;  %v5269_v18 = vmax.f32 %v18153_v2, %v18152_v63  ;;  %v5271_v6 = vmax.f32 %v5007_v39, %v5015_v12  ;;  %v5273_v59 = vmax.f32 %v5009_v17, %v5017_v62  ;;  %v18165_v14 = vld [vmem:[#allocation124_spill] sm:$0xff]  ;;  %v18166_v39 = vld [vmem:[#allocation110_spill] sm:$0xff] }
 0x670   :  { %v5275_v31 = vmax.f32 %v5011_v44, %v5019_v26  ;;  %v8879_v35 = vunpack.i.h.bf16 %v8877_v32  ;;  %v8878_v8 = vunpack.i.l.bf16 %v8877_v32  ;;  %v18156_v21 = vmax.f32 %v18154_v23, %v18155_v7 }
 0x671   :  { %v5799_v25 = vperm.slane %v5227_v55, 0  ;;  %v5800_v15 = vperm.slane %v5237_v1, 0  ;;  %v5801_v19 = vperm.slane %v5239_v58, 0  ;;  %v5802_v47 = vperm.slane %v5241_v41, 0  ;;  %v18168_v55 = vld [vmem:[#allocation112_spill] sm:$0xff] }
 0x672   :  { %v5798_v51 = vperm.slane %v18156_v21, 0  ;;  %v5803_v30 = vperm.slane %v5243_v0, 0  ;;  %v5807_v53 = vperm.slane %v5259_v24, 0  ;;  %v5808_v45 = vperm.slane %v5269_v18, 0  ;;  %v18170_v24 = vld [vmem:[#allocation77_spill] sm:$0xff] }
 0x673   :  { %v5809_v37 = vperm.slane %v5271_v6, 0  ;;  %v5810_v11 = vperm.slane %v5273_v59, 0  ;;  %v5811_v54 = vperm.slane %v5275_v31, 0  ;;  %v5854_v50 = vsel %vm5405_vm6, %v18158_v9, %v18157_v42  ;;  %v18172_v31 = vld [vmem:[#allocation123_spill] sm:$0xff] }
 0x674   :  { %v5861_v43 = vsel %vm5405_vm6, %v18160_v61, %v18159_v52  ;;  %v8407_v5 = vor.u32 %v8770_v49, %v8406_v28  ;;  %v5855_v57 = vsel %vm5407_vm7, %v5798_v51, %v5854_v50  ;;  %v2521_v3 = vrot.slane %v18162_v22, 4  ;;  %v18174_v28 = vld [vmem:[#allocation233_spill] sm:$0xff]  ;;  %v18175_v49 = vld [vmem:[#allocation22_spill] sm:$0xff] }
 0x675   :  { %v5862_v4 = vsel %vm5407_vm7, %v18161_v34, %v5861_v43  ;;  %v2527_v16 = vrot.slane %v18163_v29, 4  ;;  %v5856_v36 = vsel %vm5409_vm8, %v5799_v25, %v5855_v57  ;;  %v2569_v46 = vrot.slane %v18164_v10, 4  ;;  %v8882_v57 = vpop.permute.xlu1 %8881 }
 0x676   :  { %v5863_v60 = vsel %vm5409_vm8, %v5807_v53, %v5862_v4  ;;  %7020 = vmatpush.bf16.msrb.mxu3 %v8407_v5  ;;  %v2575_v33 = vrot.slane %v18165_v14, 4  ;;  %v5857_v20 = vsel %vm5411_vm9, %v5800_v15, %v5856_v36  ;;  %v18167_v17 = vrot.slane %v18166_v39, 4 }
 0x677   :  { %v5864_v38 = vsel %vm5411_vm9, %v5808_v45, %v5863_v60  ;;  %v8168_v48 = vrot.slane %v18162_v22, 9  ;;  %v5858_v12 = vsel %vm5413_vm10, %v5801_v19, %v5857_v20  ;;  %v8170_v26 = vrot.slane %v2521_v3, 9 }
 0x678   :  { %v8166_v44 = vrot.slane %v18167_v17, 9  ;;  %v5865_v62 = vsel %vm5413_vm10, %v5809_v37, %v5864_v38  ;;  %v18169_v27 = vrot.slane %v18168_v55, 4  ;;  %v5859_v1 = vsel %vm5415_vm11, %v5802_v47, %v5858_v12  ;;  %v18177_v47 = vld [vmem:[#allocation230_spill] sm:$0xff]  ;;  %v18193_v55 = vld [vmem:[#allocation256_spill] sm:$0xff] }
 0x679   :  { %v5866_v58 = vsel %vm5415_vm11, %v5810_v11, %v5865_v62  ;;  %v8176_v41 = vrot.slane %v18163_v29, 9  ;;  %v8178_v0 = vrot.slane %v2527_v16, 9  ;;  %v5860_v56 = vsel %vm5417_vm12, %v5803_v30, %v5859_v1  ;;  %v18178_v30 = vld [vmem:[#allocation235_spill] sm:$0xff]  ;;  %v18180_v37 = vld [vmem:[#allocation238_spill] sm:$0xff] }
 0x67a   :  { %v8174_v40 = vrot.slane %v18169_v27, 9  ;;  %v5867_v13 = vsel %vm5417_vm12, %v5811_v54, %v5866_v58  ;;  %v18171_v32 = vrot.slane %v18170_v24, 4  ;;  %v8232_v2 = vrot.slane %v18164_v10, 9  ;;  %v18189_v12 = vld [vmem:[#allocation118_spill] sm:$0xff]  ;;  %v18195_v1 = vld [vmem:[#allocation259_spill] sm:$0xff]  ;;  %v18196_v58 = vld [vmem:[#allocation253_spill] sm:$0xff] }
 0x67b   :  { %v6098_v18 = vsel %vm1144_vm1, %v5860_v56, %v8878_v8  ;;  %v6099_v6 = vsel %vm1144_vm1, %v5867_v13, %v8879_v35  ;;  %v8234_v59 = vrot.slane %v2569_v46, 9  ;;  %v18173_v23 = vrot.slane %v18172_v31, 4  ;;  %v18181_v8 = vld [vmem:[#allocation106_spill] sm:$0xff]  ;;  %v18200_v24 = vld [vmem:[#allocation315_spill] sm:$0xff] }
 0x67c   :  { %v8230_v63 = vrot.slane %v18171_v32, 9  ;;  %v6107_v21 = vpack.c.bf16 %v6099_v6, %v6098_v18  ;;  %v8240_v51 = vrot.slane %v18165_v14, 9  ;;  %v8242_v25 = vrot.slane %v2575_v33, 9  ;;  %v8398_v31 = vld [vmem:[%s15703_s3 + $0x50] sm:$0xf] }
 0x67d   :  { %v8238_v7 = vrot.slane %v18173_v23, 9  ;;  %v18176_v15 = vrot.slane %v18175_v49, 4  ;;  %v18179_v53 = vmax.f32 %v18177_v47, %v18178_v30  ;;  %v18182_v11 = vrot.slane %v18181_v8, 4  ;;  %v18205_v30 = vld [vmem:[#allocation163_spill] sm:$0xff]  ;;  %v8390_v8 = vld [vmem:[%s15703_s3 + $0x40] sm:$0xf] }
 0x67e   :  { %v18183_v54 = vmov %v18167_v17  ;;  %v4929_v9 = vmax.f32 %v18162_v22, %v8168_v48  ;;  %6288 = vmatmul.bf16.gmra.mxu2 %v6107_v21  ;;  %v4931_v50 = vmax.f32 %v2521_v3, %v8170_v26  ;;  %v18184_v52 = vmov %v18169_v27  ;;  %v18187_v17 = vld [vmem:[#allocation305_spill] sm:$0xff]  ;;  %v18192_v26 = vld [vmem:[#allocation250_spill] sm:$0xff] }
 0x67f   :  { %v4899_v19 = vmax.f32 %v18176_v15, %v18174_v28  ;;  %v5390_v45 = vperm.slane %v18179_v53, 0  ;;  %v4907_v35 = vmax.f32 %v18182_v11, %v18180_v37  ;;  %v4927_v42 = vmax.f32 %v18183_v54, %v8166_v44  ;;  %v18188_v44 = vld [vmem:[#allocation246_spill] sm:$0xff]  ;;  %v18202_v21 = vld [vmem:[#allocation301_spill] sm:$0xff] }
 0x680   :  { %v4935_v61 = vmax.f32 %v18184_v52, %v8174_v40  ;;  %v4937_v43 = vmax.f32 %v18163_v29, %v8176_v41  ;;  %v4939_v5 = vmax.f32 %v2527_v16, %v8178_v0  ;;  %v18185_v34 = vmov %v18171_v32  ;;  %v18190_v29 = vld [vmem:[#allocation75_spill] sm:$0xff]  ;;  %v18197_v0 = vld [vmem:[#allocation308_spill] sm:$0xff]  ;;  %v18201_v32 = vld [vmem:[#allocation314_spill] sm:$0xff] }
 0x681   :  { %v4991_v4 = vmax.f32 %v18185_v34, %v8230_v63  ;;  %v4993_v36 = vmax.f32 %v18164_v10, %v8232_v2  ;;  %v18186_v60 = vmov %v18173_v23  ;;  %v5001_v38 = vmax.f32 %v18165_v14, %v8240_v51  ;;  %v18198_v14 = vld [vmem:[#allocation309_spill] sm:$0xff]  ;;  %v8768_v23 = vld [vmem:[%s15703_s3 + $0x54] sm:$0xf0]  ;;  %v18203_v51 = vld [vmem:[#allocation302_spill] sm:$0xff] }
 0x682   :  { %v4999_v20 = vmax.f32 %v18186_v60, %v8238_v7  ;;  %v4995_v22 = vmax.f32 %v2569_v46, %v8234_v59  ;;  %v5003_v39 = vmax.f32 %v2575_v33, %v8242_v25  ;;  %v5219_v3 = vmax.f32 %v4899_v19, %v4907_v35  ;;  %v8766_v11 = vld [vmem:[%s15703_s3 + $0x44] sm:$0xf0] }
 0x683   :  { %v5229_v48 = vmax.f32 %v18188_v44, %v18187_v17  ;;  %v18191_v16 = vmax.f32 %v18189_v12, %v18190_v29  ;;  %v18194_v27 = vmax.f32 %v18192_v26, %v18193_v55  ;;  %v5231_v10 = vmax.f32 %v4927_v42, %v4935_v61  ;;  %v8382_v12 = vld [vmem:[%s15703_s3 + $0x30] sm:$0xf]  ;;  %v8764_v29 = vld [vmem:[%s15703_s3 + $0x34] sm:$0xf0] }
 0x684   :  { %v5251_v41 = vmax.f32 %v18196_v58, %v18195_v1  ;;  %v18199_v46 = vmax.f32 %v18197_v0, %v18198_v14  ;;  %v8884_v56 = vunpack.i.h.bf16 %v8882_v57  ;;  %v8883_v13 = vunpack.i.l.bf16 %v8882_v57 }
 0x685   :  { %v5397_v62 = vperm.slane %v18191_v16, 0  ;;  %v5398_v40 = vperm.slane %v18194_v27, 0  ;;  %v5261_v63 = vmax.f32 %v18201_v32, %v18200_v24  ;;  %v5233_v2 = vmax.f32 %v4929_v9, %v4937_v43 }
 0x686   :  { %v5399_v33 = vperm.slane %v18199_v46, 0  ;;  %v5235_v18 = vmax.f32 %v4931_v50, %v4939_v5  ;;  %v5263_v6 = vmax.f32 %v4991_v4, %v4999_v20  ;;  %v5265_v59 = vmax.f32 %v4993_v36, %v5001_v38 }
 0x687   :  { %v5267_v7 = vmax.f32 %v4995_v22, %v5003_v39  ;;  %v18204_v25 = vmax.f32 %v18202_v21, %v18203_v51  ;;  %v5392_v49 = vperm.slane %v5219_v3, 0  ;;  %v5393_v15 = vperm.slane %v5229_v48, 0 }
 0x688   :  { %v5394_v19 = vperm.slane %v5231_v10, 0  ;;  %v5400_v47 = vperm.slane %v5251_v41, 0  ;;  %v5454_v53 = vsel %vm5405_vm6, %v5390_v45, %v18205_v30  ;;  %v5461_v37 = vsel %vm5405_vm6, %v5398_v40, %v5397_v62  ;;  %v6274_v62 = vpop.f32.mrf.mxu2  ;;  %v8374_v40 = vld [vmem:[%s15703_s3 + $0x20] sm:$0xf]  ;;  %v8762_v10 = vld [vmem:[%s15703_s3 + $0x24] sm:$0xf0] }
 0x689   :  { %v5391_v28 = vperm.slane %v18204_v25, 0  ;;  %v5401_v35 = vperm.slane %v5261_v63, 0  ;;  %v5462_v42 = vsel %vm5407_vm7, %v5399_v33, %v5461_v37  ;;  %v8399_v9 = vor.u32 %v8768_v23, %v8398_v31 }
 0x68a   :  { %v5395_v50 = vperm.slane %v5233_v2, 0  ;;  %v5402_v52 = vperm.slane %v5263_v6, 0  ;;  %v5463_v61 = vsel %vm5409_vm8, %v5400_v47, %v5462_v42  ;;  %v5403_v43 = vperm.slane %v5265_v59, 0 }
 0x68b   :  { %v5455_v54 = vsel %vm5407_vm7, %v5391_v28, %v5454_v53  ;;  %v5464_v57 = vsel %vm5411_vm9, %v5401_v35, %v5463_v61  ;;  %7021 = vmatpush.bf16.msrb.mxu3 %v8399_v9  ;;  %v8391_v34 = vor.u32 %v8766_v11, %v8390_v8  ;;  %v5396_v4 = vperm.slane %v5235_v18, 0 }
 0x68c   :  { %v5456_v45 = vsel %vm5409_vm8, %v5392_v49, %v5455_v54  ;;  %v5404_v36 = vperm.slane %v5267_v7, 0  ;;  %v5465_v20 = vsel %vm5413_vm10, %v5402_v52, %v5464_v57  ;;  %v8383_v16 = vor.u32 %v8764_v29, %v8382_v12 }
 0x68d   :  { %v5457_v5 = vsel %vm5411_vm9, %v5393_v15, %v5456_v45  ;;  %v5466_v22 = vsel %vm5415_vm11, %v5403_v43, %v5465_v20  ;;  %v8375_v1 = vor.u32 %v8762_v10, %v8374_v40  ;;  %v8932_v8 = vmov 64.0  }
 0x68e   :  { %v5458_v60 = vsel %vm5413_vm10, %v5394_v19, %v5457_v5  ;;  %v5467_v3 = vsel %vm5417_vm12, %v5404_v36, %v5466_v22  ;;  %8889 = vrcp.f32 %v8932_v8 }
 0x68f   :  { %v5459_v38 = vsel %vm5415_vm11, %v5395_v50, %v5458_v60  ;;  %v6091_v44 = vsel %vm1144_vm1, %v5467_v3, %v8884_v56  ;;  %7022 = vmatpush.bf16.msrb.mxu3 %v8391_v34  ;;  %v28_v56 = vld [vmem:[%s15705_s5 + $0x3] ss:$0 sm:$0xff] }
 0x690   :  { %v5460_v39 = vsel %vm5417_vm12, %v5396_v4, %v5459_v38  ;;  %v6276_v55 = vpop.f32.mrf.mxu2 }
 0x691   :  { %v6090_v17 = vsel %vm1144_vm1, %v5460_v39, %v8883_v13  ;;  %vm7125_vm1 = vcmask 1043456  }
 0x692   :  { %v6106_v48 = vpack.c.bf16 %v6091_v44, %v6090_v17 }
 0x693   :  { %7023 = vmatpush.bf16.msrb.mxu3 %v8383_v16 }
 0x694   :  { %6259 = vmatmul.bf16.gmra.mxu1 %v6106_v48  ;;  %v8890_v43 = vpop.eup %8889 }
 0x695   :  { %v6316_v3 = vmul.f32 64.0, %v8890_v43  ;;  %vm6320_vm13 = vweird.f32 %v8890_v43 }
 0x697   :  { %7024 = vmatpush.bf16.msrb.mxu3 %v8375_v1 }
 0x6b8   :  { %v6245_v26 = vpop.f32.mrf.mxu1 }
 0x6b9   :  { %v6246_v24 = vadd.f32 %v6245_v26, %v28_v56  ;;  %v6317_v26 = vsub.f32 1.0, %v6316_v3  ;;  %v8788_v3 = vld [vmem:[%s15703_s3 + $0xf4] sm:$0xf0] }
 0x6bb   :  { %v6275_v59 = vadd.f32 %v6274_v62, %v6246_v24 }
 0x6bd   :  { %v15032_v25 = vmax.f32 %v6275_v59, 0.0 }
 0x6bf   :  { %v6323_v11 = vmul.f32 %v15032_v25, %v15032_v25 }
 0x6c0   :  { %v6247_v27 = vpop.f32.mrf.mxu1 }
 0x6c1   :  { %v6248_v13 = vadd.f32 %v6247_v27, %v28_v56 }
 0x6c3   :  { %v6277_v18 = vadd.f32 %v6276_v55, %v6248_v13 }
 0x6c5   :  { %v15030_v7 = vmax.f32 %v6277_v18, 0.0 }
 0x6c7   :  { %v6324_v15 = vmul.f32 %v15030_v7, %v15030_v7  ;;  %v6302_v35 = vadd.f32 %v15030_v7, %v15032_v25 }
 0x6c9   :  { %v6331_v50 = vadd.f32 %v6324_v15, %v6323_v11 }
 0x6cb   :  { %v6250_v41 = vpop.f32.mrf.mxu1 }
 0x6cc   :  { %v6251_v2 = vadd.f32 %v6250_v41, %v28_v56 }
 0x6d1   :  { %v6279_v58 = vpop.f32.mrf.mxu2 }
 0x6d2   :  { %v6280_v31 = vadd.f32 %v6279_v58, %v6251_v2  ;;  %v6318_v58 = vmul.f32 %v8890_v43, %v6317_v26  ;;  %v8814_v26 = vld [vmem:[%s15703_s3 + $0x1c4] sm:$0xf0] }
 0x6d3   :  { %v6252_v14 = vpop.f32.mrf.mxu1 }
 0x6d4   :  { %v6253_v6 = vadd.f32 %v6252_v14, %v28_v56  ;;  %v15034_v28 = vmax.f32 %v6280_v31, 0.0 }
 0x6d6   :  { %v6325_v54 = vmul.f32 %v15034_v28, %v15034_v28  ;;  %v6303_v52 = vadd.f32 %v6302_v35, %v15034_v28  ;;  %v8534_v35 = vld [vmem:[%s15703_s3 + $0x160] sm:$0xf] }
 0x6d8   :  { %v6332_v5 = vadd.f32 %v6331_v50, %v6325_v54  ;;  %v8802_v54 = vld [vmem:[%s15703_s3 + $0x164] sm:$0xf0] }
 0x6d9   :  { %v6281_v0 = vpop.f32.mrf.mxu2  ;;  %v8818_v50 = vld [vmem:[%s15703_s3 + $0x1e4] sm:$0xf0] }
 0x6da   :  { %v6282_v21 = vadd.f32 %v6281_v0, %v6253_v6 }
 0x6dc   :  { %v15038_v30 = vmax.f32 %v6282_v21, 0.0  ;;  %v8366_v21 = vld [vmem:[%s15703_s3 + $0x10] sm:$0xf] }
 0x6de   :  { %v6326_v45 = vmul.f32 %v15038_v30, %v15038_v30  ;;  %v6304_v57 = vadd.f32 %v6303_v52, %v15038_v30 }
 0x6e0   :  { %v6333_v60 = vadd.f32 %v6332_v5, %v6326_v45  ;;  %v8535_v45 = vor.u32 %v8802_v54, %v8534_v35  ;;  %v8526_v5 = vld [vmem:[%s15703_s3 + $0x150] sm:$0xf]  ;;  %v15207_v35 = vld [vmem:[%s15703_s3 + $0x100] sm:$0xf]  ;;  %v15212_v54 = vld [vmem:[%s15703_s3 + $0x104] sm:$0xf0] }
 0x6e1   :  { %v6284_v46 = vpop.f32.mrf.mxu2 }
 0x6e7   :  { %v6255_v33 = vpop.f32.mrf.mxu1 }
 0x6e8   :  { %v6256_v23 = vadd.f32 %v6255_v33, %v28_v56  ;;  %v6319_v33 = vadd.f32 %v8890_v43, %v6318_v58  ;;  %v8510_v58 = vld [vmem:[%s15703_s3 + $0x130] sm:$0xf] }
 0x6e9   :  { %v6286_v32 = vpop.f32.mrf.mxu2 }
 0x6ea   :  { %v6285_v49 = vadd.f32 %v6284_v46, %v6256_v23 }
 0x6ec   :  { %v15046_v42 = vmax.f32 %v6285_v49, 0.0  ;;  %v8542_v49 = vld [vmem:[%s15703_s3 + $0x170] sm:$0xf] }
 0x6ee   :  { %v6327_v34 = vmul.f32 %v15046_v42, %v15046_v42  ;;  %v6305_v20 = vadd.f32 %v6304_v57, %v15046_v42  ;;  %v8800_v57 = vld [vmem:[%s15703_s3 + $0x154] sm:$0xf0] }
 0x6ef   :  { %v6257_v63 = vpop.f32.mrf.mxu1 }
 0x6f0   :  { %v6258_v51 = vadd.f32 %v6257_v63, %v28_v56  ;;  %v6334_v17 = vadd.f32 %v6333_v60, %v6327_v34  ;;  %v6321_v63 = vsel %vm6320_vm13, %v8890_v43, %v6319_v33  ;;  %v8590_v34 = vld [vmem:[%s15703_s3 + $0x1d0] sm:$0xf]  ;;  %v8812_v33 = vld [vmem:[%s15703_s3 + $0x1b4] sm:$0xf0] }
 0x6f2   :  { %v6287_v53 = vadd.f32 %v6286_v32, %v6258_v51  ;;  %v8760_v51 = vld [vmem:[%s15703_s3 + $0x14] sm:$0xf0] }
 0x6f3   :  { %v8367_v15 = vor.u32 %v8760_v51, %v8366_v21  ;;  %v8566_v21 = vld [vmem:[%s15703_s3 + $0x1a0] sm:$0xf]  ;;  %v8810_v51 = vld [vmem:[%s15703_s3 + $0x1a4] sm:$0xf0] }
 0x6f4   :  { %v15051_v61 = vmax.f32 %v6287_v53, 0.0  ;;  %v8820_v53 = vld [vmem:[%s15703_s3 + $0x1f4] sm:$0xf0] }
 0x6f5   :  { %7025 = vmatpush.bf16.msrb.mxu3 %v8367_v15  ;;  %v8494_v15 = vld [vmem:[%s15703_s3 + $0x110] sm:$0xf] }
 0x6f6   :  { %v6328_v38 = vmul.f32 %v15051_v61, %v15051_v61  ;;  %v6306_v44 = vadd.f32 %v6305_v20, %v15051_v61  ;;  %v8358_v20 = vld [vmem:[%s15703_s3] sm:$0xf] }
 0x6f8   :  { %v6335_v29 = vadd.f32 %v6334_v17, %v6328_v38  ;;  %v8527_v38 = vor.u32 %v8800_v57, %v8526_v5  ;;  %v15232_v5 = vld [vmem:[%s15703_s3 + $0x180] sm:$0xf]  ;;  %v8806_v57 = vld [vmem:[%s15703_s3 + $0x184] sm:$0xf0] }
 0x701   :  { %v6289_v19 = vpop.f32.mrf.mxu2 }
 0x709   :  { %v6291_v39 = vpop.f32.mrf.mxu2 }
 0x711   :  { %v6260_v47 = vpop.f32.mrf.mxu1 }
 0x712   :  { %v6261_v37 = vadd.f32 %v6260_v47, %v28_v56  ;;  %v8606_v47 = vld [vmem:[%s15703_s3 + $0x1f0] sm:$0xf] }
 0x713   :  { %v8607_v11 = vor.u32 %v8820_v53, %v8606_v47  ;;  %v8558_v47 = vld [vmem:[%s15703_s3 + $0x190] sm:$0xf]  ;;  %v8808_v53 = vld [vmem:[%s15703_s3 + $0x194] sm:$0xf0] }
 0x714   :  { %v6290_v9 = vadd.f32 %v6289_v19, %v6261_v37  ;;  %v8804_v19 = vld [vmem:[%s15703_s3 + $0x174] sm:$0xf0] }
 0x715   :  { %v8543_v8 = vor.u32 %v8804_v19, %v8542_v49  ;;  %7058 = vmatpush.bf16.msra.mxu2 %v8607_v11  ;;  %v8792_v19 = vld [vmem:[%s15703_s3 + $0x114] sm:$0xf0]  ;;  %v8567_v11 = vor.u32 %v8810_v51, %v8566_v21 }
 0x716   :  { %v15056_v4 = vmax.f32 %v6290_v9, 0.0  ;;  %v8598_v9 = vld [vmem:[%s15703_s3 + $0x1e0] sm:$0xf] }
 0x717   :  { %7045 = vmatpush.bf16.msra.mxu1 %v8543_v8  ;;  %v8599_v43 = vor.u32 %v8818_v50, %v8598_v9  ;;  %v8446_v9 = vld [vmem:[%s15703_s3 + $0xb0] sm:$0xf]  ;;  %v8780_v50 = vld [vmem:[%s15703_s3 + $0xb4] sm:$0xf0] }
 0x718   :  { %v6329_v48 = vmul.f32 %v15056_v4, %v15056_v4  ;;  %v6307_v16 = vadd.f32 %v6306_v44, %v15056_v4  ;;  %v8518_v44 = vld [vmem:[%s15703_s3 + $0x140] sm:$0xf] }
 0x719   :  { %v6262_v36 = vpop.f32.mrf.mxu1  ;;  %7059 = vmatpush.bf16.msra.mxu2 %v8599_v43 }
 0x71a   :  { %v6263_v22 = vadd.f32 %v6262_v36, %v28_v56  ;;  %v6336_v55 = vadd.f32 %v6335_v29, %v6329_v48  ;;  %v8816_v36 = vld [vmem:[%s15703_s3 + $0x1d4] sm:$0xf0]  ;;  %v8798_v48 = vld [vmem:[%s15703_s3 + $0x144] sm:$0xf0] }
 0x71b   :  { %7046 = vmatpush.bf16.msra.mxu1 %v8535_v45  ;;  %v8591_v17 = vor.u32 %v8816_v36, %v8590_v34  ;;  %v15240_v34 = vld [vmem:[%s15703_s3 + $0xf4] sm:$0xf]  ;;  %v15245_v36 = vld [vmem:[%s15703_s3 + $0xf8] sm:$0xf0] }
 0x71c   :  { %v6292_v12 = vadd.f32 %v6291_v39, %v6263_v22  ;;  %v8758_v22 = vld [vmem:[%s15703_s3 + $0x4] sm:$0xf0]  ;;  %v8478_v39 = vld [vmem:[%s15703_s3 + $0xf0] sm:$0xf] }
 0x71d   :  { %v8359_v29 = vor.u32 %v8758_v22, %v8358_v20  ;;  %7060 = vmatpush.bf16.msra.mxu2 %v8591_v17  ;;  %v8544_v20 = vld [vmem:[%s15703_s3 + $0x178] sm:$0xf0]  ;;  %v15263_v22 = vld [vmem:[%s15703_s3 + $0xe8] sm:$0xf0]  ;;  %v8438_v17 = vld [vmem:[%s15703_s3 + $0xa0] sm:$0xf] }
 0x71e   :  { %v15065_v62 = vmax.f32 %v6292_v12, 0.0  ;;  %v8582_v12 = vld [vmem:[%s15703_s3 + $0x1c0] sm:$0xf] }
 0x71f   :  { %7026 = vmatpush.bf16.msrb.mxu3 %v8359_v29  ;;  %7047 = vmatpush.bf16.msra.mxu1 %v8527_v38  ;;  %v15258_v38 = vld [vmem:[%s15703_s3 + $0xe4] sm:$0xf]  ;;  %v15285_v29 = vld [vmem:[%s15703_s3 + $0xd4] sm:$0xf] }
 0x720   :  { %v6308_v27 = vadd.f32 %v6307_v16, %v15065_v62  ;;  %v6330_v40 = vmul.f32 %v15065_v62, %v15065_v62  ;;  %v8479_v16 = vor.u32 %v8788_v3, %v8478_v39  ;;  %v15268_v39 = vld [vmem:[%s15703_s3 + $0x164] sm:$0xf]  ;;  %v15273_v3 = vld [vmem:[%s15703_s3 + $0x168] sm:$0xf0] }
 0x722   :  { %v6309_v10 = vrot.slane %v6308_v27, 4  ;;  %v6337_v1 = vadd.f32 %v6336_v55, %v6330_v40  ;;  %v8470_v55 = vld [vmem:[%s15703_s3 + $0xe0] sm:$0xf] }
 0x723   :  { %7032 = vmatpush.bf16.msra.mxu3 %v8479_v16  ;;  %v15290_v16 = vld [vmem:[%s15703_s3 + $0xd8] sm:$0xf0] }
 0x724   :  { %v6310_v41 = vadd.f32 %v6309_v10, %v6308_v27  ;;  %v6338_v0 = vrot.slane %v6337_v1, 4  ;;  %v8786_v27 = vld [vmem:[%s15703_s3 + $0xe4] sm:$0xf0]  ;;  %v8519_v10 = vor.u32 %v8798_v48, %v8518_v44  ;;  %v8467_v21 = vor.u32 %v15285_v29, %v15290_v16 }
 0x725   :  { %v8471_v40 = vor.u32 %v8786_v27, %v8470_v55  ;;  %v8778_v44 = vld [vmem:[%s15703_s3 + $0xa4] sm:$0xf0]  ;;  %v8495_v55 = vor.u32 %v8792_v19, %v8494_v15  ;;  %v8559_v27 = vor.u32 %v8808_v53, %v8558_v47 }
 0x726   :  { %v6311_v14 = vrot.slane %v6310_v41, 2  ;;  %v6339_v46 = vadd.f32 %v6338_v0, %v6337_v1  ;;  %v8583_v1 = vor.u32 %v8814_v26, %v8582_v12  ;;  %v8784_v0 = vld [vmem:[%s15703_s3 + $0xd4] sm:$0xf0]  ;;  %7048 = vmatpush.bf16.msra.mxu1 %v8519_v10  ;;  %v8447_v12 = vor.u32 %v8780_v50, %v8446_v9  ;;  %v15295_v26 = vld [vmem:[%s15703_s3 + $0x154] sm:$0xf] }
 0x727   :  { %7033 = vmatpush.bf16.msra.mxu3 %v8471_v40  ;;  %v15300_v40 = vld [vmem:[%s15703_s3 + $0x158] sm:$0xf0]  ;;  %v8430_v10 = vld [vmem:[%s15703_s3 + $0x90] sm:$0xf] }
 0x728   :  { %v6312_v56 = vadd.f32 %v6311_v14, %v6310_v41  ;;  %v6340_v13 = vrot.slane %v6339_v46, 2  ;;  %v8462_v41 = vld [vmem:[%s15703_s3 + $0xd0] sm:$0xf]  ;;  %v8796_v14 = vld [vmem:[%s15703_s3 + $0x134] sm:$0xf0]  ;;  %7061 = vmatpush.bf16.msra.mxu2 %v8583_v1 }
 0x729   :  { %v8776_v1 = vld [vmem:[%s15703_s3 + $0x94] sm:$0xf0] }
 0x72a   :  { %v6313_v24 = vrot.slane %v6312_v56, 1  ;;  %v6341_v32 = vadd.f32 %v6340_v13, %v6339_v46  ;;  %v8574_v46 = vld [vmem:[%s15703_s3 + $0x1b0] sm:$0xf]  ;;  %v8431_v15 = vor.u32 %v8776_v1, %v8430_v10 }
 0x72c   :  { %v6314_v2 = vadd.f32 %v6313_v24, %v6312_v56  ;;  %v6342_v18 = vrot.slane %v6341_v32, 1  ;;  %v8463_v24 = vor.u32 %v8784_v0, %v8462_v41  ;;  %v8487_v41 = vor.u32 %v15212_v54, %v15207_v35  ;;  %v15316_v0 = vld [vmem:[%s15703_s3 + $0xc4] sm:$0xf] }
 0x72e   :  { %v15070_v6 = vmul.f32 %v6321_v63, %v6314_v2  ;;  %v6343_v59 = vadd.f32 %v6342_v18, %v6341_v32  ;;  %v8511_v32 = vor.u32 %v8796_v14, %v8510_v58  ;;  %v8502_v2 = vld [vmem:[%s15703_s3 + $0x120] sm:$0xf]  ;;  %7034 = vmatpush.bf16.msra.mxu3 %v8463_v24  ;;  %v15321_v14 = vld [vmem:[%s15703_s3 + $0xc8] sm:$0xf0] }
 0x72f   :  { %v8454_v18 = vld [vmem:[%s15703_s3 + $0xc0] sm:$0xf]  ;;  %v8459_v47 = vor.u32 %v15316_v0, %v15321_v14 }
 0x730   :  { %v6344_v31 = vmul.f32 %v6343_v59, %v6321_v63  ;;  %v6345_v23 = vmul.f32 %v15070_v6, %v15070_v6  ;;  %v8575_v63 = vor.u32 %v8812_v33, %v8574_v46  ;;  %v8782_v59 = vld [vmem:[%s15703_s3 + $0xc4] sm:$0xf0]  ;;  %7049 = vmatpush.bf16.msra.mxu1 %v8511_v32  ;;  %v15326_v46 = vld [vmem:[%s15703_s3 + $0x144] sm:$0xf]  ;;  %v15335_v32 = vld [vmem:[%s15703_s3 + $0x148] sm:$0xf0] }
 0x731   :  { %v8523_v53 = vor.u32 %v15326_v46, %v15335_v32 }
 0x732   :  { %v6346_v37 = vsub.f32 %v6344_v31, %v6345_v23  ;;  %v8794_v23 = vld [vmem:[%s15703_s3 + $0x124] sm:$0xf0]  ;;  %7062 = vmatpush.bf16.msra.mxu2 %v8575_v63  ;;  %v8422_v63 = vld [vmem:[%s15703_s3 + $0x80] sm:$0xf] }
 0x733   :  { %v8503_v8 = vor.u32 %v8794_v23, %v8502_v2  ;;  %v8774_v2 = vld [vmem:[%s15703_s3 + $0x84] sm:$0xf0]  ;;  %v8439_v23 = vor.u32 %v8778_v44, %v8438_v17 }
 0x734   :  { %v6347_v52 = vmax.f32 %v6346_v37, 0.0  ;;  %v8455_v37 = vor.u32 %v8782_v59, %v8454_v18  ;;  %v30_v18 = vld [vmem:[%s15705_s5 + $0x5] ss:$0 sm:$0xff]  ;;  %v8475_v59 = vor.u32 %v15258_v38, %v15263_v22 }
 0x735   :  { %7050 = vmatpush.bf16.msra.mxu1 %v8503_v8 }
 0x736   :  { %v15116_v60 = vadd.f32 1e-05, %v6347_v52  ;;  %v29_v52 = vld [vmem:[%s15705_s5 + $0x4] ss:$0 sm:$0xff]  ;;  %7035 = vmatpush.bf16.msra.mxu3 %v8455_v37  ;;  %7063 = vmatpush.bf16.msra.mxu2 %v8567_v11  ;;  %v8423_v37 = vor.u32 %v8774_v2, %v8422_v63 }
 0x738   :  { %8891 = vrsqrt.f32 %v15116_v60  ;;  %vm6355_vm15 = vweird.f32 %v15116_v60 }
 0x739   :  { %7051 = vmatpush.bf16.msra.mxu1 %v8495_v55 }
 0x73a   :  { %7036 = vmatpush.bf16.msra.mxu3 %v8447_v12  ;;  %7064 = vmatpush.bf16.msra.mxu2 %v8559_v27 }
 0x73d   :  { %7052 = vmatpush.bf16.msra.mxu1 %v8487_v41 }
 0x73e   :  { %v15167_v56 = vpop.eup %8891  ;;  %7037 = vmatpush.bf16.msra.mxu3 %v8439_v23 }
 0x73f   :  { %v6350_v13 = vmul.f32 %v15167_v56, %v15116_v60  ;;  %vm6356_vm14 = vweird.f32 %v15167_v56  ;;  %v15250_v60 = vld [vmem:[%s15703_s3 + $0x174] sm:$0xf] }
 0x740   :  { %vm15225_vm0 = vmor %vm6355_vm15, %vm6356_vm14  ;;  %v8547_v24 = vor.u32 %v15250_v60, %v8544_v20 }
 0x741   :  { %v6351_v31 = vmul.f32 %v15167_v56, %v6350_v13  ;;  %v8483_v13 = vor.u32 %v15240_v34, %v15245_v36 }
 0x742   :  { %7038 = vmatpush.bf16.msra.mxu3 %v8431_v15 }
 0x743   :  { %v6352_v49 = vmul.f32 0.5, %v6351_v31  ;;  %v8539_v31 = vor.u32 %v15268_v39, %v15273_v3  ;;  %7084 = vmatpush.bf16.msrb.mxu1 %v8483_v13 }
 0x745   :  { %v6353_v45 = vsub.f32 1.5, %v6352_v49  ;;  %v8531_v49 = vor.u32 %v15295_v26, %v15300_v40 }
 0x746   :  { %7039 = vmatpush.bf16.msra.mxu3 %v8423_v37 }
 0x747   :  { %v6354_v48 = vmul.f32 %v15167_v56, %v6353_v45  ;;  %7085 = vmatpush.bf16.msrb.mxu1 %v8475_v59 }
 0x749   :  { %v6358_v58 = vsel %vm15225_vm0, %v15167_v56, %v6354_v48  ;;  %v8551_v56 = vor.u32 %v8806_v57, %v15232_v5 }
 0x74a   :  { %v6359_v33 = vmul.f32 %v6358_v58, %v29_v52 }
 0x74b   :  { %7065 = vmatpush.bf16.msra.mxu2 %v8551_v56  ;;  %7086 = vmatpush.bf16.msrb.mxu1 %v8467_v21 }
 0x74c   :  { %v6360_v51 = vmul.f32 %v6359_v33, %v15070_v6  ;;  %v6369_v19 = vmul.f32 %v6359_v33, %v15065_v62  ;;  %v6362_v11 = vmul.f32 %v6359_v33, %v15032_v25  ;;  %v6364_v6 = vmul.f32 %v6359_v33, %v15034_v28 }
 0x74d   :  { %v6366_v35 = vmul.f32 %v6359_v33, %v15046_v42  ;;  %v6368_v54 = vmul.f32 %v6359_v33, %v15056_v4  ;;  %v6363_v9 = vmul.f32 %v6359_v33, %v15030_v7  ;;  %v6365_v62 = vmul.f32 %v6359_v33, %v15038_v30 }
 0x74e   :  { %v6361_v8 = vsub.f32 %v30_v18, %v6360_v51  ;;  %v6367_v50 = vmul.f32 %v6359_v33, %v15051_v61 }
 0x74f   :  { %7097 = vmatpush.bf16.msrb.mxu2 %v8547_v24  ;;  %7087 = vmatpush.bf16.msrb.mxu1 %v8459_v47 }
 0x750   :  { %v15367_v52 = vadd.f32 %v6369_v19, %v6361_v8  ;;  %v15369_v45 = vadd.f32 %v6362_v11, %v6361_v8  ;;  %v15371_v25 = vadd.f32 %v6364_v6, %v6361_v8  ;;  %v15373_v28 = vadd.f32 %v6366_v35, %v6361_v8 }
 0x751   :  { %v15375_v42 = vadd.f32 %v6368_v54, %v6361_v8  ;;  %v15377_v4 = vadd.f32 %v6363_v9, %v6361_v8  ;;  %v15391_v29 = vadd.f32 %v6365_v62, %v6361_v8  ;;  %v15393_v16 = vadd.f32 %v6367_v50, %v6361_v8 }
 0x752   :  { %v6387_v7 = vrot.slane %v15369_v45, 4  ;;  %v6393_v30 = vrot.slane %v15371_v25, 4  ;;  %v8324_v61 = vrot.slane %v15369_v45, 9  ;;  %v8332_v43 = vrot.slane %v15371_v25, 9 }
 0x753   :  { %v6399_v5 = vrot.slane %v15373_v28, 4  ;;  %v6405_v57 = vrot.slane %v15375_v42, 4  ;;  %v8340_v34 = vrot.slane %v15373_v28, 9  ;;  %v8348_v36 = vrot.slane %v15375_v42, 9  ;;  %7098 = vmatpush.bf16.msrb.mxu2 %v8539_v31 }
 0x754   :  { %v8326_v60 = vrot.slane %v6387_v7, 9  ;;  %v8334_v20 = vrot.slane %v6393_v30, 9  ;;  %v6530_v38 = vmax.f32 %v15369_v45, %v8324_v61  ;;  %v6538_v22 = vmax.f32 %v15371_v25, %v8332_v43 }
 0x755   :  { %v8342_v39 = vrot.slane %v6399_v5, 9  ;;  %v8350_v3 = vrot.slane %v6405_v57, 9  ;;  %v6546_v17 = vmax.f32 %v15373_v28, %v8340_v34  ;;  %v6554_v44 = vmax.f32 %v15375_v42, %v8348_v36 }
 0x756   :  { %v6532_v48 = vmax.f32 %v6387_v7, %v8326_v60  ;;  %v6540_v12 = vmax.f32 %v6393_v30, %v8334_v20  ;;  %v6390_v27 = vrot.slane %v15377_v4, 4  ;;  %v6408_v40 = vrot.slane %v15367_v52, 4 }
 0x757   :  { %v6548_v26 = vmax.f32 %v6399_v5, %v8342_v39  ;;  %v6556_v55 = vmax.f32 %v6405_v57, %v8350_v3  ;;  %v6396_v58 = vrot.slane %v15391_v29, 4  ;;  %v6402_v41 = vrot.slane %v15393_v16, 4  ;;  %7099 = vmatpush.bf16.msrb.mxu2 %v8531_v49  ;;  %v8771_v3 = vld [vmem:[%s15703_s3 + $0x74] sm:$0xf] }
 0x758   :  { %v6562_v10 = vmax.f32 %v6530_v38, %v6532_v48  ;;  %v6566_v1 = vmax.f32 %v6538_v22, %v6540_v12  ;;  %v8328_v13 = vrot.slane %v15377_v4, 9  ;;  %v8330_v24 = vrot.slane %v6390_v27, 9 }
 0x759   :  { %v6570_v33 = vmax.f32 %v6546_v17, %v6548_v26  ;;  %v6574_v56 = vmax.f32 %v6554_v44, %v6556_v55  ;;  %v8336_v18 = vrot.slane %v15391_v29, 9  ;;  %v8338_v59 = vrot.slane %v6396_v58, 9  ;;  %v8416_v17 = vld [vmem:[%s15703_s3 + $0x78] sm:$0xf0]  ;;  %v8795_v26 = vld [vmem:[%s15703_s3 + $0x134] sm:$0xf] }
 0x75a   :  { %v6582_v63 = vperm.slane %v6562_v10, 0  ;;  %v6583_v2 = vperm.slane %v6566_v1, 0  ;;  %v8344_v51 = vrot.slane %v15393_v16, 9  ;;  %v8346_v15 = vrot.slane %v6402_v41, 9  ;;  %v8512_v55 = vld [vmem:[%s15703_s3 + $0x138] sm:$0xf0] }
 0x75b   :  { %v6584_v31 = vperm.slane %v6570_v33, 0  ;;  %v6585_v23 = vperm.slane %v6574_v56, 0  ;;  %v8352_v21 = vrot.slane %v15367_v52, 9  ;;  %v8354_v49 = vrot.slane %v6408_v40, 9  ;;  %7100 = vmatpush.bf16.msrb.mxu2 %v8523_v53  ;;  %v8777_v33 = vld [vmem:[%s15703_s3 + $0xa4] sm:$0xf] }
 0x75c   :  { %v6586_v19 = vsel %vm5405_vm6, %v6583_v2, %v6582_v63  ;;  %v6534_v37 = vmax.f32 %v15377_v4, %v8328_v13  ;;  %v6536_v11 = vmax.f32 %v6390_v27, %v8330_v24  ;;  %v6542_v6 = vmax.f32 %v15391_v29, %v8336_v18  ;;  %v8440_v56 = vld [vmem:[%s15703_s3 + $0xa8] sm:$0xf0]  ;;  %v8793_v18 = vld [vmem:[%s15703_s3 + $0x124] sm:$0xf] }
 0x75d   :  { %v6587_v8 = vsel %vm5407_vm7, %v6584_v31, %v6586_v19  ;;  %v6389_v35 = vrot.slane %v15377_v4, 2  ;;  %v6544_v9 = vmax.f32 %v6396_v58, %v8338_v59  ;;  %v6550_v62 = vmax.f32 %v15393_v16, %v8344_v51  ;;  %v8769_v58 = vld [vmem:[%s15703_s3 + $0x64] sm:$0xf]  ;;  %v8504_v59 = vld [vmem:[%s15703_s3 + $0x128] sm:$0xf0] }
 0x75e   :  { %v6588_v54 = vsel %vm5409_vm8, %v6585_v23, %v6587_v8  ;;  %v6552_v50 = vmax.f32 %v6402_v41, %v8346_v15  ;;  %v6558_v0 = vmax.f32 %v15367_v52, %v8352_v21  ;;  %v6560_v14 = vmax.f32 %v6408_v40, %v8354_v49  ;;  %v8408_v41 = vld [vmem:[%s15703_s3 + $0x68] sm:$0xf0]  ;;  %v15469_v31 = vld [vmem:[%s15703_s3 + $0x54] sm:$0xf]  ;;  %v8400_v21 = vld [vmem:[%s15703_s3 + $0x58] sm:$0xf0] }
 0x75f   :  { %v15416_v7 = vpack.c.bf16 %v6588_v54, %v6588_v54  ;;  %v6564_v46 = vmax.f32 %v6534_v37, %v6536_v11  ;;  %v6568_v32 = vmax.f32 %v6542_v6, %v6544_v9  ;;  %v6391_v53 = vrot.slane %v15377_v4, 6  ;;  %v15479_v49 = vld [vmem:[%s15703_s3 + $0x94] sm:$0xf]  ;;  %v8432_v37 = vld [vmem:[%s15703_s3 + $0x98] sm:$0xf0] }
 0x760   :  { %v6572_v47 = vmax.f32 %v6550_v62, %v6552_v50  ;;  %v6395_v30 = vrot.slane %v15391_v29, 2  ;;  %v6576_v61 = vmax.f32 %v6558_v0, %v6560_v14  ;;  %v6397_v5 = vrot.slane %v15391_v29, 6  ;;  %v8791_v54 = vld [vmem:[%s15703_s3 + $0x114] sm:$0xf]  ;;  %v8496_v9 = vld [vmem:[%s15703_s3 + $0x118] sm:$0xf0] }
 0x761   :  { %7027 = vmatmul.bf16.vlgmr.msrb.gmra.mxu3 %v15416_v7  ;;  %v6606_v43 = vperm.slane %v6564_v46, 0  ;;  %v6401_v57 = vrot.slane %v15393_v16, 2  ;;  %v6607_v34 = vperm.slane %v6568_v32, 0  ;;  %v6403_v60 = vrot.slane %v15393_v16, 6  ;;  %v8779_v16 = vld [vmem:[%s15703_s3 + $0xb4] sm:$0xf] }
 0x762   :  { %v6608_v36 = vperm.slane %v6572_v47, 0  ;;  %v6407_v20 = vrot.slane %v15367_v52, 2  ;;  %v6609_v38 = vperm.slane %v6576_v61, 0  ;;  %v6409_v22 = vrot.slane %v15367_v52, 6  ;;  %v8448_v52 = vld [vmem:[%s15703_s3 + $0xb8] sm:$0xf0] }
 0x763   :  { %v8329_v4 = vrot.slane %v6389_v35, 9  ;;  %v8331_v39 = vrot.slane %v6391_v53, 9  ;;  %v6610_v44 = vsel %vm5405_vm6, %v6607_v34, %v6606_v43  ;;  %v8337_v48 = vrot.slane %v6395_v30, 9  ;;  %v15493_v62 = vld [vmem:[%s15703_s3 + $0x44] sm:$0xf] }
 0x764   :  { %v8339_v12 = vrot.slane %v6397_v5, 9  ;;  %v8345_v29 = vrot.slane %v6401_v57, 9  ;;  %v6611_v27 = vsel %vm5407_vm7, %v6608_v36, %v6610_v44  ;;  %v8347_v40 = vrot.slane %v6403_v60, 9  ;;  %v8392_v32 = vld [vmem:[%s15703_s3 + $0x48] sm:$0xf0] }
 0x765   :  { %v8353_v10 = vrot.slane %v6407_v20, 9  ;;  %v8355_v1 = vrot.slane %v6409_v22, 9  ;;  %v6612_v13 = vsel %vm5409_vm8, %v6609_v38, %v6611_v27  ;;  %v6535_v24 = vmax.f32 %v6389_v35, %v8329_v4  ;;  %v15502_v47 = vld [vmem:[%s15703_s3 + $0x84] sm:$0xf]  ;;  %v8488_v34 = vld [vmem:[%s15703_s3 + $0x108] sm:$0xf0] }
 0x766   :  { %v6537_v63 = vmax.f32 %v6391_v53, %v8331_v39  ;;  %v6543_v2 = vmax.f32 %v6395_v30, %v8337_v48  ;;  %v15471_v23 = vpack.c.bf16 %v6612_v13, %v6612_v13  ;;  %v6545_v51 = vmax.f32 %v6397_v5, %v8339_v12  ;;  %v15507_v53 = vld [vmem:[%s15703_s3 + $0x88] sm:$0xf0] }
 0x767   :  { %v6551_v15 = vmax.f32 %v6401_v57, %v8345_v29  ;;  %v6553_v19 = vmax.f32 %v6403_v60, %v8347_v40  ;;  %v6559_v8 = vmax.f32 %v6407_v20, %v8353_v10  ;;  %v6561_v11 = vmax.f32 %v6409_v22, %v8355_v1  ;;  %v8789_v57 = vld [vmem:[%s15703_s3 + $0x104] sm:$0xf] }
 0x768   :  { %v6565_v6 = vmax.f32 %v6535_v24, %v6537_v63  ;;  %v8419_v35 = vor.u32 %v8771_v3, %v8416_v17  ;;  %7053 = vmatmul.bf16.vlgmr.msra.gmra.mxu1 %v15471_v23  ;;  %v6569_v50 = vmax.f32 %v6543_v2, %v6545_v51  ;;  %v8451_v14 = vor.u32 %v8779_v16, %v8448_v52  ;;  %v8384_v51 = vld [vmem:[%s15703_s3 + $0x38] sm:$0xf0] }
 0x769   :  { %v6573_v0 = vmax.f32 %v6551_v15, %v6553_v19  ;;  %v8515_v46 = vor.u32 %v8795_v26, %v8512_v55  ;;  %v6577_v30 = vmax.f32 %v6559_v8, %v6561_v11  ;;  %v8411_v43 = vor.u32 %v8769_v58, %v8408_v41 }
 0x76a   :  { %v6618_v61 = vperm.slane %v6565_v6, 0  ;;  %7071 = vmatpush.bf16.msrb.mxu3 %v8419_v35  ;;  %v8443_v5 = vor.u32 %v8777_v33, %v8440_v56  ;;  %v6619_v36 = vperm.slane %v6569_v50, 0  ;;  %7088 = vmatpush.bf16.msrb.mxu1 %v8451_v14  ;;  %v8507_v20 = vor.u32 %v8793_v18, %v8504_v59  ;;  %v8376_v50 = vld [vmem:[%s15703_s3 + $0x28] sm:$0xf0] }
 0x76b   :  { %v6620_v60 = vperm.slane %v6573_v0, 0  ;;  %7101 = vmatpush.bf16.msrb.mxu2 %v8515_v46  ;;  %v8403_v38 = vor.u32 %v15469_v31, %v8400_v21  ;;  %v6621_v22 = vperm.slane %v6577_v30, 0  ;;  %v8435_v4 = vor.u32 %v15479_v49, %v8432_v37  ;;  %v8759_v30 = vld [vmem:[%s15703_s3 + $0x14] sm:$0xf] }
 0x76c   :  { %v8499_v39 = vor.u32 %v8791_v54, %v8496_v9  ;;  %v8395_v3 = vor.u32 %v15493_v62, %v8392_v32  ;;  %v6622_v17 = vsel %vm5405_vm6, %v6619_v36, %v6618_v61  ;;  %v8427_v44 = vor.u32 %v15502_v47, %v15507_v53  ;;  %v8761_v62 = vld [vmem:[%s15703_s3 + $0x24] sm:$0xf]  ;;  %v8368_v61 = vld [vmem:[%s15703_s3 + $0x18] sm:$0xf0] }
 0x76d   :  { %v8491_v48 = vor.u32 %v8789_v57, %v8488_v34  ;;  %v6386_v12 = vrot.slane %v15369_v45, 2  ;;  %v6623_v29 = vsel %vm5407_vm7, %v6620_v60, %v6622_v17  ;;  %v6388_v16 = vrot.slane %v15369_v45, 6  ;;  %v8360_v57 = vld [vmem:[%s15703_s3 + $0x8] sm:$0xf0]  ;;  %v8819_v34 = vld [vmem:[%s15703_s3 + $0x1f4] sm:$0xf] }
 0x76e   :  { %7072 = vmatpush.bf16.msrb.mxu3 %v8411_v43  ;;  %v6392_v52 = vrot.slane %v15371_v25, 2  ;;  %v6394_v26 = vrot.slane %v15371_v25, 6  ;;  %v6624_v55 = vsel %vm5409_vm8, %v6621_v22, %v6623_v29  ;;  %7089 = vmatpush.bf16.msrb.mxu1 %v8443_v5  ;;  %v6398_v27 = vrot.slane %v15373_v28, 2  ;;  %v8757_v5 = vld [vmem:[%s15703_s3 + $0x4] sm:$0xf] }
 0x76f   :  { %7102 = vmatpush.bf16.msrb.mxu2 %v8507_v20  ;;  %v6400_v40 = vrot.slane %v15373_v28, 6  ;;  %v6404_v10 = vrot.slane %v15375_v42, 2  ;;  %v15530_v1 = vpack.c.bf16 %v6624_v55, %v6624_v55  ;;  %v6406_v58 = vrot.slane %v15375_v42, 6  ;;  %v8763_v42 = vld [vmem:[%s15703_s3 + $0x34] sm:$0xf] }
 0x770   :  { %v8325_v41 = vrot.slane %v6386_v12, 9  ;;  %v8327_v45 = vrot.slane %v6388_v16, 9  ;;  %v8333_v33 = vrot.slane %v6392_v52, 9  ;;  %v8335_v56 = vrot.slane %v6394_v26, 9  ;;  %v8608_v36 = vld [vmem:[%s15703_s3 + $0x1f8] sm:$0xf0] }
 0x771   :  { %v8341_v13 = vrot.slane %v6398_v27, 9  ;;  %v8343_v25 = vrot.slane %v6400_v40, 9  ;;  %7066 = vmatmul.bf16.vlgmr.msra.gmra.mxu2 %v15530_v1  ;;  %v8349_v24 = vrot.slane %v6404_v10, 9  ;;  %v8351_v63 = vrot.slane %v6406_v58, 9  ;;  %v8600_v22 = vld [vmem:[%s15703_s3 + $0x1e8] sm:$0xf0] }
 0x772   :  { %7073 = vmatpush.bf16.msrb.mxu3 %v8403_v38  ;;  %v6531_v2 = vmax.f32 %v6386_v12, %v8325_v41  ;;  %v6533_v18 = vmax.f32 %v6388_v16, %v8327_v45  ;;  %7090 = vmatpush.bf16.msrb.mxu1 %v8435_v4  ;;  %v6539_v28 = vmax.f32 %v6392_v52, %v8333_v33  ;;  %v8817_v38 = vld [vmem:[%s15703_s3 + $0x1e4] sm:$0xf]  ;;  %v8811_v12 = vld [vmem:[%s15703_s3 + $0x1b4] sm:$0xf]  ;;  %v8576_v29 = vld [vmem:[%s15703_s3 + $0x1b8] sm:$0xf0] }
 0x773   :  { %7103 = vmatpush.bf16.msrb.mxu2 %v8499_v39  ;;  %v6541_v59 = vmax.f32 %v6394_v26, %v8335_v56  ;;  %v6547_v31 = vmax.f32 %v6398_v27, %v8341_v13  ;;  %v6549_v15 = vmax.f32 %v6400_v40, %v8343_v25  ;;  %v6555_v19 = vmax.f32 %v6404_v10, %v8349_v24  ;;  %v8815_v39 = vld [vmem:[%s15703_s3 + $0x1d4] sm:$0xf]  ;;  %v8813_v17 = vld [vmem:[%s15703_s3 + $0x1c4] sm:$0xf]  ;;  %v8560_v27 = vld [vmem:[%s15703_s3 + $0x198] sm:$0xf0] }
 0x774   :  { %v6557_v21 = vmax.f32 %v6406_v58, %v8351_v63  ;;  %v6563_v49 = vmax.f32 %v6531_v2, %v6533_v18  ;;  %v8387_v35 = vor.u32 %v8763_v42, %v8384_v51  ;;  %v8379_v47 = vor.u32 %v8761_v62, %v8376_v50  ;;  %v8809_v52 = vld [vmem:[%s15703_s3 + $0x1a4] sm:$0xf]  ;;  %v8807_v55 = vld [vmem:[%s15703_s3 + $0x194] sm:$0xf]  ;;  %v8552_v58 = vld [vmem:[%s15703_s3 + $0x188] sm:$0xf0] }
 0x775   :  { %v6567_v37 = vmax.f32 %v6539_v28, %v6541_v59  ;;  %v6571_v8 = vmax.f32 %v6547_v31, %v6549_v15  ;;  %v8371_v43 = vor.u32 %v8759_v30, %v8368_v61  ;;  %v8363_v60 = vor.u32 %v8757_v5, %v8360_v57  ;;  %v8805_v10 = vld [vmem:[%s15703_s3 + $0x184] sm:$0xf] }
 0x776   :  { %7074 = vmatpush.bf16.msrb.mxu3 %v8395_v3  ;;  %v6575_v11 = vmax.f32 %v6555_v19, %v6557_v21  ;;  %v6594_v6 = vperm.slane %v6563_v49, 0  ;;  %7091 = vmatpush.bf16.msrb.mxu1 %v8427_v44  ;;  %v8611_v20 = vor.u32 %v8819_v34, %v8608_v36  ;;  %v8603_v4 = vor.u32 %v8817_v38, %v8600_v22  ;;  %v8584_v44 = vld [vmem:[%s15703_s3 + $0x1c8] sm:$0xf0] }
 0x777   :  { %7104 = vmatpush.bf16.msrb.mxu2 %v8491_v48  ;;  %v6595_v54 = vperm.slane %v6567_v37, 0  ;;  %v6596_v9 = vperm.slane %v6571_v8, 0  ;;  %v8587_v48 = vor.u32 %v8813_v17, %v8584_v44  ;;  %v8579_v16 = vor.u32 %v8811_v12, %v8576_v29  ;;  %v7421_v24 = vld [vmem:[%s15705_s5 + $0x6] ss:$8 sm:$0x3] }
 0x778   :  { %v6597_v0 = vperm.slane %v6575_v11, 0  ;;  %v8563_v40 = vor.u32 %v8807_v55, %v8560_v27  ;;  %v8555_v41 = vor.u32 %v8805_v10, %v8552_v58  ;;  %v6695_v2 = vperm.slane %v7421_v24, 0 }
 0x779   :  { %v6598_v14 = vsel %vm5405_vm6, %v6595_v54, %v6594_v6 }
 0x77a   :  { %v6599_v46 = vsel %vm5407_vm7, %v6596_v9, %v6598_v14  ;;  %7075 = vmatpush.bf16.msrb.mxu3 %v8387_v35  ;;  %v8933_v14 = vmov 4.0  }
 0x77b   :  { %v6600_v32 = vsel %vm5409_vm8, %v6597_v0, %v6599_v46  ;;  %8893 = vrcp.f32 %v8933_v14  ;;  %vm7198_vm8 = vcmask 1040384  }
 0x77c   :  { %v6627_v53 = vpack.c.bf16 %v6600_v32, %v6600_v32  ;;  %v6696_v32 = vperm.slane %v7421_v24, 1 }
 0x77e   :  { %7040 = vmatmul.bf16.vlgmr.msra.gmra.mxu3 %v6627_v53  ;;  %7092 = vmatmul.bf16.vlgmr.msrb.gmra.mxu1 %v6627_v53 }
 0x77f   :  { %7076 = vmatpush.bf16.msrb.mxu3 %v8379_v47 }
 0x781   :  { %7105 = vmatmul.bf16.vlgmr.msrb.gmra.mxu2 %v15471_v23  ;;  %v8592_v23 = vld [vmem:[%s15703_s3 + $0x1d8] sm:$0xf0]  ;;  %v8894_v30 = vpop.eup %8893 }
 0x782   :  { %v8595_v3 = vor.u32 %v8815_v39, %v8592_v23  ;;  %vm7145_vm2 = vweird.f32 %v8894_v30 }
 0x783   :  { %7077 = vmatpush.bf16.msrb.mxu3 %v8371_v43  ;;  %v7141_v43 = vmul.f32 4.0, %v8894_v30 }
 0x785   :  { %v7142_v34 = vsub.f32 1.0, %v7141_v43 }
 0x787   :  { %7078 = vmatpush.bf16.msrb.mxu3 %v8363_v60  ;;  %v7143_v60 = vmul.f32 %v8894_v30, %v7142_v34  ;;  %v8832_v34 = vld [vmem:[%s15704_s4 + $0x58] sm:$0xff] }
 0x789   :  { %v7144_v22 = vadd.f32 %v8894_v30, %v7143_v60 }
 0x78b   :  { %7110 = vmatpush.bf16.msra.mxu3 %v8611_v20  ;;  %v7146_v23 = vsel %vm7145_vm2, %v8894_v30, %v7144_v22  ;;  %v8831_v22 = vld [vmem:[%s15704_s4 + $0x50] sm:$0xff] }
 0x78e   :  { %7079 = vmatmul.bf16.vlgmr.msrb.gmra.mxu3 %v15416_v7  ;;  %v8568_v7 = vld [vmem:[%s15703_s3 + $0x1a8] sm:$0xf0] }
 0x78f   :  { %7111 = vmatpush.bf16.msra.mxu3 %v8603_v4  ;;  %v8571_v26 = vor.u32 %v8809_v52, %v8568_v7 }
 0x793   :  { %7112 = vmatpush.bf16.msra.mxu3 %v8595_v3 }
 0x797   :  { %7113 = vmatpush.bf16.msra.mxu3 %v8587_v48 }
 0x79b   :  { %7114 = vmatpush.bf16.msra.mxu3 %v8579_v16 }
 0x79f   :  { %7115 = vmatpush.bf16.msra.mxu3 %v8571_v26 }
 0x7a3   :  { %7116 = vmatpush.bf16.msra.mxu3 %v8563_v40 }
 0x7a7   :  { %7117 = vmatpush.bf16.msra.mxu3 %v8555_v41 }
 0x7aa   :  { %7118 = vmatmul.bf16.vlgmr.msra.gmra.mxu3 %v15530_v1 }
 0x7e4   :  { %v7028_v45 = vpop.f32.mrf.mxu3 }
 0x7e5   :  { %v7054_v33 = vpop.f32.mrf.mxu1  ;;  %v7029_v28 = vadd.f32 %v7028_v45, %v6695_v2 }
 0x7ec   :  { %v7030_v56 = vpop.f32.mrf.mxu3 }
 0x7ed   :  { %v7056_v13 = vpop.f32.mrf.mxu1 }
 0x7f4   :  { %v7067_v25 = vpop.f32.mrf.mxu2 }
 0x7fb   :  { %v7093_v63 = vpop.f32.mrf.mxu1 }
 0x7fc   :  { %v7069_v18 = vpop.f32.mrf.mxu2 }
 0x801   :  { %v7041_v59 = vpop.f32.mrf.mxu3 }
 0x802   :  { %v7042_v31 = vadd.f32 %v7041_v59, %v7029_v28 }
 0x803   :  { %v7095_v42 = vpop.f32.mrf.mxu1 }
 0x804   :  { %v7055_v51 = vadd.f32 %v7054_v33, %v7042_v31  ;;  %v7106_v15 = vpop.f32.mrf.mxu2 }
 0x806   :  { %v7068_v19 = vadd.f32 %v7067_v25, %v7055_v51 }
 0x808   :  { %v15615_v1 = vmax.f32 %v7068_v19, 0.0 }
 0x809   :  { %v7043_v21 = vpop.f32.mrf.mxu3 }
 0x80a   :  { %v7149_v49 = vmul.f32 %v15615_v1, %v15615_v1  ;;  %v7126_v8 = vsel %vm7125_vm1, %v15615_v1, 0.0 }
 0x80b   :  { %v7127_v35 = vrot.slane %v7126_v8, 4 }
 0x80c   :  { %v7108_v37 = vpop.f32.mrf.mxu2  ;;  %v7151_v11 = vsel %vm7125_vm1, %v7149_v49, 0.0  ;;  %v8828_v49 = vld [vmem:[%s15704_s4 + $0x38] sm:$0xff] }
 0x80d   :  { %v7152_v54 = vrot.slane %v7151_v11, 4  ;;  %v7128_v9 = vadd.f32 %v7127_v35, %v7126_v8  ;;  %v8836_v37 = vld [vmem:[%s15704_s4 + $0x78] sm:$0xff]  ;;  %7354 = vmatpush.bf16.msra.mxu1 %v8828_v49 }
 0x80e   :  { %7367 = vmatpush.bf16.msra.mxu2 %v8836_v37 }
 0x80f   :  { %v7153_v62 = vadd.f32 %v7152_v54, %v7151_v11  ;;  %v7129_v0 = vrot.slane %v7128_v9, 2  ;;  %v8827_v11 = vld [vmem:[%s15704_s4 + $0x30] sm:$0xff] }
 0x811   :  { %v7080_v6 = vpop.f32.mrf.mxu3  ;;  %v7154_v46 = vrot.slane %v7153_v62, 2  ;;  %v7130_v47 = vadd.f32 %v7129_v0, %v7128_v9  ;;  %7355 = vmatpush.bf16.msra.mxu1 %v8827_v11 }
 0x812   :  { %v7081_v61 = vadd.f32 %v7080_v6, %v6696_v32  ;;  %v8835_v6 = vld [vmem:[%s15704_s4 + $0x70] sm:$0xff]  ;;  %v8825_v32 = vld [vmem:[%s15704_s4 + $0x20] sm:$0xff] }
 0x813   :  { %v7155_v53 = vadd.f32 %v7154_v46, %v7153_v62  ;;  %v7131_v5 = vrot.slane %v7130_v47, 1  ;;  %7368 = vmatpush.bf16.msra.mxu2 %v8835_v6  ;;  %v8826_v62 = vld [vmem:[%s15704_s4 + $0x28] sm:$0xff] }
 0x814   :  { %v7094_v36 = vadd.f32 %v7093_v63, %v7081_v61  ;;  %v7422_v61 = vld [vmem:[%s15705_s5 + $0x7] ss:$8 sm:$0x3] }
 0x815   :  { %v7156_v57 = vrot.slane %v7155_v53, 1  ;;  %v7132_v20 = vadd.f32 %v7131_v5, %v7130_v47  ;;  %7356 = vmatpush.bf16.msra.mxu1 %v8826_v62  ;;  %v8833_v47 = vld [vmem:[%s15704_s4 + $0x60] sm:$0xff] }
 0x816   :  { %v7107_v4 = vadd.f32 %v7106_v15, %v7094_v36 }
 0x817   :  { %v7157_v38 = vadd.f32 %v7156_v57, %v7155_v53  ;;  %v15622_v17 = vmul.f32 %v7146_v23, %v7132_v20  ;;  %v8824_v57 = vld [vmem:[%s15704_s4 + $0x18] sm:$0xff] }
 0x819   :  { %v7082_v50 = vpop.f32.mrf.mxu3  ;;  %v7165_v44 = vmul.f32 %v7157_v38, %v7146_v23  ;;  %v7167_v12 = vmul.f32 %v15622_v17, %v15622_v17  ;;  %7357 = vmatpush.bf16.msra.mxu1 %v8825_v32  ;;  %v8823_v38 = vld [vmem:[%s15704_s4 + $0x10] sm:$0xff] }
 0x81a   :  { %v8834_v50 = vld [vmem:[%s15704_s4 + $0x68] sm:$0xff] }
 0x81b   :  { %v7169_v7 = vsub.f32 %v7165_v44, %v7167_v12  ;;  %7369 = vmatpush.bf16.msra.mxu2 %v8834_v50  ;;  %v8830_v44 = vld [vmem:[%s15704_s4 + $0x48] sm:$0xff]  ;;  %v7423_v12 = vld [vmem:[%s15705_s5 + $0x10] ss:$8 sm:$0x3] }
 0x81d   :  { %v7171_v41 = vmax.f32 %v7169_v7, 0.0  ;;  %7358 = vmatpush.bf16.msra.mxu1 %v8824_v57 }
 0x81f   :  { %v7173_v25 = vadd.f32 1e-05, %v7171_v41  ;;  %7370 = vmatpush.bf16.msra.mxu2 %v8833_v47 }
 0x821   :  { %8895 = vrsqrt.f32 %v7173_v25  ;;  %vm7181_vm7 = vweird.f32 %v7173_v25  ;;  %7359 = vmatpush.bf16.msra.mxu1 %v8823_v38 }
 0x823   :  { %7371 = vmatpush.bf16.msra.mxu2 %v8832_v34 }
 0x827   :  { %v8896_v42 = vpop.eup %8895  ;;  %7372 = vmatpush.bf16.msra.mxu2 %v8831_v22 }
 0x828   :  { %v7176_v19 = vmul.f32 %v8896_v42, %v7173_v25  ;;  %vm7182_vm4 = vweird.f32 %v8896_v42 }
 0x829   :  { %vm7183_vm9 = vmor %vm7181_vm7, %vm7182_vm4 }
 0x82a   :  { %v7177_v21 = vmul.f32 %v8896_v42, %v7176_v19 }
 0x82b   :  { %7373 = vmatpush.bf16.msra.mxu2 %v8830_v44 }
 0x82c   :  { %v7178_v35 = vmul.f32 0.5, %v7177_v21 }
 0x82d   :  { %v7119_v39 = vpop.f32.mrf.mxu3 }
 0x82e   :  { %v7120_v3 = vadd.f32 %v7119_v39, %v7107_v4  ;;  %v7179_v0 = vsub.f32 1.5, %v7178_v35 }
 0x830   :  { %v15624_v48 = vmax.f32 %v7120_v3, 0.0  ;;  %v7180_v53 = vmul.f32 %v8896_v42, %v7179_v0  ;;  %v8822_v3 = vld [vmem:[%s15704_s4 + $0x8] sm:$0xff] }
 0x831   :  { %7360 = vmatpush.bf16.msra.mxu1 %v8822_v3 }
 0x832   :  { %v7133_v29 = vsel %vm7125_vm1, %v15624_v48, 0.0  ;;  %v7150_v16 = vmul.f32 %v15624_v48, %v15624_v48  ;;  %v7184_v36 = vsel %vm7183_vm9, %v8896_v42, %v7180_v53 }
 0x833   :  { %v7134_v52 = vrot.slane %v7133_v29, 4 }
 0x834   :  { %v7158_v26 = vsel %vm7125_vm1, %v7150_v16, 0.0 }
 0x835   :  { %v7135_v55 = vadd.f32 %v7134_v52, %v7133_v29  ;;  %v7159_v27 = vrot.slane %v7158_v26, 4  ;;  %v7121_v40 = vpop.f32.mrf.mxu3 }
 0x837   :  { %v7136_v10 = vrot.slane %v7135_v55, 2  ;;  %v7160_v58 = vadd.f32 %v7159_v27, %v7158_v26  ;;  %v8821_v26 = vld [vmem:[%s15704_s4] sm:$0xff] }
 0x838   :  { %7361 = vmatpush.bf16.msra.mxu1 %v8821_v26 }
 0x839   :  { %v7137_v45 = vadd.f32 %v7136_v10, %v7135_v55  ;;  %v7161_v33 = vrot.slane %v7160_v58, 2  ;;  %v8829_v55 = vld [vmem:[%s15704_s4 + $0x40] sm:$0xff]  ;;  %s8934_s4 = smov [#allocation2]  }
 0x83a   :  { %7374 = vmatpush.bf16.msra.mxu2 %v8829_v55 }
 0x83b   :  { %v7138_v56 = vrot.slane %v7137_v45, 1  ;;  %v7162_v13 = vadd.f32 %v7161_v33, %v7160_v58 }
 0x83d   :  { %v7139_v24 = vadd.f32 %v7138_v56, %v7137_v45  ;;  %v7163_v63 = vrot.slane %v7162_v13, 1 }
 0x83f   :  { %v7148_v2 = vmul.f32 %v7146_v23, %v7139_v24  ;;  %v7164_v18 = vadd.f32 %v7163_v63, %v7162_v13  ;;  %v37_v13 = vld [vmem:[%s15705_s5 + $0x11] ss:$0 sm:$0xff]  ;;  %s7410_s5 = sshll.u32 %s8934_s4, 4  ;;  %s7411_s5 = int_to_ptr.vmem [resolvable:$true] %s7410_s5 }
 0x841   :  { %v7166_v28 = vmul.f32 %v7164_v18, %v7146_v23  ;;  %v7168_v59 = vmul.f32 %v7148_v2, %v7148_v2 }
 0x843   :  { %v7170_v31 = vsub.f32 %v7166_v28, %v7168_v59 }
 0x845   :  { %v7172_v51 = vmax.f32 %v7170_v31, 0.0 }
 0x847   :  { %v7174_v15 = vadd.f32 1e-05, %v7172_v51 }
 0x849   :  { %8897 = vrsqrt.f32 %v7174_v15  ;;  %vm7191_vm5 = vweird.f32 %v7174_v15 }
 0x84f   :  { %v8898_v8 = vpop.eup %8897 }
 0x850   :  { %v7186_v54 = vmul.f32 %v8898_v8, %v7174_v15  ;;  %vm7192_vm3 = vweird.f32 %v8898_v8 }
 0x851   :  { %vm7193_vm6 = vmor %vm7191_vm5, %vm7192_vm3 }
 0x852   :  { %v7187_v9 = vmul.f32 %v8898_v8, %v7186_v54 }
 0x854   :  { %v7188_v14 = vmul.f32 0.5, %v7187_v9 }
 0x856   :  { %v7189_v46 = vsub.f32 1.5, %v7188_v14 }
 0x858   :  { %v7190_v30 = vmul.f32 %v8898_v8, %v7189_v46 }
 0x85a   :  { %v7194_v43 = vsel %vm7193_vm6, %v8898_v8, %v7190_v30 }
 0x85b   :  { %v7197_v5 = vrot.slane %v7194_v43, 7 }
 0x85d   :  { %v7199_v60 = vsel %vm7198_vm8, %v7184_v36, %v7197_v5 }
 0x85e   :  { %v7201_v20 = vmul.f32 %v7422_v61, %v7199_v60 }
 0x860   :  { %v7203_v4 = vperm.slane %v7201_v20, 0  ;;  %v7204_v39 = vperm.slane %v7201_v20, 1 }
 0x862   :  { %v7208_v23 = vmul.f32 %v7204_v39, %v7148_v2  ;;  %v7207_v29 = vmul.f32 %v7203_v4, %v15622_v17  ;;  %v7215_v27 = vmul.f32 %v7203_v4, %v15615_v1  ;;  %v7216_v40 = vmul.f32 %v7204_v39, %v15624_v48 }
 0x864   :  { %v7211_v16 = vrot.slane %v7208_v23, 7 }
 0x866   :  { %v7212_v52 = vsel %vm7198_vm8, %v7207_v29, %v7211_v16 }
 0x867   :  { %v7214_v7 = vsub.f32 %v7423_v12, %v7212_v52 }
 0x869   :  { %v7218_v10 = vperm.slane %v7214_v7, 0  ;;  %v7219_v17 = vperm.slane %v7214_v7, 1 }
 0x86b   :  { %v7223_v58 = vadd.f32 %v7219_v17, %v7216_v40  ;;  %v7222_v41 = vadd.f32 %v7218_v10, %v7215_v27 }
 0x86d   :  { %v7225_v45 = vpack.c.bf16 %v7223_v58, %v7223_v58  ;;  %v7224_v33 = vpack.c.bf16 %v7222_v41, %v7222_v41 }
 0x86f   :  { %7362 = vmatmul.bf16.vlgmr.msra.gmra.mxu1 %v7224_v33  ;;  %7375 = vmatmul.bf16.vlgmr.msra.gmra.mxu2 %v7225_v45 }
 0x8ec   :  { %v7363_v56 = vpop.f32.mrf.mxu1 }
 0x8ed   :  { %v7364_v25 = vadd.f32 %v7363_v56, %v37_v13 }
 0x8f2   :  { %v7376_v24 = vpop.f32.mrf.mxu2 }
 0x8f3   :  { %v7377_v1 = vadd.f32 %v7376_v24, %v7364_v25 }
 0x8f4   :  { %v7365_v63 = vpop.f32.mrf.mxu1 }
 0x8f5   :  { %v7380_v48 = vsel %vm7125_vm1, %v7377_v1, -inf }
 0x8f6   :  { %7381 = vmax.xlane.f32.xlu2 %v7380_v48 }
 0x8fa   :  { %v7378_v2 = vpop.f32.mrf.mxu2 }
 0x969   :  { %v7382_v18 = vpop.xlane.xlu2 %7381 }
 0x96a   :  { %v7383_v28 = vsub.f32 %v7377_v1, %v7382_v18 }
 0x96c   :  { %v7384_v59 = vmul.f32 1.442695, %v7383_v28 }
 0x96e   :  { %8899 = vpow2.f32 %v7384_v59 }
 0x974   :  { %v8900_v31 = vpop.eup %8899 }
 0x975   :  { %v7386_v42 = vsel %vm7125_vm1, %v8900_v31, 0.0 }
 0x976   :  { %7387 = vadd.xlane.f32.xlu0 %v7386_v42 }
 0x9e9   :  { %v7388_v51 = vpop.xlane.xlu0 %7387 }
 0x9ea   :  { %8901 = vrcp.f32 %v7388_v51  ;;  %v7400_v49 = vand.u32 2147483648, %v7388_v51  ;;  %v7398_v8 = vand.u32 2147483647, %v7388_v51  ;;  %vm7394_vm11 = vweird.f32 %v7388_v51 }
 0x9ec   :  { %v7401_v6 = vor.u32 1.1754944e-38, %v7400_v49  ;;  %vm7399_vm13 = vcmp.eq.f32.partialorder %v7398_v8, 8.507059e+37 }
 0x9f0   :  { %v8902_v15 = vpop.eup %8901 }
 0x9f1   :  { %v7390_v19 = vmul.f32 %v8902_v15, %v7388_v51  ;;  %vm7395_vm10 = vweird.f32 %v8902_v15 }
 0x9f2   :  { %vm7396_vm12 = vmor %vm7394_vm11, %vm7395_vm10 }
 0x9f3   :  { %v7391_v21 = vsub.f32 1.0, %v7390_v19 }
 0x9f5   :  { %v7392_v37 = vmul.f32 %v8902_v15, %v7391_v21 }
 0x9f7   :  { %v7393_v11 = vadd.f32 %v8902_v15, %v7392_v37 }
 0x9f9   :  { %v7397_v35 = vsel %vm7396_vm12, %v8902_v15, %v7393_v11 }
 0x9fa   :  { %v7402_v54 = vsel %vm7399_vm13, %v7401_v6, %v7397_v35 }
 0x9fb   :  { %v7403_v9 = vmul.f32 %v8900_v31, %v7402_v54 }
 0x9fd   :  { %7404 = vst [vmem:[#allocation2] sm:$0xf] %v7403_v9 }
 0x9fe   :  { %7415 = dma.vmem_to_hbm [thread:$0]  %s7411_s5, 64, %s7413_s19, [#allocation3]  }
 0x9ff   :  { %8928 = dma.done.wait [#allocation3], 64  }
 0xa00   :  { %8929 = vsyncadd [#allocation3], 4294967232 }
 0xa01   :  { %7420 = vsyncpa [#allocation3], 1 }

</bundles_post_ra>
